<compile_context>
chip_gen: v7x
topology: tpu7x:2x2x1
jax: 0.10.0
libtpu: 0.0.40
codegen_flags: <defaults>
</compile_context>

<pallas_src>
import functools

import jax
import jax.numpy as jnp
from jax import lax
from jax.experimental import pallas as pl
from jax.experimental.pallas import tpu as pltpu

BN_EPS = 1e-5
LANE = 128

_VMEM_LIMIT = None


def _vmem_limit_bytes():
    """Derive a safe scoped-VMEM limit per chip generation (v7x has 64 MiB)."""
    global _VMEM_LIMIT
    if _VMEM_LIMIT is None:
        try:
            cap = int(pltpu.get_tpu_info().vmem_capacity_bytes)
        except Exception:
            cap = 64 * 1024 * 1024
        _VMEM_LIMIT = int(min(cap * 3 // 4, 96 * 1024 * 1024))
    return _VMEM_LIMIT


def _round_up(x, m):
    return (x + m - 1) // m * m


def _pick_tn(cp_out):
    if cp_out <= 512:
        return cp_out
    for cand in (512, 256, 128):
        if cp_out % cand == 0:
            return cand
    return 128


# ----------------------------- Pallas kernels -----------------------------

def _conv3x3_kernel(x_ref, w_ref, sc_ref, sh_ref, y_ref, stats_ref, pad_ref,
                    *, fuse_pre_bn_relu):
    """3x3 / pad-1 / stride-1 conv of one image, all 9 taps in-kernel.

      x_ref:    (H, W, Cin_p)   bf16  raw activation of image n (no halo)
      w_ref:    (9, Cin_p, tn)  bf16  VMEM-resident weights for this cout tile
      sc_ref:   (1, Cin_p)      f32   fused pre-BN scale (branch2a fold)
      sh_ref:   (1, Cin_p)      f32   fused pre-BN shift
      y_ref:    (H, W, tn)      bf16  raw conv output (pre-BN)
      stats_ref:(2, tn)         f32   per-image per-channel [sum, sum_sq]
      pad_ref:  VMEM (H+2, W+2, Cin_p) bf16 scratch (zero halo)
    """
    h, w, cin = x_ref.shape
    tn = y_ref.shape[-1]

    x = x_ref[...]
    if fuse_pre_bn_relu:
        x = jnp.maximum(
            x.astype(jnp.float32) * sc_ref[...] + sh_ref[...], 0.0
        ).astype(jnp.bfloat16)

    pad_ref[...] = jnp.zeros_like(pad_ref)
    pad_ref[1:h + 1, 1:w + 1, :] = x

    acc = jnp.zeros((h * w, tn), jnp.float32)
    for kh in range(3):
        for kw in range(3):
            lhs = pad_ref[kh:kh + h, kw:kw + w, :].reshape(h * w, cin)
            acc = acc + jnp.dot(lhs, w_ref[kh * 3 + kw],
                                preferred_element_type=jnp.float32)

    y_ref[...] = acc.reshape(h, w, tn).astype(y_ref.dtype)
    stats_ref[...] = jnp.concatenate(
        [jnp.sum(acc, axis=0, keepdims=True),
         jnp.sum(acc * acc, axis=0, keepdims=True)], axis=0)


def _conv1x1_kernel(x_ref, w_ref, y_ref, stats_ref):
    """1x1 projection conv of one image (plain matmul) + stats partials."""
    h, w, cin = x_ref.shape
    tn = y_ref.shape[-1]
    lhs = x_ref[...].reshape(h * w, cin)
    acc = jnp.dot(lhs, w_ref[...], preferred_element_type=jnp.float32)
    y_ref[...] = acc.reshape(h, w, tn).astype(y_ref.dtype)
    stats_ref[...] = jnp.concatenate(
        [jnp.sum(acc, axis=0, keepdims=True),
         jnp.sum(acc * acc, axis=0, keepdims=True)], axis=0)


def _bn_relu_add_kernel(y2_ref, sc2_ref, sh2_ref, r_ref, sc1_ref, sh1_ref, o_ref):
    """Final fused pass: BN(branch2b)+ReLU + residual affine + add + ReLU."""
    b2 = jnp.maximum(
        y2_ref[...].astype(jnp.float32) * sc2_ref[...] + sh2_ref[...], 0.0)
    b1 = r_ref[...].astype(jnp.float32) * sc1_ref[...] + sh1_ref[...]
    o_ref[...] = jnp.maximum(b1 + b2, 0.0).astype(o_ref.dtype)


# ----------------------------- kernel wrappers -----------------------------

def _conv3x3(x_nhwc, w9, pre_scale, pre_shift, *, fuse_pre_bn_relu, tn):
    """x_nhwc: (N, H, W, Cin_p) bf16, w9: (9, Cin_p, Cout_p) bf16."""
    n, h, w, cin_p = x_nhwc.shape
    cout_p = w9.shape[-1]
    n_c = cout_p // tn
    kernel = functools.partial(_conv3x3_kernel,
                               fuse_pre_bn_relu=fuse_pre_bn_relu)
    return pl.pallas_call(
        kernel,
        out_shape=(jax.ShapeDtypeStruct((n, h, w, cout_p), jnp.bfloat16),
                   jax.ShapeDtypeStruct((n, 2, cout_p), jnp.float32)),
        grid_spec=pltpu.PrefetchScalarGridSpec(
            num_scalar_prefetch=0,
            grid=(n_c, n),                      # n innermost -> weights resident
            in_specs=[
                pl.BlockSpec((None, h, w, cin_p), lambda ci, ni: (ni, 0, 0, 0)),
                pl.BlockSpec((9, cin_p, tn), lambda ci, ni: (0, 0, ci)),
                pl.BlockSpec((1, cin_p), lambda ci, ni: (0, 0)),
                pl.BlockSpec((1, cin_p), lambda ci, ni: (0, 0)),
            ],
            out_specs=[
                pl.BlockSpec((None, h, w, tn), lambda ci, ni: (ni, 0, 0, ci)),
                pl.BlockSpec((None, 2, tn), lambda ci, ni: (ni, 0, ci)),
            ],
            scratch_shapes=[pltpu.VMEM((h + 2, w + 2, cin_p), jnp.bfloat16)]),
        compiler_params=pltpu.CompilerParams(
            dimension_semantics=("parallel", "parallel"),
            vmem_limit_bytes=_vmem_limit_bytes()),
    )(x_nhwc, w9, pre_scale, pre_shift)


def _conv1x1(x_nhwc, w1, *, tn):
    """x_nhwc: (N, H, W, Cin_p) bf16 (already stride-subsampled), w1: (Cin_p, Cout_p)."""
    n, h, w, cin_p = x_nhwc.shape
    cout_p = w1.shape[-1]
    n_c = cout_p // tn
    return pl.pallas_call(
        _conv1x1_kernel,
        out_shape=(jax.ShapeDtypeStruct((n, h, w, cout_p), jnp.bfloat16),
                   jax.ShapeDtypeStruct((n, 2, cout_p), jnp.float32)),
        grid_spec=pltpu.PrefetchScalarGridSpec(
            num_scalar_prefetch=0,
            grid=(n_c, n),
            in_specs=[
                pl.BlockSpec((None, h, w, cin_p), lambda ci, ni: (ni, 0, 0, 0)),
                pl.BlockSpec((cin_p, tn), lambda ci, ni: (0, ci)),
            ],
            out_specs=[
                pl.BlockSpec((None, h, w, tn), lambda ci, ni: (ni, 0, 0, ci)),
                pl.BlockSpec((None, 2, tn), lambda ci, ni: (ni, 0, ci)),
            ]),
        compiler_params=pltpu.CompilerParams(
            dimension_semantics=("parallel", "parallel"),
            vmem_limit_bytes=_vmem_limit_bytes()),
    )(x_nhwc, w1)


def _bn_relu_add(y2, sc2, sh2, r, sc1, sh1, *, tn):
    n, h, w, cp = y2.shape
    n_c = cp // tn
    return pl.pallas_call(
        _bn_relu_add_kernel,
        out_shape=jax.ShapeDtypeStruct((n, h, w, cp), jnp.float32),
        grid_spec=pltpu.PrefetchScalarGridSpec(
            num_scalar_prefetch=0,
            grid=(n_c, n),
            in_specs=[
                pl.BlockSpec((None, h, w, tn), lambda ci, ni: (ni, 0, 0, ci)),
                pl.BlockSpec((1, tn), lambda ci, ni: (0, ci)),
                pl.BlockSpec((1, tn), lambda ci, ni: (0, ci)),
                pl.BlockSpec((None, h, w, tn), lambda ci, ni: (ni, 0, 0, ci)),
                pl.BlockSpec((1, tn), lambda ci, ni: (0, ci)),
                pl.BlockSpec((1, tn), lambda ci, ni: (0, ci)),
            ],
            out_specs=pl.BlockSpec((None, h, w, tn),
                                   lambda ci, ni: (ni, 0, 0, ci))),
        compiler_params=pltpu.CompilerParams(
            dimension_semantics=("parallel", "parallel"),
            vmem_limit_bytes=_vmem_limit_bytes()),
    )(y2, sc2, sh2, r, sc1, sh1)


# ------------------------------ glue (plain JAX) ---------------------------

def _pad_channels(x, cp):
    c = x.shape[-1]
    if c == cp:
        return x
    return jnp.pad(x, [(0, 0)] * (x.ndim - 1) + [(0, cp - c)])


def _prep_conv3x3_weight(w, cp_in, cp_out):
    """PyTorch (Cout, Cin, 3, 3) -> (9, Cin_p, Cout_p) bf16."""
    cout, cin, kh, kw = w.shape
    wt = jnp.transpose(w, (2, 3, 1, 0))                  # (3, 3, Cin, Cout)
    wt = jnp.pad(wt, ((0, 0), (0, 0), (0, cp_in - cin), (0, cp_out - cout)))
    return wt.reshape(kh * kw, cp_in, cp_out).astype(jnp.bfloat16)


def _prep_conv1x1_weight(w, cp_in, cp_out):
    """PyTorch (Cout, Cin, 1, 1) -> (Cin_p, Cout_p) bf16."""
    cout, cin = w.shape[0], w.shape[1]
    wt = jnp.transpose(w[:, :, 0, 0], (1, 0))            # (Cin, Cout)
    wt = jnp.pad(wt, ((0, cp_in - cin), (0, cp_out - cout)))
    return wt.astype(jnp.bfloat16)


def _bn_scale_shift(stats, gamma, beta, m_true, cp_out):
    """Fold train-mode batch stats (biased var) + affine into scale/shift."""
    s = jnp.sum(stats, axis=0)                           # (2, cp_out)
    mean = s[0] / m_true
    var = jnp.maximum(s[1] / m_true - mean * mean, 0.0)  # biased variance
    g = jnp.pad(gamma.astype(jnp.float32), (0, cp_out - gamma.shape[0])).reshape(1, -1)
    b = jnp.pad(beta.astype(jnp.float32), (0, cp_out - beta.shape[0])).reshape(1, -1)
    scale = g * lax.rsqrt(var + BN_EPS)
    shift = b - mean * scale
    return scale, shift


def res_block_basic(x_nchw, params, *, stride=1):
    """Forward pass of make_a_res_block_basic.  Input/output are NCHW f32."""
    x = jnp.transpose(x_nchw, (0, 2, 3, 1)).astype(jnp.float32)   # -> NHWC
    n, h, w, cin = x.shape

    w2a, g2a, b2a = params["branch2a"]
    w2b, g2b, b2b = params["branch2b"]
    cout = w2a.shape[0]

    s = stride
    ho = (h - 1) // s + 1
    wo = (w - 1) // s + 1
    m = n * ho * wo

    cp_in = _round_up(cin, LANE)
    cp_out = _round_up(cout, LANE)
    tn = _pick_tn(cp_out)

    x_p = _pad_channels(x.astype(jnp.bfloat16), cp_in)            # (n,h,w,cp_in)
    ones_in = jnp.ones((1, cp_in), jnp.float32)
    zeros_in = jnp.zeros((1, cp_in), jnp.float32)

    wa = _prep_conv3x3_weight(w2a, cp_in, cp_out)
    wb = _prep_conv3x3_weight(w2b, cp_out, cp_out)

    # ---- branch2a: conv3x3(stride); its BN+ReLU is fused into branch2b ----
    y2a_full, st2a_full = _conv3x3(x_p, wa, ones_in, zeros_in,
                                   fuse_pre_bn_relu=False, tn=tn)
    if s == 1:
        y2a, st2a = y2a_full, st2a_full
    else:
        # TODO(synk): strided branch2a reuses the stride-1 conv kernel and
        # subsamples (s^2 extra MXU work); not exercised by the tested configs.
        y2a = y2a_full[:, ::s, ::s, :]
        yf = y2a.astype(jnp.float32)
        st2a = jnp.stack([jnp.sum(yf, axis=(0, 1, 2)),
                          jnp.sum(yf * yf, axis=(0, 1, 2))])[None]
    sc2a, sh2a = _bn_scale_shift(st2a, g2a, b2a, m, cp_out)

    # ---- branch2b: (fused BN2a+ReLU) -> conv3x3(1) -------------------------
    y2b, st2b = _conv3x3(y2a, wb, sc2a, sh2a, fuse_pre_bn_relu=True, tn=tn)
    sc2b, sh2b = _bn_scale_shift(st2b, g2b, b2b, m, cp_out)

    # ---- branch1: conv1x1(stride) -> BN (projection) or identity -----------
    if s != 1 or cin != cout:
        w1, g1, b1 = params["branch1"]
        x1 = x_p[:, ::s, ::s, :] if s != 1 else x_p
        w1p = _prep_conv1x1_weight(w1, cp_in, cp_out)
        r, st1 = _conv1x1(x1, w1p, tn=tn)
        sc1, sh1 = _bn_scale_shift(st1, g1, b1, m, cp_out)
    else:
        r = _pad_channels(x, cp_out)                     # f32 identity residual
        sc1 = jnp.ones((1, cp_out), jnp.float32)
        sh1 = jnp.zeros((1, cp_out), jnp.float32)

    # ---- BN(branch2b)+ReLU + residual(+BN) + final ReLU, fused -------------
    out = _bn_relu_add(y2b, sc2b, sh2b, r, sc1, sh1, tn=tn)
    y = out[:, :, :, :cout]
    return jnp.transpose(y, (0, 3, 1, 2))                # -> NCHW


def init_params(key, in_dim, out_dim, stride=1):
    """Synthetic params in PyTorch layout: conv (Cout,Cin,KH,KW), BN gamma/beta."""
    k1, k2, k3 = jax.random.split(key, 3)

    def conv_w(k, cout, cin, ksize):
        fan_in = cin * ksize * ksize
        return (jax.random.normal(k, (cout, cin, ksize, ksize), jnp.float32)
                * (2.0 / fan_in) ** 0.5)

    params = {
        "branch2a": (conv_w(k1, out_dim, in_dim, 3),
                     jnp.ones((out_dim,), jnp.float32),
                     jnp.zeros((out_dim,), jnp.float32)),
        "branch2b": (conv_w(k2, out_dim, out_dim, 3),
                     jnp.ones((out_dim,), jnp.float32),
                     jnp.zeros((out_dim,), jnp.float32)),
    }
    if stride != 1 or in_dim != out_dim:
        params["branch1"] = (conv_w(k3, out_dim, in_dim, 1),
                             jnp.ones((out_dim,), jnp.float32),
                             jnp.zeros((out_dim,), jnp.float32))
    return params


def _reference(x_nchw, params, *, stride=1):
    """Pure-JAX (f32, XLA) reference of the forward pass for a sanity check."""
    def conv(x, w, s, pad):
        return lax.conv_general_dilated(
            x, w, window_strides=(s, s), padding=[(pad, pad), (pad, pad)],
            dimension_numbers=("NCHW", "OIHW", "NCHW"))

    def bn(y, gamma, beta):
        mean = jnp.mean(y, axis=(0, 2, 3), keepdims=True)
        var = jnp.mean((y - mean) ** 2, axis=(0, 2, 3), keepdims=True)
        return ((y - mean) * lax.rsqrt(var + BN_EPS)
                * gamma.reshape(1, -1, 1, 1) + beta.reshape(1, -1, 1, 1))

    w2a, g2a, b2a = params["branch2a"]
    w2b, g2b, b2b = params["branch2b"]
    a = jax.nn.relu(bn(conv(x_nchw, w2a, stride, 1), g2a, b2a))
    b2 = jax.nn.relu(bn(conv(a, w2b, 1, 1), g2b, b2b))
    if "branch1" in params:
        w1, g1, b1 = params["branch1"]
        b1_out = bn(conv(x_nchw, w1, stride, 0), g1, b1)
    else:
        b1_out = x_nchw
    return jax.nn.relu(b1_out + b2)


if __name__ == "__main__":
    key = jax.random.PRNGKey(0)
    kx, kp, kp2 = jax.random.split(key, 3)

    block_fn = jax.jit(res_block_basic, static_argnames=("stride",))

    # Config 1: projection shortcut (in_dim != out_dim), stride 1.
    N, IN_DIM, OUT_DIM, HW, STRIDE = 2, 4, 8, 16, 1
    x = jax.random.normal(kx, (N, IN_DIM, HW, HW), dtype=jnp.float32)
    params = init_params(kp, IN_DIM, OUT_DIM, STRIDE)
    y = jax.block_until_ready(block_fn(x, params, stride=STRIDE))
    ref = _reference(x, params, stride=STRIDE)
    assert y.shape == (N, OUT_DIM, HW, HW)
    assert bool(jnp.all(y >= 0.0)) and bool(jnp.all(jnp.isfinite(y)))
    assert float(jnp.max(jnp.abs(y - ref))) < 0.3      # bf16-matmul tolerance

    # Config 2: identity shortcut (in_dim == out_dim), stride 1.
    x2 = jax.random.normal(kx, (N, OUT_DIM, HW, HW), dtype=jnp.float32)
    params_id = init_params(kp2, OUT_DIM, OUT_DIM, 1)
    y2 = jax.block_until_ready(block_fn(x2, params_id, stride=1))
    ref2 = _reference(x2, params_id, stride=1)
    assert y2.shape == (N, OUT_DIM, HW, HW)
    assert bool(jnp.all(y2 >= 0.0)) and bool(jnp.all(jnp.isfinite(y2)))
    assert float(jnp.max(jnp.abs(y2 - ref2))) < 0.3

    print("KERNEL_OK")
</pallas_src>

<mosaic_0001>
module attributes {stable_mosaic.version = 11 : i64} {
  func.func @_conv3x3_kernel(%arg0: i32, %arg1: i32, %arg2: memref<1x16x16x128xbf16, #tpu.memory_space<vmem>>, %arg3: memref<9x128x128xbf16, #tpu.memory_space<vmem>>, %arg4: memref<1x128xf32, #tpu.memory_space<vmem>>, %arg5: memref<1x128xf32, #tpu.memory_space<vmem>>, %arg6: memref<1x16x16x128xbf16, #tpu.memory_space<vmem>>, %arg7: memref<1x2x128xf32, #tpu.memory_space<vmem>>, %arg8: memref<18x18x128xbf16, #tpu.memory_space<vmem>>) attributes {dimension_semantics = [#tpu.dimension_semantics<parallel>, #tpu.dimension_semantics<parallel>], iteration_bounds = array<i64: 1, 2>, scalar_prefetch = 0 : i64, scratch_operands = 1 : i64, tpu.core_type = #tpu.core_type<tc>, window_params = [{transform_indices = @transform_0, window_bounds = array<i64: 1, 16, 16, 128>}, {transform_indices = @transform_1, window_bounds = array<i64: 9, 128, 128>}, {pipeline_mode = #tpu.pipeline_mode<synchronous>, transform_indices = @transform_2, window_bounds = array<i64: 1, 128>}, {pipeline_mode = #tpu.pipeline_mode<synchronous>, transform_indices = @transform_3, window_bounds = array<i64: 1, 128>}, {transform_indices = @transform_4, window_bounds = array<i64: 1, 16, 16, 128>}, {transform_indices = @transform_5, window_bounds = array<i64: 1, 2, 128>}]} {
    %c0 = arith.constant 0 : index
    %c0_0 = arith.constant 0 : index
    %c0_1 = arith.constant 0 : index
    %c0_2 = arith.constant 0 : index
    %0 = vector.load %arg2[%c0, %c0_0, %c0_1, %c0_2] : memref<1x16x16x128xbf16, #tpu.memory_space<vmem>>, vector<1x16x16x128xbf16>
    %1 = vector.shape_cast %0 : vector<1x16x16x128xbf16> to vector<16x16x128xbf16>
    %cst = arith.constant 0.000000e+00 : bf16
    %2 = vector.broadcast %cst : bf16 to vector<18x18x128xbf16>
    %c0_3 = arith.constant 0 : index
    %c0_4 = arith.constant 0 : index
    %c0_5 = arith.constant 0 : index
    %3 = vector.load %arg8[%c0_3, %c0_4, %c0_5] : memref<18x18x128xbf16, #tpu.memory_space<vmem>>, vector<18x18x128xbf16>
    tpu.vector_store %arg8[%c0_3, %c0_4, %c0_5], %2 {strides = array<i32>} : memref<18x18x128xbf16, #tpu.memory_space<vmem>>, vector<18x18x128xbf16>,
    %c1 = arith.constant 1 : index
    %c1_6 = arith.constant 1 : index
    %c0_7 = arith.constant 0 : index
    %4 = vector.load %arg8[%c1, %c1_6, %c0_7] : memref<18x18x128xbf16, #tpu.memory_space<vmem>>, vector<16x16x128xbf16>
    tpu.vector_store %arg8[%c1, %c1_6, %c0_7], %1 {strides = array<i32>} : memref<18x18x128xbf16, #tpu.memory_space<vmem>>, vector<16x16x128xbf16>,
    %cst_8 = arith.constant 0.000000e+00 : f32
    %5 = vector.broadcast %cst_8 : f32 to vector<256x128xf32>
    %c0_9 = arith.constant 0 : index
    %c0_10 = arith.constant 0 : index
    %c0_11 = arith.constant 0 : index
    %6 = vector.load %arg8[%c0_9, %c0_10, %c0_11] : memref<18x18x128xbf16, #tpu.memory_space<vmem>>, vector<16x16x128xbf16>
    %7 = vector.shape_cast %6 : vector<16x16x128xbf16> to vector<256x128xbf16>
    %c0_12 = arith.constant 0 : index
    %c0_13 = arith.constant 0 : index
    %c0_14 = arith.constant 0 : index
    %8 = vector.load %arg3[%c0_12, %c0_13, %c0_14] : memref<9x128x128xbf16, #tpu.memory_space<vmem>>, vector<1x128x128xbf16>
    %9 = vector.shape_cast %8 : vector<1x128x128xbf16> to vector<128x128xbf16>
    %cst_15 = arith.constant dense<0.000000e+00> : vector<256x128xf32>
    %10 = tpu.matmul %7, %9, %cst_15 {dimension_numbers = #tpu.dot_dimension_numbers<[1], [0], [0], [1], [0, 0, 1, 1], [], []>} : vector<256x128xbf16>, vector<128x128xbf16>, vector<256x128xf32> -> vector<256x128xf32>
    %11 = arith.addf %5, %10 : vector<256x128xf32>
    %c0_16 = arith.constant 0 : index
    %c1_17 = arith.constant 1 : index
    %c0_18 = arith.constant 0 : index
    %12 = vector.load %arg8[%c0_16, %c1_17, %c0_18] : memref<18x18x128xbf16, #tpu.memory_space<vmem>>, vector<16x16x128xbf16>
    %13 = vector.shape_cast %12 : vector<16x16x128xbf16> to vector<256x128xbf16>
    %c1_19 = arith.constant 1 : index
    %c0_20 = arith.constant 0 : index
    %c0_21 = arith.constant 0 : index
    %14 = vector.load %arg3[%c1_19, %c0_20, %c0_21] : memref<9x128x128xbf16, #tpu.memory_space<vmem>>, vector<1x128x128xbf16>
    %15 = vector.shape_cast %14 : vector<1x128x128xbf16> to vector<128x128xbf16>
    %cst_22 = arith.constant dense<0.000000e+00> : vector<256x128xf32>
    %16 = tpu.matmul %13, %15, %cst_22 {dimension_numbers = #tpu.dot_dimension_numbers<[1], [0], [0], [1], [0, 0, 1, 1], [], []>} : vector<256x128xbf16>, vector<128x128xbf16>, vector<256x128xf32> -> vector<256x128xf32>
    %17 = arith.addf %11, %16 : vector<256x128xf32>
    %c0_23 = arith.constant 0 : index
    %c2 = arith.constant 2 : index
    %c0_24 = arith.constant 0 : index
    %18 = vector.load %arg8[%c0_23, %c2, %c0_24] : memref<18x18x128xbf16, #tpu.memory_space<vmem>>, vector<16x16x128xbf16>
    %19 = vector.shape_cast %18 : vector<16x16x128xbf16> to vector<256x128xbf16>
    %c2_25 = arith.constant 2 : index
    %c0_26 = arith.constant 0 : index
    %c0_27 = arith.constant 0 : index
    %20 = vector.load %arg3[%c2_25, %c0_26, %c0_27] : memref<9x128x128xbf16, #tpu.memory_space<vmem>>, vector<1x128x128xbf16>
    %21 = vector.shape_cast %20 : vector<1x128x128xbf16> to vector<128x128xbf16>
    %cst_28 = arith.constant dense<0.000000e+00> : vector<256x128xf32>
    %22 = tpu.matmul %19, %21, %cst_28 {dimension_numbers = #tpu.dot_dimension_numbers<[1], [0], [0], [1], [0, 0, 1, 1], [], []>} : vector<256x128xbf16>, vector<128x128xbf16>, vector<256x128xf32> -> vector<256x128xf32>
    %23 = arith.addf %17, %22 : vector<256x128xf32>
    %c1_29 = arith.constant 1 : index
    %c0_30 = arith.constant 0 : index
    %c0_31 = arith.constant 0 : index
    %24 = vector.load %arg8[%c1_29, %c0_30, %c0_31] : memref<18x18x128xbf16, #tpu.memory_space<vmem>>, vector<16x16x128xbf16>
    %25 = vector.shape_cast %24 : vector<16x16x128xbf16> to vector<256x128xbf16>
    %c3 = arith.constant 3 : index
    %c0_32 = arith.constant 0 : index
    %c0_33 = arith.constant 0 : index
    %26 = vector.load %arg3[%c3, %c0_32, %c0_33] : memref<9x128x128xbf16, #tpu.memory_space<vmem>>, vector<1x128x128xbf16>
    %27 = vector.shape_cast %26 : vector<1x128x128xbf16> to vector<128x128xbf16>
    %cst_34 = arith.constant dense<0.000000e+00> : vector<256x128xf32>
    %28 = tpu.matmul %25, %27, %cst_34 {dimension_numbers = #tpu.dot_dimension_numbers<[1], [0], [0], [1], [0, 0, 1, 1], [], []>} : vector<256x128xbf16>, vector<128x128xbf16>, vector<256x128xf32> -> vector<256x128xf32>
    %29 = arith.addf %23, %28 : vector<256x128xf32>
    %c1_35 = arith.constant 1 : index
    %c1_36 = arith.constant 1 : index
    %c0_37 = arith.constant 0 : index
    %30 = vector.load %arg8[%c1_35, %c1_36, %c0_37] : memref<18x18x128xbf16, #tpu.memory_space<vmem>>, vector<16x16x128xbf16>
    %31 = vector.shape_cast %30 : vector<16x16x128xbf16> to vector<256x128xbf16>
    %c4 = arith.constant 4 : index
    %c0_38 = arith.constant 0 : index
    %c0_39 = arith.constant 0 : index
    %32 = vector.load %arg3[%c4, %c0_38, %c0_39] : memref<9x128x128xbf16, #tpu.memory_space<vmem>>, vector<1x128x128xbf16>
    %33 = vector.shape_cast %32 : vector<1x128x128xbf16> to vector<128x128xbf16>
    %cst_40 = arith.constant dense<0.000000e+00> : vector<256x128xf32>
    %34 = tpu.matmul %31, %33, %cst_40 {dimension_numbers = #tpu.dot_dimension_numbers<[1], [0], [0], [1], [0, 0, 1, 1], [], []>} : vector<256x128xbf16>, vector<128x128xbf16>, vector<256x128xf32> -> vector<256x128xf32>
    %35 = arith.addf %29, %34 : vector<256x128xf32>
    %c1_41 = arith.constant 1 : index
    %c2_42 = arith.constant 2 : index
    %c0_43 = arith.constant 0 : index
    %36 = vector.load %arg8[%c1_41, %c2_42, %c0_43] : memref<18x18x128xbf16, #tpu.memory_space<vmem>>, vector<16x16x128xbf16>
    %37 = vector.shape_cast %36 : vector<16x16x128xbf16> to vector<256x128xbf16>
    %c5 = arith.constant 5 : index
    %c0_44 = arith.constant 0 : index
    %c0_45 = arith.constant 0 : index
    %38 = vector.load %arg3[%c5, %c0_44, %c0_45] : memref<9x128x128xbf16, #tpu.memory_space<vmem>>, vector<1x128x128xbf16>
    %39 = vector.shape_cast %38 : vector<1x128x128xbf16> to vector<128x128xbf16>
    %cst_46 = arith.constant dense<0.000000e+00> : vector<256x128xf32>
    %40 = tpu.matmul %37, %39, %cst_46 {dimension_numbers = #tpu.dot_dimension_numbers<[1], [0], [0], [1], [0, 0, 1, 1], [], []>} : vector<256x128xbf16>, vector<128x128xbf16>, vector<256x128xf32> -> vector<256x128xf32>
    %41 = arith.addf %35, %40 : vector<256x128xf32>
    %c2_47 = arith.constant 2 : index
    %c0_48 = arith.constant 0 : index
    %c0_49 = arith.constant 0 : index
    %42 = vector.load %arg8[%c2_47, %c0_48, %c0_49] : memref<18x18x128xbf16, #tpu.memory_space<vmem>>, vector<16x16x128xbf16>
    %43 = vector.shape_cast %42 : vector<16x16x128xbf16> to vector<256x128xbf16>
    %c6 = arith.constant 6 : index
    %c0_50 = arith.constant 0 : index
    %c0_51 = arith.constant 0 : index
    %44 = vector.load %arg3[%c6, %c0_50, %c0_51] : memref<9x128x128xbf16, #tpu.memory_space<vmem>>, vector<1x128x128xbf16>
    %45 = vector.shape_cast %44 : vector<1x128x128xbf16> to vector<128x128xbf16>
    %cst_52 = arith.constant dense<0.000000e+00> : vector<256x128xf32>
    %46 = tpu.matmul %43, %45, %cst_52 {dimension_numbers = #tpu.dot_dimension_numbers<[1], [0], [0], [1], [0, 0, 1, 1], [], []>} : vector<256x128xbf16>, vector<128x128xbf16>, vector<256x128xf32> -> vector<256x128xf32>
    %47 = arith.addf %41, %46 : vector<256x128xf32>
    %c2_53 = arith.constant 2 : index
    %c1_54 = arith.constant 1 : index
    %c0_55 = arith.constant 0 : index
    %48 = vector.load %arg8[%c2_53, %c1_54, %c0_55] : memref<18x18x128xbf16, #tpu.memory_space<vmem>>, vector<16x16x128xbf16>
    %49 = vector.shape_cast %48 : vector<16x16x128xbf16> to vector<256x128xbf16>
    %c7 = arith.constant 7 : index
    %c0_56 = arith.constant 0 : index
    %c0_57 = arith.constant 0 : index
    %50 = vector.load %arg3[%c7, %c0_56, %c0_57] : memref<9x128x128xbf16, #tpu.memory_space<vmem>>, vector<1x128x128xbf16>
    %51 = vector.shape_cast %50 : vector<1x128x128xbf16> to vector<128x128xbf16>
    %cst_58 = arith.constant dense<0.000000e+00> : vector<256x128xf32>
    %52 = tpu.matmul %49, %51, %cst_58 {dimension_numbers = #tpu.dot_dimension_numbers<[1], [0], [0], [1], [0, 0, 1, 1], [], []>} : vector<256x128xbf16>, vector<128x128xbf16>, vector<256x128xf32> -> vector<256x128xf32>
    %53 = arith.addf %47, %52 : vector<256x128xf32>
    %c2_59 = arith.constant 2 : index
    %c2_60 = arith.constant 2 : index
    %c0_61 = arith.constant 0 : index
    %54 = vector.load %arg8[%c2_59, %c2_60, %c0_61] : memref<18x18x128xbf16, #tpu.memory_space<vmem>>, vector<16x16x128xbf16>
    %55 = vector.shape_cast %54 : vector<16x16x128xbf16> to vector<256x128xbf16>
    %c8 = arith.constant 8 : index
    %c0_62 = arith.constant 0 : index
    %c0_63 = arith.constant 0 : index
    %56 = vector.load %arg3[%c8, %c0_62, %c0_63] : memref<9x128x128xbf16, #tpu.memory_space<vmem>>, vector<1x128x128xbf16>
    %57 = vector.shape_cast %56 : vector<1x128x128xbf16> to vector<128x128xbf16>
    %cst_64 = arith.constant dense<0.000000e+00> : vector<256x128xf32>
    %58 = tpu.matmul %55, %57, %cst_64 {dimension_numbers = #tpu.dot_dimension_numbers<[1], [0], [0], [1], [0, 0, 1, 1], [], []>} : vector<256x128xbf16>, vector<128x128xbf16>, vector<256x128xf32> -> vector<256x128xf32>
    %59 = arith.addf %53, %58 : vector<256x128xf32>
    %60 = vector.shape_cast %59 : vector<256x128xf32> to vector<16x16x128xf32>
    %61 = arith.truncf %60 : vector<16x16x128xf32> to vector<16x16x128xbf16>
    %c0_65 = arith.constant 0 : index
    %c0_66 = arith.constant 0 : index
    %c0_67 = arith.constant 0 : index
    %c0_68 = arith.constant 0 : index
    %62 = vector.load %arg6[%c0_65, %c0_66, %c0_67, %c0_68] : memref<1x16x16x128xbf16, #tpu.memory_space<vmem>>, vector<1x16x16x128xbf16>
    %63 = vector.shape_cast %62 : vector<1x16x16x128xbf16> to vector<16x16x128xbf16>
    %64 = vector.shape_cast %61 : vector<16x16x128xbf16> to vector<1x16x16x128xbf16>
    tpu.vector_store %arg6[%c0_65, %c0_66, %c0_67, %c0_68], %64 {strides = array<i32>} : memref<1x16x16x128xbf16, #tpu.memory_space<vmem>>, vector<1x16x16x128xbf16>,
    %cst_69 = arith.constant dense<0.000000e+00> : vector<128xf32>
    %65 = vector.multi_reduction <add>, %59, %cst_69 [0] : vector<256x128xf32> to vector<128xf32>
    %66 = vector.shape_cast %65 : vector<128xf32> to vector<1x128xf32>
    %67 = arith.mulf %59, %59 : vector<256x128xf32>
    %cst_70 = arith.constant dense<0.000000e+00> : vector<128xf32>
    %68 = vector.multi_reduction <add>, %67, %cst_70 [0] : vector<256x128xf32> to vector<128xf32>
    %69 = vector.shape_cast %68 : vector<128xf32> to vector<1x128xf32>
    %70 = tpu.concatenate %66, %69 in 0 : vector<1x128xf32>, vector<1x128xf32> -> vector<2x128xf32>
    %c0_71 = arith.constant 0 : index
    %c0_72 = arith.constant 0 : index
    %c0_73 = arith.constant 0 : index
    %71 = vector.load %arg7[%c0_71, %c0_72, %c0_73] : memref<1x2x128xf32, #tpu.memory_space<vmem>>, vector<1x2x128xf32>
    %72 = vector.shape_cast %71 : vector<1x2x128xf32> to vector<2x128xf32>
    %73 = vector.shape_cast %70 : vector<2x128xf32> to vector<1x2x128xf32>
    tpu.vector_store %arg7[%c0_71, %c0_72, %c0_73], %73 {strides = array<i32>} : memref<1x2x128xf32, #tpu.memory_space<vmem>>, vector<1x2x128xf32>,
    return
  }
  func.func @transform_0(%arg0: i32, %arg1: i32) -> (i32, i32, i32, i32) {
    %c0_i32 = arith.constant 0 : i32
    %c0_i32_0 = arith.constant 0 : i32
    %c0_i32_1 = arith.constant 0 : i32
    %c0_i32_2 = arith.constant 0 : i32
    return %arg1, %c0_i32, %c0_i32_0, %c0_i32_1 : i32, i32, i32, i32
  }
  func.func @transform_1(%arg0: i32, %arg1: i32) -> (i32, i32, i32) {
    %c0_i32 = arith.constant 0 : i32
    %c0_i32_0 = arith.constant 0 : i32
    %c0_i32_1 = arith.constant 0 : i32
    return %c0_i32, %c0_i32_0, %arg0 : i32, i32, i32
  }
  func.func @transform_2(%arg0: i32, %arg1: i32) -> (i32, i32) {
    %c0_i32 = arith.constant 0 : i32
    %c0_i32_0 = arith.constant 0 : i32
    %c0_i32_1 = arith.constant 0 : i32
    return %c0_i32, %c0_i32_0 : i32, i32
  }
  func.func @transform_3(%arg0: i32, %arg1: i32) -> (i32, i32) {
    %c0_i32 = arith.constant 0 : i32
    %c0_i32_0 = arith.constant 0 : i32
    %c0_i32_1 = arith.constant 0 : i32
    return %c0_i32, %c0_i32_0 : i32, i32
  }
  func.func @transform_4(%arg0: i32, %arg1: i32) -> (i32, i32, i32, i32) {
    %c0_i32 = arith.constant 0 : i32
    %c0_i32_0 = arith.constant 0 : i32
    %c0_i32_1 = arith.constant 0 : i32
    return %arg1, %c0_i32, %c0_i32_0, %arg0 : i32, i32, i32, i32
  }
  func.func @transform_5(%arg0: i32, %arg1: i32) -> (i32, i32, i32) {
    %c0_i32 = arith.constant 0 : i32
    %c0_i32_0 = arith.constant 0 : i32
    return %arg1, %c0_i32, %arg0 : i32, i32, i32
  }
}

module attributes {stable_mosaic.version = 11 : i64} {
  func.func @_conv1x1_kernel(%arg0: i32, %arg1: i32, %arg2: memref<1x16x16x128xbf16, #tpu.memory_space<vmem>>, %arg3: memref<128x128xbf16, #tpu.memory_space<vmem>>, %arg4: memref<1x16x16x128xbf16, #tpu.memory_space<vmem>>, %arg5: memref<1x2x128xf32, #tpu.memory_space<vmem>>) attributes {dimension_semantics = [#tpu.dimension_semantics<parallel>, #tpu.dimension_semantics<parallel>], iteration_bounds = array<i64: 1, 2>, scalar_prefetch = 0 : i64, scratch_operands = 0 : i64, tpu.core_type = #tpu.core_type<tc>, window_params = [{transform_indices = @transform_0, window_bounds = array<i64: 1, 16, 16, 128>}, {transform_indices = @transform_1, window_bounds = array<i64: 128, 128>}, {transform_indices = @transform_2, window_bounds = array<i64: 1, 16, 16, 128>}, {transform_indices = @transform_3, window_bounds = array<i64: 1, 2, 128>}]} {
    %c0 = arith.constant 0 : index
    %c0_0 = arith.constant 0 : index
    %c0_1 = arith.constant 0 : index
    %c0_2 = arith.constant 0 : index
    %0 = vector.load %arg2[%c0, %c0_0, %c0_1, %c0_2] : memref<1x16x16x128xbf16, #tpu.memory_space<vmem>>, vector<1x16x16x128xbf16>
    %1 = vector.shape_cast %0 : vector<1x16x16x128xbf16> to vector<16x16x128xbf16>
    %2 = vector.shape_cast %1 : vector<16x16x128xbf16> to vector<256x128xbf16>
    %c0_3 = arith.constant 0 : index
    %c0_4 = arith.constant 0 : index
    %3 = vector.load %arg3[%c0_3, %c0_4] : memref<128x128xbf16, #tpu.memory_space<vmem>>, vector<128x128xbf16>
    %cst = arith.constant dense<0.000000e+00> : vector<256x128xf32>
    %4 = tpu.matmul %2, %3, %cst {dimension_numbers = #tpu.dot_dimension_numbers<[1], [0], [0], [1], [0, 0, 1, 1], [], []>} : vector<256x128xbf16>, vector<128x128xbf16>, vector<256x128xf32> -> vector<256x128xf32>
    %5 = vector.shape_cast %4 : vector<256x128xf32> to vector<16x16x128xf32>
    %6 = arith.truncf %5 : vector<16x16x128xf32> to vector<16x16x128xbf16>
    %c0_5 = arith.constant 0 : index
    %c0_6 = arith.constant 0 : index
    %c0_7 = arith.constant 0 : index
    %c0_8 = arith.constant 0 : index
    %7 = vector.load %arg4[%c0_5, %c0_6, %c0_7, %c0_8] : memref<1x16x16x128xbf16, #tpu.memory_space<vmem>>, vector<1x16x16x128xbf16>
    %8 = vector.shape_cast %7 : vector<1x16x16x128xbf16> to vector<16x16x128xbf16>
    %9 = vector.shape_cast %6 : vector<16x16x128xbf16> to vector<1x16x16x128xbf16>
    tpu.vector_store %arg4[%c0_5, %c0_6, %c0_7, %c0_8], %9 {strides = array<i32>} : memref<1x16x16x128xbf16, #tpu.memory_space<vmem>>, vector<1x16x16x128xbf16>,
    %cst_9 = arith.constant dense<0.000000e+00> : vector<128xf32>
    %10 = vector.multi_reduction <add>, %4, %cst_9 [0] : vector<256x128xf32> to vector<128xf32>
    %11 = vector.shape_cast %10 : vector<128xf32> to vector<1x128xf32>
    %12 = arith.mulf %4, %4 : vector<256x128xf32>
    %cst_10 = arith.constant dense<0.000000e+00> : vector<128xf32>
    %13 = vector.multi_reduction <add>, %12, %cst_10 [0] : vector<256x128xf32> to vector<128xf32>
    %14 = vector.shape_cast %13 : vector<128xf32> to vector<1x128xf32>
    %15 = tpu.concatenate %11, %14 in 0 : vector<1x128xf32>, vector<1x128xf32> -> vector<2x128xf32>
    %c0_11 = arith.constant 0 : index
    %c0_12 = arith.constant 0 : index
    %c0_13 = arith.constant 0 : index
    %16 = vector.load %arg5[%c0_11, %c0_12, %c0_13] : memref<1x2x128xf32, #tpu.memory_space<vmem>>, vector<1x2x128xf32>
    %17 = vector.shape_cast %16 : vector<1x2x128xf32> to vector<2x128xf32>
    %18 = vector.shape_cast %15 : vector<2x128xf32> to vector<1x2x128xf32>
    tpu.vector_store %arg5[%c0_11, %c0_12, %c0_13], %18 {strides = array<i32>} : memref<1x2x128xf32, #tpu.memory_space<vmem>>, vector<1x2x128xf32>,
    return
  }
  func.func @transform_0(%arg0: i32, %arg1: i32) -> (i32, i32, i32, i32) {
    %c0_i32 = arith.constant 0 : i32
    %c0_i32_0 = arith.constant 0 : i32
    %c0_i32_1 = arith.constant 0 : i32
    %c0_i32_2 = arith.constant 0 : i32
    return %arg1, %c0_i32, %c0_i32_0, %c0_i32_1 : i32, i32, i32, i32
  }
  func.func @transform_1(%arg0: i32, %arg1: i32) -> (i32, i32) {
    %c0_i32 = arith.constant 0 : i32
    %c0_i32_0 = arith.constant 0 : i32
    return %c0_i32, %arg0 : i32, i32
  }
  func.func @transform_2(%arg0: i32, %arg1: i32) -> (i32, i32, i32, i32) {
    %c0_i32 = arith.constant 0 : i32
    %c0_i32_0 = arith.constant 0 : i32
    %c0_i32_1 = arith.constant 0 : i32
    return %arg1, %c0_i32, %c0_i32_0, %arg0 : i32, i32, i32, i32
  }
  func.func @transform_3(%arg0: i32, %arg1: i32) -> (i32, i32, i32) {
    %c0_i32 = arith.constant 0 : i32
    %c0_i32_0 = arith.constant 0 : i32
    return %arg1, %c0_i32, %arg0 : i32, i32, i32
  }
}

module attributes {stable_mosaic.version = 11 : i64} {
  func.func @_conv3x3_kernel(%arg0: i32, %arg1: i32, %arg2: memref<1x16x16x128xbf16, #tpu.memory_space<vmem>>, %arg3: memref<9x128x128xbf16, #tpu.memory_space<vmem>>, %arg4: memref<1x128xf32, #tpu.memory_space<vmem>>, %arg5: memref<1x128xf32, #tpu.memory_space<vmem>>, %arg6: memref<1x16x16x128xbf16, #tpu.memory_space<vmem>>, %arg7: memref<1x2x128xf32, #tpu.memory_space<vmem>>, %arg8: memref<18x18x128xbf16, #tpu.memory_space<vmem>>) attributes {dimension_semantics = [#tpu.dimension_semantics<parallel>, #tpu.dimension_semantics<parallel>], iteration_bounds = array<i64: 1, 2>, scalar_prefetch = 0 : i64, scratch_operands = 1 : i64, tpu.core_type = #tpu.core_type<tc>, window_params = [{transform_indices = @transform_0, window_bounds = array<i64: 1, 16, 16, 128>}, {transform_indices = @transform_1, window_bounds = array<i64: 9, 128, 128>}, {pipeline_mode = #tpu.pipeline_mode<synchronous>, transform_indices = @transform_2, window_bounds = array<i64: 1, 128>}, {pipeline_mode = #tpu.pipeline_mode<synchronous>, transform_indices = @transform_3, window_bounds = array<i64: 1, 128>}, {transform_indices = @transform_4, window_bounds = array<i64: 1, 16, 16, 128>}, {transform_indices = @transform_5, window_bounds = array<i64: 1, 2, 128>}]} {
    %c0 = arith.constant 0 : index
    %c0_0 = arith.constant 0 : index
    %c0_1 = arith.constant 0 : index
    %c0_2 = arith.constant 0 : index
    %0 = vector.load %arg2[%c0, %c0_0, %c0_1, %c0_2] : memref<1x16x16x128xbf16, #tpu.memory_space<vmem>>, vector<1x16x16x128xbf16>
    %1 = vector.shape_cast %0 : vector<1x16x16x128xbf16> to vector<16x16x128xbf16>
    %2 = arith.extf %1 : vector<16x16x128xbf16> to vector<16x16x128xf32>
    %c0_3 = arith.constant 0 : index
    %c0_4 = arith.constant 0 : index
    %3 = vector.load %arg4[%c0_3, %c0_4] : memref<1x128xf32, #tpu.memory_space<vmem>>, vector<1x128xf32>
    %4 = vector.shape_cast %3 : vector<1x128xf32> to vector<1x1x128xf32>
    %5 = vector.broadcast %4 : vector<1x1x128xf32> to vector<16x16x128xf32>
    %6 = arith.mulf %2, %5 : vector<16x16x128xf32>
    %c0_5 = arith.constant 0 : index
    %c0_6 = arith.constant 0 : index
    %7 = vector.load %arg5[%c0_5, %c0_6] : memref<1x128xf32, #tpu.memory_space<vmem>>, vector<1x128xf32>
    %8 = vector.shape_cast %7 : vector<1x128xf32> to vector<1x1x128xf32>
    %9 = vector.broadcast %8 : vector<1x1x128xf32> to vector<16x16x128xf32>
    %10 = arith.addf %6, %9 : vector<16x16x128xf32>
    %cst = arith.constant 0.000000e+00 : f32
    %11 = vector.broadcast %cst : f32 to vector<16x16x128xf32>
    %12 = arith.maximumf %10, %11 : vector<16x16x128xf32>
    %13 = arith.truncf %12 : vector<16x16x128xf32> to vector<16x16x128xbf16>
    %cst_7 = arith.constant 0.000000e+00 : bf16
    %14 = vector.broadcast %cst_7 : bf16 to vector<18x18x128xbf16>
    %c0_8 = arith.constant 0 : index
    %c0_9 = arith.constant 0 : index
    %c0_10 = arith.constant 0 : index
    %15 = vector.load %arg8[%c0_8, %c0_9, %c0_10] : memref<18x18x128xbf16, #tpu.memory_space<vmem>>, vector<18x18x128xbf16>
    tpu.vector_store %arg8[%c0_8, %c0_9, %c0_10], %14 {strides = array<i32>} : memref<18x18x128xbf16, #tpu.memory_space<vmem>>, vector<18x18x128xbf16>,
    %c1 = arith.constant 1 : index
    %c1_11 = arith.constant 1 : index
    %c0_12 = arith.constant 0 : index
    %16 = vector.load %arg8[%c1, %c1_11, %c0_12] : memref<18x18x128xbf16, #tpu.memory_space<vmem>>, vector<16x16x128xbf16>
    tpu.vector_store %arg8[%c1, %c1_11, %c0_12], %13 {strides = array<i32>} : memref<18x18x128xbf16, #tpu.memory_space<vmem>>, vector<16x16x128xbf16>,
    %cst_13 = arith.constant 0.000000e+00 : f32
    %17 = vector.broadcast %cst_13 : f32 to vector<256x128xf32>
    %c0_14 = arith.constant 0 : index
    %c0_15 = arith.constant 0 : index
    %c0_16 = arith.constant 0 : index
    %18 = vector.load %arg8[%c0_14, %c0_15, %c0_16] : memref<18x18x128xbf16, #tpu.memory_space<vmem>>, vector<16x16x128xbf16>
    %19 = vector.shape_cast %18 : vector<16x16x128xbf16> to vector<256x128xbf16>
    %c0_17 = arith.constant 0 : index
    %c0_18 = arith.constant 0 : index
    %c0_19 = arith.constant 0 : index
    %20 = vector.load %arg3[%c0_17, %c0_18, %c0_19] : memref<9x128x128xbf16, #tpu.memory_space<vmem>>, vector<1x128x128xbf16>
    %21 = vector.shape_cast %20 : vector<1x128x128xbf16> to vector<128x128xbf16>
    %cst_20 = arith.constant dense<0.000000e+00> : vector<256x128xf32>
    %22 = tpu.matmul %19, %21, %cst_20 {dimension_numbers = #tpu.dot_dimension_numbers<[1], [0], [0], [1], [0, 0, 1, 1], [], []>} : vector<256x128xbf16>, vector<128x128xbf16>, vector<256x128xf32> -> vector<256x128xf32>
    %23 = arith.addf %17, %22 : vector<256x128xf32>
    %c0_21 = arith.constant 0 : index
    %c1_22 = arith.constant 1 : index
    %c0_23 = arith.constant 0 : index
    %24 = vector.load %arg8[%c0_21, %c1_22, %c0_23] : memref<18x18x128xbf16, #tpu.memory_space<vmem>>, vector<16x16x128xbf16>
    %25 = vector.shape_cast %24 : vector<16x16x128xbf16> to vector<256x128xbf16>
    %c1_24 = arith.constant 1 : index
    %c0_25 = arith.constant 0 : index
    %c0_26 = arith.constant 0 : index
    %26 = vector.load %arg3[%c1_24, %c0_25, %c0_26] : memref<9x128x128xbf16, #tpu.memory_space<vmem>>, vector<1x128x128xbf16>
    %27 = vector.shape_cast %26 : vector<1x128x128xbf16> to vector<128x128xbf16>
    %cst_27 = arith.constant dense<0.000000e+00> : vector<256x128xf32>
    %28 = tpu.matmul %25, %27, %cst_27 {dimension_numbers = #tpu.dot_dimension_numbers<[1], [0], [0], [1], [0, 0, 1, 1], [], []>} : vector<256x128xbf16>, vector<128x128xbf16>, vector<256x128xf32> -> vector<256x128xf32>
    %29 = arith.addf %23, %28 : vector<256x128xf32>
    %c0_28 = arith.constant 0 : index
    %c2 = arith.constant 2 : index
    %c0_29 = arith.constant 0 : index
    %30 = vector.load %arg8[%c0_28, %c2, %c0_29] : memref<18x18x128xbf16, #tpu.memory_space<vmem>>, vector<16x16x128xbf16>
    %31 = vector.shape_cast %30 : vector<16x16x128xbf16> to vector<256x128xbf16>
    %c2_30 = arith.constant 2 : index
    %c0_31 = arith.constant 0 : index
    %c0_32 = arith.constant 0 : index
    %32 = vector.load %arg3[%c2_30, %c0_31, %c0_32] : memref<9x128x128xbf16, #tpu.memory_space<vmem>>, vector<1x128x128xbf16>
    %33 = vector.shape_cast %32 : vector<1x128x128xbf16> to vector<128x128xbf16>
    %cst_33 = arith.constant dense<0.000000e+00> : vector<256x128xf32>
    %34 = tpu.matmul %31, %33, %cst_33 {dimension_numbers = #tpu.dot_dimension_numbers<[1], [0], [0], [1], [0, 0, 1, 1], [], []>} : vector<256x128xbf16>, vector<128x128xbf16>, vector<256x128xf32> -> vector<256x128xf32>
    %35 = arith.addf %29, %34 : vector<256x128xf32>
    %c1_34 = arith.constant 1 : index
    %c0_35 = arith.constant 0 : index
    %c0_36 = arith.constant 0 : index
    %36 = vector.load %arg8[%c1_34, %c0_35, %c0_36] : memref<18x18x128xbf16, #tpu.memory_space<vmem>>, vector<16x16x128xbf16>
    %37 = vector.shape_cast %36 : vector<16x16x128xbf16> to vector<256x128xbf16>
    %c3 = arith.constant 3 : index
    %c0_37 = arith.constant 0 : index
    %c0_38 = arith.constant 0 : index
    %38 = vector.load %arg3[%c3, %c0_37, %c0_38] : memref<9x128x128xbf16, #tpu.memory_space<vmem>>, vector<1x128x128xbf16>
    %39 = vector.shape_cast %38 : vector<1x128x128xbf16> to vector<128x128xbf16>
    %cst_39 = arith.constant dense<0.000000e+00> : vector<256x128xf32>
    %40 = tpu.matmul %37, %39, %cst_39 {dimension_numbers = #tpu.dot_dimension_numbers<[1], [0], [0], [1], [0, 0, 1, 1], [], []>} : vector<256x128xbf16>, vector<128x128xbf16>, vector<256x128xf32> -> vector<256x128xf32>
    %41 = arith.addf %35, %40 : vector<256x128xf32>
    %c1_40 = arith.constant 1 : index
    %c1_41 = arith.constant 1 : index
    %c0_42 = arith.constant 0 : index
    %42 = vector.load %arg8[%c1_40, %c1_41, %c0_42] : memref<18x18x128xbf16, #tpu.memory_space<vmem>>, vector<16x16x128xbf16>
    %43 = vector.shape_cast %42 : vector<16x16x128xbf16> to vector<256x128xbf16>
    %c4 = arith.constant 4 : index
    %c0_43 = arith.constant 0 : index
    %c0_44 = arith.constant 0 : index
    %44 = vector.load %arg3[%c4, %c0_43, %c0_44] : memref<9x128x128xbf16, #tpu.memory_space<vmem>>, vector<1x128x128xbf16>
    %45 = vector.shape_cast %44 : vector<1x128x128xbf16> to vector<128x128xbf16>
    %cst_45 = arith.constant dense<0.000000e+00> : vector<256x128xf32>
    %46 = tpu.matmul %43, %45, %cst_45 {dimension_numbers = #tpu.dot_dimension_numbers<[1], [0], [0], [1], [0, 0, 1, 1], [], []>} : vector<256x128xbf16>, vector<128x128xbf16>, vector<256x128xf32> -> vector<256x128xf32>
    %47 = arith.addf %41, %46 : vector<256x128xf32>
    %c1_46 = arith.constant 1 : index
    %c2_47 = arith.constant 2 : index
    %c0_48 = arith.constant 0 : index
    %48 = vector.load %arg8[%c1_46, %c2_47, %c0_48] : memref<18x18x128xbf16, #tpu.memory_space<vmem>>, vector<16x16x128xbf16>
    %49 = vector.shape_cast %48 : vector<16x16x128xbf16> to vector<256x128xbf16>
    %c5 = arith.constant 5 : index
    %c0_49 = arith.constant 0 : index
    %c0_50 = arith.constant 0 : index
    %50 = vector.load %arg3[%c5, %c0_49, %c0_50] : memref<9x128x128xbf16, #tpu.memory_space<vmem>>, vector<1x128x128xbf16>
    %51 = vector.shape_cast %50 : vector<1x128x128xbf16> to vector<128x128xbf16>
    %cst_51 = arith.constant dense<0.000000e+00> : vector<256x128xf32>
    %52 = tpu.matmul %49, %51, %cst_51 {dimension_numbers = #tpu.dot_dimension_numbers<[1], [0], [0], [1], [0, 0, 1, 1], [], []>} : vector<256x128xbf16>, vector<128x128xbf16>, vector<256x128xf32> -> vector<256x128xf32>
    %53 = arith.addf %47, %52 : vector<256x128xf32>
    %c2_52 = arith.constant 2 : index
    %c0_53 = arith.constant 0 : index
    %c0_54 = arith.constant 0 : index
    %54 = vector.load %arg8[%c2_52, %c0_53, %c0_54] : memref<18x18x128xbf16, #tpu.memory_space<vmem>>, vector<16x16x128xbf16>
    %55 = vector.shape_cast %54 : vector<16x16x128xbf16> to vector<256x128xbf16>
    %c6 = arith.constant 6 : index
    %c0_55 = arith.constant 0 : index
    %c0_56 = arith.constant 0 : index
    %56 = vector.load %arg3[%c6, %c0_55, %c0_56] : memref<9x128x128xbf16, #tpu.memory_space<vmem>>, vector<1x128x128xbf16>
    %57 = vector.shape_cast %56 : vector<1x128x128xbf16> to vector<128x128xbf16>
    %cst_57 = arith.constant dense<0.000000e+00> : vector<256x128xf32>
    %58 = tpu.matmul %55, %57, %cst_57 {dimension_numbers = #tpu.dot_dimension_numbers<[1], [0], [0], [1], [0, 0, 1, 1], [], []>} : vector<256x128xbf16>, vector<128x128xbf16>, vector<256x128xf32> -> vector<256x128xf32>
    %59 = arith.addf %53, %58 : vector<256x128xf32>
    %c2_58 = arith.constant 2 : index
    %c1_59 = arith.constant 1 : index
    %c0_60 = arith.constant 0 : index
    %60 = vector.load %arg8[%c2_58, %c1_59, %c0_60] : memref<18x18x128xbf16, #tpu.memory_space<vmem>>, vector<16x16x128xbf16>
    %61 = vector.shape_cast %60 : vector<16x16x128xbf16> to vector<256x128xbf16>
    %c7 = arith.constant 7 : index
    %c0_61 = arith.constant 0 : index
    %c0_62 = arith.constant 0 : index
    %62 = vector.load %arg3[%c7, %c0_61, %c0_62] : memref<9x128x128xbf16, #tpu.memory_space<vmem>>, vector<1x128x128xbf16>
    %63 = vector.shape_cast %62 : vector<1x128x128xbf16> to vector<128x128xbf16>
    %cst_63 = arith.constant dense<0.000000e+00> : vector<256x128xf32>
    %64 = tpu.matmul %61, %63, %cst_63 {dimension_numbers = #tpu.dot_dimension_numbers<[1], [0], [0], [1], [0, 0, 1, 1], [], []>} : vector<256x128xbf16>, vector<128x128xbf16>, vector<256x128xf32> -> vector<256x128xf32>
    %65 = arith.addf %59, %64 : vector<256x128xf32>
    %c2_64 = arith.constant 2 : index
    %c2_65 = arith.constant 2 : index
    %c0_66 = arith.constant 0 : index
    %66 = vector.load %arg8[%c2_64, %c2_65, %c0_66] : memref<18x18x128xbf16, #tpu.memory_space<vmem>>, vector<16x16x128xbf16>
    %67 = vector.shape_cast %66 : vector<16x16x128xbf16> to vector<256x128xbf16>
    %c8 = arith.constant 8 : index
    %c0_67 = arith.constant 0 : index
    %c0_68 = arith.constant 0 : index
    %68 = vector.load %arg3[%c8, %c0_67, %c0_68] : memref<9x128x128xbf16, #tpu.memory_space<vmem>>, vector<1x128x128xbf16>
    %69 = vector.shape_cast %68 : vector<1x128x128xbf16> to vector<128x128xbf16>
    %cst_69 = arith.constant dense<0.000000e+00> : vector<256x128xf32>
    %70 = tpu.matmul %67, %69, %cst_69 {dimension_numbers = #tpu.dot_dimension_numbers<[1], [0], [0], [1], [0, 0, 1, 1], [], []>} : vector<256x128xbf16>, vector<128x128xbf16>, vector<256x128xf32> -> vector<256x128xf32>
    %71 = arith.addf %65, %70 : vector<256x128xf32>
    %72 = vector.shape_cast %71 : vector<256x128xf32> to vector<16x16x128xf32>
    %73 = arith.truncf %72 : vector<16x16x128xf32> to vector<16x16x128xbf16>
    %c0_70 = arith.constant 0 : index
    %c0_71 = arith.constant 0 : index
    %c0_72 = arith.constant 0 : index
    %c0_73 = arith.constant 0 : index
    %74 = vector.load %arg6[%c0_70, %c0_71, %c0_72, %c0_73] : memref<1x16x16x128xbf16, #tpu.memory_space<vmem>>, vector<1x16x16x128xbf16>
    %75 = vector.shape_cast %74 : vector<1x16x16x128xbf16> to vector<16x16x128xbf16>
    %76 = vector.shape_cast %73 : vector<16x16x128xbf16> to vector<1x16x16x128xbf16>
    tpu.vector_store %arg6[%c0_70, %c0_71, %c0_72, %c0_73], %76 {strides = array<i32>} : memref<1x16x16x128xbf16, #tpu.memory_space<vmem>>, vector<1x16x16x128xbf16>,
    %cst_74 = arith.constant dense<0.000000e+00> : vector<128xf32>
    %77 = vector.multi_reduction <add>, %71, %cst_74 [0] : vector<256x128xf32> to vector<128xf32>
    %78 = vector.shape_cast %77 : vector<128xf32> to vector<1x128xf32>
    %79 = arith.mulf %71, %71 : vector<256x128xf32>
    %cst_75 = arith.constant dense<0.000000e+00> : vector<128xf32>
    %80 = vector.multi_reduction <add>, %79, %cst_75 [0] : vector<256x128xf32> to vector<128xf32>
    %81 = vector.shape_cast %80 : vector<128xf32> to vector<1x128xf32>
    %82 = tpu.concatenate %78, %81 in 0 : vector<1x128xf32>, vector<1x128xf32> -> vector<2x128xf32>
    %c0_76 = arith.constant 0 : index
    %c0_77 = arith.constant 0 : index
    %c0_78 = arith.constant 0 : index
    %83 = vector.load %arg7[%c0_76, %c0_77, %c0_78] : memref<1x2x128xf32, #tpu.memory_space<vmem>>, vector<1x2x128xf32>
    %84 = vector.shape_cast %83 : vector<1x2x128xf32> to vector<2x128xf32>
    %85 = vector.shape_cast %82 : vector<2x128xf32> to vector<1x2x128xf32>
    tpu.vector_store %arg7[%c0_76, %c0_77, %c0_78], %85 {strides = array<i32>} : memref<1x2x128xf32, #tpu.memory_space<vmem>>, vector<1x2x128xf32>,
    return
  }
  func.func @transform_0(%arg0: i32, %arg1: i32) -> (i32, i32, i32, i32) {
    %c0_i32 = arith.constant 0 : i32
    %c0_i32_0 = arith.constant 0 : i32
    %c0_i32_1 = arith.constant 0 : i32
    %c0_i32_2 = arith.constant 0 : i32
    return %arg1, %c0_i32, %c0_i32_0, %c0_i32_1 : i32, i32, i32, i32
  }
  func.func @transform_1(%arg0: i32, %arg1: i32) -> (i32, i32, i32) {
    %c0_i32 = arith.constant 0 : i32
    %c0_i32_0 = arith.constant 0 : i32
    %c0_i32_1 = arith.constant 0 : i32
    return %c0_i32, %c0_i32_0, %arg0 : i32, i32, i32
  }
  func.func @transform_2(%arg0: i32, %arg1: i32) -> (i32, i32) {
    %c0_i32 = arith.constant 0 : i32
    %c0_i32_0 = arith.constant 0 : i32
    %c0_i32_1 = arith.constant 0 : i32
    return %c0_i32, %c0_i32_0 : i32, i32
  }
  func.func @transform_3(%arg0: i32, %arg1: i32) -> (i32, i32) {
    %c0_i32 = arith.constant 0 : i32
    %c0_i32_0 = arith.constant 0 : i32
    %c0_i32_1 = arith.constant 0 : i32
    return %c0_i32, %c0_i32_0 : i32, i32
  }
  func.func @transform_4(%arg0: i32, %arg1: i32) -> (i32, i32, i32, i32) {
    %c0_i32 = arith.constant 0 : i32
    %c0_i32_0 = arith.constant 0 : i32
    %c0_i32_1 = arith.constant 0 : i32
    return %arg1, %c0_i32, %c0_i32_0, %arg0 : i32, i32, i32, i32
  }
  func.func @transform_5(%arg0: i32, %arg1: i32) -> (i32, i32, i32) {
    %c0_i32 = arith.constant 0 : i32
    %c0_i32_0 = arith.constant 0 : i32
    return %arg1, %c0_i32, %arg0 : i32, i32, i32
  }
}

module attributes {stable_mosaic.version = 11 : i64} {
  func.func @_bn_relu_add_kernel(%arg0: i32, %arg1: i32, %arg2: memref<1x16x16x128xbf16, #tpu.memory_space<vmem>>, %arg3: memref<1x128xf32, #tpu.memory_space<vmem>>, %arg4: memref<1x128xf32, #tpu.memory_space<vmem>>, %arg5: memref<1x16x16x128xbf16, #tpu.memory_space<vmem>>, %arg6: memref<1x128xf32, #tpu.memory_space<vmem>>, %arg7: memref<1x128xf32, #tpu.memory_space<vmem>>, %arg8: memref<1x16x16x128xf32, #tpu.memory_space<vmem>>) attributes {dimension_semantics = [#tpu.dimension_semantics<parallel>, #tpu.dimension_semantics<parallel>], iteration_bounds = array<i64: 1, 2>, scalar_prefetch = 0 : i64, scratch_operands = 0 : i64, tpu.core_type = #tpu.core_type<tc>, window_params = [{transform_indices = @transform_0, window_bounds = array<i64: 1, 16, 16, 128>}, {transform_indices = @transform_1, window_bounds = array<i64: 1, 128>}, {transform_indices = @transform_2, window_bounds = array<i64: 1, 128>}, {transform_indices = @transform_3, window_bounds = array<i64: 1, 16, 16, 128>}, {transform_indices = @transform_4, window_bounds = array<i64: 1, 128>}, {transform_indices = @transform_5, window_bounds = array<i64: 1, 128>}, {transform_indices = @transform_6, window_bounds = array<i64: 1, 16, 16, 128>}]} {
    %c0 = arith.constant 0 : index
    %c0_0 = arith.constant 0 : index
    %c0_1 = arith.constant 0 : index
    %c0_2 = arith.constant 0 : index
    %0 = vector.load %arg2[%c0, %c0_0, %c0_1, %c0_2] : memref<1x16x16x128xbf16, #tpu.memory_space<vmem>>, vector<1x16x16x128xbf16>
    %1 = vector.shape_cast %0 : vector<1x16x16x128xbf16> to vector<16x16x128xbf16>
    %2 = arith.extf %1 : vector<16x16x128xbf16> to vector<16x16x128xf32>
    %c0_3 = arith.constant 0 : index
    %c0_4 = arith.constant 0 : index
    %3 = vector.load %arg3[%c0_3, %c0_4] : memref<1x128xf32, #tpu.memory_space<vmem>>, vector<1x128xf32>
    %4 = vector.shape_cast %3 : vector<1x128xf32> to vector<1x1x128xf32>
    %5 = vector.broadcast %4 : vector<1x1x128xf32> to vector<16x16x128xf32>
    %6 = arith.mulf %2, %5 : vector<16x16x128xf32>
    %c0_5 = arith.constant 0 : index
    %c0_6 = arith.constant 0 : index
    %7 = vector.load %arg4[%c0_5, %c0_6] : memref<1x128xf32, #tpu.memory_space<vmem>>, vector<1x128xf32>
    %8 = vector.shape_cast %7 : vector<1x128xf32> to vector<1x1x128xf32>
    %9 = vector.broadcast %8 : vector<1x1x128xf32> to vector<16x16x128xf32>
    %10 = arith.addf %6, %9 : vector<16x16x128xf32>
    %cst = arith.constant 0.000000e+00 : f32
    %11 = vector.broadcast %cst : f32 to vector<16x16x128xf32>
    %12 = arith.maximumf %10, %11 : vector<16x16x128xf32>
    %c0_7 = arith.constant 0 : index
    %c0_8 = arith.constant 0 : index
    %c0_9 = arith.constant 0 : index
    %c0_10 = arith.constant 0 : index
    %13 = vector.load %arg5[%c0_7, %c0_8, %c0_9, %c0_10] : memref<1x16x16x128xbf16, #tpu.memory_space<vmem>>, vector<1x16x16x128xbf16>
    %14 = vector.shape_cast %13 : vector<1x16x16x128xbf16> to vector<16x16x128xbf16>
    %15 = arith.extf %14 : vector<16x16x128xbf16> to vector<16x16x128xf32>
    %c0_11 = arith.constant 0 : index
    %c0_12 = arith.constant 0 : index
    %16 = vector.load %arg6[%c0_11, %c0_12] : memref<1x128xf32, #tpu.memory_space<vmem>>, vector<1x128xf32>
    %17 = vector.shape_cast %16 : vector<1x128xf32> to vector<1x1x128xf32>
    %18 = vector.broadcast %17 : vector<1x1x128xf32> to vector<16x16x128xf32>
    %19 = arith.mulf %15, %18 : vector<16x16x128xf32>
    %c0_13 = arith.constant 0 : index
    %c0_14 = arith.constant 0 : index
    %20 = vector.load %arg7[%c0_13, %c0_14] : memref<1x128xf32, #tpu.memory_space<vmem>>, vector<1x128xf32>
    %21 = vector.shape_cast %20 : vector<1x128xf32> to vector<1x1x128xf32>
    %22 = vector.broadcast %21 : vector<1x1x128xf32> to vector<16x16x128xf32>
    %23 = arith.addf %19, %22 : vector<16x16x128xf32>
    %24 = arith.addf %23, %12 : vector<16x16x128xf32>
    %cst_15 = arith.constant 0.000000e+00 : f32
    %25 = vector.broadcast %cst_15 : f32 to vector<16x16x128xf32>
    %26 = arith.maximumf %24, %25 : vector<16x16x128xf32>
    %c0_16 = arith.constant 0 : index
    %c0_17 = arith.constant 0 : index
    %c0_18 = arith.constant 0 : index
    %c0_19 = arith.constant 0 : index
    %27 = vector.load %arg8[%c0_16, %c0_17, %c0_18, %c0_19] : memref<1x16x16x128xf32, #tpu.memory_space<vmem>>, vector<1x16x16x128xf32>
    %28 = vector.shape_cast %27 : vector<1x16x16x128xf32> to vector<16x16x128xf32>
    %29 = vector.shape_cast %26 : vector<16x16x128xf32> to vector<1x16x16x128xf32>
    tpu.vector_store %arg8[%c0_16, %c0_17, %c0_18, %c0_19], %29 {strides = array<i32>} : memref<1x16x16x128xf32, #tpu.memory_space<vmem>>, vector<1x16x16x128xf32>,
    return
  }
  func.func @transform_0(%arg0: i32, %arg1: i32) -> (i32, i32, i32, i32) {
    %c0_i32 = arith.constant 0 : i32
    %c0_i32_0 = arith.constant 0 : i32
    %c0_i32_1 = arith.constant 0 : i32
    return %arg1, %c0_i32, %c0_i32_0, %arg0 : i32, i32, i32, i32
  }
  func.func @transform_1(%arg0: i32, %arg1: i32) -> (i32, i32) {
    %c0_i32 = arith.constant 0 : i32
    %c0_i32_0 = arith.constant 0 : i32
    return %c0_i32, %arg0 : i32, i32
  }
  func.func @transform_2(%arg0: i32, %arg1: i32) -> (i32, i32) {
    %c0_i32 = arith.constant 0 : i32
    %c0_i32_0 = arith.constant 0 : i32
    return %c0_i32, %arg0 : i32, i32
  }
  func.func @transform_3(%arg0: i32, %arg1: i32) -> (i32, i32, i32, i32) {
    %c0_i32 = arith.constant 0 : i32
    %c0_i32_0 = arith.constant 0 : i32
    %c0_i32_1 = arith.constant 0 : i32
    return %arg1, %c0_i32, %c0_i32_0, %arg0 : i32, i32, i32, i32
  }
  func.func @transform_4(%arg0: i32, %arg1: i32) -> (i32, i32) {
    %c0_i32 = arith.constant 0 : i32
    %c0_i32_0 = arith.constant 0 : i32
    return %c0_i32, %arg0 : i32, i32
  }
  func.func @transform_5(%arg0: i32, %arg1: i32) -> (i32, i32) {
    %c0_i32 = arith.constant 0 : i32
    %c0_i32_0 = arith.constant 0 : i32
    return %c0_i32, %arg0 : i32, i32
  }
  func.func @transform_6(%arg0: i32, %arg1: i32) -> (i32, i32, i32, i32) {
    %c0_i32 = arith.constant 0 : i32
    %c0_i32_0 = arith.constant 0 : i32
    %c0_i32_1 = arith.constant 0 : i32
    return %arg1, %c0_i32, %c0_i32_0, %arg0 : i32, i32, i32, i32
  }
}

</mosaic_0001>

<bundles_post_ra>
// kernel: res_block_basic.7
= control target key start
LH: loop header
LB: loop body
LE: loop exit
PB: predicated region body
PF: predicated region fallthrough
CT: control target
= control target key end

     0   :  { %s1197_s21 = smov 0   ;;  %s1199_s22 = smov 0   ;;  %s1455_s0 = inlined_call_operand.vmem [shape: bf16[2,16,16,128], index: 0, kind: input, shape index: {}]   ;;  %s1456_s1 = inlined_call_operand.vmem [shape: f32[1,128], index: 1, kind: input, shape index: {}]   ;;  %s1457_s2 = inlined_call_operand.vmem [shape: f32[1,128], index: 2, kind: input, shape index: {}]   ;;  %s1458_s3 = inlined_call_operand.vmem [shape: bf16[2,16,16,128], index: 3, kind: input, shape index: {}]   ;;  %s1459_s4 = inlined_call_operand.vmem [shape: f32[1,128], index: 4, kind: input, shape index: {}]   ;;  %s1460_s5 = inlined_call_operand.vmem [shape: f32[1,128], index: 5, kind: input, shape index: {}]   ;;  %s1461_s6 = inlined_call_operand.vmem [shape: f32[2,16,16,128], index: 6, kind: output, shape index: {}]  }
   0x1   :  { %s1201_s23 = smov 0  }
   0x2 LB: > { %s25_s24 = sadd.s32 1, %s1156_s22  ;;  %p940_p0 = scmp.ge.s32.totalorder %s1160_s23, 1  ;;  %s1160_s23 = sphi %s1201_s23, %s16_s23   ;;  %s1156_s22 = sphi %s1199_s22, %s1463_s22   ;;  %s1152_s21 = sphi %s1197_s21, %s1462_s21  }
   0x3   : > { %p26_p1 = scmp.ge.s32.totalorder %s25_s24, 2  ;;  %p278_p2 = scmp.lt.s32.totalorder %s1160_s23, 3 }
   0x5   : > { %s1465_s24 = smov (%p26_p1, %s25_s24), 0  ;;  %p279_p3 = pnand %p940_p0, %p278_p2 }
   0x6   : > { %p334_p4 = scmp.lt.s32.totalorder (!%p279_p3), %s1152_s21, 1  ;;  %v1231_v0 = vld [vmem:[%s1456_s1] ss:$0 sm:$0xff] (!%p279_p3) }
   0x7   : > { %282 = sbr.rel (%p279_p3) target bundleno = 97 (0x61), region = 44  ;;  %v1236_v1 = vld [vmem:[%s1459_s4] ss:$0 sm:$0xff] (!%p279_p3) }
   0x8   : > { %v1245_v10 = vld [vmem:[%s1457_s2] ss:$0 sm:$0xff] (!%p279_p3) }
   0x9   : > { %v1250_v11 = vld [vmem:[%s1460_s5] ss:$0 sm:$0xff] (!%p279_p3) }
   0xe   : > { %s1467_s21 = smov (!%p334_p4, %s1152_s21), 1 }
   0xf   : > { %s953_s25 = sshll.u32 %s1467_s21, 7  ;;  %s955_s16 = sshll.u32 %s1467_s21, 8 }
  0x10   : > { %s1221_s28 = scalar_lea.vmem %s1455_s0, %s953_s25  ;;  %s1226_s7 = scalar_lea.vmem %s1458_s3, %s953_s25 }
  0x11   : > { %v957_v2 = vld [vmem:[%s1221_s28] sm:$0xff]   ;;  %v1084_v4 = vld [vmem:[%s1221_s28 + $0x8] sm:$0xff]   ;;  %v1085_v24 = vld [vmem:[%s1221_s28 + $0x10] sm:$0xff]   ;;  %s1276_s19 = scalar_lea.vmem %s1461_s6, %s955_s16 }
  0x12   : > { %v1021_v3 = vld [vmem:[%s1226_s7] sm:$0xff]   ;;  %v958_v5 = vunpack.c.l.bf16 %v957_v2  ;;  %v959_v7 = vunpack.c.h.bf16 %v957_v2  ;;  %v1099_v9 = vld [vmem:[%s1226_s7 + $0x8] sm:$0xff]   ;;  %v962_v12 = vunpack.c.l.bf16 %v1084_v4  ;;  %v963_v14 = vunpack.c.h.bf16 %v1084_v4  ;;  %v1100_v25 = vld [vmem:[%s1226_s7 + $0x10] sm:$0xff]  }
  0x13   : > { %v1022_v6 = vunpack.c.l.bf16 %v1021_v3  ;;  %v1023_v8 = vunpack.c.h.bf16 %v1021_v3  ;;  %v1026_v13 = vunpack.c.l.bf16 %v1099_v9  ;;  %v1027_v15 = vunpack.c.h.bf16 %v1099_v9  ;;  %v1086_v50 = vld [vmem:[%s1221_s28 + $0x18] sm:$0xff]   ;;  %v1087_v56 = vld [vmem:[%s1221_s28 + $0x20] sm:$0xff]  }
  0x14   : > { %v441_v16 = vmul.f32 %v958_v5, %v1231_v0  ;;  %v442_v18 = vmul.f32 %v959_v7, %v1231_v0  ;;  %v443_v20 = vmul.f32 %v962_v12, %v1231_v0  ;;  %v444_v22 = vmul.f32 %v963_v14, %v1231_v0  ;;  %v1101_v51 = vld [vmem:[%s1226_s7 + $0x18] sm:$0xff]   ;;  %v1102_v57 = vld [vmem:[%s1226_s7 + $0x20] sm:$0xff]  }
  0x15   : > { %v615_v17 = vmul.f32 %v1022_v6, %v1236_v1  ;;  %v616_v19 = vmul.f32 %v1023_v8, %v1236_v1  ;;  %v617_v21 = vmul.f32 %v1026_v13, %v1236_v1  ;;  %v618_v23 = vmul.f32 %v1027_v15, %v1236_v1 }
  0x16   : > { %v480_v26 = vadd.f32 %v1245_v10, %v441_v16  ;;  %v481_v28 = vadd.f32 %v1245_v10, %v442_v18  ;;  %v482_v30 = vadd.f32 %v1245_v10, %v443_v20  ;;  %v483_v32 = vadd.f32 %v1245_v10, %v444_v22  ;;  %v1088_v22 = vld [vmem:[%s1221_s28 + $0x28] sm:$0xff]  }
  0x17   : > { %v654_v27 = vadd.f32 %v1250_v11, %v615_v17  ;;  %v655_v29 = vadd.f32 %v1250_v11, %v616_v19  ;;  %v656_v31 = vadd.f32 %v1250_v11, %v617_v21  ;;  %v657_v33 = vadd.f32 %v1250_v11, %v618_v23  ;;  %v1103_v23 = vld [vmem:[%s1226_s7 + $0x28] sm:$0xff]  }
  0x18   : > { %v512_v34 = vmax.f32 %v480_v26, 0.0  ;;  %v513_v35 = vmax.f32 %v481_v28, 0.0  ;;  %v966_v36 = vunpack.c.l.bf16 %v1085_v24  ;;  %v1030_v37 = vunpack.c.l.bf16 %v1100_v25 }
  0x19   : > { %v514_v38 = vmax.f32 %v482_v30, 0.0  ;;  %v515_v39 = vmax.f32 %v483_v32, 0.0  ;;  %v967_v40 = vunpack.c.h.bf16 %v1085_v24  ;;  %v1031_v41 = vunpack.c.h.bf16 %v1100_v25 }
  0x1a   : > { %v686_v42 = vadd.f32 %v654_v27, %v512_v34  ;;  %v687_v43 = vadd.f32 %v655_v29, %v513_v35  ;;  %v445_v44 = vmul.f32 %v966_v36, %v1231_v0  ;;  %v619_v45 = vmul.f32 %v1030_v37, %v1236_v1 }
  0x1b   : > { %v688_v46 = vadd.f32 %v656_v31, %v514_v38  ;;  %v689_v47 = vadd.f32 %v657_v33, %v515_v39  ;;  %v446_v48 = vmul.f32 %v967_v40, %v1231_v0  ;;  %v620_v49 = vmul.f32 %v1031_v41, %v1236_v1 }
  0x1c   : > { %v718_v52 = vmax.f32 %v686_v42, 0.0  ;;  %v719_v53 = vmax.f32 %v687_v43, 0.0  ;;  %v484_v54 = vadd.f32 %v1245_v10, %v445_v44  ;;  %v658_v55 = vadd.f32 %v1250_v11, %v619_v45  ;;  %v1089_v44 = vld [vmem:[%s1221_s28 + $0x30] sm:$0xff]  }
  0x1d   : > { %v720_v58 = vmax.f32 %v688_v46, 0.0  ;;  %v721_v59 = vmax.f32 %v689_v47, 0.0  ;;  %v485_v60 = vadd.f32 %v1245_v10, %v446_v48  ;;  %v659_v61 = vadd.f32 %v1250_v11, %v620_v49  ;;  %v1104_v45 = vld [vmem:[%s1226_s7 + $0x30] sm:$0xff]  }
  0x1e   : > { %750 = vst [vmem:[%s1276_s19] sm:$0xff] %v718_v52  ;;  %751 = vst [vmem:[%s1276_s19 + $0x8] sm:$0xff] %v719_v53  ;;  %v516_v62 = vmax.f32 %v484_v54, 0.0  ;;  %v970_v63 = vunpack.c.l.bf16 %v1086_v50  ;;  %v1034_v2 = vunpack.c.l.bf16 %v1101_v51  ;;  %v971_v3 = vunpack.c.h.bf16 %v1086_v50 }
  0x1f   : > { %752 = vst [vmem:[%s1276_s19 + $0x10] sm:$0xff] %v720_v58  ;;  %753 = vst [vmem:[%s1276_s19 + $0x18] sm:$0xff] %v721_v59  ;;  %v517_v4 = vmax.f32 %v485_v60, 0.0  ;;  %v1035_v5 = vunpack.c.h.bf16 %v1101_v51  ;;  %v974_v6 = vunpack.c.l.bf16 %v1087_v56  ;;  %v1038_v7 = vunpack.c.l.bf16 %v1102_v57  ;;  %v1090_v58 = vld [vmem:[%s1221_s28 + $0x38] sm:$0xff]  }
  0x20   : > { %v690_v8 = vadd.f32 %v658_v55, %v516_v62  ;;  %v447_v9 = vmul.f32 %v970_v63, %v1231_v0  ;;  %v621_v12 = vmul.f32 %v1034_v2, %v1236_v1  ;;  %v448_v13 = vmul.f32 %v971_v3, %v1231_v0 }
  0x21   : > { %v691_v14 = vadd.f32 %v659_v61, %v517_v4  ;;  %v622_v15 = vmul.f32 %v1035_v5, %v1236_v1  ;;  %v449_v16 = vmul.f32 %v974_v6, %v1231_v0  ;;  %v623_v17 = vmul.f32 %v1038_v7, %v1236_v1 }
  0x22   : > { %v722_v18 = vmax.f32 %v690_v8, 0.0  ;;  %v486_v19 = vadd.f32 %v1245_v10, %v447_v9  ;;  %v660_v20 = vadd.f32 %v1250_v11, %v621_v12  ;;  %v487_v21 = vadd.f32 %v1245_v10, %v448_v13  ;;  %v1105_v9 = vld [vmem:[%s1226_s7 + $0x38] sm:$0xff]  }
  0x23   : > { %v723_v24 = vmax.f32 %v691_v14, 0.0  ;;  %v661_v25 = vadd.f32 %v1250_v11, %v622_v15  ;;  %v488_v26 = vadd.f32 %v1245_v10, %v449_v16  ;;  %v662_v27 = vadd.f32 %v1250_v11, %v623_v17  ;;  %v1091_v16 = vld [vmem:[%s1221_s28 + $0x40] sm:$0xff]  }
  0x24   : > { %754 = vst [vmem:[%s1276_s19 + $0x20] sm:$0xff] %v722_v18  ;;  %v518_v28 = vmax.f32 %v486_v19, 0.0  ;;  %v519_v29 = vmax.f32 %v487_v21, 0.0  ;;  %v975_v30 = vunpack.c.h.bf16 %v1087_v56  ;;  %v1039_v31 = vunpack.c.h.bf16 %v1102_v57 }
  0x25   : > { %755 = vst [vmem:[%s1276_s19 + $0x28] sm:$0xff] %v723_v24  ;;  %v520_v32 = vmax.f32 %v488_v26, 0.0  ;;  %v978_v33 = vunpack.c.l.bf16 %v1088_v22  ;;  %v1042_v34 = vunpack.c.l.bf16 %v1103_v23  ;;  %v979_v35 = vunpack.c.h.bf16 %v1088_v22 }
  0x26   : > { %v692_v36 = vadd.f32 %v660_v20, %v518_v28  ;;  %v693_v37 = vadd.f32 %v661_v25, %v519_v29  ;;  %v450_v38 = vmul.f32 %v975_v30, %v1231_v0  ;;  %v624_v39 = vmul.f32 %v1039_v31, %v1236_v1  ;;  %v1106_v29 = vld [vmem:[%s1226_s7 + $0x40] sm:$0xff]  }
  0x27   : > { %v694_v40 = vadd.f32 %v662_v27, %v520_v32  ;;  %v451_v41 = vmul.f32 %v978_v33, %v1231_v0  ;;  %v625_v42 = vmul.f32 %v1042_v34, %v1236_v1  ;;  %v452_v43 = vmul.f32 %v979_v35, %v1231_v0 }
  0x28   : > { %v724_v46 = vmax.f32 %v692_v36, 0.0  ;;  %v725_v47 = vmax.f32 %v693_v37, 0.0  ;;  %v489_v48 = vadd.f32 %v1245_v10, %v450_v38  ;;  %v663_v49 = vadd.f32 %v1250_v11, %v624_v39 }
  0x29   : > { %v726_v50 = vmax.f32 %v694_v40, 0.0  ;;  %v490_v51 = vadd.f32 %v1245_v10, %v451_v41  ;;  %v664_v52 = vadd.f32 %v1250_v11, %v625_v42  ;;  %v491_v53 = vadd.f32 %v1245_v10, %v452_v43  ;;  %v1092_v42 = vld [vmem:[%s1221_s28 + $0x48] sm:$0xff]  }
  0x2a   : > { %756 = vst [vmem:[%s1276_s19 + $0x30] sm:$0xff] %v724_v46  ;;  %757 = vst [vmem:[%s1276_s19 + $0x38] sm:$0xff] %v725_v47  ;;  %v521_v54 = vmax.f32 %v489_v48, 0.0  ;;  %v1043_v55 = vunpack.c.h.bf16 %v1103_v23  ;;  %v982_v56 = vunpack.c.l.bf16 %v1089_v44  ;;  %v1046_v57 = vunpack.c.l.bf16 %v1104_v45  ;;  %v1107_v43 = vld [vmem:[%s1226_s7 + $0x48] sm:$0xff]  }
  0x2b   : > { %758 = vst [vmem:[%s1276_s19 + $0x40] sm:$0xff] %v726_v50  ;;  %v522_v59 = vmax.f32 %v490_v51, 0.0  ;;  %v523_v60 = vmax.f32 %v491_v53, 0.0  ;;  %v983_v61 = vunpack.c.h.bf16 %v1089_v44  ;;  %v1047_v62 = vunpack.c.h.bf16 %v1104_v45 }
  0x2c   : > { %v695_v63 = vadd.f32 %v663_v49, %v521_v54  ;;  %v626_v2 = vmul.f32 %v1043_v55, %v1236_v1  ;;  %v453_v3 = vmul.f32 %v982_v56, %v1231_v0  ;;  %v627_v4 = vmul.f32 %v1046_v57, %v1236_v1 }
  0x2d   : > { %v696_v5 = vadd.f32 %v664_v52, %v522_v59  ;;  %v454_v6 = vmul.f32 %v983_v61, %v1231_v0  ;;  %v628_v7 = vmul.f32 %v1047_v62, %v1236_v1  ;;  %v986_v8 = vunpack.c.l.bf16 %v1090_v58 }
  0x2e   : > { %v727_v12 = vmax.f32 %v695_v63, 0.0  ;;  %v665_v13 = vadd.f32 %v1250_v11, %v626_v2  ;;  %v492_v14 = vadd.f32 %v1245_v10, %v453_v3  ;;  %v666_v15 = vadd.f32 %v1250_v11, %v627_v4  ;;  %v1093_v2 = vld [vmem:[%s1221_s28 + $0x50] sm:$0xff]  }
  0x2f   : > { %v728_v17 = vmax.f32 %v696_v5, 0.0  ;;  %v493_v18 = vadd.f32 %v1245_v10, %v454_v6  ;;  %v667_v19 = vadd.f32 %v1250_v11, %v628_v7  ;;  %v455_v20 = vmul.f32 %v986_v8, %v1231_v0  ;;  %v1108_v3 = vld [vmem:[%s1226_s7 + $0x50] sm:$0xff]  }
  0x30   : > { %759 = vst [vmem:[%s1276_s19 + $0x48] sm:$0xff] %v727_v12  ;;  %v697_v21 = vadd.f32 %v665_v13, %v523_v60  ;;  %v524_v22 = vmax.f32 %v492_v14, 0.0  ;;  %v1050_v23 = vunpack.c.l.bf16 %v1105_v9  ;;  %v987_v24 = vunpack.c.h.bf16 %v1090_v58 }
  0x31   : > { %760 = vst [vmem:[%s1276_s19 + $0x50] sm:$0xff] %v728_v17  ;;  %v525_v25 = vmax.f32 %v493_v18, 0.0  ;;  %v494_v26 = vadd.f32 %v1245_v10, %v455_v20  ;;  %v1051_v27 = vunpack.c.h.bf16 %v1105_v9  ;;  %v990_v28 = vunpack.c.l.bf16 %v1091_v16 }
  0x32   : > { %v729_v30 = vmax.f32 %v697_v21, 0.0  ;;  %v698_v31 = vadd.f32 %v666_v15, %v524_v22  ;;  %v629_v32 = vmul.f32 %v1050_v23, %v1236_v1  ;;  %v456_v33 = vmul.f32 %v987_v24, %v1231_v0  ;;  %v1094_v22 = vld [vmem:[%s1221_s28 + $0x58] sm:$0xff]  }
  0x33   : > { %v699_v34 = vadd.f32 %v667_v19, %v525_v25  ;;  %v526_v35 = vmax.f32 %v494_v26, 0.0  ;;  %v630_v36 = vmul.f32 %v1051_v27, %v1236_v1  ;;  %v457_v37 = vmul.f32 %v990_v28, %v1231_v0  ;;  %v1109_v27 = vld [vmem:[%s1226_s7 + $0x58] sm:$0xff]  }
  0x34   : > { %761 = vst [vmem:[%s1276_s19 + $0x58] sm:$0xff] %v729_v30  ;;  %v730_v38 = vmax.f32 %v698_v31, 0.0  ;;  %v668_v39 = vadd.f32 %v1250_v11, %v629_v32  ;;  %v495_v40 = vadd.f32 %v1245_v10, %v456_v33  ;;  %v1054_v41 = vunpack.c.l.bf16 %v1106_v29 }
  0x35   : > { %v731_v44 = vmax.f32 %v699_v34, 0.0  ;;  %v669_v45 = vadd.f32 %v1250_v11, %v630_v36  ;;  %v496_v46 = vadd.f32 %v1245_v10, %v457_v37  ;;  %v991_v47 = vunpack.c.h.bf16 %v1091_v16 }
  0x36   : > { %762 = vst [vmem:[%s1276_s19 + $0x60] sm:$0xff] %v730_v38  ;;  %v700_v48 = vadd.f32 %v668_v39, %v526_v35  ;;  %v527_v49 = vmax.f32 %v495_v40, 0.0  ;;  %v631_v50 = vmul.f32 %v1054_v41, %v1236_v1  ;;  %v1055_v51 = vunpack.c.h.bf16 %v1106_v29  ;;  %v1095_v40 = vld [vmem:[%s1221_s28 + $0x60] sm:$0xff]  }
  0x37   : > { %763 = vst [vmem:[%s1276_s19 + $0x68] sm:$0xff] %v731_v44  ;;  %v528_v52 = vmax.f32 %v496_v46, 0.0  ;;  %v458_v53 = vmul.f32 %v991_v47, %v1231_v0  ;;  %v994_v54 = vunpack.c.l.bf16 %v1092_v42  ;;  %v1058_v55 = vunpack.c.l.bf16 %v1107_v43 }
  0x38   : > { %v732_v56 = vmax.f32 %v700_v48, 0.0  ;;  %v701_v57 = vadd.f32 %v669_v45, %v527_v49  ;;  %v670_v58 = vadd.f32 %v1250_v11, %v631_v50  ;;  %v632_v59 = vmul.f32 %v1055_v51, %v1236_v1  ;;  %v1110_v45 = vld [vmem:[%s1226_s7 + $0x60] sm:$0xff]  }
  0x39   : > { %v497_v60 = vadd.f32 %v1245_v10, %v458_v53  ;;  %v459_v61 = vmul.f32 %v994_v54, %v1231_v0  ;;  %v633_v62 = vmul.f32 %v1058_v55, %v1236_v1  ;;  %v995_v63 = vunpack.c.h.bf16 %v1092_v42 }
  0x3a   : > { %764 = vst [vmem:[%s1276_s19 + $0x70] sm:$0xff] %v732_v56  ;;  %v733_v4 = vmax.f32 %v701_v57, 0.0  ;;  %v702_v5 = vadd.f32 %v670_v58, %v528_v52  ;;  %v671_v6 = vadd.f32 %v1250_v11, %v632_v59  ;;  %v1059_v7 = vunpack.c.h.bf16 %v1107_v43 }
  0x3b   : > { %v529_v8 = vmax.f32 %v497_v60, 0.0  ;;  %v498_v9 = vadd.f32 %v1245_v10, %v459_v61  ;;  %v672_v12 = vadd.f32 %v1250_v11, %v633_v62  ;;  %v460_v13 = vmul.f32 %v995_v63, %v1231_v0  ;;  %v1096_v62 = vld [vmem:[%s1221_s28 + $0x68] sm:$0xff]  }
  0x3c   : > { %765 = vst [vmem:[%s1276_s19 + $0x78] sm:$0xff] %v733_v4  ;;  %v734_v14 = vmax.f32 %v702_v5, 0.0  ;;  %v634_v15 = vmul.f32 %v1059_v7, %v1236_v1  ;;  %v998_v16 = vunpack.c.l.bf16 %v1093_v2  ;;  %v1062_v17 = vunpack.c.l.bf16 %v1108_v3  ;;  %v1111_v63 = vld [vmem:[%s1226_s7 + $0x68] sm:$0xff]  }
  0x3d   : > { %v703_v18 = vadd.f32 %v671_v6, %v529_v8  ;;  %v530_v19 = vmax.f32 %v498_v9, 0.0  ;;  %v499_v20 = vadd.f32 %v1245_v10, %v460_v13  ;;  %v999_v21 = vunpack.c.h.bf16 %v1093_v2 }
  0x3e   : > { %766 = vst [vmem:[%s1276_s19 + $0x80] sm:$0xff] %v734_v14  ;;  %v673_v23 = vadd.f32 %v1250_v11, %v634_v15  ;;  %v461_v24 = vmul.f32 %v998_v16, %v1231_v0  ;;  %v635_v25 = vmul.f32 %v1062_v17, %v1236_v1  ;;  %v1063_v26 = vunpack.c.h.bf16 %v1108_v3 }
  0x3f   : > { %v735_v28 = vmax.f32 %v703_v18, 0.0  ;;  %v704_v29 = vadd.f32 %v672_v12, %v530_v19  ;;  %v531_v30 = vmax.f32 %v499_v20, 0.0  ;;  %v462_v31 = vmul.f32 %v999_v21, %v1231_v0 }
  0x40   : > { %v500_v32 = vadd.f32 %v1245_v10, %v461_v24  ;;  %v674_v33 = vadd.f32 %v1250_v11, %v635_v25  ;;  %v636_v34 = vmul.f32 %v1063_v26, %v1236_v1  ;;  %v1002_v35 = vunpack.c.l.bf16 %v1094_v22  ;;  %v1097_v24 = vld [vmem:[%s1221_s28 + $0x70] sm:$0xff]  }
  0x41   : > { %767 = vst [vmem:[%s1276_s19 + $0x88] sm:$0xff] %v735_v28  ;;  %v736_v36 = vmax.f32 %v704_v29, 0.0  ;;  %v705_v37 = vadd.f32 %v673_v23, %v531_v30  ;;  %v501_v38 = vadd.f32 %v1245_v10, %v462_v31  ;;  %v1066_v39 = vunpack.c.l.bf16 %v1109_v27  ;;  %v1112_v25 = vld [vmem:[%s1226_s7 + $0x70] sm:$0xff]  }
  0x42   : > { %v532_v41 = vmax.f32 %v500_v32, 0.0  ;;  %v675_v42 = vadd.f32 %v1250_v11, %v636_v34  ;;  %v463_v43 = vmul.f32 %v1002_v35, %v1231_v0  ;;  %v1003_v44 = vunpack.c.h.bf16 %v1094_v22 }
  0x43   : > { %768 = vst [vmem:[%s1276_s19 + $0x90] sm:$0xff] %v736_v36  ;;  %v737_v46 = vmax.f32 %v705_v37, 0.0  ;;  %v533_v47 = vmax.f32 %v501_v38, 0.0  ;;  %v637_v48 = vmul.f32 %v1066_v39, %v1236_v1  ;;  %v1067_v49 = vunpack.c.h.bf16 %v1109_v27 }
  0x44   : > { %v706_v50 = vadd.f32 %v674_v33, %v532_v41  ;;  %v502_v51 = vadd.f32 %v1245_v10, %v463_v43  ;;  %v464_v52 = vmul.f32 %v1003_v44, %v1231_v0  ;;  %v1006_v53 = vunpack.c.l.bf16 %v1095_v40 }
  0x45   : > { %769 = vst [vmem:[%s1276_s19 + $0x98] sm:$0xff] %v737_v46  ;;  %v707_v54 = vadd.f32 %v675_v42, %v533_v47  ;;  %v676_v55 = vadd.f32 %v1250_v11, %v637_v48  ;;  %v638_v56 = vmul.f32 %v1067_v49, %v1236_v1  ;;  %v1070_v57 = vunpack.c.l.bf16 %v1110_v45  ;;  %v1098_v42 = vld [vmem:[%s1221_s28 + $0x78] sm:$0xff]  }
  0x46   : > { %v738_v58 = vmax.f32 %v706_v50, 0.0  ;;  %v534_v59 = vmax.f32 %v502_v51, 0.0  ;;  %v503_v60 = vadd.f32 %v1245_v10, %v464_v52  ;;  %v465_v61 = vmul.f32 %v1006_v53, %v1231_v0  ;;  %v1113_v47 = vld [vmem:[%s1226_s7 + $0x78] sm:$0xff]  }
  0x47   : > { %v739_v2 = vmax.f32 %v707_v54, 0.0  ;;  %v677_v3 = vadd.f32 %v1250_v11, %v638_v56  ;;  %v639_v4 = vmul.f32 %v1070_v57, %v1236_v1  ;;  %v1007_v5 = vunpack.c.h.bf16 %v1095_v40 }
  0x48   : > { %770 = vst [vmem:[%s1276_s19 + $0xa0] sm:$0xff] %v738_v58  ;;  %v708_v6 = vadd.f32 %v676_v55, %v534_v59  ;;  %v535_v7 = vmax.f32 %v503_v60, 0.0  ;;  %v504_v8 = vadd.f32 %v1245_v10, %v465_v61  ;;  %v1071_v9 = vunpack.c.h.bf16 %v1110_v45 }
  0x49   : > { %771 = vst [vmem:[%s1276_s19 + $0xa8] sm:$0xff] %v739_v2  ;;  %v678_v12 = vadd.f32 %v1250_v11, %v639_v4  ;;  %v466_v13 = vmul.f32 %v1007_v5, %v1231_v0  ;;  %v1010_v14 = vunpack.c.l.bf16 %v1096_v62  ;;  %v1074_v15 = vunpack.c.l.bf16 %v1111_v63 }
  0x4a   : > { %v740_v16 = vmax.f32 %v708_v6, 0.0  ;;  %v709_v17 = vadd.f32 %v677_v3, %v535_v7  ;;  %v536_v18 = vmax.f32 %v504_v8, 0.0  ;;  %v640_v19 = vmul.f32 %v1071_v9, %v1236_v1 }
  0x4b   : > { %v505_v20 = vadd.f32 %v1245_v10, %v466_v13  ;;  %v467_v21 = vmul.f32 %v1010_v14, %v1231_v0  ;;  %v641_v22 = vmul.f32 %v1074_v15, %v1236_v1  ;;  %v1011_v23 = vunpack.c.h.bf16 %v1096_v62 }
  0x4c   : > { %772 = vst [vmem:[%s1276_s19 + $0xb0] sm:$0xff] %v740_v16  ;;  %v741_v26 = vmax.f32 %v709_v17, 0.0  ;;  %v710_v27 = vadd.f32 %v678_v12, %v536_v18  ;;  %v679_v28 = vadd.f32 %v1250_v11, %v640_v19  ;;  %v1075_v29 = vunpack.c.h.bf16 %v1111_v63 }
  0x4d   : > { %v537_v30 = vmax.f32 %v505_v20, 0.0  ;;  %v506_v31 = vadd.f32 %v1245_v10, %v467_v21  ;;  %v680_v32 = vadd.f32 %v1250_v11, %v641_v22  ;;  %v468_v33 = vmul.f32 %v1011_v23, %v1231_v0 }
  0x4e   : > { %773 = vst [vmem:[%s1276_s19 + $0xb8] sm:$0xff] %v741_v26  ;;  %v742_v34 = vmax.f32 %v710_v27, 0.0  ;;  %v642_v35 = vmul.f32 %v1075_v29, %v1236_v1  ;;  %v1014_v36 = vunpack.c.l.bf16 %v1097_v24  ;;  %v1078_v37 = vunpack.c.l.bf16 %v1112_v25 }
  0x4f   : > { %v711_v38 = vadd.f32 %v679_v28, %v537_v30  ;;  %v538_v39 = vmax.f32 %v506_v31, 0.0  ;;  %v507_v40 = vadd.f32 %v1245_v10, %v468_v33  ;;  %v1015_v41 = vunpack.c.h.bf16 %v1097_v24 }
  0x50   : > { %774 = vst [vmem:[%s1276_s19 + $0xc0] sm:$0xff] %v742_v34  ;;  %v681_v43 = vadd.f32 %v1250_v11, %v642_v35  ;;  %v469_v44 = vmul.f32 %v1014_v36, %v1231_v0  ;;  %v643_v45 = vmul.f32 %v1078_v37, %v1236_v1  ;;  %v1079_v46 = vunpack.c.h.bf16 %v1112_v25 }
  0x51   : > { %v743_v48 = vmax.f32 %v711_v38, 0.0  ;;  %v712_v49 = vadd.f32 %v680_v32, %v538_v39  ;;  %v539_v50 = vmax.f32 %v507_v40, 0.0  ;;  %v470_v51 = vmul.f32 %v1015_v41, %v1231_v0 }
  0x52   : > { %v508_v52 = vadd.f32 %v1245_v10, %v469_v44  ;;  %v682_v53 = vadd.f32 %v1250_v11, %v643_v45  ;;  %v644_v54 = vmul.f32 %v1079_v46, %v1236_v1  ;;  %v1018_v55 = vunpack.c.l.bf16 %v1098_v42 }
  0x53   : > { %775 = vst [vmem:[%s1276_s19 + $0xc8] sm:$0xff] %v743_v48  ;;  %v744_v56 = vmax.f32 %v712_v49, 0.0  ;;  %v713_v57 = vadd.f32 %v681_v43, %v539_v50  ;;  %v509_v58 = vadd.f32 %v1245_v10, %v470_v51  ;;  %v1082_v59 = vunpack.c.l.bf16 %v1113_v47 }
  0x54   : > { %v540_v60 = vmax.f32 %v508_v52, 0.0  ;;  %v683_v61 = vadd.f32 %v1250_v11, %v644_v54  ;;  %v471_v62 = vmul.f32 %v1018_v55, %v1231_v0  ;;  %v1019_v63 = vunpack.c.h.bf16 %v1098_v42 }
  0x55   : > { %776 = vst [vmem:[%s1276_s19 + $0xd0] sm:$0xff] %v744_v56  ;;  %v745_v2 = vmax.f32 %v713_v57, 0.0  ;;  %v541_v3 = vmax.f32 %v509_v58, 0.0  ;;  %v645_v4 = vmul.f32 %v1082_v59, %v1236_v1  ;;  %v1083_v5 = vunpack.c.h.bf16 %v1113_v47 }
  0x56   : > { %v714_v6 = vadd.f32 %v682_v53, %v540_v60  ;;  %v510_v7 = vadd.f32 %v1245_v10, %v471_v62  ;;  %v472_v8 = vmul.f32 %v1019_v63, %v1231_v0 }
  0x57   : > { %777 = vst [vmem:[%s1276_s19 + $0xd8] sm:$0xff] %v745_v2  ;;  %v715_v9 = vadd.f32 %v683_v61, %v541_v3  ;;  %v684_v12 = vadd.f32 %v1250_v11, %v645_v4  ;;  %v646_v13 = vmul.f32 %v1083_v5, %v1236_v1 }
  0x58   : > { %v746_v14 = vmax.f32 %v714_v6, 0.0  ;;  %v542_v15 = vmax.f32 %v510_v7, 0.0  ;;  %v511_v16 = vadd.f32 %v1245_v10, %v472_v8 }
  0x59   : > { %v747_v17 = vmax.f32 %v715_v9, 0.0  ;;  %v685_v18 = vadd.f32 %v1250_v11, %v646_v13 }
  0x5a   : > { %778 = vst [vmem:[%s1276_s19 + $0xe0] sm:$0xff] %v746_v14  ;;  %v716_v19 = vadd.f32 %v684_v12, %v542_v15  ;;  %v543_v20 = vmax.f32 %v511_v16, 0.0 }
  0x5b   : > { %779 = vst [vmem:[%s1276_s19 + $0xe8] sm:$0xff] %v747_v17 }
  0x5c   : > { %v748_v0 = vmax.f32 %v716_v19, 0.0  ;;  %v717_v21 = vadd.f32 %v685_v18, %v543_v20 }
  0x5e   : > { %780 = vst [vmem:[%s1276_s19 + $0xf0] sm:$0xff] %v748_v0  ;;  %v749_v22 = vmax.f32 %v717_v21, 0.0 }
  0x60   : > { %781 = vst [vmem:[%s1276_s19 + $0xf8] sm:$0xff] %v749_v22 }
  0x61 PF: > { %s16_s23 = sadd.s32 1, %s1160_s23   ;;  %s1462_s21 = smov %s1156_s22 }
  0x62   : > { %p13_p5 = scmp.ge.s32.totalorder %s16_s23, 4   ;;  %s1463_s22 = smov %s1465_s24 }
  0x64   :  { %15 = sbr.rel (!%p13_p5) target bundleno = 2 (0x2), region = 89 }

// kernel: res_block_basic.6
= control target key start
LH: loop header
LB: loop body
LE: loop exit
PB: predicated region body
PF: predicated region fallthrough
CT: control target
= control target key end

     0   :  { %s1362_s12 = smov 0   ;;  %s1364_s13 = smov 0   ;;  %s1550_s0 = inlined_call_operand.vmem [shape: bf16[2,16,16,128], index: 0, kind: input, shape index: {}]   ;;  %s1551_s1 = inlined_call_operand.vmem [shape: bf16[128,128], index: 1, kind: input, shape index: {}]   ;;  %s1552_s2 = inlined_call_operand.vmem [shape: bf16[2,16,16,128], index: 2, kind: output, shape index: {0}]   ;;  %s1553_s3 = inlined_call_operand.vmem [shape: f32[2,2,128], index: 3, kind: output, shape index: {1}]  }
   0x1   :  { %s1366_s14 = smov 0  }
   0x2 LB: > { %s23_s15 = sadd.s32 1, %s1336_s13  ;;  %p989_p0 = scmp.ge.s32.totalorder %s1340_s14, 1  ;;  %s1340_s14 = sphi %s1366_s14, %s14_s14   ;;  %s1336_s13 = sphi %s1364_s13, %s1555_s13   ;;  %s1332_s12 = sphi %s1362_s12, %s1554_s12  }
   0x3   : > { %p24_p1 = scmp.ge.s32.totalorder %s23_s15, 2  ;;  %p165_p2 = scmp.lt.s32.totalorder %s1340_s14, 3 }
   0x5   : > { %s1557_s15 = smov (%p24_p1, %s23_s15), 0  ;;  %p166_p3 = pnand %p989_p0, %p165_p2 }
   0x6   : > { %v1294_v0 = vld [vmem:[%s1551_s1] sm:$0xff] (!%p166_p3)   ;;  %p203_p4 = scmp.lt.s32.totalorder (!%p166_p3), %s1332_s12, 1  ;;  %v1295_v1 = vld [vmem:[%s1551_s1 + $0x8] sm:$0xff] (!%p166_p3)   ;;  %v1296_v2 = vld [vmem:[%s1551_s1 + $0x10] sm:$0xff] (!%p166_p3)   ;;  %vm847_vm0 = vcmask (!%p166_p3), 1040384  }
   0x7   : > { %169 = sbr.rel (%p166_p3) target bundleno = 332 (0x14c), region = 28  ;;  %1206 = vmatprep.subr.bf16.mxu0 (!%p166_p3), %v1294_v0  ;;  %1254 = vmatprep.subr.bf16.mxu1 (!%p166_p3), %v1294_v0  ;;  %v1297_v3 = vld [vmem:[%s1551_s1 + $0x18] sm:$0xff] (!%p166_p3)   ;;  %v1298_v5 = vld [vmem:[%s1551_s1 + $0x20] sm:$0xff] (!%p166_p3)   ;;  %v1299_v6 = vld [vmem:[%s1551_s1 + $0x28] sm:$0xff] (!%p166_p3)  }
   0x8   : > { %1207 = vmatpush3.bf16.msra.mxu0 (!%p166_p3), %v1294_v0  ;;  %1262 = vmatpush3.bf16.msra.mxu1 (!%p166_p3), %v1294_v0  ;;  %v1300_v8 = vld [vmem:[%s1551_s1 + $0x30] sm:$0xff] (!%p166_p3)   ;;  %v1301_v9 = vld [vmem:[%s1551_s1 + $0x38] sm:$0xff] (!%p166_p3)  }
   0x9   : > { %1208 = vmatprep.subr.bf16.mxu0 (!%p166_p3), %v1295_v1  ;;  %1255 = vmatprep.subr.bf16.mxu1 (!%p166_p3), %v1295_v1 }
   0xc   : > { %1209 = vmatpush3.bf16.msra.mxu0 (!%p166_p3), %v1295_v1  ;;  %1263 = vmatpush3.bf16.msra.mxu1 (!%p166_p3), %v1295_v1 }
   0xd   : > { %1210 = vmatprep.subr.bf16.mxu0 (!%p166_p3), %v1296_v2  ;;  %1256 = vmatprep.subr.bf16.mxu1 (!%p166_p3), %v1296_v2 }
   0xe   : > { %s1559_s12 = smov (!%p203_p4, %s1332_s12), 1 }
   0xf   : > { %s1053_s22 = sshll.u32 %s1559_s12, 7  ;;  %s994_s16 = sshll.u32 %s1559_s12, 1 }
  0x10   : > { %s1397_s25 = scalar_lea.vmem %s1550_s0, %s1053_s22  ;;  %1211 = vmatpush3.bf16.msra.mxu0 %v1296_v2  ;;  %1264 = vmatpush3.bf16.msra.mxu1 %v1296_v2  ;;  %s1439_s11 = scalar_lea.vmem %s1552_s2, %s1053_s22 }
  0x11   : > { %v1302_v4 = vld [vmem:[%s1397_s25] sm:$0xff]   ;;  %1212 = vmatprep.subr.bf16.mxu0 %v1297_v3  ;;  %1257 = vmatprep.subr.bf16.mxu1 %v1297_v3  ;;  %v1303_v10 = vld [vmem:[%s1397_s25 + $0x8] sm:$0xff]   ;;  %v1304_v12 = vld [vmem:[%s1397_s25 + $0x10] sm:$0xff]   ;;  %s226_s19 = scalar_lea.vmem %s1553_s3, %s994_s16 }
  0x12   : > { %1222 = vmatprep.mubr.bf16.mxu0 %v1302_v4  ;;  %v1310_v7 = vld [vmem:[%s1397_s25 + $0x40] sm:$0xff]   ;;  %v1311_v11 = vld [vmem:[%s1397_s25 + $0x48] sm:$0xff]   ;;  %v1312_v13 = vld [vmem:[%s1397_s25 + $0x50] sm:$0xff]  }
  0x13   : > { %1238 = vmatprep.mubr.bf16.mxu1 %v1310_v7  ;;  %v1305_v14 = vld [vmem:[%s1397_s25 + $0x18] sm:$0xff]   ;;  %v1306_v16 = vld [vmem:[%s1397_s25 + $0x20] sm:$0xff]   ;;  %v1307_v18 = vld [vmem:[%s1397_s25 + $0x28] sm:$0xff]  }
  0x14   : > { %1213 = vmatpush3.bf16.msra.mxu0 %v1297_v3  ;;  %1265 = vmatpush3.bf16.msra.mxu1 %v1297_v3  ;;  %v1313_v15 = vld [vmem:[%s1397_s25 + $0x58] sm:$0xff]   ;;  %v1314_v17 = vld [vmem:[%s1397_s25 + $0x60] sm:$0xff]   ;;  %v1315_v19 = vld [vmem:[%s1397_s25 + $0x68] sm:$0xff]  }
  0x15   : > { %1214 = vmatprep.subr.bf16.mxu0 %v1298_v5  ;;  %1258 = vmatprep.subr.bf16.mxu1 %v1298_v5  ;;  %v1308_v20 = vld [vmem:[%s1397_s25 + $0x30] sm:$0xff]   ;;  %v1309_v22 = vld [vmem:[%s1397_s25 + $0x38] sm:$0xff]  }
  0x16   : > { %v1316_v21 = vld [vmem:[%s1397_s25 + $0x70] sm:$0xff]   ;;  %v1317_v23 = vld [vmem:[%s1397_s25 + $0x78] sm:$0xff]  }
  0x18   : > { %1215 = vmatpush3.bf16.msra.mxu0 %v1298_v5  ;;  %1266 = vmatpush3.bf16.msra.mxu1 %v1298_v5 }
  0x19   : > { %1216 = vmatprep.subr.bf16.mxu0 %v1299_v6  ;;  %1259 = vmatprep.subr.bf16.mxu1 %v1299_v6 }
  0x1c   : > { %1217 = vmatpush3.bf16.msra.mxu0 %v1299_v6  ;;  %1267 = vmatpush3.bf16.msra.mxu1 %v1299_v6 }
  0x1d   : > { %1218 = vmatprep.subr.bf16.mxu0 %v1300_v8  ;;  %1260 = vmatprep.subr.bf16.mxu1 %v1300_v8 }
  0x20   : > { %1219 = vmatpush3.bf16.msra.mxu0 %v1300_v8  ;;  %1268 = vmatpush3.bf16.msra.mxu1 %v1300_v8 }
  0x21   : > { %1220 = vmatprep.subr.bf16.mxu0 %v1301_v9  ;;  %1261 = vmatprep.subr.bf16.mxu1 %v1301_v9 }
  0x24   : > { %1221 = vmatpush3.bf16.msra.mxu0 %v1301_v9  ;;  %1269 = vmatpush3.bf16.msra.mxu1 %v1301_v9 }
  0x27   : > { %1223 = vmatmul.mubr.bf16.vlgmr.msra.gmra.mrb[0].mxu0 %v1303_v10  ;;  %1239 = vmatmul.mubr.bf16.vlgmr.msra.gmra.mrb[0].mxu1 %v1311_v11 }
  0x28   : > { %1226 = vmatprep.mubr.bf16.mxu0 %v1304_v12  ;;  %1242 = vmatprep.mubr.bf16.mxu1 %v1312_v13 }
  0x2f   : > { %1227 = vmatmul.mubr.bf16.gmra.mrb[4].mxu0 %v1305_v14  ;;  %1243 = vmatmul.mubr.bf16.gmra.mrb[4].mxu1 %v1313_v15 }
  0x30   : > { %1230 = vmatprep.mubr.bf16.mxu0 %v1306_v16  ;;  %1246 = vmatprep.mubr.bf16.mxu1 %v1314_v17 }
  0x37   : > { %1231 = vmatmul.mubr.bf16.gmra.mrb[8].mxu0 %v1307_v18  ;;  %1247 = vmatmul.mubr.bf16.gmra.mrb[8].mxu1 %v1315_v19 }
  0x38   : > { %1234 = vmatprep.mubr.bf16.mxu0 %v1308_v20  ;;  %1250 = vmatprep.mubr.bf16.mxu1 %v1316_v21 }
  0x3f   : > { %1235 = vmatmul.mubr.bf16.gmra.mrb[12].mxu0 %v1309_v22  ;;  %1251 = vmatmul.mubr.bf16.gmra.mrb[12].mxu1 %v1317_v23 }
  0xfa   : > { %v1224_v24 = vpop.f32.mrb[0].mxu0  ;;  %v1430_v25 = vpop.f32.mrb[0].mxu1 }
  0xfb   : > { %v454_v26 = vpop.f32.mrb[1].mxu0  ;;  %v1432_v27 = vpop.f32.mrb[1].mxu1  ;;  %v780_v39 = vmul.f32 %v1224_v24, %v1224_v24 }
  0xfc   : > { %v1225_v28 = vpop.f32.mrb[2].mxu0  ;;  %v1441_v29 = vpop.f32.mrb[2].mxu1  ;;  %v778_v30 = vmul.f32 %v454_v26, %v454_v26 }
  0xfd   : > { %v1095_v31 = vpack.c.bf16 %v1225_v28, %v1224_v24  ;;  %v457_v32 = vpop.f32.mrb[3].mxu0  ;;  %v1135_v33 = vpack.c.bf16 %v1441_v29, %v1430_v25  ;;  %v1445_v34 = vpop.f32.mrb[3].mxu1  ;;  %v781_v42 = vmul.f32 %v1225_v28, %v1225_v28 }
  0xfe   : > { %v1090_v35 = vpack.c.bf16 %v457_v32, %v454_v26  ;;  %v741_v36 = vadd.f32 %v457_v32, %v454_v26  ;;  %v779_v37 = vmul.f32 %v457_v32, %v457_v32  ;;  %v1130_v38 = vpack.c.bf16 %v1445_v34, %v1432_v27 }
  0xff   : > { %1167 = vst [vmem:[%s1439_s11 + $0x8] sm:$0xff] %v1095_v31   ;;  %1175 = vst [vmem:[%s1439_s11 + $0x48] sm:$0xff] %v1135_v33  }
 0x100   : > { %1091 = vst [vmem:[%s1439_s11] sm:$0xff] %v1090_v35   ;;  %v742_v40 = vadd.f32 %v1224_v24, %v741_v36  ;;  %v810_v41 = vadd.f32 %v779_v37, %v778_v30  ;;  %1174 = vst [vmem:[%s1439_s11 + $0x40] sm:$0xff] %v1130_v38  }
 0x102   : > { %v811_v43 = vadd.f32 %v810_v41, %v780_v39  ;;  %v1228_v44 = vpop.f32.mrb[4].mxu0  ;;  %v743_v45 = vadd.f32 %v1225_v28, %v742_v40  ;;  %v1453_v46 = vpop.f32.mrb[4].mxu1 }
 0x103   : > { %v470_v47 = vpop.f32.mrb[5].mxu0  ;;  %v1455_v48 = vpop.f32.mrb[5].mxu1  ;;  %v784_v63 = vmul.f32 %v1228_v44, %v1228_v44 }
 0x104   : > { %v744_v49 = vadd.f32 %v743_v45, %v470_v47  ;;  %v782_v50 = vmul.f32 %v470_v47, %v470_v47  ;;  %v812_v51 = vadd.f32 %v811_v43, %v781_v42  ;;  %v1229_v52 = vpop.f32.mrb[6].mxu0  ;;  %v1457_v53 = vpop.f32.mrb[6].mxu1 }
 0x105   : > { %v1105_v54 = vpack.c.bf16 %v1229_v52, %v1228_v44  ;;  %v473_v55 = vpop.f32.mrb[7].mxu0  ;;  %v1145_v56 = vpack.c.bf16 %v1457_v53, %v1453_v46  ;;  %v1461_v57 = vpop.f32.mrb[7].mxu1  ;;  %v785_v2 = vmul.f32 %v1229_v52, %v1229_v52 }
 0x106   : > { %v813_v58 = vadd.f32 %v812_v51, %v782_v50  ;;  %v1100_v59 = vpack.c.bf16 %v473_v55, %v470_v47  ;;  %v745_v60 = vadd.f32 %v744_v49, %v473_v55  ;;  %v783_v61 = vmul.f32 %v473_v55, %v473_v55 }
 0x107   : > { %1169 = vst [vmem:[%s1439_s11 + $0x18] sm:$0xff] %v1105_v54   ;;  %1177 = vst [vmem:[%s1439_s11 + $0x58] sm:$0xff] %v1145_v56   ;;  %v1140_v62 = vpack.c.bf16 %v1461_v57, %v1455_v48 }
 0x108   : > { %1168 = vst [vmem:[%s1439_s11 + $0x10] sm:$0xff] %v1100_v59   ;;  %v746_v0 = vadd.f32 %v1228_v44, %v745_v60  ;;  %v814_v1 = vadd.f32 %v813_v58, %v783_v61  ;;  %v794_v61 = vmul.f32 %v1432_v27, %v1432_v27 }
 0x109   : > { %1176 = vst [vmem:[%s1439_s11 + $0x50] sm:$0xff] %v1140_v62  }
 0x10a   : > { %v815_v3 = vadd.f32 %v814_v1, %v784_v63  ;;  %v1232_v4 = vpop.f32.mrb[8].mxu0  ;;  %v747_v5 = vadd.f32 %v1229_v52, %v746_v0  ;;  %v1469_v6 = vpop.f32.mrb[8].mxu1 }
 0x10b   : > { %v486_v7 = vpop.f32.mrb[9].mxu0  ;;  %v1471_v8 = vpop.f32.mrb[9].mxu1  ;;  %v788_v23 = vmul.f32 %v1232_v4, %v1232_v4 }
 0x10c   : > { %v748_v9 = vadd.f32 %v747_v5, %v486_v7  ;;  %v786_v10 = vmul.f32 %v486_v7, %v486_v7  ;;  %v816_v11 = vadd.f32 %v815_v3, %v785_v2  ;;  %v1233_v12 = vpop.f32.mrb[10].mxu0  ;;  %v1473_v13 = vpop.f32.mrb[10].mxu1  ;;  %v795_v2 = vmul.f32 %v1445_v34, %v1445_v34 }
 0x10d   : > { %v1115_v14 = vpack.c.bf16 %v1233_v12, %v1232_v4  ;;  %v489_v15 = vpop.f32.mrb[11].mxu0  ;;  %v1155_v16 = vpack.c.bf16 %v1473_v13, %v1469_v6  ;;  %v1477_v17 = vpop.f32.mrb[11].mxu1  ;;  %v789_v28 = vmul.f32 %v1233_v12, %v1233_v12  ;;  %v796_v3 = vmul.f32 %v1430_v25, %v1430_v25 }
 0x10e   : > { %v817_v18 = vadd.f32 %v816_v11, %v786_v10  ;;  %v1110_v19 = vpack.c.bf16 %v489_v15, %v486_v7  ;;  %v749_v20 = vadd.f32 %v748_v9, %v489_v15  ;;  %v787_v21 = vmul.f32 %v489_v15, %v489_v15 }
 0x10f   : > { %1171 = vst [vmem:[%s1439_s11 + $0x28] sm:$0xff] %v1115_v14   ;;  %1179 = vst [vmem:[%s1439_s11 + $0x68] sm:$0xff] %v1155_v16   ;;  %v1150_v22 = vpack.c.bf16 %v1477_v17, %v1471_v8  ;;  %v797_v7 = vmul.f32 %v1441_v29, %v1441_v29  ;;  %v799_v15 = vmul.f32 %v1461_v57, %v1461_v57 }
 0x110   : > { %1170 = vst [vmem:[%s1439_s11 + $0x20] sm:$0xff] %v1110_v19   ;;  %v750_v24 = vadd.f32 %v1232_v4, %v749_v20  ;;  %v818_v26 = vadd.f32 %v817_v18, %v787_v21 }
 0x111   : > { %1178 = vst [vmem:[%s1439_s11 + $0x60] sm:$0xff] %v1150_v22  }
 0x112   : > { %v819_v30 = vadd.f32 %v818_v26, %v788_v23  ;;  %v1236_v31 = vpop.f32.mrb[12].mxu0  ;;  %v751_v32 = vadd.f32 %v1233_v12, %v750_v24  ;;  %v1485_v33 = vpop.f32.mrb[12].mxu1  ;;  %v803_v24 = vmul.f32 %v1477_v17, %v1477_v17 }
 0x113   : > { %v502_v35 = vpop.f32.mrb[13].mxu0  ;;  %v566_v36 = vpop.f32.mrb[13].mxu1  ;;  %v792_v54 = vmul.f32 %v1236_v31, %v1236_v31 }
 0x114   : > { %v752_v37 = vadd.f32 %v751_v32, %v502_v35  ;;  %v790_v38 = vmul.f32 %v502_v35, %v502_v35  ;;  %v820_v39 = vadd.f32 %v819_v30, %v789_v28  ;;  %v1237_v40 = vpop.f32.mrb[14].mxu0  ;;  %v1487_v41 = vpop.f32.mrb[14].mxu1 }
 0x115   : > { %v1125_v42 = vpack.c.bf16 %v1237_v40, %v1236_v31  ;;  %v505_v43 = vpop.f32.mrb[15].mxu0  ;;  %v1165_v44 = vpack.c.bf16 %v1487_v41, %v1485_v33  ;;  %v569_v45 = vpop.f32.mrb[15].mxu1  ;;  %v793_v58 = vmul.f32 %v1237_v40, %v1237_v40 }
 0x116   : > { %v821_v47 = vadd.f32 %v820_v39, %v790_v38  ;;  %v1120_v49 = vpack.c.bf16 %v505_v43, %v502_v35  ;;  %v753_v50 = vadd.f32 %v752_v37, %v505_v43  ;;  %v791_v51 = vmul.f32 %v505_v43, %v505_v43 }
 0x117   : > { %1173 = vst [vmem:[%s1439_s11 + $0x38] sm:$0xff] %v1125_v42   ;;  %1181 = vst [vmem:[%s1439_s11 + $0x78] sm:$0xff] %v1165_v44   ;;  %v1160_v52 = vpack.c.bf16 %v569_v45, %v566_v36  ;;  %v807_v39 = vmul.f32 %v569_v45, %v569_v45  ;;  %v809_v42 = vmul.f32 %v1487_v41, %v1487_v41 }
 0x118   : > { %1172 = vst [vmem:[%s1439_s11 + $0x30] sm:$0xff] %v1120_v49   ;;  %v754_v55 = vadd.f32 %v1236_v31, %v753_v50  ;;  %v822_v56 = vadd.f32 %v821_v47, %v791_v51 }
 0x119   : > { %1180 = vst [vmem:[%s1439_s11 + $0x70] sm:$0xff] %v1160_v52  }
 0x11a   : > { %v823_v59 = vadd.f32 %v822_v56, %v792_v54  ;;  %v755_v60 = vadd.f32 %v1237_v40, %v754_v55 }
 0x11c   : > { %v756_v62 = vadd.f32 %v755_v60, %v1432_v27  ;;  %v824_v63 = vadd.f32 %v823_v59, %v793_v58  ;;  %v798_v27 = vmul.f32 %v1455_v48, %v1455_v48 }
 0x11e   : > { %v825_v0 = vadd.f32 %v824_v63, %v794_v61  ;;  %v757_v1 = vadd.f32 %v756_v62, %v1445_v34 }
 0x120   : > { %v758_v4 = vadd.f32 %v1430_v25, %v757_v1  ;;  %v826_v5 = vadd.f32 %v825_v0, %v795_v2  ;;  %v800_v25 = vmul.f32 %v1453_v46, %v1453_v46 }
 0x122   : > { %v827_v9 = vadd.f32 %v826_v5, %v796_v3  ;;  %v759_v10 = vadd.f32 %v1441_v29, %v758_v4  ;;  %v801_v29 = vmul.f32 %v1457_v53, %v1457_v53 }
 0x124   : > { %v760_v11 = vadd.f32 %v759_v10, %v1455_v48  ;;  %v828_v12 = vadd.f32 %v827_v9, %v797_v7  ;;  %v802_v48 = vmul.f32 %v1471_v8, %v1471_v8 }
 0x126   : > { %v829_v14 = vadd.f32 %v828_v12, %v798_v27  ;;  %v761_v34 = vadd.f32 %v760_v11, %v1461_v57 }
 0x128   : > { %v762_v16 = vadd.f32 %v1453_v46, %v761_v34  ;;  %v830_v18 = vadd.f32 %v829_v14, %v799_v15  ;;  %v804_v46 = vmul.f32 %v1469_v6, %v1469_v6 }
 0x12a   : > { %v831_v19 = vadd.f32 %v830_v18, %v800_v25  ;;  %v763_v20 = vadd.f32 %v1457_v53, %v762_v16  ;;  %v805_v53 = vmul.f32 %v1473_v13, %v1473_v13 }
 0x12c   : > { %v764_v21 = vadd.f32 %v763_v20, %v1471_v8  ;;  %v832_v22 = vadd.f32 %v831_v19, %v801_v29  ;;  %v806_v8 = vmul.f32 %v566_v36, %v566_v36 }
 0x12e   : > { %v833_v23 = vadd.f32 %v832_v22, %v802_v48  ;;  %v765_v57 = vadd.f32 %v764_v21, %v1477_v17  ;;  %v808_v17 = vmul.f32 %v1485_v33, %v1485_v33 }
 0x130   : > { %v766_v26 = vadd.f32 %v1469_v6, %v765_v57  ;;  %v834_v28 = vadd.f32 %v833_v23, %v803_v24 }
 0x132   : > { %v835_v30 = vadd.f32 %v834_v28, %v804_v46  ;;  %v767_v31 = vadd.f32 %v1473_v13, %v766_v26 }
 0x134   : > { %v768_v32 = vadd.f32 %v767_v31, %v566_v36  ;;  %v836_v35 = vadd.f32 %v835_v30, %v805_v53 }
 0x136   : > { %v837_v37 = vadd.f32 %v836_v35, %v806_v8  ;;  %v769_v38 = vadd.f32 %v768_v32, %v569_v45 }
 0x138   : > { %v770_v40 = vadd.f32 %v1485_v33, %v769_v38  ;;  %v838_v6 = vadd.f32 %v837_v37, %v807_v39 }
 0x13a   : > { %v771_v43 = vadd.f32 %v1487_v41, %v770_v40  ;;  %v839_v44 = vadd.f32 %v838_v6, %v808_v17 }
 0x13c   : > { %v772_v13 = vrot.slane %v771_v43, 4  ;;  %v840_v47 = vadd.f32 %v839_v44, %v809_v42 }
 0x13e   : > { %v773_v36 = vadd.f32 %v772_v13, %v771_v43  ;;  %v841_v49 = vrot.slane %v840_v47, 4 }
 0x140   : > { %v774_v50 = vrot.slane %v773_v36, 2  ;;  %v842_v51 = vadd.f32 %v841_v49, %v840_v47 }
 0x142   : > { %v775_v45 = vadd.f32 %v774_v50, %v773_v36  ;;  %v843_v52 = vrot.slane %v842_v51, 2 }
 0x144   : > { %v776_v54 = vrot.slane %v775_v45, 1  ;;  %v844_v55 = vadd.f32 %v843_v52, %v842_v51 }
 0x146   : > { %v845_v56 = vrot.slane %v844_v55, 1  ;;  %v777_v33 = vadd.f32 %v776_v54, %v775_v45 }
 0x148   : > { %v846_v41 = vadd.f32 %v845_v56, %v844_v55 }
 0x14a   : > { %v848_v58 = vsel %vm847_vm0, %v777_v33, %v846_v41 }
 0x14b   : > { %849 = vst [vmem:[%s226_s19] sm:$0x3] %v848_v58 }
 0x14c PF: > { %s14_s14 = sadd.s32 1, %s1340_s14   ;;  %s1554_s12 = smov %s1336_s13 }
 0x14d   : > { %p11_p5 = scmp.ge.s32.totalorder %s14_s14, 4   ;;  %s1555_s13 = smov %s1557_s15 }
 0x14f   :  { %13 = sbr.rel (!%p11_p5) target bundleno = 2 (0x2), region = 73 }

// kernel: res_block_basic.4
= control target key start
LH: loop header
LB: loop body
LE: loop exit
PB: predicated region body
PF: predicated region fallthrough
CT: control target
= control target key end

     0   :  { %s7781_s18 = smov 0   ;;  %s7783_s19 = smov 0   ;;  %s9500_s0 = inlined_call_operand.vmem [shape: bf16[2,16,16,128], index: 0, kind: input, shape index: {}]   ;;  %s9501_s1 = inlined_call_operand.vmem [shape: bf16[9,128,128], index: 1, kind: input, shape index: {}]   ;;  %s9502_s2 = inlined_call_operand.vmem [shape: f32[1,128], index: 2, kind: input, shape index: {}]   ;;  %s9503_s3 = inlined_call_operand.vmem [shape: f32[1,128], index: 3, kind: input, shape index: {}]   ;;  %s9504_s4 = inlined_call_operand.vmem [shape: bf16[2,16,16,128], index: 4, kind: output, shape index: {0}]   ;;  %s9505_s5 = inlined_call_operand.vmem [shape: f32[2,2,128], index: 5, kind: output, shape index: {1}]  }
   0x1   :  { %s7785_s20 = smov 0  }
   0x2 LB: > { %s25_s2 = sadd.s32 1, %s7744_s19  ;;  %p6025_p0 = scmp.ge.s32.totalorder %s7748_s20, 1  ;;  %s7748_s20 = sphi %s7785_s20, %s16_s20   ;;  %s7744_s19 = sphi %s7783_s19, %s9583_s19   ;;  %s7740_s18 = sphi %s7781_s18, %s9582_s18  }
   0x3   : > { %p26_p1 = scmp.ge.s32.totalorder %s25_s2, 2  ;;  %p215_p2 = scmp.lt.s32.totalorder %s7748_s20, 3 }
   0x5   : > { %s9585_s2 = smov (%p26_p1, %s25_s2), 0  ;;  %p216_p3 = pnand %p6025_p0, %p215_p2 }
   0x7   : > { %219 = sbr.rel (%p216_p3) target bundleno = 682 (0x2aa), region = 36 }
   0xe   : > { %v7531_v0 = vld [vmem:[%s9501_s1 + $0x40] sm:$0xff]   ;;  %v7750_v2 = vmov 0   ;;  %v7533_v3 = vld [vmem:[%s9501_s1 + $0x48] sm:$0xff]   ;;  %v7535_v5 = vld [vmem:[%s9501_s1 + $0x50] sm:$0xff]   ;;  %p257_p4 = scmp.lt.s32.totalorder %s7740_s18, 1  ;;  %vm692_vm0 = vcmask 1043456  }
   0xf   : > { %v7532_v1 = vld [vmem:[%s9501_s1 + $0x100] sm:$0xff]   ;;  %314 = vst [vmem:[#allocation2] sm:$0xf] %v7750_v2  ;;  %315 = vst [vmem:[#allocation2 + $0x4] sm:$0xf] %v7750_v2  ;;  %6802 = vmatprep.subr.bf16.mxu1 %v7531_v0  ;;  %v7534_v4 = vld [vmem:[%s9501_s1 + $0x108] sm:$0xff]  }
  0x10   : > { %316 = vst [vmem:[#allocation2 + $0x8] sm:$0x1] %v7750_v2  ;;  %317 = vst [vmem:[#allocation2 + $0xc] sm:$0xf] %v7750_v2  ;;  %6994 = vmatprep.subr.bf16.mxu0 %v7532_v1  ;;  %6803 = vmatpush3.bf16.msra.mxu1 %v7531_v0  ;;  %v7536_v6 = vld [vmem:[%s9501_s1 + $0x110] sm:$0xff]   ;;  %v7537_v7 = vld [vmem:[%s9501_s1 + $0x58] sm:$0xff]  }
  0x11   : > { %318 = vst [vmem:[#allocation2 + $0x10] sm:$0xf] %v7750_v2  ;;  %319 = vst [vmem:[#allocation2 + $0x14] sm:$0x1] %v7750_v2  ;;  %6995 = vmatpush3.bf16.msra.mxu0 %v7532_v1  ;;  %6804 = vmatprep.subr.bf16.mxu1 %v7533_v3  ;;  %s9587_s18 = smov (!%p257_p4, %s7740_s18), 1  ;;  %v7538_v8 = vld [vmem:[%s9501_s1 + $0x118] sm:$0xff]  }
  0x12   : > { %320 = vst [vmem:[#allocation2 + $0x18] sm:$0xf] %v7750_v2  ;;  %321 = vst [vmem:[#allocation2 + $0x1c] sm:$0xf] %v7750_v2  ;;  %6996 = vmatprep.subr.bf16.mxu0 %v7534_v4  ;;  %v7539_v9 = vld [vmem:[%s9501_s1 + $0x60] sm:$0xff]   ;;  %s6457_s13 = sshll.u32 %s9587_s18, 7 }
  0x13   : > { %322 = vst [vmem:[#allocation2 + $0x20] sm:$0x1] %v7750_v2  ;;  %323 = vst [vmem:[#allocation2 + $0x24] sm:$0xf] %v7750_v2  ;;  %v7540_v10 = vld [vmem:[%s9501_s1 + $0x120] sm:$0xff]   ;;  %v7541_v11 = vld [vmem:[%s9501_s1 + $0x68] sm:$0xff]   ;;  %s7844_s22 = scalar_lea.vmem %s9500_s0, %s6457_s13  ;;  %s9464_s10 = scalar_lea.vmem %s9504_s4, %s6457_s13 }
  0x14   : > { %324 = vst [vmem:[#allocation2 + $0x28] sm:$0xf] %v7750_v2  ;;  %325 = vst [vmem:[#allocation2 + $0x2c] sm:$0x1] %v7750_v2  ;;  %6805 = vmatpush3.bf16.msra.mxu1 %v7533_v3  ;;  %v7542_v15 = vld [vmem:[%s9501_s1 + $0x128] sm:$0xff]   ;;  %vm699_vm2 = vcmask 1040384  }
  0x15   : > { %326 = vst [vmem:[#allocation2 + $0x30] sm:$0xf] %v7750_v2  ;;  %327 = vst [vmem:[#allocation2 + $0x34] sm:$0xf] %v7750_v2  ;;  %6997 = vmatpush3.bf16.msra.mxu0 %v7534_v4  ;;  %6806 = vmatprep.subr.bf16.mxu1 %v7535_v5  ;;  %vm873_vm1 = vsmask.f32 3328 }
  0x16   : > { %328 = vst [vmem:[#allocation2 + $0x38] sm:$0x1] %v7750_v2  ;;  %329 = vst [vmem:[#allocation2 + $0x3c] sm:$0xf] %v7750_v2  ;;  %6998 = vmatprep.subr.bf16.mxu0 %v7536_v6  ;;  %v809_v12 = vld [vmem:[#allocation2] sm:$0xf] }
  0x17   : > { %330 = vst [vmem:[#allocation2 + $0x40] sm:$0xf] %v7750_v2  ;;  %331 = vst [vmem:[#allocation2 + $0x44] sm:$0x1] %v7750_v2  ;;  %v810_v13 = vld [vmem:[#allocation2 + $0x4] sm:$0xf] }
  0x18   : > { %332 = vst [vmem:[#allocation2 + $0x48] sm:$0xf] %v7750_v2  ;;  %333 = vst [vmem:[#allocation2 + $0x4c] sm:$0xf] %v7750_v2  ;;  %6807 = vmatpush3.bf16.msra.mxu1 %v7535_v5  ;;  %v857_v14 = vld [vmem:[#allocation2 + $0x8] sm:$0x1] }
  0x19   : > { %334 = vst [vmem:[#allocation2 + $0x50] sm:$0x1] %v7750_v2  ;;  %335 = vst [vmem:[#allocation2 + $0x54] sm:$0xf] %v7750_v2  ;;  %6999 = vmatpush3.bf16.msra.mxu0 %v7536_v6  ;;  %6808 = vmatprep.subr.bf16.mxu1 %v7537_v7  ;;  %v877_v16 = vshrl.u32 %v809_v12, 16  ;;  %v880_v17 = vshll.u32 %v809_v12, 16 }
  0x1a   : > { %336 = vst [vmem:[#allocation2 + $0x58] sm:$0xf] %v7750_v2  ;;  %337 = vst [vmem:[#allocation2 + $0x5c] sm:$0x1] %v7750_v2  ;;  %7000 = vmatprep.subr.bf16.mxu0 %v7538_v8  ;;  %v7543_v18 = vld [vmem:[%s9501_s1 + $0x70] sm:$0xff]   ;;  %v886_v19 = vshll.u32 %v810_v13, 16 }
  0x1b   : > { %338 = vst [vmem:[#allocation2 + $0x60] sm:$0xf] %v7750_v2  ;;  %339 = vst [vmem:[#allocation2 + $0x64] sm:$0xf] %v7750_v2  ;;  %v890_v20 = vshrl.u32 %v810_v13, 16  ;;  %v896_v21 = vshll.u32 %v857_v14, 16 }
  0x1c   : > { %340 = vst [vmem:[#allocation2 + $0x68] sm:$0x1] %v7750_v2  ;;  %341 = vst [vmem:[#allocation2 + $0x6c] sm:$0xf] %v7750_v2  ;;  %6809 = vmatpush3.bf16.msra.mxu1 %v7537_v7  ;;  %v282_v22 = vld [vmem:[%s7844_s22] sm:$0xf] }
  0x1d   : > { %342 = vst [vmem:[#allocation2 + $0x70] sm:$0xf] %v7750_v2  ;;  %343 = vst [vmem:[#allocation2 + $0x74] sm:$0x1] %v7750_v2  ;;  %7001 = vmatpush3.bf16.msra.mxu0 %v7538_v8  ;;  %6810 = vmatprep.subr.bf16.mxu1 %v7539_v9  ;;  %vm874_vm3 = vsmask.f32 7440 }
  0x1e   : > { %344 = vst [vmem:[#allocation2 + $0x78] sm:$0xf] %v7750_v2  ;;  %345 = vst [vmem:[#allocation2 + $0x7c] sm:$0xf] %v7750_v2  ;;  %7002 = vmatprep.subr.bf16.mxu0 %v7540_v10  ;;  %v879_v23 = vrot.slane %v877_v16, 4  ;;  %v882_v24 = vrot.slane %v880_v17, 5 }
  0x1f   : > { %346 = vst [vmem:[#allocation2 + $0x80] sm:$0x1] %v7750_v2  ;;  %347 = vst [vmem:[#allocation2 + $0x84] sm:$0xf] %v7750_v2  ;;  %v283_v25 = vld [vmem:[%s7844_s22 + $0x4] sm:$0xf] }
  0x20   : > { %348 = vst [vmem:[#allocation2 + $0x88] sm:$0xf] %v7750_v2  ;;  %349 = vst [vmem:[#allocation2 + $0x8c] sm:$0x1] %v7750_v2  ;;  %6811 = vmatpush3.bf16.msra.mxu1 %v7539_v9  ;;  %v888_v26 = vrot.slane %v886_v19, 5  ;;  %v892_v27 = vrot.slane %v890_v20, 4  ;;  %v883_v29 = vor.u32 %v882_v24, %v879_v23 }
  0x21   : > { %350 = vst [vmem:[#allocation2 + $0x90] sm:$0xf] %v7750_v2  ;;  %351 = vst [vmem:[#allocation2 + $0x94] sm:$0xf] %v7750_v2  ;;  %7003 = vmatpush3.bf16.msra.mxu0 %v7540_v10  ;;  %6812 = vmatprep.subr.bf16.mxu1 %v7541_v11  ;;  %vm368_vm4 = vsmask.f32 256 }
  0x22   : > { %352 = vst [vmem:[#allocation2 + $0x98] sm:$0x1] %v7750_v2  ;;  %353 = vst [vmem:[#allocation2 + $0x9c] sm:$0xf] %v7750_v2  ;;  %vm369_vm5 = vsmask.f32 4368  ;;  %7004 = vmatprep.subr.bf16.mxu0 %v7542_v15  ;;  %v893_v35 = vor.u32 %v892_v27, %v888_v26 }
  0x23   : > { %354 = vst [vmem:[#allocation2 + $0xa0] sm:$0xf] %v7750_v2  ;;  %355 = vst [vmem:[#allocation2 + $0xa4] sm:$0x1] %v7750_v2  ;;  %v7544_v28 = vld [vmem:[%s9501_s1 + $0x130] sm:$0xff]   ;;  %v372_v30 = vshrl.u32 %v282_v22, 16 }
  0x24   : > { %356 = vst [vmem:[#allocation2 + $0xa8] sm:$0xf] %v7750_v2  ;;  %357 = vst [vmem:[#allocation2 + $0xac] sm:$0xf] %v7750_v2  ;;  %v375_v31 = vshll.u32 %v282_v22, 16  ;;  %v380_v32 = vshrl.u32 %v283_v25, 16  ;;  %6813 = vmatpush3.bf16.msra.mxu1 %v7541_v11 }
  0x25   : > { %358 = vst [vmem:[#allocation2 + $0xb0] sm:$0x1] %v7750_v2  ;;  %359 = vst [vmem:[#allocation2 + $0xb4] sm:$0xf] %v7750_v2  ;;  %v7545_v33 = vld [vmem:[%s9501_s1 + $0x78] sm:$0xff]   ;;  %v898_v36 = vrot.slane %v896_v21, 5  ;;  %7005 = vmatpush3.bf16.msra.mxu0 %v7542_v15  ;;  %6814 = vmatprep.subr.bf16.mxu1 %v7543_v18 }
  0x26   : > { %360 = vst [vmem:[#allocation2 + $0xb8] sm:$0xf] %v7750_v2  ;;  %361 = vst [vmem:[#allocation2 + $0xbc] sm:$0x1] %v7750_v2  ;;  %v383_v37 = vshll.u32 %v283_v25, 16  ;;  %v7546_v39 = vld [vmem:[%s9501_s1 + $0x138] sm:$0xff]   ;;  %7006 = vmatprep.subr.bf16.mxu0 %v7544_v28 }
  0x27   : > { %362 = vst [vmem:[#allocation2 + $0xc0] sm:$0xf] %v7750_v2  ;;  %363 = vst [vmem:[#allocation2 + $0xc4] sm:$0xf] %v7750_v2  ;;  %vm693_vm7 = vsmask.f32 7938 }
  0x28   : > { %364 = vst [vmem:[#allocation2 + $0xc8] sm:$0x1] %v7750_v2  ;;  %365 = vst [vmem:[#allocation2 + $0xcc] sm:$0xf] %v7750_v2  ;;  %v695_v38 = vld [vmem:[#allocation2 + $0xc] sm:$0xf]  ;;  %6815 = vmatpush3.bf16.msra.mxu1 %v7543_v18 }
  0x29   : > { %366 = vst [vmem:[#allocation2 + $0xd0] sm:$0xf] %v7750_v2  ;;  %367 = vst [vmem:[#allocation2 + $0xd4] sm:$0x1] %v7750_v2  ;;  %v884_v40 = vrot.slane %v883_v29, 4  ;;  %v374_v42 = vrot.slane %v372_v30, 7  ;;  %7007 = vmatpush3.bf16.msra.mxu0 %v7544_v28  ;;  %6816 = vmatprep.subr.bf16.mxu1 %v7545_v33 }
  0x2a   : > { %vm7862_vm6 = vmor %vm873_vm1, %vm874_vm3  ;;  %v382_v43 = vrot.slane %v380_v32, 7  ;;  %v894_v44 = vrot.slane %v893_v35, 4  ;;  %v284_v46 = vld [vmem:[%s7844_s22 + $0x8] sm:$0xf]  ;;  %v701_v52 = vld [vmem:[#allocation2 + $0x14] sm:$0x1]  ;;  %7008 = vmatprep.subr.bf16.mxu0 %v7546_v39 }
  0x2b   : > { %vm7871_vm8 = vmor %vm368_vm4, %vm369_vm5  ;;  %v889_v47 = vsel %vm7862_vm6, %v884_v40, %v888_v26  ;;  %v377_v48 = vor.u32 %v375_v31, %v374_v42  ;;  %v378_v49 = vrot.slane %v374_v42, 4  ;;  %v285_v53 = vld [vmem:[%s7844_s22 + $0xc] sm:$0xf]  ;;  %v389_v56 = vshrl.u32 %v284_v46, 16  ;;  %v7899_v61 = vld [vmem:[%s9501_s1] sm:$0xff]   ;;  %s6030_s13 = sshll.u32 %s9587_s18, 1 }
  0x2c   : > { %vm7876_vm9 = vmand %vm692_vm0, %vm693_vm7  ;;  %v385_v50 = vor.u32 %v383_v37, %v382_v43  ;;  %v899_v54 = vsel %vm7862_vm6, %v894_v44, %v898_v36  ;;  %v387_v55 = vrot.slane %v382_v43, 4  ;;  %v392_v57 = vshll.u32 %v284_v46, 16  ;;  %v704_v63 = vld [vmem:[#allocation2 + $0x18] sm:$0xf]  ;;  %v7906_v4 = vld [vmem:[%s9501_s1 + $0x140] sm:$0xff]   ;;  %6817 = vmatpush3.bf16.msra.mxu1 %v7545_v33  ;;  %s280_s14 = scalar_lea.vmem %s9505_s5, %s6030_s13 }
  0x2d   : > { %vm7885_vm10 = vmand %vm699_vm2, %vm368_vm4  ;;  %v6047_v58 = vcombine.low %v889_v47, %v899_v54  ;;  %v696_v60 = vsel %vm7876_vm9, %v377_v48, %v695_v38  ;;  %v397_v62 = vshrl.u32 %v285_v53, 16  ;;  %v391_v1 = vrot.slane %v389_v56, 7  ;;  %v286_v5 = vld [vmem:[%s7844_s22 + $0x10] sm:$0xf]  ;;  %v287_v6 = vld [vmem:[%s7844_s22 + $0x14] sm:$0xf]  ;;  %7009 = vmatpush3.bf16.msra.mxu0 %v7546_v39  ;;  %6850 = vmatprep.subr.bf16.mxu1 %v7899_v61 }
  0x2e   : > { %v386_v59 = vsel %vm7871_vm8, %v378_v49, %v385_v50  ;;  %697 = vst [vmem:[#allocation2 + $0xc] sm:$0xf] %v696_v60  ;;  %v702_v0 = vsel %vm7885_vm10, %v387_v55, %v701_v52  ;;  %v400_v2 = vshll.u32 %v285_v53, 16  ;;  %v708_v9 = vld [vmem:[#allocation2 + $0x20] sm:$0x1]  ;;  %v406_v10 = vshrl.u32 %v286_v5, 16  ;;  %7042 = vmatprep.subr.bf16.mxu0 %v7906_v4 }
  0x2f   : > { %698 = vst [vmem:[#allocation2 + $0x10] sm:$0xf] %v386_v59  ;;  %6818 = vmatprep.mubr.bf16.mxu1 %v6047_v58  ;;  %703 = vst [vmem:[#allocation2 + $0x14] sm:$0x1] %v702_v0  ;;  %v399_v3 = vrot.slane %v397_v62, 7  ;;  %v394_v7 = vor.u32 %v392_v57, %v391_v1  ;;  %v395_v8 = vrot.slane %v391_v1, 4 }
  0x30   : > { %v409_v11 = vshll.u32 %v286_v5, 16  ;;  %v414_v14 = vshrl.u32 %v287_v6, 16  ;;  %v417_v15 = vshll.u32 %v287_v6, 16  ;;  %v408_v17 = vrot.slane %v406_v10, 7  ;;  %v7921_v21 = vld [vmem:[%s7844_s22 + $0x18] sm:$0xf] }
  0x31   : > { %v402_v12 = vor.u32 %v400_v2, %v399_v3  ;;  %v404_v13 = vrot.slane %v399_v3, 4  ;;  %v705_v16 = vsel %vm7876_vm9, %v394_v7, %v704_v63  ;;  %v711_v24 = vld [vmem:[#allocation2 + $0x24] sm:$0xf]  ;;  %v423_v25 = vshrl.u32 %v7921_v21, 16  ;;  %v7581_v51 = vld [vmem:[%s9501_s1 + $0x98] sm:$0xff]  }
  0x32   : > { %706 = vst [vmem:[#allocation2 + $0x18] sm:$0xf] %v705_v16  ;;  %v7918_v20 = vrot.slane %v414_v14, 7  ;;  %v411_v22 = vor.u32 %v409_v11, %v408_v17  ;;  %v412_v23 = vrot.slane %v408_v17, 4  ;;  %v426_v42 = vshll.u32 %v7921_v21, 16 }
  0x33   : > { %v403_v18 = vsel %vm7871_vm8, %v395_v8, %v402_v12  ;;  %v709_v19 = vsel %vm7885_vm10, %v404_v13, %v708_v9  ;;  %vm1903_vm11 = vcmask 1042432   ;;  %vm1904_vm12 = vcmask 1046532  }
  0x34   : > { %707 = vst [vmem:[#allocation2 + $0x1c] sm:$0xf] %v403_v18  ;;  %710 = vst [vmem:[#allocation2 + $0x20] sm:$0x1] %v709_v19  ;;  %v419_v29 = vor.u32 %v417_v15, %v7918_v20  ;;  %v712_v40 = vsel %vm7876_vm9, %v411_v22, %v711_v24 }
  0x35   : > { %v2726_v26 = vld [vmem:[#allocation2 + $0xc] sm:$0xf]  ;;  %713 = vst [vmem:[#allocation2 + $0x24] sm:$0xf] %v712_v40  ;;  %vm7992_vm13 = vmor %vm1903_vm11, %vm1904_vm12 }
  0x36   : > { %v7924_v27 = vld [vmem:[#allocation2 + $0x10] sm:$0xf]  ;;  %v811_v28 = vld [vmem:[#allocation2 + $0xc] sm:$0xf]  ;;  %v7927_v30 = vld [vmem:[#allocation2 + $0x14] sm:$0x1]  ;;  %v420_v39 = vsel %vm7871_vm8, %v412_v23, %v419_v29 }
  0x37   : > { %v2775_v31 = vshrl.u32 %v2726_v26, 16  ;;  %v2778_v32 = vshll.u32 %v2726_v26, 16  ;;  %v2784_v33 = vshll.u32 %v7924_v27, 16  ;;  %v2788_v35 = vshrl.u32 %v7924_v27, 16  ;;  %v812_v37 = vld [vmem:[#allocation2 + $0x10] sm:$0xf] }
  0x38   : > { %v2794_v36 = vshll.u32 %v7927_v30, 16  ;;  %v858_v38 = vld [vmem:[#allocation2 + $0x14] sm:$0x1]  ;;  %714 = vst [vmem:[#allocation2 + $0x28] sm:$0xf] %v420_v39  ;;  %v901_v49 = vshrl.u32 %v811_v28, 16 }
  0x39   : > { %v2777_v43 = vrot.slane %v2775_v31, 4  ;;  %v2780_v44 = vrot.slane %v2778_v32, 5  ;;  %v2786_v46 = vrot.slane %v2784_v33, 5  ;;  %v2790_v47 = vrot.slane %v2788_v35, 4  ;;  %v2729_v57 = vld [vmem:[#allocation2 + $0x18] sm:$0xf] }
  0x3a   : > { %v2796_v48 = vrot.slane %v2794_v36, 5  ;;  %v904_v50 = vshll.u32 %v811_v28, 16  ;;  %v910_v52 = vshll.u32 %v812_v37, 16  ;;  %v914_v55 = vshrl.u32 %v812_v37, 16  ;;  %v813_v18 = vld [vmem:[#allocation2 + $0x18] sm:$0xf] }
  0x3b   : > { %v2781_v53 = vor.u32 %v2780_v44, %v2777_v43  ;;  %v2791_v54 = vor.u32 %v2790_v47, %v2786_v46  ;;  %v920_v56 = vshll.u32 %v858_v38, 16  ;;  %v3549_v58 = vrot.slane %v7927_v30, 5  ;;  %v7938_v63 = vld [vmem:[#allocation2 + $0x1c] sm:$0xf]  ;;  %v7940_v6 = vld [vmem:[#allocation2 + $0x20] sm:$0x1] }
  0x3c   : > { %v903_v59 = vrot.slane %v901_v49, 4  ;;  %v906_v60 = vrot.slane %v904_v50, 5  ;;  %v912_v62 = vrot.slane %v910_v52, 5  ;;  %v916_v2 = vrot.slane %v914_v55, 4  ;;  %v814_v32 = vld [vmem:[#allocation2 + $0x1c] sm:$0xf] }
  0x3d   : > { %v2782_v0 = vrot.slane %v2781_v53, 4  ;;  %v2792_v1 = vrot.slane %v2791_v54, 4  ;;  %v922_v3 = vrot.slane %v920_v56, 5  ;;  %v2799_v7 = vshrl.u32 %v2729_v57, 16  ;;  %v859_v33 = vld [vmem:[#allocation2 + $0x20] sm:$0x1] }
  0x3e   : > { %v907_v5 = vor.u32 %v906_v60, %v903_v59  ;;  %v2802_v8 = vshll.u32 %v2729_v57, 16  ;;  %v2808_v9 = vshll.u32 %v7938_v63, 16  ;;  %v917_v12 = vor.u32 %v916_v2, %v912_v62  ;;  %v715_v39 = vld [vmem:[#allocation2 + $0x2c] sm:$0x1]  ;;  %v2732_v47 = vld [vmem:[#allocation2 + $0x24] sm:$0xf] }
  0x3f   : > { %v2787_v10 = vsel %vm7862_vm6, %v2782_v0, %v2786_v46  ;;  %v2797_v11 = vsel %vm7862_vm6, %v2792_v1, %v2796_v48  ;;  %v2812_v13 = vshrl.u32 %v7938_v63, 16  ;;  %v2801_v16 = vrot.slane %v2799_v7, 4  ;;  %v7550_v48 = vld [vmem:[%s9501_s1 + $0x8] sm:$0xff]   ;;  %v815_v60 = vld [vmem:[#allocation2 + $0x24] sm:$0xf] }
  0x40   : > { %v6207_v14 = vcombine.low %v2787_v10, %v2797_v11  ;;  %v908_v15 = vrot.slane %v907_v5, 4  ;;  %v2804_v17 = vrot.slane %v2802_v8, 5  ;;  %v918_v19 = vrot.slane %v917_v12, 4  ;;  %v2733_v54 = vld [vmem:[#allocation2 + $0x28] sm:$0xf]  ;;  %v7553_v10 = vld [vmem:[%s9501_s1 + $0x10] sm:$0xff]  }
  0x41   : > { %v2810_v22 = vrot.slane %v2808_v9, 5  ;;  %v2814_v23 = vrot.slane %v2812_v13, 4  ;;  %v2818_v24 = vshll.u32 %v7940_v6, 16  ;;  %v3553_v29 = vrot.slane %v7938_v63, 5  ;;  %v7549_v0 = vld [vmem:[%s9501_s1 + $0x148] sm:$0xff]  }
  0x42   : > { %7010 = vmatprep.mubr.bf16.mxu0 %v6207_v14  ;;  %v913_v26 = vsel %vm7862_vm6, %v908_v15, %v912_v62  ;;  %v2805_v28 = vor.u32 %v2804_v17, %v2801_v16  ;;  %v3556_v31 = vrot.slane %v7940_v6, 5  ;;  %v923_v35 = vsel %vm7862_vm6, %v918_v19, %v922_v3  ;;  %v816_v5 = vld [vmem:[#allocation2 + $0x28] sm:$0xf] }
  0x43   : > { %v2815_v36 = vor.u32 %v2814_v23, %v2810_v22  ;;  %v2820_v37 = vrot.slane %v2818_v24, 5  ;;  %v925_v38 = vshrl.u32 %v813_v18, 16  ;;  %v6048_v40 = vcombine.low %v913_v26, %v923_v35  ;;  %v7551_v24 = vld [vmem:[%s9501_s1 + $0x150] sm:$0xff]   ;;  %v289_v35 = vld [vmem:[%s7844_s22 + $0x1c] sm:$0xf] }
  0x44   : > { %v2806_v43 = vrot.slane %v2805_v28, 4  ;;  %v7957_v44 = vrot.slane %v3553_v29, 4  ;;  %v928_v46 = vshll.u32 %v813_v18, 16  ;;  %v934_v52 = vshll.u32 %v814_v32, 16 }
  0x45   : > { %v2816_v49 = vrot.slane %v2815_v36, 4  ;;  %v927_v50 = vrot.slane %v925_v38, 4  ;;  %v938_v53 = vshrl.u32 %v814_v32, 16  ;;  %6819 = vmatmul.mubr.bf16.vlgmr.msra.gmra.mrb[0].mxu1 %v6048_v40  ;;  %v944_v57 = vshll.u32 %v859_v33, 16  ;;  %v718_v40 = vld [vmem:[#allocation2 + $0x30] sm:$0xf] }
  0x46   : > { %v2811_v55 = vsel %vm7862_vm6, %v2806_v43, %v2810_v22  ;;  %v930_v56 = vrot.slane %v928_v46, 5  ;;  %v421_v59 = vrot.slane %v7918_v20, 4  ;;  %6851 = vmatpush3.bf16.msra.mxu1 %v7899_v61  ;;  %v936_v1 = vrot.slane %v934_v52, 5  ;;  %v7559_v52 = vld [vmem:[%s9501_s1 + $0x20] sm:$0xff]  }
  0x47   : > { %v2821_v62 = vsel %vm7862_vm6, %v2816_v49, %v2820_v37  ;;  %v940_v2 = vrot.slane %v938_v53, 4  ;;  %v2823_v3 = vshrl.u32 %v2732_v47, 16  ;;  %v946_v9 = vrot.slane %v944_v57, 5  ;;  %6852 = vmatprep.subr.bf16.mxu1 %v7550_v48  ;;  %v290_v57 = vld [vmem:[%s7844_s22 + $0x20] sm:$0xf] }
  0x48   : > { %v6208_v7 = vcombine.low %v2811_v55, %v2821_v62  ;;  %v931_v8 = vor.u32 %v930_v56, %v927_v50  ;;  %v716_v20 = vsel %vm7885_vm10, %v421_v59, %v715_v39  ;;  %v2826_v12 = vshll.u32 %v2732_v47, 16  ;;  %v7552_v50 = vld [vmem:[%s9501_s1 + $0x158] sm:$0xff]  }
  0x49   : > { %v941_v61 = vor.u32 %v940_v2, %v936_v1  ;;  %717 = vst [vmem:[#allocation2 + $0x2c] sm:$0x1] %v716_v20  ;;  %v2825_v11 = vrot.slane %v2823_v3, 4  ;;  %v2832_v13 = vshll.u32 %v2733_v54, 16  ;;  %v2836_v15 = vshrl.u32 %v2733_v54, 16 }
  0x4a   : > { %7011 = vmatmul.mubr.bf16.vlgmr.msra.gmra.mrb[0].mxu0 %v6208_v7  ;;  %v932_v14 = vrot.slane %v931_v8, 4  ;;  %v949_v16 = vshrl.u32 %v815_v60, 16  ;;  %v952_v17 = vshll.u32 %v815_v60, 16  ;;  %v2828_v19 = vrot.slane %v2826_v12, 5  ;;  %6853 = vmatpush3.bf16.msra.mxu1 %v7550_v48  ;;  %v291_v8 = vld [vmem:[%s7844_s22 + $0x24] sm:$0xf] }
  0x4b   : > { %7043 = vmatpush3.bf16.msra.mxu0 %v7906_v4  ;;  %v942_v18 = vrot.slane %v941_v61, 4  ;;  %v7977_v22 = vrot.slane %v2832_v13, 5  ;;  %v958_v23 = vshll.u32 %v816_v5, 16  ;;  %v2838_v28 = vrot.slane %v2836_v15, 4  ;;  %6854 = vmatprep.subr.bf16.mxu1 %v7553_v10  ;;  %v7556_v4 = vld [vmem:[%s9501_s1 + $0x18] sm:$0xff]  }
  0x4c   : > { %7044 = vmatprep.subr.bf16.mxu0 %v7549_v0  ;;  %v937_v26 = vsel %vm7862_vm6, %v932_v14, %v936_v1  ;;  %v951_v32 = vrot.slane %v949_v16, 4  ;;  %v954_v33 = vrot.slane %v952_v17, 5  ;;  %v2829_v37 = vor.u32 %v2828_v19, %v2825_v11  ;;  %v7554_v11 = vld [vmem:[%s9501_s1 + $0x160] sm:$0xff]   ;;  %v292_v16 = vld [vmem:[%s7844_s22 + $0x28] sm:$0xf] }
  0x4d   : > { %v947_v36 = vsel %vm7862_vm6, %v942_v18, %v946_v9  ;;  %v960_v38 = vrot.slane %v958_v23, 5  ;;  %v962_v39 = vshrl.u32 %v816_v5, 16  ;;  %v2839_v47 = vor.u32 %v2838_v28, %v7977_v22  ;;  %v7561_v17 = vld [vmem:[%s9501_s1 + $0x28] sm:$0xff]  }
  0x4e   : > { %v6049_v46 = vcombine.low %v937_v26, %v947_v36  ;;  %v955_v48 = vor.u32 %v954_v33, %v951_v32  ;;  %v425_v49 = vrot.slane %v423_v25, 7  ;;  %v2830_v53 = vrot.slane %v2829_v37, 4  ;;  %6855 = vmatpush3.bf16.msra.mxu1 %v7553_v10  ;;  %v8039_v26 = vld [vmem:[%s7844_s22 + $0x30] sm:$0xf]  ;;  %v7555_v36 = vld [vmem:[%s9501_s1 + $0x168] sm:$0xff]  }
  0x4f   : > { %7045 = vmatpush3.bf16.msra.mxu0 %v7549_v0  ;;  %v964_v54 = vrot.slane %v962_v39, 4  ;;  %v431_v55 = vshrl.u32 %v289_v35, 16  ;;  %v434_v56 = vshll.u32 %v289_v35, 16  ;;  %v2840_v25 = vrot.slane %v2839_v47, 4  ;;  %6856 = vmatprep.subr.bf16.mxu1 %v7556_v4 }
  0x50   : > { %6822 = vmatprep.mubr.bf16.mxu1 %v6049_v46  ;;  %v8006_v59 = vld [vmem:[#allocation2 + $0x2c] sm:$0x1]  ;;  %v956_v62 = vrot.slane %v955_v48, 4  ;;  %v428_v1 = vor.u32 %v426_v42, %v425_v49  ;;  %7046 = vmatprep.subr.bf16.mxu0 %v7551_v24  ;;  %v8015_v0 = vsel %vm7992_vm13, %v7957_v44, %v3556_v31  ;;  %v2835_v2 = vsel %vm7862_vm6, %v2830_v53, %v7977_v22  ;;  %v722_v44 = vld [vmem:[#allocation2 + $0x38] sm:$0x1]  ;;  %v7563_v46 = vld [vmem:[%s9501_s1 + $0x30] sm:$0xff]  }
  0x51   : > { %v860_v60 = vld [vmem:[#allocation2 + $0x2c] sm:$0x1]  ;;  %v2842_v3 = vshll.u32 %v8006_v59, 16  ;;  %v965_v5 = vor.u32 %v964_v54, %v960_v38  ;;  %v429_v42 = vrot.slane %v425_v49, 4  ;;  %v433_v6 = vrot.slane %v431_v55, 7 }
  0x52   : > { %v968_v7 = vshll.u32 %v860_v60, 16  ;;  %v961_v21 = vsel %vm7862_vm6, %v956_v62, %v960_v38  ;;  %v719_v31 = vsel %vm7876_vm9, %v428_v1, %v718_v40  ;;  %v440_v61 = vshrl.u32 %v290_v57, 16  ;;  %6857 = vmatpush3.bf16.msra.mxu1 %v7556_v4  ;;  %v725_v4 = vld [vmem:[#allocation2 + $0x3c] sm:$0xf] }
  0x53   : > { %v2844_v9 = vrot.slane %v2842_v3, 5  ;;  %v966_v20 = vrot.slane %v965_v5, 4  ;;  %720 = vst [vmem:[#allocation2 + $0x30] sm:$0xf] %v719_v31  ;;  %7047 = vmatpush3.bf16.msra.mxu0 %v7551_v24  ;;  %v436_v12 = vor.u32 %v434_v56, %v433_v6  ;;  %v438_v13 = vrot.slane %v433_v6, 4  ;;  %6858 = vmatprep.subr.bf16.mxu1 %v7559_v52  ;;  %v7557_v31 = vld [vmem:[%s9501_s1 + $0x170] sm:$0xff]  }
  0x54   : > { %v970_v10 = vrot.slane %v968_v7, 5  ;;  %7048 = vmatprep.subr.bf16.mxu0 %v7552_v50  ;;  %v443_v14 = vshll.u32 %v290_v57, 16  ;;  %v448_v15 = vshrl.u32 %v291_v8, 16  ;;  %v442_v22 = vrot.slane %v440_v61, 7  ;;  %v293_v24 = vld [vmem:[%s7844_s22 + $0x2c] sm:$0xf] }
  0x55   : > { %v2845_v18 = vsel %vm7862_vm6, %v2840_v25, %v2844_v9  ;;  %v451_v23 = vshll.u32 %v291_v8, 16  ;;  %v437_v33 = vsel %vm7871_vm8, %v429_v42, %v436_v12  ;;  %v723_v35 = vsel %vm7885_vm10, %v438_v13, %v722_v44  ;;  %v729_v56 = vld [vmem:[#allocation2 + $0x44] sm:$0x1]  ;;  %v732_v7 = vld [vmem:[#allocation2 + $0x48] sm:$0xf]  ;;  %v7565_v44 = vld [vmem:[%s9501_s1 + $0x38] sm:$0xff]  }
  0x56   : > { %v971_v19 = vsel %vm7862_vm6, %v966_v20, %v970_v10  ;;  %v6209_v28 = vcombine.low %v2835_v2, %v2845_v18  ;;  %721 = vst [vmem:[#allocation2 + $0x34] sm:$0xf] %v437_v33  ;;  %724 = vst [vmem:[#allocation2 + $0x38] sm:$0x1] %v723_v35  ;;  %v445_v37 = vor.u32 %v443_v14, %v442_v22  ;;  %v446_v38 = vrot.slane %v442_v22, 4  ;;  %v7558_v33 = vld [vmem:[%s9501_s1 + $0x178] sm:$0xff]  }
  0x57   : > { %v6050_v32 = vcombine.low %v961_v21, %v971_v19  ;;  %7049 = vmatpush3.bf16.msra.mxu0 %v7552_v50  ;;  %v450_v39 = vrot.slane %v448_v15, 7  ;;  %v457_v40 = vshrl.u32 %v292_v16, 16  ;;  %6859 = vmatpush3.bf16.msra.mxu1 %v7559_v52  ;;  %v460_v47 = vshll.u32 %v292_v16, 16 }
  0x58   : > { %7014 = vmatprep.mubr.bf16.mxu0 %v6209_v28  ;;  %v465_v48 = vshrl.u32 %v293_v24, 16  ;;  %v468_v49 = vshll.u32 %v293_v24, 16  ;;  %v474_v53 = vshrl.u32 %v8039_v26, 16  ;;  %v726_v50 = vsel %vm7876_vm9, %v445_v37, %v725_v4  ;;  %7050 = vmatprep.subr.bf16.mxu0 %v7554_v11 }
  0x59   : > { %6823 = vmatmul.mubr.bf16.gmra.mrb[4].mxu1 %v6050_v32  ;;  %v453_v54 = vor.u32 %v451_v23, %v450_v39  ;;  %v455_v55 = vrot.slane %v450_v39, 4  ;;  %v8054_v57 = vrot.slane %v457_v40, 7  ;;  %6860 = vmatprep.subr.bf16.mxu1 %v7561_v17  ;;  %727 = vst [vmem:[#allocation2 + $0x3c] sm:$0xf] %v726_v50 }
  0x5a   : > { %v2735_v52 = vld [vmem:[#allocation2 + $0x30] sm:$0xf]  ;;  %v8056_v60 = vrot.slane %v465_v48, 7  ;;  %v8058_v62 = vrot.slane %v474_v53, 7 }
  0x5b   : > { %v817_v25 = vld [vmem:[#allocation2 + $0x30] sm:$0xf]  ;;  %v2847_v1 = vshrl.u32 %v2735_v52, 16  ;;  %v2850_v2 = vshll.u32 %v2735_v52, 16  ;;  %7051 = vmatpush3.bf16.msra.mxu0 %v7554_v11  ;;  %6861 = vmatpush3.bf16.msra.mxu1 %v7561_v17  ;;  %v454_v8 = vsel %vm7871_vm8, %v446_v38, %v453_v54  ;;  %v730_v21 = vsel %vm7885_vm10, %v455_v55, %v729_v56 }
  0x5c   : > { %v973_v3 = vshrl.u32 %v817_v25, 16  ;;  %v976_v5 = vshll.u32 %v817_v25, 16  ;;  %v462_v42 = vor.u32 %v460_v47, %v8054_v57  ;;  %v463_v6 = vrot.slane %v8054_v57, 4  ;;  %7052 = vmatprep.subr.bf16.mxu0 %v7555_v36  ;;  %6862 = vmatprep.subr.bf16.mxu1 %v7563_v46  ;;  %728 = vst [vmem:[#allocation2 + $0x40] sm:$0xf] %v454_v8 }
  0x5d   : > { %v2849_v9 = vrot.slane %v2847_v1, 4  ;;  %v2852_v20 = vrot.slane %v2850_v2, 5  ;;  %731 = vst [vmem:[#allocation2 + $0x44] sm:$0x1] %v730_v21  ;;  %v8072_v11 = vld [vmem:[#allocation2 + $0x34] sm:$0xf]  ;;  %v470_v14 = vor.u32 %v468_v49, %v8056_v60 }
  0x5e   : > { %v975_v10 = vrot.slane %v973_v3, 4  ;;  %v978_v61 = vrot.slane %v976_v5, 5  ;;  %v8074_v12 = vld [vmem:[#allocation2 + $0x38] sm:$0x1]  ;;  %v818_v13 = vld [vmem:[#allocation2 + $0x34] sm:$0xf]  ;;  %v733_v15 = vsel %vm7876_vm9, %v462_v42, %v732_v7 }
  0x5f   : > { %v2853_v16 = vor.u32 %v2852_v20, %v2849_v9  ;;  %v2856_v17 = vshll.u32 %v8072_v11, 16  ;;  %v2860_v18 = vshrl.u32 %v8072_v11, 16  ;;  %v2866_v19 = vshll.u32 %v8074_v12, 16  ;;  %v861_v22 = vld [vmem:[#allocation2 + $0x38] sm:$0x1]  ;;  %7053 = vmatpush3.bf16.msra.mxu0 %v7555_v36  ;;  %6863 = vmatpush3.bf16.msra.mxu1 %v7563_v46  ;;  %v8098_v1 = vld [vmem:[%s9501_s1 + $0x180] sm:$0xff]  }
  0x60   : > { %734 = vst [vmem:[#allocation2 + $0x48] sm:$0xf] %v733_v15  ;;  %v979_v23 = vor.u32 %v978_v61, %v975_v10  ;;  %v982_v24 = vshll.u32 %v818_v13, 16  ;;  %v986_v28 = vshrl.u32 %v818_v13, 16  ;;  %v992_v32 = vshll.u32 %v861_v22, 16  ;;  %7054 = vmatprep.subr.bf16.mxu0 %v7557_v31  ;;  %6864 = vmatprep.subr.bf16.mxu1 %v7565_v44 }
  0x61   : > { %v2854_v35 = vrot.slane %v2853_v16, 4  ;;  %v2858_v4 = vrot.slane %v2856_v17, 5  ;;  %v2862_v37 = vrot.slane %v2860_v18, 4  ;;  %v2868_v38 = vrot.slane %v2866_v19, 5  ;;  %v2738_v39 = vld [vmem:[#allocation2 + $0x3c] sm:$0xf] }
  0x62   : > { %v980_v40 = vrot.slane %v979_v23, 4  ;;  %v984_v47 = vrot.slane %v982_v24, 5  ;;  %v988_v48 = vrot.slane %v986_v28, 4  ;;  %v994_v36 = vrot.slane %v992_v32, 5  ;;  %v819_v54 = vld [vmem:[#allocation2 + $0x3c] sm:$0xf] }
  0x63   : > { %v2863_v46 = vor.u32 %v2862_v37, %v2858_v4  ;;  %v2871_v49 = vshrl.u32 %v2738_v39, 16  ;;  %v2874_v53 = vshll.u32 %v2738_v39, 16  ;;  %7055 = vmatpush3.bf16.msra.mxu0 %v7557_v31  ;;  %6865 = vmatpush3.bf16.msra.mxu1 %v7565_v44  ;;  %v2859_v55 = vsel %vm7862_vm6, %v2854_v35, %v2858_v4  ;;  %v8089_v57 = vld [vmem:[#allocation2 + $0x40] sm:$0xf]  ;;  %v736_v4 = vld [vmem:[#allocation2 + $0x50] sm:$0x1] }
  0x64   : > { %v985_v50 = vsel %vm7862_vm6, %v980_v40, %v984_v47  ;;  %v989_v56 = vor.u32 %v988_v48, %v984_v47  ;;  %v8091_v52 = vld [vmem:[#allocation2 + $0x44] sm:$0x1]  ;;  %v471_v25 = vsel %vm7871_vm8, %v463_v6, %v470_v14  ;;  %7056 = vmatprep.subr.bf16.mxu0 %v7558_v33  ;;  %v2880_v7 = vshll.u32 %v8089_v57, 16  ;;  %v820_v31 = vld [vmem:[#allocation2 + $0x40] sm:$0xf] }
  0x65   : > { %v2864_v2 = vrot.slane %v2863_v46, 4  ;;  %v2873_v3 = vrot.slane %v2871_v49, 4  ;;  %v2876_v5 = vrot.slane %v2874_v53, 5  ;;  %735 = vst [vmem:[#allocation2 + $0x4c] sm:$0xf] %v471_v25  ;;  %v2884_v21 = vshrl.u32 %v8089_v57, 16 }
  0x66   : > { %v990_v8 = vrot.slane %v989_v56, 4  ;;  %v2890_v42 = vshll.u32 %v8091_v52, 16  ;;  %v997_v44 = vshrl.u32 %v819_v54, 16  ;;  %v2882_v20 = vrot.slane %v2880_v7, 5  ;;  %v862_v10 = vld [vmem:[#allocation2 + $0x44] sm:$0x1] }
  0x67   : > { %v2869_v6 = vsel %vm7862_vm6, %v2864_v2, %v2868_v38  ;;  %v2877_v9 = vor.u32 %v2876_v5, %v2873_v3  ;;  %v1000_v61 = vshll.u32 %v819_v54, 16  ;;  %7057 = vmatpush3.bf16.msra.mxu0 %v7558_v33  ;;  %v2886_v15 = vrot.slane %v2884_v21, 4  ;;  %v2741_v17 = vld [vmem:[#allocation2 + $0x48] sm:$0xf]  ;;  %v7569_v24 = vld [vmem:[%s9501_s1 + $0x80] sm:$0xff]  }
  0x68   : > { %v6210_v13 = vcombine.low %v2859_v55, %v2869_v6  ;;  %v995_v14 = vsel %vm7862_vm6, %v990_v8, %v994_v36  ;;  %v2892_v16 = vrot.slane %v2890_v42, 5  ;;  %7090 = vmatprep.subr.bf16.mxu0 %v8098_v1  ;;  %v999_v22 = vrot.slane %v997_v44, 4  ;;  %v821_v47 = vld [vmem:[#allocation2 + $0x48] sm:$0xf]  ;;  %6898 = vmatprep.subr.bf16.mxu1 %v7569_v24 }
  0x69   : > { %v6051_v18 = vcombine.low %v985_v50, %v995_v14  ;;  %v2878_v19 = vrot.slane %v2877_v9, 4  ;;  %v1002_v23 = vrot.slane %v1000_v61, 5  ;;  %v2887_v28 = vor.u32 %v2886_v15, %v2882_v20  ;;  %v295_v14 = vld [vmem:[%s7844_s22 + $0x34] sm:$0xf] }
  0x6a   : > { %7015 = vmatmul.mubr.bf16.gmra.mrb[4].mxu0 %v6210_v13  ;;  %v1006_v32 = vshll.u32 %v820_v31, 16  ;;  %v1010_v33 = vshrl.u32 %v820_v31, 16  ;;  %v1016_v35 = vshll.u32 %v862_v10, 16  ;;  %v472_v39 = vrot.slane %v8056_v60, 4 }
  0x6b   : > { %6826 = vmatprep.mubr.bf16.mxu1 %v6051_v18  ;;  %v2883_v37 = vsel %vm7862_vm6, %v2878_v19, %v2882_v20  ;;  %v1003_v38 = vor.u32 %v1002_v23, %v999_v22  ;;  %v2895_v40 = vshrl.u32 %v2741_v17, 16  ;;  %v2888_v48 = vrot.slane %v2887_v28, 4  ;;  %v739_v28 = vld [vmem:[#allocation2 + $0x54] sm:$0xf] }
  0x6c   : > { %v1008_v36 = vrot.slane %v1006_v32, 5  ;;  %v1012_v46 = vrot.slane %v1010_v33, 4  ;;  %v1018_v49 = vrot.slane %v1016_v35, 5  ;;  %v8114_v53 = vld [vmem:[#allocation2 + $0x4c] sm:$0xf]  ;;  %v737_v55 = vsel %vm7885_vm10, %v472_v39, %v736_v4 }
  0x6d   : > { %v1004_v54 = vrot.slane %v1003_v38, 4  ;;  %v2897_v50 = vrot.slane %v2895_v40, 4  ;;  %v2898_v56 = vshll.u32 %v2741_v17, 16  ;;  %v2893_v25 = vsel %vm7862_vm6, %v2888_v48, %v2892_v16  ;;  %738 = vst [vmem:[#allocation2 + $0x50] sm:$0x1] %v737_v55 }
  0x6e   : > { %v1013_v2 = vor.u32 %v1012_v46, %v1008_v36  ;;  %v2904_v60 = vshll.u32 %v8114_v53, 16  ;;  %v2908_v3 = vshrl.u32 %v8114_v53, 16  ;;  %v822_v5 = vld [vmem:[#allocation2 + $0x4c] sm:$0xf]  ;;  %v6211_v7 = vcombine.low %v2883_v37, %v2893_v25  ;;  %v296_v37 = vld [vmem:[%s7844_s22 + $0x38] sm:$0xf] }
  0x6f   : > { %v1009_v8 = vsel %vm7862_vm6, %v1004_v54, %v1008_v36  ;;  %v2900_v21 = vrot.slane %v2898_v56, 5  ;;  %v1021_v42 = vshrl.u32 %v821_v47, 16  ;;  %v1024_v9 = vshll.u32 %v821_v47, 16  ;;  %v297_v38 = vld [vmem:[%s7844_s22 + $0x3c] sm:$0xf] }
  0x70   : > { %v1014_v31 = vrot.slane %v1013_v2, 4  ;;  %v2906_v44 = vrot.slane %v2904_v60, 5  ;;  %v2910_v6 = vrot.slane %v2908_v3, 4  ;;  %7018 = vmatprep.mubr.bf16.mxu0 %v6211_v7  ;;  %v1030_v61 = vshll.u32 %v822_v5, 16  ;;  %v3480_v2 = vld [vmem:[#allocation2 + $0xc] sm:$0xe] }
  0x71   : > { %v2901_v20 = vor.u32 %v2900_v21, %v2897_v50  ;;  %v1023_v10 = vrot.slane %v1021_v42, 4  ;;  %v1034_v13 = vshrl.u32 %v822_v5, 16  ;;  %v1026_v17 = vrot.slane %v1024_v9, 5  ;;  %v743_v7 = vld [vmem:[#allocation2 + $0x5c] sm:$0x1] }
  0x72   : > { %v1019_v15 = vsel %vm7862_vm6, %v1014_v31, %v1018_v49  ;;  %v2911_v16 = vor.u32 %v2910_v6, %v2906_v44  ;;  %v477_v18 = vshll.u32 %v8039_v26, 16  ;;  %v1032_v23 = vrot.slane %v1030_v61, 5  ;;  %v746_v6 = vld [vmem:[#allocation2 + $0x60] sm:$0xf] }
  0x73   : > { %v6052_v19 = vcombine.low %v1009_v8, %v1019_v15  ;;  %v2902_v22 = vrot.slane %v2901_v20, 4  ;;  %v1036_v24 = vrot.slane %v1034_v13, 4  ;;  %v1027_v33 = vor.u32 %v1026_v17, %v1023_v10  ;;  %v298_v13 = vld [vmem:[%s7844_s22 + $0x40] sm:$0xf] }
  0x74   : > { %v2912_v32 = vrot.slane %v2911_v16, 4  ;;  %v479_v35 = vor.u32 %v477_v18, %v8058_v62  ;;  %v480_v4 = vrot.slane %v8058_v62, 4  ;;  %v8132_v39 = vld [vmem:[#allocation2 + $0x50] sm:$0x1]  ;;  %v482_v48 = vshrl.u32 %v295_v14, 16 }
  0x75   : > { %6827 = vmatmul.mubr.bf16.gmra.mrb[8].mxu1 %v6052_v19  ;;  %v2907_v40 = vsel %vm7862_vm6, %v2902_v22, %v2906_v44  ;;  %v863_v26 = vld [vmem:[#allocation2 + $0x50] sm:$0x1]  ;;  %v1037_v47 = vor.u32 %v1036_v24, %v1032_v23  ;;  %v485_v36 = vshll.u32 %v295_v14, 16  ;;  %v2914_v46 = vshll.u32 %v8132_v39, 16  ;;  %v299_v14 = vld [vmem:[%s7844_s22 + $0x44] sm:$0xf] }
  0x76   : > { %v1028_v49 = vrot.slane %v1027_v33, 4  ;;  %v1040_v54 = vshll.u32 %v863_v26, 16  ;;  %v740_v55 = vsel %vm7876_vm9, %v479_v35, %v739_v28  ;;  %v484_v50 = vrot.slane %v482_v48, 7  ;;  %v750_v19 = vld [vmem:[#allocation2 + $0x68] sm:$0x1] }
  0x77   : > { %v1038_v62 = vrot.slane %v1037_v47, 4  ;;  %741 = vst [vmem:[#allocation2 + $0x54] sm:$0xf] %v740_v55  ;;  %v491_v56 = vshrl.u32 %v296_v37, 16  ;;  %v494_v25 = vshll.u32 %v296_v37, 16  ;;  %v2916_v60 = vrot.slane %v2914_v46, 5 }
  0x78   : > { %v1033_v3 = vsel %vm7862_vm6, %v1028_v49, %v1032_v23  ;;  %v1042_v5 = vrot.slane %v1040_v54, 5  ;;  %v499_v8 = vshrl.u32 %v297_v38, 16  ;;  %v487_v21 = vor.u32 %v485_v36, %v484_v50 }
  0x79   : > { %v489_v42 = vrot.slane %v484_v50, 4  ;;  %v493_v31 = vrot.slane %v491_v56, 7  ;;  %v502_v44 = vshll.u32 %v297_v38, 16  ;;  %v2917_v9 = vsel %vm7862_vm6, %v2912_v32, %v2916_v60 }
  0x7a   : > { %v1043_v20 = vsel %vm7862_vm6, %v1038_v62, %v1042_v5  ;;  %v501_v10 = vrot.slane %v499_v8, 7  ;;  %v6231_v61 = vrot.slane %v3480_v2, 9  ;;  %v6212_v15 = vcombine.low %v2907_v40, %v2917_v9  ;;  %v753_v8 = vld [vmem:[#allocation2 + $0x6c] sm:$0xf] }
  0x7b   : > { %v6053_v16 = vcombine.low %v1033_v3, %v1043_v20  ;;  %v488_v17 = vsel %vm7871_vm8, %v480_v4, %v487_v21  ;;  %v744_v18 = vsel %vm7885_vm10, %v489_v42, %v743_v7  ;;  %v496_v22 = vor.u32 %v494_v25, %v493_v31 }
  0x7c   : > { %742 = vst [vmem:[#allocation2 + $0x58] sm:$0xf] %v488_v17  ;;  %745 = vst [vmem:[#allocation2 + $0x5c] sm:$0x1] %v744_v18  ;;  %v497_v23 = vrot.slane %v493_v31, 4  ;;  %v504_v24 = vor.u32 %v502_v44, %v501_v10  ;;  %v506_v28 = vrot.slane %v501_v10, 4  ;;  %7019 = vmatmul.mubr.bf16.gmra.mrb[8].mxu0 %v6212_v15 }
  0x7d   : > { %6830 = vmatprep.mubr.bf16.mxu1 %v6053_v16  ;;  %v3546_v32 = vrot.slane %v7924_v27, 5  ;;  %v508_v33 = vshrl.u32 %v298_v13, 16  ;;  %v511_v35 = vshll.u32 %v298_v13, 16  ;;  %v516_v37 = vshrl.u32 %v299_v14, 16 }
  0x7e   : > { %v2744_v38 = vld [vmem:[#allocation2 + $0x54] sm:$0xf]  ;;  %v505_v4 = vsel %vm7871_vm8, %v497_v23, %v504_v24  ;;  %v747_v26 = vsel %vm7876_vm9, %v496_v22, %v746_v6  ;;  %v751_v47 = vsel %vm7885_vm10, %v506_v28, %v750_v19  ;;  %v519_v48 = vshll.u32 %v299_v14, 16 }
  0x7f   : > { %v823_v40 = vld [vmem:[#allocation2 + $0x54] sm:$0xf]  ;;  %v2919_v36 = vshrl.u32 %v2744_v38, 16  ;;  %v2922_v46 = vshll.u32 %v2744_v38, 16  ;;  %748 = vst [vmem:[#allocation2 + $0x60] sm:$0xf] %v747_v26  ;;  %v8160_v27 = vsel %vm7992_vm13, %v6231_v61, %v3546_v32 }
  0x80   : > { %v1045_v49 = vshrl.u32 %v823_v40, 16  ;;  %v1048_v54 = vshll.u32 %v823_v40, 16  ;;  %749 = vst [vmem:[#allocation2 + $0x64] sm:$0xf] %v505_v4  ;;  %752 = vst [vmem:[#allocation2 + $0x68] sm:$0x1] %v751_v47 }
  0x81   : > { %v3548_v55 = vrot.slane %v3546_v32, 4  ;;  %v510_v62 = vrot.slane %v508_v33, 7  ;;  %v8162_v50 = vrot.slane %v516_v37, 7  ;;  %v2921_v56 = vrot.slane %v2919_v36, 4 }
  0x82   : > { %v2924_v25 = vrot.slane %v2922_v46, 5  ;;  %v1047_v2 = vrot.slane %v1045_v49, 4  ;;  %v1050_v60 = vrot.slane %v1048_v54, 5 }
  0x83   : > { %v8168_v3 = vsel %vm7992_vm13, %v3548_v55, %v3549_v58  ;;  %v513_v5 = vor.u32 %v511_v35, %v510_v62  ;;  %v514_v7 = vrot.slane %v510_v62, 4  ;;  %v8170_v21 = vld [vmem:[#allocation2 + $0x58] sm:$0xf]  ;;  %v8172_v42 = vld [vmem:[#allocation2 + $0x5c] sm:$0x1]  ;;  %v521_v20 = vor.u32 %v519_v48, %v8162_v50 }
  0x84   : > { %v2925_v31 = vor.u32 %v2924_v25, %v2921_v56  ;;  %v824_v44 = vld [vmem:[#allocation2 + $0x58] sm:$0xf]  ;;  %v1051_v6 = vor.u32 %v1050_v60, %v1047_v2  ;;  %v6263_v9 = vcombine.low %v8160_v27, %v8168_v3  ;;  %v2928_v30 = vshll.u32 %v8170_v21, 16  ;;  %v864_v61 = vld [vmem:[#allocation2 + $0x5c] sm:$0x1] }
  0x85   : > { %v2932_v58 = vshrl.u32 %v8170_v21, 16  ;;  %v2938_v10 = vshll.u32 %v8172_v42, 16  ;;  %v1054_v13 = vshll.u32 %v824_v44, 16  ;;  %v1058_v16 = vshrl.u32 %v824_v44, 16 }
  0x86   : > { %v2926_v14 = vrot.slane %v2925_v31, 4  ;;  %v1052_v15 = vrot.slane %v1051_v6, 4  ;;  %v1064_v17 = vshll.u32 %v864_v61, 16  ;;  %v2930_v18 = vrot.slane %v2928_v30, 5  ;;  %v2747_v24 = vld [vmem:[#allocation2 + $0x60] sm:$0xf] }
  0x87   : > { %v2934_v19 = vrot.slane %v2932_v58, 4  ;;  %v2940_v22 = vrot.slane %v2938_v10, 5  ;;  %v1056_v23 = vrot.slane %v1054_v13, 5  ;;  %v1060_v28 = vrot.slane %v1058_v16, 4  ;;  %v8180_v33 = vld [vmem:[#allocation2 + $0x64] sm:$0xf] }
  0x88   : > { %v1066_v32 = vrot.slane %v1064_v17, 5  ;;  %v8182_v35 = vld [vmem:[#allocation2 + $0x68] sm:$0x1]  ;;  %v522_v37 = vsel %vm7871_vm8, %v514_v7, %v521_v20  ;;  %v754_v38 = vsel %vm7876_vm9, %v513_v5, %v753_v8  ;;  %v2931_v40 = vsel %vm7862_vm6, %v2926_v14, %v2930_v18  ;;  %v825_v48 = vld [vmem:[#allocation2 + $0x60] sm:$0xf] }
  0x89   : > { %v2935_v4 = vor.u32 %v2934_v19, %v2930_v18  ;;  %v1057_v26 = vsel %vm7862_vm6, %v1052_v15, %v1056_v23  ;;  %v2943_v47 = vshrl.u32 %v2747_v24, 16  ;;  %755 = vst [vmem:[#allocation2 + $0x6c] sm:$0xf] %v754_v38  ;;  %756 = vst [vmem:[#allocation2 + $0x70] sm:$0xf] %v522_v37  ;;  %v1061_v36 = vor.u32 %v1060_v28, %v1056_v23 }
  0x8a   : > { %v2946_v46 = vshll.u32 %v2747_v24, 16  ;;  %v2952_v49 = vshll.u32 %v8180_v33, 16  ;;  %v2956_v54 = vshrl.u32 %v8180_v33, 16  ;;  %v2962_v56 = vshll.u32 %v8182_v35, 16  ;;  %v826_v25 = vld [vmem:[#allocation2 + $0x64] sm:$0xf] }
  0x8b   : > { %v2936_v55 = vrot.slane %v2935_v4, 4  ;;  %v2945_v62 = vrot.slane %v2943_v47, 4  ;;  %v1069_v2 = vshrl.u32 %v825_v48, 16  ;;  %v1062_v60 = vrot.slane %v1061_v36, 4  ;;  %v865_v31 = vld [vmem:[#allocation2 + $0x68] sm:$0x1] }
  0x8c   : > { %v2948_v5 = vrot.slane %v2946_v46, 5  ;;  %v2954_v7 = vrot.slane %v2952_v49, 5  ;;  %v2958_v8 = vrot.slane %v2956_v54, 4  ;;  %v2964_v6 = vrot.slane %v2962_v56, 5  ;;  %v757_v14 = vld [vmem:[#allocation2 + $0x74] sm:$0x1] }
  0x8d   : > { %v2941_v44 = vsel %vm7862_vm6, %v2936_v55, %v2940_v22  ;;  %v1071_v20 = vrot.slane %v1069_v2, 4  ;;  %v1072_v30 = vshll.u32 %v825_v48, 16  ;;  %v1067_v10 = vsel %vm7862_vm6, %v1062_v60, %v1066_v32  ;;  %v3481_v19 = vld [vmem:[#allocation2 + $0x18] sm:$0xe]  ;;  %v300_v49 = vld [vmem:[%s7844_s22 + $0x48] sm:$0xf] }
  0x8e   : > { %v6213_v58 = vcombine.low %v2931_v40, %v2941_v44  ;;  %v2949_v61 = vor.u32 %v2948_v5, %v2945_v62  ;;  %v2959_v13 = vor.u32 %v2958_v8, %v2954_v7  ;;  %v6054_v15 = vcombine.low %v1057_v26, %v1067_v10  ;;  %v301_v54 = vld [vmem:[%s7844_s22 + $0x4c] sm:$0xf]  ;;  %v3482_v8 = vld [vmem:[#allocation2 + $0x24] sm:$0xe] }
  0x8f   : > { %v1074_v16 = vrot.slane %v1072_v30, 5  ;;  %v1078_v17 = vshll.u32 %v826_v25, 16  ;;  %v1082_v18 = vshrl.u32 %v826_v25, 16  ;;  %v1088_v24 = vshll.u32 %v865_v31, 16 }
  0x90   : > { %7022 = vmatprep.mubr.bf16.mxu0 %v6213_v58  ;;  %v2950_v23 = vrot.slane %v2949_v61, 4  ;;  %v2960_v22 = vrot.slane %v2959_v13, 4  ;;  %v523_v28 = vrot.slane %v8162_v50, 4  ;;  %v827_v37 = vld [vmem:[#allocation2 + $0x6c] sm:$0xf]  ;;  %6831 = vmatmul.mubr.bf16.gmra.mrb[12].mxu1 %v6054_v15  ;;  %v6232_v5 = vrot.slane %v3481_v19, 9 }
  0x91   : > { %v1075_v38 = vor.u32 %v1074_v16, %v1071_v20  ;;  %v1080_v32 = vrot.slane %v1078_v17, 5  ;;  %v1084_v40 = vrot.slane %v1082_v18, 4  ;;  %v828_v4 = vld [vmem:[#allocation2 + $0x70] sm:$0xf]  ;;  %v1093_v47 = vshrl.u32 %v827_v37, 16 }
  0x92   : > { %v2955_v26 = vsel %vm7862_vm6, %v2950_v23, %v2954_v7  ;;  %v2965_v48 = vsel %vm7862_vm6, %v2960_v22, %v2964_v6  ;;  %v1090_v36 = vrot.slane %v1088_v24, 5  ;;  %v758_v46 = vsel %vm7885_vm10, %v523_v28, %v757_v14  ;;  %v760_v61 = vld [vmem:[#allocation2 + $0x78] sm:$0xf]  ;;  %v302_v17 = vld [vmem:[%s7844_s22 + $0x50] sm:$0xf]  ;;  %v7562_v28 = vld [vmem:[%s9501_s1 + $0x188] sm:$0xff]  }
  0x93   : > { %v6214_v50 = vcombine.low %v2955_v26, %v2965_v48  ;;  %v1076_v55 = vrot.slane %v1075_v38, 4  ;;  %v1085_v62 = vor.u32 %v1084_v40, %v1080_v32  ;;  %759 = vst [vmem:[#allocation2 + $0x74] sm:$0x1] %v758_v46  ;;  %v1095_v56 = vrot.slane %v1093_v47, 4  ;;  %v764_v19 = vld [vmem:[#allocation2 + $0x80] sm:$0x1] }
  0x94   : > { %v1096_v25 = vshll.u32 %v827_v37, 16  ;;  %v1102_v2 = vshll.u32 %v828_v4, 16  ;;  %v1106_v60 = vshrl.u32 %v828_v4, 16  ;;  %v525_v44 = vshrl.u32 %v300_v49, 16  ;;  %v3483_v46 = vld [vmem:[#allocation2 + $0x30] sm:$0xe] }
  0x95   : > { %7023 = vmatmul.mubr.bf16.gmra.mrb[12].mxu0 %v6214_v50  ;;  %v1081_v7 = vsel %vm7862_vm6, %v1076_v55, %v1080_v32  ;;  %v1086_v31 = vrot.slane %v1085_v62, 4  ;;  %v528_v6 = vshll.u32 %v300_v49, 16  ;;  %v3554_v10 = vsel %vm7992_vm13, %v6232_v5, %v3553_v29  ;;  %v303_v29 = vld [vmem:[%s7844_s22 + $0x54] sm:$0xf]  ;;  %v7651_v32 = vld [vmem:[#allocation2 + $0x28] sm:$0xf] }
  0x96   : > { %7058 = vmatprep.mubr.bf16.mxu0 %v6263_v9  ;;  %v1098_v20 = vrot.slane %v1096_v25, 5  ;;  %v1104_v30 = vrot.slane %v1102_v2, 5  ;;  %v1108_v58 = vrot.slane %v1106_v60, 4  ;;  %v6264_v14 = vcombine.low %v3554_v10, %v8015_v0  ;;  %v767_v2 = vld [vmem:[#allocation2 + $0x84] sm:$0xf] }
  0x97   : > { %v1091_v13 = vsel %vm7862_vm6, %v1086_v31, %v1090_v36  ;;  %v527_v15 = vrot.slane %v525_v44, 7  ;;  %v533_v16 = vshrl.u32 %v301_v54, 16  ;;  %v536_v18 = vshll.u32 %v301_v54, 16  ;;  %v304_v31 = vld [vmem:[%s7844_s22 + $0x58] sm:$0xf]  ;;  %v7564_v44 = vld [vmem:[%s9501_s1 + $0x190] sm:$0xff]  }
  0x98   : > { %v6055_v27 = vcombine.low %v1081_v7, %v1091_v13  ;;  %v1099_v3 = vor.u32 %v1098_v20, %v1095_v56  ;;  %v1109_v9 = vor.u32 %v1108_v58, %v1104_v30  ;;  %v6233_v24 = vrot.slane %v3482_v8, 9  ;;  %v305_v10 = vld [vmem:[%s7844_s22 + $0x5c] sm:$0xf] }
  0x99   : > { %v530_v23 = vor.u32 %v528_v6, %v527_v15  ;;  %v531_v63 = vrot.slane %v527_v15, 4  ;;  %v535_v22 = vrot.slane %v533_v16, 7  ;;  %v3560_v40 = vrot.slane %v7651_v32, 5 }
  0x9a   : > { %6834 = vmatprep.mubr.bf16.mxu1 %v6055_v27  ;;  %v866_v37 = vld [vmem:[#allocation2 + $0x74] sm:$0x1]  ;;  %v1100_v0 = vrot.slane %v1099_v3, 4  ;;  %v1110_v38 = vrot.slane %v1109_v9, 4  ;;  %v3563_v4 = vrot.slane %v8006_v59, 5  ;;  %v542_v55 = vshrl.u32 %v302_v17, 16 }
  0x9b   : > { %v1112_v47 = vshll.u32 %v866_v37, 16  ;;  %v538_v26 = vor.u32 %v536_v18, %v535_v22  ;;  %v540_v48 = vrot.slane %v535_v22, 4  ;;  %v761_v36 = vsel %vm7876_vm9, %v530_v23, %v760_v61  ;;  %v774_v23 = vld [vmem:[#allocation2 + $0x90] sm:$0xf] }
  0x9c   : > { %v1105_v49 = vsel %vm7862_vm6, %v1100_v0, %v1104_v30  ;;  %762 = vst [vmem:[#allocation2 + $0x78] sm:$0xf] %v761_v36  ;;  %v3561_v54 = vsel %vm7992_vm13, %v6233_v24, %v3560_v40  ;;  %v3562_v50 = vrot.slane %v3560_v40, 4  ;;  %v545_v25 = vshll.u32 %v302_v17, 16  ;;  %v771_v30 = vld [vmem:[#allocation2 + $0x8c] sm:$0x1] }
  0x9d   : > { %v1114_v62 = vrot.slane %v1112_v47, 5  ;;  %7059 = vmatmul.mubr.bf16.vlgmr.msra.gmra.mrb[0].mxu0 %v6264_v14  ;;  %v539_v59 = vsel %vm7871_vm8, %v531_v63, %v538_v26  ;;  %v765_v56 = vsel %vm7885_vm10, %v540_v48, %v764_v19  ;;  %v544_v5 = vrot.slane %v542_v55, 7  ;;  %v3484_v40 = vld [vmem:[#allocation2 + $0x3c] sm:$0xe] }
  0x9e   : > { %7091 = vmatpush3.bf16.msra.mxu0 %v8098_v1  ;;  %763 = vst [vmem:[#allocation2 + $0x7c] sm:$0xf] %v539_v59  ;;  %766 = vst [vmem:[#allocation2 + $0x80] sm:$0x1] %v765_v56  ;;  %v3564_v60 = vsel %vm7992_vm13, %v3562_v50, %v3563_v4  ;;  %v550_v8 = vshrl.u32 %v303_v29, 16  ;;  %v553_v7 = vshll.u32 %v303_v29, 16 }
  0x9f   : > { %v1115_v6 = vsel %vm7862_vm6, %v1110_v38, %v1114_v62  ;;  %v6265_v20 = vcombine.low %v3561_v54, %v3564_v60  ;;  %v6234_v58 = vrot.slane %v3483_v46, 9  ;;  %v3567_v1 = vrot.slane %v8072_v11, 5  ;;  %7092 = vmatprep.subr.bf16.mxu0 %v7562_v28  ;;  %v778_v59 = vld [vmem:[#allocation2 + $0x98] sm:$0x1] }
  0xa0   : > { %v6056_v61 = vcombine.low %v1105_v49, %v1115_v6  ;;  %v547_v13 = vor.u32 %v545_v25, %v544_v5  ;;  %v548_v14 = vrot.slane %v544_v5, 4  ;;  %v552_v15 = vrot.slane %v550_v8, 7  ;;  %v7570_v49 = vld [vmem:[%s9501_s1 + $0x1a0] sm:$0xff]  }
  0xa1   : > { %7062 = vmatprep.mubr.bf16.mxu0 %v6265_v20  ;;  %v3568_v16 = vsel %vm7992_vm13, %v6234_v58, %v3567_v1  ;;  %v3569_v17 = vrot.slane %v3567_v1, 4  ;;  %v3570_v27 = vrot.slane %v8074_v12, 5  ;;  %v559_v3 = vshrl.u32 %v304_v31, 16  ;;  %v7566_v12 = vld [vmem:[%s9501_s1 + $0x198] sm:$0xff]   ;;  %v306_v5 = vld [vmem:[%s7844_s22 + $0x60] sm:$0xf] }
  0xa2   : > { %6835 = vmatmul.mubr.bf16.gmra.mrb[16].mxu1 %v6056_v61  ;;  %v555_v9 = vor.u32 %v553_v7, %v552_v15  ;;  %v557_v18 = vrot.slane %v552_v15, 4  ;;  %v768_v11 = vsel %vm7876_vm9, %v547_v13, %v767_v2  ;;  %7093 = vmatpush3.bf16.msra.mxu0 %v7562_v28  ;;  %v562_v19 = vshll.u32 %v304_v31, 16 }
  0xa3   : > { %v829_v63 = vld [vmem:[#allocation2 + $0x78] sm:$0xf]  ;;  %769 = vst [vmem:[#allocation2 + $0x84] sm:$0xf] %v768_v11  ;;  %v3571_v22 = vsel %vm7992_vm13, %v3569_v17, %v3570_v27  ;;  %v561_v24 = vrot.slane %v559_v3, 7  ;;  %v567_v29 = vshrl.u32 %v305_v10, 16  ;;  %7094 = vmatprep.subr.bf16.mxu0 %v7564_v44 }
  0xa4   : > { %v570_v37 = vshll.u32 %v305_v10, 16  ;;  %v1117_v0 = vshrl.u32 %v829_v63, 16  ;;  %v1120_v38 = vshll.u32 %v829_v63, 16  ;;  %v556_v28 = vsel %vm7871_vm8, %v548_v14, %v555_v9 }
  0xa5   : > { %v772_v32 = vsel %vm7885_vm10, %v557_v18, %v771_v30  ;;  %v8261_v4 = vld [vmem:[#allocation2 + $0x7c] sm:$0xf]  ;;  %v867_v47 = vld [vmem:[#allocation2 + $0x80] sm:$0x1]  ;;  %770 = vst [vmem:[#allocation2 + $0x88] sm:$0xf] %v556_v28  ;;  %v6266_v26 = vcombine.low %v3568_v16, %v3571_v22  ;;  %v564_v48 = vor.u32 %v562_v19, %v561_v24 }
  0xa6   : > { %773 = vst [vmem:[#allocation2 + $0x8c] sm:$0x1] %v772_v32  ;;  %v565_v36 = vrot.slane %v561_v24, 4  ;;  %v569_v46 = vrot.slane %v567_v29, 7  ;;  %v1119_v54 = vrot.slane %v1117_v0, 4  ;;  %v1122_v50 = vrot.slane %v1120_v38, 5  ;;  %7095 = vmatpush3.bf16.msra.mxu0 %v7564_v44 }
  0xa7   : > { %v1126_v55 = vshll.u32 %v8261_v4, 16  ;;  %v1130_v62 = vshrl.u32 %v8261_v4, 16  ;;  %v1136_v56 = vshll.u32 %v867_v47, 16  ;;  %7063 = vmatmul.mubr.bf16.gmra.mrb[4].mxu0 %v6266_v26  ;;  %v775_v60 = vsel %vm7876_vm9, %v564_v48, %v774_v23  ;;  %7096 = vmatprep.subr.bf16.mxu0 %v7566_v12  ;;  %v7578_v0 = vld [vmem:[%s9501_s1 + $0x1b0] sm:$0xff]   ;;  %v307_v26 = vld [vmem:[%s7844_s22 + $0x64] sm:$0xf] }
  0xa8   : > { %v572_v25 = vor.u32 %v570_v37, %v569_v46  ;;  %v574_v2 = vrot.slane %v569_v46, 4  ;;  %v1123_v8 = vor.u32 %v1122_v50, %v1119_v54  ;;  %776 = vst [vmem:[#allocation2 + $0x90] sm:$0xf] %v775_v60  ;;  %v6235_v6 = vrot.slane %v3484_v40, 9  ;;  %v781_v50 = vld [vmem:[#allocation2 + $0x9c] sm:$0xf] }
  0xa9   : > { %v1128_v7 = vrot.slane %v1126_v55, 5  ;;  %v1132_v31 = vrot.slane %v1130_v62, 4  ;;  %v1138_v20 = vrot.slane %v1136_v56, 5  ;;  %v3574_v58 = vrot.slane %v8089_v57, 5  ;;  %v7574_v57 = vld [vmem:[%s9501_s1 + $0x1a8] sm:$0xff]  }
  0xaa   : > { %v573_v30 = vsel %vm7871_vm8, %v565_v36, %v572_v25  ;;  %v779_v44 = vsel %vm7885_vm10, %v574_v2, %v778_v59  ;;  %v1124_v1 = vrot.slane %v1123_v8, 4  ;;  %v8276_v61 = vld [vmem:[#allocation2 + $0x84] sm:$0xf]  ;;  %v3577_v13 = vrot.slane %v8091_v52, 5  ;;  %7097 = vmatpush3.bf16.msra.mxu0 %v7566_v12 }
  0xab   : > { %v1133_v10 = vor.u32 %v1132_v31, %v1128_v7  ;;  %777 = vst [vmem:[#allocation2 + $0x94] sm:$0xf] %v573_v30  ;;  %780 = vst [vmem:[#allocation2 + $0x98] sm:$0x1] %v779_v44  ;;  %v576_v14 = vshrl.u32 %v306_v5, 16  ;;  %v1141_v15 = vshrl.u32 %v8276_v61, 16  ;;  %7098 = vmatprep.subr.bf16.mxu0 %v7570_v49  ;;  %v3575_v52 = vsel %vm7992_vm13, %v6235_v6, %v3574_v58 }
  0xac   : > { %v1144_v16 = vshll.u32 %v8276_v61, 16  ;;  %v3576_v17 = vrot.slane %v3574_v58, 4  ;;  %v1129_v27 = vsel %vm7862_vm6, %v1124_v1, %v1128_v7  ;;  %v8286_v9 = vld [vmem:[#allocation2 + $0x88] sm:$0xf]  ;;  %v579_v12 = vshll.u32 %v306_v5, 16  ;;  %v7582_v58 = vld [vmem:[%s9501_s1 + $0x1b8] sm:$0xff]  }
  0xad   : > { %v1134_v3 = vrot.slane %v1133_v10, 4  ;;  %v868_v18 = vld [vmem:[#allocation2 + $0x8c] sm:$0x1]  ;;  %v8290_v11 = vrot.slane %v576_v14, 7  ;;  %v1143_v19 = vrot.slane %v1141_v15, 4  ;;  %v1150_v63 = vshll.u32 %v8286_v9, 16 }
  0xae   : > { %v1146_v23 = vrot.slane %v1144_v16, 5  ;;  %v1154_v22 = vshrl.u32 %v8286_v9, 16  ;;  %v1160_v29 = vshll.u32 %v868_v18, 16  ;;  %v3578_v37 = vsel %vm7992_vm13, %v3576_v17, %v3577_v13  ;;  %7099 = vmatpush3.bf16.msra.mxu0 %v7570_v49  ;;  %v3485_v7 = vld [vmem:[#allocation2 + $0x48] sm:$0xe] }
  0xaf   : > { %v1139_v24 = vsel %vm7862_vm6, %v1134_v3, %v1138_v20  ;;  %v1152_v32 = vrot.slane %v1150_v63, 5  ;;  %v8301_v47 = vld [vmem:[#allocation2 + $0x90] sm:$0xf]  ;;  %7100 = vmatprep.subr.bf16.mxu0 %v7574_v57  ;;  %v6267_v54 = vcombine.low %v3575_v52, %v3578_v37  ;;  %v581_v56 = vor.u32 %v579_v12, %v8290_v11  ;;  %v308_v44 = vld [vmem:[%s7844_s22 + $0x68] sm:$0xf]  ;;  %v8328_v37 = vld [vmem:[%s9501_s1 + $0x1c0] sm:$0xff]  }
  0xb0   : > { %v6057_v38 = vcombine.low %v1129_v27, %v1139_v24  ;;  %v1147_v28 = vor.u32 %v1146_v23, %v1143_v19  ;;  %v1156_v40 = vrot.slane %v1154_v22, 4  ;;  %v1162_v48 = vrot.slane %v1160_v29, 5  ;;  %v785_v15 = vld [vmem:[#allocation2 + $0xa4] sm:$0x1]  ;;  %v309_v3 = vld [vmem:[%s7844_s22 + $0x6c] sm:$0xf] }
  0xb1   : > { %v1165_v36 = vshrl.u32 %v8301_v47, 16  ;;  %v1168_v46 = vshll.u32 %v8301_v47, 16  ;;  %v582_v25 = vrot.slane %v8290_v11, 4  ;;  %7066 = vmatprep.mubr.bf16.mxu0 %v6267_v54  ;;  %v584_v30 = vshrl.u32 %v307_v26, 16  ;;  %v3486_v23 = vld [vmem:[#allocation2 + $0x54] sm:$0xe] }
  0xb2   : > { %6838 = vmatprep.mubr.bf16.mxu1 %v6057_v38  ;;  %v1148_v49 = vrot.slane %v1147_v28, 4  ;;  %v1157_v55 = vor.u32 %v1156_v40, %v1152_v32  ;;  %v8306_v62 = vld [vmem:[#allocation2 + $0x94] sm:$0xf]  ;;  %v869_v59 = vld [vmem:[#allocation2 + $0x98] sm:$0x1]  ;;  %7101 = vmatpush3.bf16.msra.mxu0 %v7574_v57  ;;  %v587_v14 = vshll.u32 %v307_v26, 16  ;;  %v782_v27 = vsel %vm7876_vm9, %v581_v56, %v781_v50 }
  0xb3   : > { %v1167_v2 = vrot.slane %v1165_v36, 4  ;;  %v1170_v60 = vrot.slane %v1168_v46, 5  ;;  %v1174_v5 = vshll.u32 %v8306_v62, 16  ;;  %v1178_v8 = vshrl.u32 %v8306_v62, 16  ;;  %7102 = vmatprep.subr.bf16.mxu0 %v7578_v0  ;;  %783 = vst [vmem:[#allocation2 + $0x9c] sm:$0xf] %v782_v27 }
  0xb4   : > { %v1153_v31 = vsel %vm7862_vm6, %v1148_v49, %v1152_v32  ;;  %v1158_v6 = vrot.slane %v1157_v55, 4  ;;  %v1184_v20 = vshll.u32 %v869_v59, 16  ;;  %v586_v57 = vrot.slane %v584_v30, 7  ;;  %v788_v50 = vld [vmem:[#allocation2 + $0xa8] sm:$0xf] }
  0xb5   : > { %v1171_v1 = vor.u32 %v1170_v60, %v1167_v2  ;;  %v1176_v10 = vrot.slane %v1174_v5, 5  ;;  %v1180_v13 = vrot.slane %v1178_v8, 4  ;;  %v6236_v19 = vrot.slane %v3485_v7, 9  ;;  %v792_v59 = vld [vmem:[#allocation2 + $0xb0] sm:$0x1] }
  0xb6   : > { %v1163_v16 = vsel %vm7862_vm6, %v1158_v6, %v1162_v48  ;;  %v1186_v17 = vrot.slane %v1184_v20, 5  ;;  %7103 = vmatpush3.bf16.msra.mxu0 %v7578_v0  ;;  %v589_v63 = vor.u32 %v587_v14, %v586_v57  ;;  %v591_v22 = vrot.slane %v586_v57, 4  ;;  %v310_v0 = vld [vmem:[%s7844_s22 + $0x70] sm:$0xf]  ;;  %v311_v7 = vld [vmem:[%s7844_s22 + $0x74] sm:$0xf] }
  0xb7   : > { %v6058_v18 = vcombine.low %v1153_v31, %v1163_v16  ;;  %v1172_v52 = vrot.slane %v1171_v1, 4  ;;  %v1181_v11 = vor.u32 %v1180_v13, %v1176_v10  ;;  %v3581_v24 = vrot.slane %v8114_v53, 5  ;;  %7104 = vmatprep.subr.bf16.mxu0 %v7582_v58  ;;  %v795_v13 = vld [vmem:[#allocation2 + $0xb4] sm:$0xf]  ;;  %v3487_v57 = vld [vmem:[#allocation2 + $0x60] sm:$0xe] }
  0xb8   : > { %v3584_v29 = vrot.slane %v8132_v39, 5  ;;  %v593_v28 = vshrl.u32 %v308_v44, 16  ;;  %v596_v32 = vshll.u32 %v308_v44, 16  ;;  %v590_v40 = vsel %vm7871_vm8, %v582_v25, %v589_v63 }
  0xb9   : > { %6839 = vmatmul.mubr.bf16.gmra.mrb[20].mxu1 %v6058_v18  ;;  %v1177_v12 = vsel %vm7862_vm6, %v1172_v52, %v1176_v10  ;;  %v1182_v38 = vrot.slane %v1181_v11, 4  ;;  %v786_v53 = vsel %vm7885_vm10, %v591_v22, %v785_v15  ;;  %v3582_v39 = vsel %vm7992_vm13, %v6236_v19, %v3581_v24  ;;  %784 = vst [vmem:[#allocation2 + $0xa0] sm:$0xf] %v590_v40 }
  0xba   : > { %v3583_v26 = vrot.slane %v3581_v24, 4  ;;  %787 = vst [vmem:[#allocation2 + $0xa4] sm:$0x1] %v786_v53  ;;  %v595_v36 = vrot.slane %v593_v28, 7  ;;  %v601_v46 = vshrl.u32 %v309_v3, 16  ;;  %v604_v54 = vshll.u32 %v309_v3, 16  ;;  %7105 = vmatpush3.bf16.msra.mxu0 %v7582_v58 }
  0xbb   : > { %v1187_v48 = vsel %vm7862_vm6, %v1182_v38, %v1186_v17  ;;  %v6237_v56 = vrot.slane %v3486_v23, 9  ;;  %v3588_v25 = vrot.slane %v8170_v21, 5  ;;  %7138 = vmatprep.subr.bf16.mxu0 %v8328_v37  ;;  %v8346_v31 = vld [vmem:[#allocation2 + $0x9c] sm:$0xf]  ;;  %v3591_v30 = vrot.slane %v8172_v42, 5 }
  0xbc   : > { %v6059_v49 = vcombine.low %v1177_v12, %v1187_v48  ;;  %v3585_v55 = vsel %vm7992_vm13, %v3583_v26, %v3584_v29  ;;  %v598_v60 = vor.u32 %v596_v32, %v595_v36  ;;  %v599_v5 = vrot.slane %v595_v36, 4  ;;  %v799_v38 = vld [vmem:[#allocation2 + $0xbc] sm:$0x1]  ;;  %v2751_v28 = vld [vmem:[#allocation2 + $0x70] sm:$0xf] }
  0xbd   : > { %v6268_v2 = vcombine.low %v3582_v39, %v3585_v55  ;;  %v603_v8 = vrot.slane %v601_v46, 7  ;;  %v3589_v6 = vsel %vm7992_vm13, %v6237_v56, %v3588_v25  ;;  %v3590_v20 = vrot.slane %v3588_v25, 4  ;;  %v3488_v39 = vld [vmem:[#allocation2 + $0x6c] sm:$0xe] }
  0xbe   : > { %6842 = vmatprep.mubr.bf16.mxu1 %v6059_v49  ;;  %v610_v44 = vshrl.u32 %v310_v0, 16  ;;  %v1189_v58 = vshrl.u32 %v8346_v31, 16  ;;  %v1192_v21 = vshll.u32 %v8346_v31, 16  ;;  %v789_v14 = vsel %vm7876_vm9, %v598_v60, %v788_v50 }
  0xbf   : > { %7067 = vmatmul.mubr.bf16.gmra.mrb[8].mxu0 %v6268_v2  ;;  %v606_v1 = vor.u32 %v604_v54, %v603_v8  ;;  %v608_v10 = vrot.slane %v603_v8, 4  ;;  %v3592_v15 = vsel %vm7992_vm13, %v3590_v20, %v3591_v30  ;;  %v613_v17 = vshll.u32 %v310_v0, 16  ;;  %790 = vst [vmem:[#allocation2 + $0xa8] sm:$0xf] %v789_v14 }
  0xc0   : > { %v612_v16 = vrot.slane %v610_v44, 7  ;;  %v1191_v27 = vrot.slane %v1189_v58, 4  ;;  %v1194_v42 = vrot.slane %v1192_v21, 5  ;;  %v8361_v52 = vld [vmem:[#allocation2 + $0xa0] sm:$0xf]  ;;  %v6269_v19 = vcombine.low %v3589_v6, %v3592_v15 }
  0xc1   : > { %v607_v3 = vsel %vm7871_vm8, %v599_v5, %v606_v1  ;;  %v793_v18 = vsel %vm7885_vm10, %v608_v10, %v792_v59  ;;  %v870_v11 = vld [vmem:[#allocation2 + $0xa4] sm:$0x1]  ;;  %v618_v63 = vshrl.u32 %v311_v7, 16  ;;  %v1198_v24 = vshll.u32 %v8361_v52, 16 }
  0xc2   : > { %791 = vst [vmem:[#allocation2 + $0xac] sm:$0xf] %v607_v3  ;;  %794 = vst [vmem:[#allocation2 + $0xb0] sm:$0x1] %v793_v18  ;;  %v615_v23 = vor.u32 %v613_v17, %v612_v16  ;;  %v1195_v22 = vor.u32 %v1194_v42, %v1191_v27  ;;  %v1202_v29 = vshrl.u32 %v8361_v52, 16  ;;  %v1208_v12 = vshll.u32 %v870_v11, 16  ;;  %7070 = vmatprep.mubr.bf16.mxu0 %v6269_v19 }
  0xc3   : > { %v616_v32 = vrot.slane %v612_v16, 4  ;;  %v620_v0 = vrot.slane %v618_v63, 7  ;;  %v621_v40 = vshll.u32 %v311_v7, 16  ;;  %v1200_v48 = vrot.slane %v1198_v24, 5  ;;  %v2752_v16 = vld [vmem:[#allocation2 + $0x74] sm:$0x1] }
  0xc4   : > { %v796_v53 = vsel %vm7876_vm9, %v615_v23, %v795_v13  ;;  %v1196_v26 = vrot.slane %v1195_v22, 4  ;;  %v1204_v36 = vrot.slane %v1202_v29, 4  ;;  %v6238_v46 = vrot.slane %v3487_v57, 9 }
  0xc5   : > { %797 = vst [vmem:[#allocation2 + $0xb4] sm:$0xf] %v796_v53  ;;  %v1210_v54 = vrot.slane %v1208_v12, 5  ;;  %v623_v50 = vor.u32 %v621_v40, %v620_v0  ;;  %v625_v49 = vrot.slane %v620_v0, 4  ;;  %v3595_v55 = vrot.slane %v8180_v33, 5 }
  0xc6   : > { %v1205_v59 = vor.u32 %v1204_v36, %v1200_v48  ;;  %v3598_v56 = vrot.slane %v8182_v35, 5  ;;  %v3602_v25 = vrot.slane %v2751_v28, 5  ;;  %v8369_v2 = vld [vmem:[#allocation2 + $0xa8] sm:$0xf]  ;;  %v6239_v7 = vrot.slane %v3488_v39, 9 }
  0xc7   : > { %v624_v60 = vsel %vm7871_vm8, %v616_v32, %v623_v50  ;;  %v800_v5 = vsel %vm7885_vm10, %v625_v49, %v799_v38  ;;  %v3597_v8 = vrot.slane %v3595_v55, 4  ;;  %v1201_v6 = vsel %vm7862_vm6, %v1196_v26, %v1200_v48  ;;  %v3489_v32 = vld [vmem:[#allocation2 + $0x78] sm:$0xe]  ;;  %v8399_v48 = vld [vmem:[#allocation2 + $0x7c] sm:$0xf] }
  0xc8   : > { %v1206_v20 = vrot.slane %v1205_v59, 4  ;;  %v1213_v35 = vshrl.u32 %v8369_v2, 16  ;;  %798 = vst [vmem:[#allocation2 + $0xb8] sm:$0xf] %v624_v60  ;;  %801 = vst [vmem:[#allocation2 + $0xbc] sm:$0x1] %v800_v5  ;;  %v3596_v44 = vsel %vm7992_vm13, %v6238_v46, %v3595_v55  ;;  %v3603_v28 = vsel %vm7992_vm13, %v6239_v7, %v3602_v25 }
  0xc9   : > { %v8377_v30 = vld [vmem:[#allocation2 + $0xac] sm:$0xf]  ;;  %v871_v33 = vld [vmem:[#allocation2 + $0xb0] sm:$0x1]  ;;  %v1216_v58 = vshll.u32 %v8369_v2, 16  ;;  %v3599_v15 = vsel %vm7992_vm13, %v3597_v8, %v3598_v56  ;;  %v3604_v17 = vrot.slane %v3602_v25, 4 }
  0xca   : > { %v1222_v21 = vshll.u32 %v8377_v30, 16  ;;  %v1226_v1 = vshrl.u32 %v8377_v30, 16  ;;  %v1232_v10 = vshll.u32 %v871_v33, 16  ;;  %v1211_v13 = vsel %vm7862_vm6, %v1206_v20, %v1210_v54  ;;  %v8401_v36 = vld [vmem:[#allocation2 + $0x80] sm:$0x1] }
  0xcb   : > { %v1215_v14 = vrot.slane %v1213_v35, 4  ;;  %v6060_v57 = vcombine.low %v1201_v6, %v1211_v13  ;;  %v1218_v27 = vrot.slane %v1216_v58, 5  ;;  %v6270_v23 = vcombine.low %v3596_v44, %v3599_v15  ;;  %v3490_v55 = vld [vmem:[#allocation2 + $0x84] sm:$0xe]  ;;  %v2757_v60 = vld [vmem:[#allocation2 + $0x88] sm:$0xf] }
  0xcc   : > { %v1224_v42 = vrot.slane %v1222_v21, 5  ;;  %v1228_v3 = vrot.slane %v1226_v1, 4  ;;  %v8389_v18 = vld [vmem:[#allocation2 + $0xb4] sm:$0xf]  ;;  %v1234_v24 = vrot.slane %v1232_v10, 5  ;;  %v3605_v29 = vrot.slane %v2752_v16, 5 }
  0xcd   : > { %v1237_v11 = vshrl.u32 %v8389_v18, 16  ;;  %v1240_v19 = vshll.u32 %v8389_v18, 16  ;;  %6843 = vmatmul.mubr.bf16.gmra.mrb[24].mxu1 %v6060_v57  ;;  %v1219_v63 = vor.u32 %v1218_v27, %v1215_v14  ;;  %7071 = vmatmul.mubr.bf16.gmra.mrb[12].mxu0 %v6270_v23  ;;  %v2758_v5 = vld [vmem:[#allocation2 + $0x8c] sm:$0x1]  ;;  %v2760_v33 = vld [vmem:[#allocation2 + $0x94] sm:$0xf] }
  0xce   : > { %v1229_v22 = vor.u32 %v1228_v3, %v1224_v42  ;;  %v3606_v26 = vsel %vm7992_vm13, %v3604_v17, %v3605_v29  ;;  %v3491_v35 = vld [vmem:[#allocation2 + $0x90] sm:$0xe]  ;;  %v6240_v58 = vrot.slane %v3489_v32, 9  ;;  %v2761_v21 = vld [vmem:[#allocation2 + $0x98] sm:$0x1]  ;;  %v3609_v13 = vrot.slane %v8399_v48, 5 }
  0xcf   : > { %v1239_v12 = vrot.slane %v1237_v11, 4  ;;  %v1242_v38 = vrot.slane %v1240_v19, 5  ;;  %v1220_v0 = vrot.slane %v1219_v63, 4  ;;  %v8395_v53 = vld [vmem:[#allocation2 + $0xb8] sm:$0xf]  ;;  %v6271_v25 = vcombine.low %v3603_v28, %v3606_v26 }
  0xd0   : > { %v1230_v40 = vrot.slane %v1229_v22, 4  ;;  %v872_v39 = vld [vmem:[#allocation2 + $0xbc] sm:$0x1]  ;;  %v1246_v54 = vshll.u32 %v8395_v53, 16  ;;  %v1250_v50 = vshrl.u32 %v8395_v53, 16  ;;  %v3612_v14 = vrot.slane %v8401_v36, 5 }
  0xd1   : > { %v1243_v46 = vor.u32 %v1242_v38, %v1239_v12  ;;  %v1256_v49 = vshll.u32 %v872_v39, 16  ;;  %v1225_v59 = vsel %vm7862_vm6, %v1220_v0, %v1224_v42  ;;  %7074 = vmatprep.mubr.bf16.mxu0 %v6271_v25  ;;  %v3492_v1 = vld [vmem:[#allocation2 + $0x9c] sm:$0xe]  ;;  %v7652_v15 = vld [vmem:[#allocation2] sm:$0xf]  ;;  %v6241_v57 = vrot.slane %v3490_v55, 9 }
  0xd2   : > { %v1235_v56 = vsel %vm7862_vm6, %v1230_v40, %v1234_v24  ;;  %v1248_v6 = vrot.slane %v1246_v54, 5  ;;  %v1252_v20 = vrot.slane %v1250_v50, 4  ;;  %v8411_v16 = vld [vmem:[#allocation2 + $0x4] sm:$0xf]  ;;  %v3616_v27 = vrot.slane %v2757_v60, 5 }
  0xd3   : > { %v6061_v8 = vcombine.low %v1225_v59, %v1235_v56  ;;  %v1244_v7 = vrot.slane %v1243_v46, 4  ;;  %v1258_v44 = vrot.slane %v1256_v49, 5  ;;  %v6071_v17 = vcombine.low %v7652_v15, %v8411_v16  ;;  %v2763_v3 = vld [vmem:[#allocation2 + $0xa0] sm:$0xf]  ;;  %v2764_v22 = vld [vmem:[#allocation2 + $0xa4] sm:$0x1] }
  0xd4   : > { %v1253_v10 = vor.u32 %v1252_v20, %v1248_v6  ;;  %v3619_v42 = vrot.slane %v2758_v5, 5  ;;  %v3610_v23 = vsel %vm7992_vm13, %v6240_v58, %v3609_v13  ;;  %v3611_v63 = vrot.slane %v3609_v13, 4  ;;  %v8418_v24 = vld [vmem:[#allocation2 + $0xac] sm:$0xf]  ;;  %v2767_v26 = vld [vmem:[#allocation2 + $0xb0] sm:$0x1] }
  0xd5   : > { %6846 = vmatprep.mubr.bf16.mxu1 %v6061_v8  ;;  %v1249_v11 = vsel %vm7862_vm6, %v1244_v7, %v1248_v6  ;;  %v3617_v29 = vsel %vm7992_vm13, %v6241_v57, %v3616_v27  ;;  %v3618_v12 = vrot.slane %v3616_v27, 4  ;;  %v6242_v38 = vrot.slane %v3491_v35, 9  ;;  %v3493_v46 = vld [vmem:[#allocation2 + $0xa8] sm:$0xe]  ;;  %v312_v60 = vld [vmem:[%s7844_s22 + $0x78] sm:$0xf] }
  0xd6   : > { %v1254_v19 = vrot.slane %v1253_v10, 4  ;;  %v3623_v28 = vrot.slane %v2760_v33, 5  ;;  %v3613_v0 = vsel %vm7992_vm13, %v3611_v63, %v3612_v14  ;;  %v3626_v40 = vrot.slane %v2761_v21, 5  ;;  %v2769_v8 = vld [vmem:[#allocation2 + $0xb8] sm:$0xf] }
  0xd7   : > { %v6243_v39 = vrot.slane %v3492_v1, 9  ;;  %v6272_v50 = vcombine.low %v3610_v23, %v3613_v0  ;;  %v3620_v49 = vsel %vm7992_vm13, %v3618_v12, %v3619_v42  ;;  %v3630_v56 = vrot.slane %v2763_v3, 5  ;;  %v313_v33 = vld [vmem:[%s7844_s22 + $0x7c] sm:$0xf]  ;;  %v3494_v58 = vld [vmem:[#allocation2 + $0xb4] sm:$0xe] }
  0xd8   : > { %v1259_v32 = vsel %vm7862_vm6, %v1254_v19, %v1258_v44  ;;  %v6273_v55 = vcombine.low %v3617_v29, %v3620_v49  ;;  %v3625_v59 = vrot.slane %v3623_v28, 4  ;;  %v3633_v25 = vrot.slane %v2764_v22, 5  ;;  %v2770_v13 = vld [vmem:[#allocation2 + $0xbc] sm:$0x1]  ;;  %v7654_v15 = vld [vmem:[#allocation2 + $0xc] sm:$0xf] }
  0xd9   : > { %v6062_v54 = vcombine.low %v1249_v11, %v1259_v32  ;;  %7075 = vmatmul.mubr.bf16.gmra.mrb[16].mxu0 %v6272_v50  ;;  %v3637_v5 = vrot.slane %v8418_v24, 5  ;;  %v3624_v7 = vsel %vm7992_vm13, %v6242_v38, %v3623_v28  ;;  %v3632_v20 = vrot.slane %v3630_v56, 4  ;;  %v7656_v11 = vld [vmem:[#allocation2 + $0x18] sm:$0xf]  ;;  %v8442_v19 = vld [vmem:[#allocation2 + $0x1c] sm:$0xf] }
  0xda   : > { %7078 = vmatprep.mubr.bf16.mxu0 %v6273_v55  ;;  %v3627_v6 = vsel %vm7992_vm13, %v3625_v59, %v3626_v40  ;;  %v6244_v35 = vrot.slane %v3493_v46, 9  ;;  %v3640_v44 = vrot.slane %v2767_v26, 5  ;;  %v3631_v21 = vsel %vm7992_vm13, %v6243_v39, %v3630_v56  ;;  %v802_v24 = vld [vmem:[#allocation2 + $0xc0] sm:$0xf]  ;;  %v7573_v29 = vld [vmem:[%s9501_s1 + $0x88] sm:$0xff]   ;;  %v7577_v56 = vld [vmem:[%s9501_s1 + $0x90] sm:$0xff]  }
  0xdb   : > { %6847 = vmatmul.mubr.bf16.gmra.mrb[28].mxu1 %v6062_v54  ;;  %v3634_v1 = vsel %vm7992_vm13, %v3632_v20, %v3633_v25  ;;  %v3639_v10 = vrot.slane %v3637_v5, 4  ;;  %v3644_v14 = vrot.slane %v2769_v8, 5  ;;  %v6274_v27 = vcombine.low %v3624_v7, %v3627_v6  ;;  %v806_v28 = vld [vmem:[#allocation2 + $0xc8] sm:$0x1]  ;;  %v7658_v54 = vld [vmem:[%s9501_s1 + $0x80] sm:$0xff]  }
  0xdc   : > { %6866 = vmatprep.mubr.bf16.mxu1 %v6071_v17  ;;  %v8439_v17 = vld [vmem:[#allocation2 + $0x10] sm:$0xf]  ;;  %v627_v42 = vshrl.u32 %v312_v60, 16  ;;  %v630_v3 = vshll.u32 %v312_v60, 16  ;;  %v6073_v23 = vcombine.low %v7656_v11, %v8442_v19  ;;  %v635_v63 = vshrl.u32 %v313_v33, 16 }
  0xdd   : > { %v6072_v57 = vcombine.low %v7654_v15, %v8439_v17  ;;  %v638_v22 = vshll.u32 %v313_v33, 16  ;;  %v6275_v12 = vcombine.low %v3631_v21, %v3634_v1  ;;  %v6245_v32 = vrot.slane %v3494_v58, 9  ;;  %v7659_v6 = vld [vmem:[#allocation2 + $0x24] sm:$0xf]  ;;  %v8468_v20 = vld [vmem:[#allocation2 + $0x28] sm:$0xf] }
  0xde   : > { %v629_v38 = vrot.slane %v627_v42, 7  ;;  %v3646_v0 = vrot.slane %v3644_v14, 4  ;;  %v3647_v40 = vrot.slane %v2770_v13, 5  ;;  %v637_v39 = vrot.slane %v635_v63, 7  ;;  %v7586_v1 = vld [vmem:[%s9501_s1 + $0xa0] sm:$0xff]  }
  0xdf   : > { %v3638_v50 = vsel %vm7992_vm13, %v6244_v35, %v3637_v5  ;;  %v3641_v49 = vsel %vm7992_vm13, %v3639_v10, %v3640_v44  ;;  %v3645_v60 = vsel %vm7992_vm13, %v6245_v32, %v3644_v14  ;;  %v6074_v33 = vcombine.low %v7659_v6, %v8468_v20  ;;  %v7661_v35 = vld [vmem:[#allocation2 + $0x30] sm:$0xf]  ;;  %v8471_v44 = vld [vmem:[#allocation2 + $0x34] sm:$0xf]  ;;  %v7663_v10 = vld [vmem:[#allocation2 + $0x3c] sm:$0xf] }
  0xe0   : > { %v632_v26 = vor.u32 %v630_v3, %v629_v38  ;;  %v633_v46 = vrot.slane %v629_v38, 4  ;;  %v640_v55 = vor.u32 %v638_v22, %v637_v39  ;;  %v642_v59 = vrot.slane %v637_v39, 4  ;;  %v8480_v13 = vld [vmem:[#allocation2 + $0x40] sm:$0xf]  ;;  %v7665_v63 = vld [vmem:[#allocation2 + $0x48] sm:$0xf] }
  0xe1   : > { %7079 = vmatmul.mubr.bf16.gmra.mrb[20].mxu0 %v6274_v27  ;;  %v3648_v5 = vsel %vm7992_vm13, %v3646_v0, %v3647_v40  ;;  %v6276_v45 = vcombine.low %v3638_v50, %v3641_v49  ;;  %v6075_v58 = vcombine.low %v7661_v35, %v8471_v44  ;;  %v6076_v14 = vcombine.low %v7663_v10, %v8480_v13  ;;  %v8485_v22 = vld [vmem:[#allocation2 + $0x4c] sm:$0xf]  ;;  %v7584_v0 = vld [vmem:[#allocation2 + $0x18] sm:$0xff]   ;;  %v1855_v39 = vld [vmem:[#allocation2] sm:$0xe] }
  0xe2   : > { %7082 = vmatprep.mubr.bf16.mxu0 %v6275_v12  ;;  %v803_v25 = vsel %vm7876_vm9, %v632_v26, %v802_v24  ;;  %v641_v8 = vsel %vm7871_vm8, %v633_v46, %v640_v55  ;;  %v807_v7 = vsel %vm7885_vm10, %v642_v59, %v806_v28  ;;  %v6277_v41 = vcombine.low %v3645_v60, %v3648_v5  ;;  %v7592_v38 = vld [vmem:[%s9501_s1 + $0xa8] sm:$0xff]   ;;  %v7598_v46 = vld [vmem:[%s9501_s1 + $0xb0] sm:$0xff]   ;;  %v1857_v50 = vld [vmem:[#allocation2 + $0x18] sm:$0xe] }
  0xe3   : > { %6867 = vmatmul.mubr.bf16.vlgmr.msra.gmra.mrb[0].mxu1 %v6072_v57  ;;  %804 = vst [vmem:[#allocation2 + $0xc0] sm:$0xf] %v803_v25  ;;  %805 = vst [vmem:[#allocation2 + $0xc4] sm:$0xf] %v641_v8  ;;  %v3000_v42 = vshll.u32 %v8399_v48, 16  ;;  %v3004_v3 = vshrl.u32 %v8399_v48, 16  ;;  %v6077_v24 = vcombine.low %v7665_v63, %v8485_v22 }
  0xe4   : > { %6899 = vmatpush3.bf16.msra.mxu1 %v7658_v54  ;;  %6870 = vmatprep.mubr.bf16.mxu1 %v6073_v23  ;;  %808 = vst [vmem:[#allocation2 + $0xc8] sm:$0x1] %v807_v7  ;;  %v3010_v26 = vshll.u32 %v8401_v36, 16  ;;  %v1856_v54 = vld [vmem:[#allocation2 + $0xc] sm:$0xe]  ;;  %v1908_v49 = vrot.slane %v8411_v16, 5 }
  0xe5   : > { %6900 = vmatprep.subr.bf16.mxu1 %v7573_v29  ;;  %v8493_v28 = vrot.slane %v3000_v42, 5  ;;  %v3006_v48 = vrot.slane %v3004_v3, 4  ;;  %v1915_v55 = vrot.slane %v8439_v17, 5  ;;  %v1922_v59 = vrot.slane %v8442_v19, 5  ;;  %v7667_v25 = vld [vmem:[#allocation2 + $0x54] sm:$0xf] }
  0xe6   : > { %v8505_v60 = vld [vmem:[#allocation2 + $0x58] sm:$0xf]  ;;  %v7669_v5 = vld [vmem:[#allocation2 + $0x8] sm:$0x1]  ;;  %v7670_v7 = vld [vmem:[#allocation2 + $0x14] sm:$0x1] }
  0xe7   : > { %9530 = vst [vmem:[#allocation3_spill] sm:$0xff] %v8493_v28  ;;  %v6078_v36 = vcombine.low %v7667_v25, %v8505_v60  ;;  %v1911_v8 = vrot.slane %v7669_v5, 5  ;;  %v1918_v6 = vrot.slane %v7670_v7, 5  ;;  %v7587_v17 = vld [vmem:[#allocation2 + $0x24] sm:$0xff]   ;;  %v1929_v35 = vrot.slane %v8468_v20, 5 }
  0xe8   : > { %6901 = vmatpush3.bf16.msra.mxu1 %v7573_v29  ;;  %v1858_v19 = vld [vmem:[#allocation2 + $0x24] sm:$0xe]  ;;  %v6097_v10 = vrot.slane %v1857_v50, 9  ;;  %v7673_v42 = vld [vmem:[#allocation2 + $0x20] sm:$0x1] }
  0xe9   : > { %6902 = vmatprep.subr.bf16.mxu1 %v7577_v56  ;;  %7083 = vmatmul.mubr.bf16.gmra.mrb[24].mxu0 %v6276_v45  ;;  %v8508_v45 = vld [vmem:[#allocation2 + $0x64] sm:$0xf]  ;;  %v1925_v20 = vrot.slane %v7673_v42, 5  ;;  %v1859_v3 = vld [vmem:[#allocation2 + $0x30] sm:$0xe] }
  0xea   : > { %7086 = vmatprep.mubr.bf16.mxu0 %v6277_v41  ;;  %v3495_v21 = vld [vmem:[#allocation2 + $0xc0] sm:$0xe]  ;;  %v2772_v15 = vld [vmem:[#allocation2 + $0xc4] sm:$0xf]  ;;  %v7590_v41 = vld [vmem:[#allocation2 + $0x30] sm:$0xff]   ;;  %v8553_v50 = vsel %vm7992_vm13, %v6097_v10, %v1922_v59 }
  0xeb   : > { %6871 = vmatmul.mubr.bf16.gmra.mrb[4].mxu1 %v6074_v33  ;;  %v2773_v57 = vld [vmem:[#allocation2 + $0xc8] sm:$0x1]  ;;  %v6246_v27 = vrot.slane %v3495_v21, 9  ;;  %v3651_v11 = vrot.slane %v2772_v15, 5  ;;  %v7671_v33 = vld [vmem:[#allocation2 + $0x60] sm:$0xf] }
  0xec   : > { %6874 = vmatprep.mubr.bf16.mxu1 %v6075_v58  ;;  %6903 = vmatpush3.bf16.msra.mxu1 %v7577_v56  ;;  %v3654_v23 = vrot.slane %v2773_v57, 5  ;;  %v3007_v56 = vor.u32 %v3006_v48, %v8493_v28  ;;  %v6079_v16 = vcombine.low %v7671_v33, %v8508_v45  ;;  %v8512_v58 = vrot.slane %v3010_v26, 5  ;;  %v8522_v63 = vld [vmem:[#allocation2 + $0x3c] sm:$0xe]  ;;  %v7678_v25 = vld [vmem:[#allocation2 + $0x38] sm:$0x1] }
  0xed   : > { %6904 = vmatprep.subr.bf16.mxu1 %v7581_v51  ;;  %v3652_v29 = vsel %vm7992_vm13, %v6246_v27, %v3651_v11  ;;  %v3653_v12 = vrot.slane %v3651_v11, 4  ;;  %v6095_v21 = vrot.slane %v1855_v39, 9  ;;  %v1910_v15 = vrot.slane %v1908_v49, 4  ;;  %v7677_v39 = vld [vmem:[#allocation2 + $0x78] sm:$0xf] }
  0xee   : > { %9531 = vst [vmem:[#allocation4_spill] sm:$0xff] %v8512_v58  ;;  %v1917_v57 = vrot.slane %v1915_v55, 4  ;;  %v1924_v27 = vrot.slane %v1922_v59, 4  ;;  %v8520_v11 = vrot.slane %v3007_v56, 4  ;;  %v1943_v48 = vrot.slane %v8480_v13, 5  ;;  %v7600_v59 = vld [vmem:[%s9501_s1 + $0x1d0] sm:$0xff]  }
  0xef   : > { %v3655_v32 = vsel %vm7992_vm13, %v3653_v12, %v3654_v23  ;;  %v6098_v23 = vrot.slane %v1858_v19, 9  ;;  %v6081_v26 = vcombine.low %v7677_v39, %v8261_v4  ;;  %v8545_v13 = vsel %vm7992_vm13, %v1910_v15, %v1911_v8  ;;  %v4365_v42 = vld [vmem:[#allocation2 + $0x18] sm:$0xf]  ;;  %v7692_v58 = vld [vmem:[#allocation2 + $0xa4] sm:$0x1] }
  0xf0   : > { %6905 = vmatpush3.bf16.msra.mxu1 %v7581_v51  ;;  %v6278_v40 = vcombine.low %v3652_v29, %v3655_v32  ;;  %v7604_v51 = vld [vmem:[%s9501_s1 + $0xb8] sm:$0xff]   ;;  %9532 = vst [vmem:[#allocation5_spill] sm:$0xff] %v8520_v11  ;;  %v7674_v29 = vld [vmem:[#allocation2 + $0x2c] sm:$0x1]  ;;  %v8549_v4 = vsel %vm7992_vm13, %v1917_v57, %v1918_v6  ;;  %v6099_v56 = vrot.slane %v1859_v3, 9  ;;  %v6100_v5 = vrot.slane %v8522_v63, 9 }
  0xf1   : > { %6906 = vmatprep.subr.bf16.mxu1 %v7586_v1  ;;  %v1932_v12 = vrot.slane %v7674_v29, 5  ;;  %v7675_v32 = vld [vmem:[#allocation2 + $0x6c] sm:$0xf]  ;;  %v1945_v7 = vrot.slane %v1943_v48, 4  ;;  %v7679_v6 = vld [vmem:[#allocation2 + $0x44] sm:$0x1] }
  0xf2   : > { %7087 = vmatmul.mubr.bf16.gmra.mrb[28].mxu0 %v6278_v40  ;;  %v1946_v33 = vrot.slane %v7679_v6, 5  ;;  %v1950_v57 = vrot.slane %v8485_v22, 5  ;;  %v8596_v63 = vld [vmem:[#allocation2 + $0x60] sm:$0xe]  ;;  %v7606_v22 = vld [vmem:[%s9501_s1 + $0x1d8] sm:$0xff]   ;;  %v8607_v29 = vsel %vm7992_vm13, %v6100_v5, %v1943_v48  ;;  %v1964_v39 = vrot.slane %v8508_v45, 5 }
  0xf3   : > { %6875 = vmatmul.mubr.bf16.gmra.mrb[8].mxu1 %v6076_v14  ;;  %7106 = vmatprep.mubr.bf16.mxu0 %v7584_v0  ;;  %v7594_v14 = vld [vmem:[%s9501_s1 + $0x1c8] sm:$0xff]   ;;  %v8526_v0 = vld [vmem:[#allocation2 + $0x70] sm:$0xf] }
  0xf4   : > { %6878 = vmatprep.mubr.bf16.mxu1 %v6077_v24  ;;  %6907 = vmatpush3.bf16.msra.mxu1 %v7586_v1  ;;  %v6096_v1 = vrot.slane %v1856_v54, 9  ;;  %v1931_v24 = vrot.slane %v1929_v35, 4  ;;  %v6080_v40 = vcombine.low %v7675_v32, %v8526_v0  ;;  %v8532_v54 = vsel %vm7992_vm13, %v6095_v21, %v1908_v49  ;;  %v7596_v21 = vld [vmem:[#allocation2 + $0x48] sm:$0xff]   ;;  %v4368_v32 = vld [vmem:[#allocation2 + $0x24] sm:$0xf] }
  0xf5   : > { %6908 = vmatprep.subr.bf16.mxu1 %v7592_v38  ;;  %v8557_v49 = vsel %vm7992_vm13, %v1924_v27, %v1925_v20  ;;  %v1862_v27 = vld [vmem:[#allocation2 + $0x54] sm:$0xe]  ;;  %v1952_v48 = vrot.slane %v1950_v57, 4  ;;  %v7680_v5 = vld [vmem:[#allocation2 + $0x50] sm:$0x1]  ;;  %v4441_v15 = vshll.u32 %v4368_v32, 16 }
  0xf6   : > { %v8570_v8 = vsel %vm7992_vm13, %v1931_v24, %v1932_v12  ;;  %v4366_v24 = vld [vmem:[#allocation2 + $0x1c] sm:$0xf]  ;;  %v8611_v12 = vsel %vm7992_vm13, %v1945_v7, %v1946_v33  ;;  %v6102_v6 = vrot.slane %v1862_v27, 9  ;;  %v7599_v20 = vld [vmem:[#allocation2 + $0x54] sm:$0xff]  }
  0xf7   : > { %v7681_v7 = vld [vmem:[#allocation2 + $0x5c] sm:$0x1]  ;;  %v4423_v3 = vshll.u32 %v4366_v24, 16 }
  0xf8   : > { %6909 = vmatpush3.bf16.msra.mxu1 %v7592_v38  ;;  %v1936_v38 = vrot.slane %v8471_v44, 5  ;;  %v8541_v44 = vld [vmem:[%s9501_s1 + $0xc0] sm:$0xff]   ;;  %v1960_v33 = vrot.slane %v7681_v7, 5  ;;  %v4371_v7 = vld [vmem:[#allocation2 + $0x30] sm:$0xf] }
  0xf9   : > { %6910 = vmatprep.subr.bf16.mxu1 %v7598_v46 }
  0xfa   : > { %7107 = vmatmul.mubr.bf16.vlgmr.msra.gmra.mrb[0].mxu0 %v7587_v17  ;;  %v7593_v17 = vld [vmem:[#allocation2 + $0x3c] sm:$0xff]  }
  0xfb   : > { %6879 = vmatmul.mubr.bf16.gmra.mrb[12].mxu1 %v6078_v36  ;;  %7139 = vmatpush3.bf16.msra.mxu0 %v8328_v37  ;;  %v1939_v36 = vrot.slane %v7678_v25, 5  ;;  %v1938_v37 = vrot.slane %v1936_v38, 4  ;;  %v4369_v25 = vld [vmem:[#allocation2 + $0x28] sm:$0xf] }
  0xfc   : > { %6882 = vmatprep.mubr.bf16.mxu1 %v6079_v16  ;;  %6911 = vmatpush3.bf16.msra.mxu1 %v7598_v46  ;;  %v8536_v46 = vsel %vm7992_vm13, %v6096_v1, %v1915_v55  ;;  %v8562_v55 = vsel %vm7992_vm13, %v6098_v23, %v1929_v35  ;;  %v6082_v16 = vcombine.low %v8276_v61, %v8286_v9  ;;  %v4447_v10 = vshll.u32 %v4369_v25, 16 }
  0xfd   : > { %6912 = vmatprep.subr.bf16.mxu1 %v7604_v51  ;;  %7110 = vmatprep.mubr.bf16.mxu0 %v7590_v41  ;;  %v8594_v23 = vsel %vm7992_vm13, %v6099_v56, %v1936_v38  ;;  %v4417_v56 = vshll.u32 %v4365_v42, 16  ;;  %v4451_v1 = vshrl.u32 %v4369_v25, 16  ;;  %v7602_v41 = vld [vmem:[#allocation2 + $0x60] sm:$0xff]   ;;  %v1864_v25 = vld [vmem:[#allocation2 + $0x6c] sm:$0xe]  ;;  %v4443_v9 = vrot.slane %v4441_v15, 5 }
  0xfe   : > { %7140 = vmatprep.subr.bf16.mxu0 %v7594_v14  ;;  %v4465_v15 = vshll.u32 %v4371_v7, 16 }
  0xff   : > { %7141 = vmatpush3.bf16.msra.mxu0 %v7594_v14  ;;  %v8603_v14 = vsel %vm7992_vm13, %v1938_v37, %v1939_v36  ;;  %v7610_v36 = vld [vmem:[%s9501_s1 + $0x1e0] sm:$0xff]   ;;  %v1953_v37 = vrot.slane %v7680_v5, 5  ;;  %v1966_v5 = vrot.slane %v1964_v39, 4  ;;  %v4419_v19 = vrot.slane %v4417_v56, 5 }
 0x100   : > { %6913 = vmatpush3.bf16.msra.mxu1 %v7604_v51  ;;  %v1861_v51 = vld [vmem:[#allocation2 + $0x48] sm:$0xe]  ;;  %7142 = vmatprep.subr.bf16.mxu0 %v7600_v59 }
 0x101   : > { %6946 = vmatprep.subr.bf16.mxu1 %v8541_v44  ;;  %v6101_v38 = vrot.slane %v1861_v51, 9  ;;  %v7682_v51 = vld [vmem:[#allocation2 + $0x68] sm:$0x1] }
 0x102   : > { %7111 = vmatmul.mubr.bf16.gmra.mrb[4].mxu0 %v7593_v17  ;;  %v1967_v45 = vrot.slane %v7682_v51, 5  ;;  %v4438_v17 = vshrl.u32 %v4368_v32, 16  ;;  %v4367_v32 = vld [vmem:[#allocation2 + $0x20] sm:$0x1]  ;;  %v9533_v51 = vcombine.low %v8301_v47, %v8306_v62  ;;  %v4370_v62 = vld [vmem:[#allocation2 + $0x2c] sm:$0x1] }
 0x103   : > { %6883 = vmatmul.mubr.bf16.gmra.mrb[16].mxu1 %v6080_v40  ;;  %v1957_v40 = vrot.slane %v8505_v60, 5  ;;  %7114 = vmatprep.mubr.bf16.mxu0 %v7596_v21  ;;  %v6103_v60 = vrot.slane %v8596_v63, 9  ;;  %v8625_v63 = vsel %vm7992_vm13, %v6101_v38, %v1950_v57  ;;  %v8641_v38 = vrot.slane %v4423_v3, 5 }
 0x104   : > { %6886 = vmatprep.mubr.bf16.mxu1 %v6081_v26  ;;  %v4414_v26 = vshrl.u32 %v4365_v42, 16  ;;  %7143 = vmatpush3.bf16.msra.mxu0 %v7600_v59  ;;  %v4427_v42 = vshrl.u32 %v4366_v24, 16  ;;  %v8629_v24 = vsel %vm7992_vm13, %v1952_v48, %v1953_v37  ;;  %v1971_v48 = vrot.slane %v8526_v0, 5  ;;  %v4372_v37 = vld [vmem:[#allocation2 + $0x34] sm:$0xf] }
 0x105   : > { %7144 = vmatprep.subr.bf16.mxu0 %v7606_v22  ;;  %v1959_v35 = vrot.slane %v1957_v40, 4  ;;  %v8639_v57 = vsel %vm7992_vm13, %v6102_v6, %v1957_v40  ;;  %v4440_v61 = vrot.slane %v4438_v17, 4  ;;  %v8655_v3 = vsel %vm7992_vm13, %v6103_v60, %v1964_v39  ;;  %v7683_v60 = vld [vmem:[#allocation2 + $0x74] sm:$0x1]  ;;  %v7605_v17 = vld [vmem:[#allocation2 + $0x6c] sm:$0xff]  }
 0x106   : > { %v4416_v27 = vrot.slane %v4414_v26, 4  ;;  %v7614_v26 = vld [vmem:[%s9501_s1 + $0x1e8] sm:$0xff]   ;;  %v4429_v56 = vrot.slane %v4427_v42, 4  ;;  %v8659_v0 = vsel %vm7992_vm13, %v1966_v5, %v1967_v45  ;;  %v4462_v6 = vshrl.u32 %v4371_v7, 16  ;;  %v1865_v7 = vld [vmem:[#allocation2 + $0x78] sm:$0xe] }
 0x107   : > { %v8651_v40 = vsel %vm7992_vm13, %v1959_v35, %v1960_v33  ;;  %v4475_v42 = vshrl.u32 %v4372_v37, 16  ;;  %v7618_v35 = vld [vmem:[%s9501_s1 + $0x1f0] sm:$0xff]   ;;  %v4433_v39 = vshll.u32 %v4367_v32, 16  ;;  %v6104_v33 = vrot.slane %v1864_v25, 9  ;;  %v7684_v32 = vld [vmem:[#allocation2 + $0x7c] sm:$0xf] }
 0x108   : > { %7145 = vmatpush3.bf16.msra.mxu0 %v7606_v22  ;;  %v4453_v22 = vrot.slane %v4451_v1, 4  ;;  %v4420_v47 = vor.u32 %v4419_v19, %v4416_v27  ;;  %v4430_v1 = vor.u32 %v4429_v56, %v8641_v38  ;;  %v1974_v45 = vrot.slane %v7683_v60, 5  ;;  %v4373_v56 = vld [vmem:[#allocation2 + $0x38] sm:$0x1] }
 0x109   : > { %7146 = vmatprep.subr.bf16.mxu0 %v7610_v36  ;;  %v1973_v19 = vrot.slane %v1971_v48, 4  ;;  %v4457_v27 = vshll.u32 %v4370_v62, 16  ;;  %v1978_v25 = vrot.slane %v7684_v32, 5  ;;  %v4467_v60 = vrot.slane %v4465_v15, 5 }
 0x10a   : > { %7115 = vmatmul.mubr.bf16.gmra.mrb[8].mxu0 %v7599_v20  ;;  %v4444_v20 = vor.u32 %v4443_v9, %v4440_v61  ;;  %v4477_v61 = vrot.slane %v4475_v42, 4  ;;  %v9534_v9 = vcombine.low %v8346_v31, %v8361_v52  ;;  %v8681_v32 = vsel %vm7992_vm13, %v6104_v33, %v1971_v48  ;;  %v7622_v31 = vld [vmem:[%s9501_s1 + $0x1f8] sm:$0xff]   ;;  %v1866_v42 = vld [vmem:[#allocation2 + $0x84] sm:$0xe]  ;;  %v7685_v33 = vld [vmem:[#allocation2 + $0x80] sm:$0x1] }
 0x10b   : > { %6887 = vmatmul.mubr.bf16.gmra.mrb[20].mxu1 %v6082_v16  ;;  %v8647_v16 = vrot.slane %v4447_v10, 5  ;;  %v4471_v10 = vshll.u32 %v4372_v37, 16  ;;  %7118 = vmatprep.mubr.bf16.mxu0 %v7602_v41  ;;  %v8670_v37 = vrot.slane %v4420_v47, 4  ;;  %v4435_v47 = vrot.slane %v4433_v39, 5 }
 0x10c   : > { %6890 = vmatprep.mubr.bf16.mxu1 %v9533_v51  ;;  %7147 = vmatpush3.bf16.msra.mxu0 %v7610_v36  ;;  %v4464_v51 = vrot.slane %v4462_v6, 4  ;;  %v4431_v36 = vrot.slane %v4430_v1, 4  ;;  %v9535_v6 = vcombine.low %v8369_v2, %v8377_v30  ;;  %v8691_v52 = vsel %vm7992_vm13, %v1973_v19, %v1974_v45  ;;  %v4374_v1 = vld [vmem:[#allocation2 + $0x3c] sm:$0xf]  ;;  %v4375_v30 = vld [vmem:[#allocation2 + $0x40] sm:$0xf] }
 0x10d   : > { %7148 = vmatprep.subr.bf16.mxu0 %v7614_v26  ;;  %v4454_v5 = vor.u32 %v4453_v22, %v8647_v16  ;;  %v8672_v21 = vrot.slane %v4471_v10, 5  ;;  %v7607_v22 = vld [vmem:[#allocation2 + $0x78] sm:$0xff]   ;;  %v4459_v10 = vrot.slane %v4457_v27, 5  ;;  %v6105_v48 = vrot.slane %v1865_v7, 9  ;;  %v7686_v19 = vld [vmem:[#allocation2 + $0x88] sm:$0xf] }
 0x10e   : > { %v1980_v39 = vrot.slane %v1978_v25, 4  ;;  %v4481_v2 = vshll.u32 %v4373_v56, 16  ;;  %v4468_v62 = vor.u32 %v4467_v60, %v4464_v51  ;;  %v4486_v7 = vshrl.u32 %v4374_v1, 16  ;;  %v4377_v60 = vld [vmem:[#allocation2 + $0x48] sm:$0xf] }
 0x10f   : > { %v4455_v15 = vrot.slane %v4454_v5, 4  ;;  %v4478_v45 = vor.u32 %v4477_v61, %v8672_v21  ;;  %v4436_v5 = vsel %vm7862_vm6, %v4431_v36, %v4435_v47  ;;  %v4495_v36 = vshll.u32 %v4375_v30, 16  ;;  %v8712_v61 = vld [vmem:[#allocation2 + $0x4c] sm:$0xf] }
 0x110   : > { %7149 = vmatpush3.bf16.msra.mxu0 %v7614_v26  ;;  %v4445_v26 = vrot.slane %v4444_v20, 4  ;;  %v1985_v20 = vrot.slane %v7686_v19, 5  ;;  %v4499_v51 = vshrl.u32 %v4375_v30, 16  ;;  %v8716_v47 = vsel %vm7992_vm13, %v6105_v48, %v1978_v25  ;;  %v7687_v27 = vld [vmem:[#allocation2 + $0x8c] sm:$0x1] }
 0x111   : > { %7150 = vmatprep.subr.bf16.mxu0 %v7618_v35  ;;  %v6106_v19 = vrot.slane %v1866_v42, 9  ;;  %v1988_v41 = vrot.slane %v7687_v27, 5  ;;  %v9537_v59 = vcombine.low %v8389_v18, %v8395_v53  ;;  %v9538_v42 = vcombine.low %v8532_v54, %v8545_v13 }
 0x112   : > { %7119 = vmatmul.mubr.bf16.gmra.mrb[12].mxu0 %v7605_v17  ;;  %v8705_v17 = vld [vmem:[%s9501_s1 + $0x200] sm:$0xff]   ;;  %v4450_v56 = vsel %vm7862_vm6, %v4445_v26, %v8647_v16  ;;  %v4380_v16 = vld [vmem:[#allocation2 + $0x54] sm:$0xf]  ;;  %v8722_v26 = vld [vmem:[#allocation2 + $0x58] sm:$0xf]  ;;  %v1987_v30 = vrot.slane %v1985_v20, 4 }
 0x113   : > { %6891 = vmatmul.mubr.bf16.gmra.mrb[24].mxu1 %v9534_v9  ;;  %v1981_v9 = vrot.slane %v7685_v33, 5  ;;  %7122 = vmatprep.mubr.bf16.mxu0 %v7607_v22  ;;  %v7611_v22 = vld [vmem:[#allocation2 + $0x90] sm:$0xff]   ;;  %v4483_v33 = vrot.slane %v4481_v2, 5  ;;  %9536 = vst [vmem:[#allocation6_spill] sm:$0xff] %v8722_v26  ;;  %v8735_v2 = vrot.slane %v4495_v36, 5  ;;  %v4510_v27 = vshrl.u32 %v4377_v60, 16 }
 0x114   : > { %6894 = vmatprep.mubr.bf16.mxu1 %v9535_v6  ;;  %v4426_v6 = vsel %vm7862_vm6, %v8670_v37, %v8641_v38  ;;  %7151 = vmatpush3.bf16.msra.mxu0 %v7618_v35  ;;  %v4489_v38 = vshll.u32 %v4374_v1, 16  ;;  %v7609_v37 = vld [vmem:[#allocation2 + $0x84] sm:$0xff]   ;;  %v4460_v35 = vsel %vm7862_vm6, %v4455_v15, %v4459_v10  ;;  %v4469_v15 = vrot.slane %v4468_v62, 4 }
 0x115   : > { %7152 = vmatprep.subr.bf16.mxu0 %v7622_v31  ;;  %v8720_v1 = vsel %vm7992_vm13, %v1980_v39, %v1981_v9  ;;  %v4479_v10 = vrot.slane %v4478_v45, 4  ;;  %v8727_v25 = vcombine.low %v4426_v6, %v4436_v5  ;;  %v8729_v48 = vcombine.low %v4450_v56, %v4460_v35  ;;  %v4376_v62 = vld [vmem:[#allocation2 + $0x44] sm:$0x1] }
 0x116   : > { %v4488_v39 = vrot.slane %v4486_v7, 4  ;;  %v4491_v9 = vrot.slane %v4489_v38, 5  ;;  %v4501_v45 = vrot.slane %v4499_v51, 4  ;;  %v4513_v18 = vshll.u32 %v4377_v60, 16  ;;  %v7613_v51 = vld [vmem:[#allocation2 + $0x9c] sm:$0xff]  }
 0x117   : > { %v4519_v6 = vshll.u32 %v8712_v61, 16  ;;  %v4523_v54 = vshrl.u32 %v8712_v61, 16  ;;  %v4534_v13 = vshrl.u32 %v4380_v16, 16  ;;  %v4537_v5 = vshll.u32 %v4380_v16, 16 }
 0x118   : > { %7153 = vmatpush3.bf16.msra.mxu0 %v7622_v31  ;;  %v1867_v31 = vld [vmem:[#allocation2 + $0x90] sm:$0xe]  ;;  %v4543_v7 = vshll.u32 %v8722_v26, 16  ;;  %v4547_v38 = vshrl.u32 %v8722_v26, 16  ;;  %v4474_v56 = vsel %vm7862_vm6, %v4469_v15, %v8672_v21  ;;  %v8754_v35 = vsel %vm7992_vm13, %v1987_v30, %v1988_v41  ;;  %v7615_v15 = vld [vmem:[#allocation2 + $0xa8] sm:$0xff]  }
 0x119   : > { %7186 = vmatprep.subr.bf16.mxu0 %v8705_v17  ;;  %v4505_v36 = vshll.u32 %v4376_v62, 16  ;;  %v4492_v60 = vor.u32 %v4491_v9, %v4488_v39  ;;  %v4512_v16 = vrot.slane %v4510_v27, 4  ;;  %v4515_v21 = vrot.slane %v4513_v18, 5  ;;  %v8764_v30 = vld [vmem:[#allocation2 + $0x5c] sm:$0x1] }
 0x11a   : > { %7123 = vmatmul.mubr.bf16.gmra.mrb[16].mxu0 %v7609_v37  ;;  %v7612_v37 = vld [vmem:[%s9501_s1 + $0xc8] sm:$0xff]   ;;  %v8762_v53 = vrot.slane %v4519_v6, 5  ;;  %v4525_v41 = vrot.slane %v4523_v54, 4  ;;  %9540 = vst [vmem:[#allocation8_spill] sm:$0xff] %v8764_v30  ;;  %v8766_v62 = vld [vmem:[#allocation2 + $0x9c] sm:$0xe]  ;;  %v9541_v27 = vcombine.low %v8536_v46, %v8549_v4 }
 0x11b   : > { %6895 = vmatmul.mubr.bf16.gmra.mrb[28].mxu1 %v9537_v59  ;;  %v8741_v59 = vsel %vm7992_vm13, %v6106_v19, %v1985_v20  ;;  %7126 = vmatprep.mubr.bf16.mxu0 %v7611_v22  ;;  %v4484_v20 = vsel %vm7862_vm6, %v4479_v10, %v4483_v33  ;;  %v4502_v22 = vor.u32 %v4501_v45, %v8735_v2  ;;  %v8760_v19 = vld [vmem:[#allocation2 + $0x50] sm:$0x1]  ;;  %v7688_v33 = vld [vmem:[#allocation2 + $0x94] sm:$0xf]  ;;  %v4536_v28 = vrot.slane %v4534_v13, 4 }
 0x11c   : > { %6914 = vmatprep.mubr.bf16.mxu1 %v9538_v42  ;;  %9539 = vst [vmem:[#allocation7_spill] sm:$0xff] %v8760_v19  ;;  %v6107_v42 = vrot.slane %v1867_v31, 9  ;;  %v1992_v10 = vrot.slane %v7688_v33, 5  ;;  %v4539_v11 = vrot.slane %v4537_v5, 5  ;;  %v8768_v39 = vrot.slane %v4543_v7, 5 }
 0x11d   : > { %v4549_v9 = vrot.slane %v4547_v38, 4  ;;  %v4383_v45 = vld [vmem:[#allocation2 + $0x60] sm:$0xf]  ;;  %v8773_v18 = vcombine.low %v4474_v56, %v4484_v20  ;;  %v8777_v6 = vrot.slane %v4505_v36, 5  ;;  %v4529_v54 = vshll.u32 %v8760_v19, 16  ;;  %v7616_v56 = vld [vmem:[%s9501_s1 + $0xd0] sm:$0xff]  }
 0x11e   : > { %v9542_v13 = vcombine.low %v8553_v50, %v8557_v49  ;;  %v8784_v5 = vrot.slane %v4492_v60, 4  ;;  %v8786_v7 = vrot.slane %v4502_v22, 4  ;;  %v7689_v46 = vld [vmem:[#allocation2 + $0x98] sm:$0x1]  ;;  %v4516_v38 = vor.u32 %v4515_v21, %v4512_v16  ;;  %v7690_v50 = vld [vmem:[#allocation2 + $0xa0] sm:$0xf] }
 0x11f   : > { %v1995_v4 = vrot.slane %v7689_v46, 5  ;;  %v8793_v20 = vsel %vm7992_vm13, %v6107_v42, %v1992_v10  ;;  %v1999_v49 = vrot.slane %v7690_v50, 5  ;;  %v4553_v36 = vshll.u32 %v8764_v30, 16  ;;  %v8797_v60 = vld [vmem:[#allocation2 + $0x64] sm:$0xf] }
 0x120   : > { %9543 = vst [vmem:[#allocation9_spill] sm:$0xff] %v8797_v60  ;;  %v1994_v22 = vrot.slane %v1992_v10, 4  ;;  %v4540_v16 = vor.u32 %v4539_v11, %v4536_v28  ;;  %v4550_v21 = vor.u32 %v4549_v9, %v8768_v39  ;;  %v1869_v33 = vld [vmem:[#allocation2 + $0xa8] sm:$0xe]  ;;  %v8800_v46 = vrot.slane %v4529_v54, 5  ;;  %v7620_v11 = vld [vmem:[%s9501_s1 + $0xd8] sm:$0xff]  }
 0x121   : > { %v6108_v42 = vrot.slane %v8766_v62, 9  ;;  %v4561_v31 = vshll.u32 %v4383_v45, 16  ;;  %v4517_v50 = vrot.slane %v4516_v38, 4  ;;  %v2002_v30 = vrot.slane %v7692_v58, 5  ;;  %v7617_v62 = vld [vmem:[#allocation2 + $0xb4] sm:$0xff]  }
 0x122   : > { %7127 = vmatmul.mubr.bf16.gmra.mrb[20].mxu0 %v7613_v51  ;;  %v4567_v51 = vshll.u32 %v8797_v60, 16  ;;  %v4571_v28 = vshrl.u32 %v8797_v60, 16  ;;  %v2001_v10 = vrot.slane %v1999_v49, 4  ;;  %v4555_v9 = vrot.slane %v4553_v36, 5  ;;  %v7693_v26 = vld [vmem:[#allocation2 + $0xb0] sm:$0x1] }
 0x123   : > { %6915 = vmatmul.mubr.bf16.vlgmr.msra.gmra.mrb[0].mxu1 %v9541_v27  ;;  %v7691_v27 = vld [vmem:[#allocation2 + $0xac] sm:$0xf]  ;;  %7130 = vmatprep.mubr.bf16.mxu0 %v7615_v15  ;;  %v6109_v54 = vrot.slane %v1869_v33, 9  ;;  %v2009_v58 = vrot.slane %v7693_v26, 5  ;;  %v9544_v19 = vcombine.low %v8562_v55, %v8570_v8  ;;  %v7623_v60 = vld [vmem:[%s9501_s1 + $0xe0] sm:$0xff]   ;;  %v4508_v36 = vsel %vm7862_vm6, %v8786_v7, %v8777_v6 }
 0x124   : > { %6947 = vmatpush3.bf16.msra.mxu1 %v8541_v44  ;;  %6918 = vmatprep.mubr.bf16.mxu1 %v9542_v13  ;;  %v4526_v44 = vor.u32 %v4525_v41, %v8762_v53  ;;  %v2006_v13 = vrot.slane %v7691_v27, 5  ;;  %v4558_v41 = vshrl.u32 %v4383_v45, 16  ;;  %v7619_v27 = vld [vmem:[#allocation2 + $0xc0] sm:$0xff]   ;;  %v4541_v45 = vrot.slane %v4540_v16, 4  ;;  %v8822_v16 = vld [vmem:[#allocation2 + $0x68] sm:$0x1] }
 0x125   : > { %6948 = vmatprep.subr.bf16.mxu1 %v7612_v37  ;;  %v9545_v55 = vcombine.low %v8594_v23, %v8603_v14  ;;  %v8829_v8 = vsel %vm7992_vm13, %v1994_v22, %v1995_v4  ;;  %v4573_v6 = vrot.slane %v4571_v28, 4  ;;  %v8845_v14 = vsel %vm7992_vm13, %v2001_v10, %v2002_v30  ;;  %v8851_v4 = vld [vmem:[#allocation2 + $0x70] sm:$0xf]  ;;  %v8863_v22 = vld [vmem:[#allocation2 + $0xb4] sm:$0xe] }
 0x126   : > { %v4527_v15 = vrot.slane %v4526_v44, 4  ;;  %v2008_v38 = vrot.slane %v2006_v13, 4  ;;  %v4498_v44 = vsel %vm7862_vm6, %v8784_v5, %v8735_v2  ;;  %v4560_v26 = vrot.slane %v4558_v41, 4  ;;  %v4386_v5 = vld [vmem:[#allocation2 + $0x6c] sm:$0xf]  ;;  %9547 = vst [vmem:[#allocation11_spill] sm:$0xff] %v8845_v14 }
 0x127   : > { %v8833_v2 = vsel %vm7992_vm13, %v6108_v42, %v1999_v49  ;;  %v8849_v7 = vsel %vm7992_vm13, %v6109_v54, %v2006_v13  ;;  %9549 = vst [vmem:[#allocation13_spill] sm:$0xff] %v8851_v4  ;;  %v4577_v30 = vshll.u32 %v8822_v16, 16  ;;  %v8865_v33 = vcombine.low %v4498_v44, %v4508_v36  ;;  %v7694_v42 = vld [vmem:[#allocation2 + $0xb8] sm:$0xf]  ;;  %v8874_v54 = vld [vmem:[#allocation2 + $0x7c] sm:$0xf] }
 0x128   : > { %6949 = vmatpush3.bf16.msra.mxu1 %v7612_v37  ;;  %v4551_v37 = vrot.slane %v4550_v21, 4  ;;  %v4563_v21 = vrot.slane %v4561_v31, 5  ;;  %9546 = vst [vmem:[#allocation10_spill] sm:$0xff] %v8833_v2  ;;  %v4522_v31 = vsel %vm7862_vm6, %v4517_v50, %v8762_v53  ;;  %v4532_v23 = vsel %vm7862_vm6, %v4527_v15, %v8800_v46  ;;  %9548 = vst [vmem:[#allocation12_spill] sm:$0xff] %v8849_v7  ;;  %v4389_v41 = vld [vmem:[#allocation2 + $0x78] sm:$0xf] }
 0x129   : > { %6950 = vmatprep.subr.bf16.mxu1 %v7616_v56  ;;  %v8860_v49 = vsel %vm7992_vm13, %v2008_v38, %v2009_v58  ;;  %v7621_v50 = vld [vmem:[#allocation2 + $0xcc] sm:$0xff]   ;;  %v4582_v15 = vshrl.u32 %v4386_v5, 16  ;;  %v4585_v10 = vshll.u32 %v4386_v5, 16  ;;  %9551 = vst [vmem:[#allocation15_spill] sm:$0xff] %v8874_v54  ;;  %v4392_v38 = vld [vmem:[#allocation2 + $0x84] sm:$0xf] }
 0x12a   : > { %7131 = vmatmul.mubr.bf16.gmra.mrb[24].mxu0 %v7617_v62  ;;  %v4556_v53 = vsel %vm7862_vm6, %v4551_v37, %v4555_v9  ;;  %9550 = vst [vmem:[#allocation14_spill] sm:$0xff] %v8860_v49  ;;  %v4564_v46 = vor.u32 %v4563_v21, %v4560_v26  ;;  %v4591_v9 = vshll.u32 %v8851_v4, 16  ;;  %v8876_v62 = vcombine.low %v4522_v31, %v4532_v23  ;;  %v8884_v37 = vld [vmem:[#allocation2 + $0x74] sm:$0x1]  ;;  %v8889_v21 = vld [vmem:[#allocation2 + $0x88] sm:$0xf] }
 0x12b   : > { %6919 = vmatmul.mubr.bf16.gmra.mrb[4].mxu1 %v9544_v19  ;;  %v8835_v19 = vrot.slane %v4567_v51, 5  ;;  %7134 = vmatprep.mubr.bf16.mxu0 %v7619_v27  ;;  %v7625_v51 = vld [vmem:[%s9501_s1 + $0xe8] sm:$0xff]   ;;  %9552 = vst [vmem:[#allocation16_spill] sm:$0xff] %v8884_v37  ;;  %v8886_v58 = vrot.slane %v4577_v30, 5  ;;  %v4595_v44 = vshrl.u32 %v8851_v4, 16  ;;  %v4606_v36 = vshrl.u32 %v4389_v41, 16 }
 0x12c   : > { %6922 = vmatprep.mubr.bf16.mxu1 %v9545_v55  ;;  %6951 = vmatpush3.bf16.msra.mxu1 %v7616_v56  ;;  %v4546_v56 = vsel %vm7862_vm6, %v4541_v45, %v8768_v39  ;;  %v2013_v39 = vrot.slane %v7694_v42, 5  ;;  %v4609_v26 = vshll.u32 %v4389_v41, 16  ;;  %9553 = vst [vmem:[#allocation17_spill] sm:$0xff] %v8889_v21  ;;  %v4395_v55 = vld [vmem:[#allocation2 + $0x90] sm:$0xf]  ;;  %v8897_v31 = vrot.slane %v4564_v46, 4 }
 0x12d   : > { %6952 = vmatprep.subr.bf16.mxu1 %v7620_v11  ;;  %v4574_v28 = vor.u32 %v4573_v6, %v8835_v19  ;;  %v8880_v45 = vcombine.low %v4546_v56, %v4556_v53  ;;  %v9554_v6 = vcombine.low %v8607_v29, %v8611_v12  ;;  %v7627_v5 = vld [vmem:[%s9501_s1 + $0xf0] sm:$0xff]   ;;  %v6110_v23 = vrot.slane %v8863_v22, 9  ;;  %v7695_v53 = vld [vmem:[#allocation2 + $0xbc] sm:$0x1]  ;;  %v8947_v7 = vld [vmem:[#allocation2 + $0x8c] sm:$0x1] }
 0x12e   : > { %v2015_v56 = vrot.slane %v2013_v39, 4  ;;  %v2016_v30 = vrot.slane %v7695_v53, 5  ;;  %v9555_v42 = vcombine.low %v8625_v63, %v8629_v24  ;;  %v8905_v29 = vrot.slane %v4582_v15, 4  ;;  %v8911_v46 = vld [vmem:[#allocation2 + $0x94] sm:$0xf] }
 0x12f   : > { %v8903_v41 = vrot.slane %v4574_v28, 4  ;;  %v8907_v12 = vrot.slane %v4585_v10, 5  ;;  %9556 = vst [vmem:[#allocation18_spill] sm:$0xff] %v8911_v46  ;;  %v4615_v22 = vshll.u32 %v8874_v54, 16  ;;  %v4619_v53 = vshrl.u32 %v8874_v54, 16  ;;  %v7629_v10 = vld [vmem:[%s9501_s1 + $0xf8] sm:$0xff]  }
 0x130   : > { %6953 = vmatpush3.bf16.msra.mxu1 %v7620_v11  ;;  %v4630_v11 = vshrl.u32 %v4392_v38, 16  ;;  %v4633_v27 = vshll.u32 %v4392_v38, 16  ;;  %v4398_v63 = vld [vmem:[#allocation2 + $0x9c] sm:$0xf]  ;;  %v8915_v24 = vrot.slane %v4595_v44, 4  ;;  %v8918_v28 = vrot.slane %v4606_v36, 4 }
 0x131   : > { %6954 = vmatprep.subr.bf16.mxu1 %v7623_v60  ;;  %v8920_v15 = vrot.slane %v4609_v26, 5  ;;  %v4643_v38 = vshrl.u32 %v8889_v21, 16  ;;  %v8928_v44 = vld [vmem:[#allocation2 + $0xa0] sm:$0xf]  ;;  %v4663_v13 = vshll.u32 %v8911_v46, 16  ;;  %v4621_v54 = vrot.slane %v4619_v53, 4 }
 0x132   : > { %7135 = vmatmul.mubr.bf16.gmra.mrb[28].mxu0 %v7621_v50  ;;  %v4657_v50 = vshll.u32 %v4395_v55, 16  ;;  %v8938_v26 = vld [vmem:[#allocation2 + $0x80] sm:$0x1]  ;;  %v4635_v49 = vrot.slane %v4633_v27, 5  ;;  %v7626_v36 = vld [vmem:[%s9501_s1 + $0x208] sm:$0xff]   ;;  %v4687_v14 = vshll.u32 %v8928_v44, 16  ;;  %v9558_v4 = vcombine.low %v8655_v3, %v8659_v0 }
 0x133   : > { %6923 = vmatmul.mubr.bf16.gmra.mrb[8].mxu1 %v9554_v6  ;;  %v8909_v6 = vrot.slane %v4591_v9, 5  ;;  %7154 = vmatprep.mubr.bf16.mxu0 %v8727_v25  ;;  %v4639_v9 = vshll.u32 %v8889_v21, 16  ;;  %v8936_v25 = vsel %vm7992_vm13, %v6110_v23, %v2013_v39  ;;  %v4667_v21 = vshrl.u32 %v8911_v46, 16  ;;  %v8956_v27 = vld [vmem:[#allocation2 + $0x98] sm:$0x1] }
 0x134   : > { %6926 = vmatprep.mubr.bf16.mxu1 %v9555_v42  ;;  %6955 = vmatpush3.bf16.msra.mxu1 %v7623_v60  ;;  %v4601_v60 = vshll.u32 %v8884_v37, 16  ;;  %v4654_v42 = vshrl.u32 %v4395_v55, 16  ;;  %v8942_v55 = vrot.slane %v4615_v22, 5  ;;  %v4678_v39 = vshrl.u32 %v4398_v63, 16 }
 0x135   : > { %6956 = vmatprep.subr.bf16.mxu1 %v7625_v51  ;;  %v4681_v23 = vshll.u32 %v4398_v63, 16  ;;  %v4691_v2 = vshrl.u32 %v8928_v44, 16  ;;  %v9557_v46 = vcombine.low %v8639_v57, %v8651_v40  ;;  %v8954_v22 = vrot.slane %v4639_v9, 5 }
 0x136   : > { %v4656_v53 = vrot.slane %v4654_v42, 4  ;;  %v4659_v37 = vrot.slane %v4657_v50, 5  ;;  %v8963_v63 = vsel %vm7992_vm13, %v2015_v56, %v2016_v30  ;;  %v4588_v57 = vor.u32 %v8907_v12, %v8905_v29  ;;  %v8983_v12 = vld [vmem:[#allocation2 + $0xa4] sm:$0x1]  ;;  %v4401_v50 = vld [vmem:[#allocation2 + $0xa8] sm:$0xf] }
 0x137   : > { %v8967_v40 = vrot.slane %v4663_v13, 5  ;;  %v4598_v9 = vor.u32 %v8915_v24, %v8909_v6  ;;  %v4622_v3 = vor.u32 %v4621_v54, %v8942_v55  ;;  %v4625_v0 = vshll.u32 %v8938_v26, 16  ;;  %v8996_v42 = vld [vmem:[%s9501_s1 + $0x100] sm:$0xff]  }
 0x138   : > { %6957 = vmatpush3.bf16.msra.mxu1 %v7625_v51  ;;  %v4632_v51 = vrot.slane %v4630_v11, 4  ;;  %v4645_v11 = vrot.slane %v4643_v38, 4  ;;  %v4612_v38 = vor.u32 %v8920_v15, %v8918_v28  ;;  %v8976_v56 = vrot.slane %v4687_v14, 5 }
 0x139   : > { %6958 = vmatprep.subr.bf16.mxu1 %v7627_v5  ;;  %v4693_v13 = vrot.slane %v4691_v2, 4  ;;  %v4649_v29 = vshll.u32 %v8947_v7, 16  ;;  %v4673_v54 = vshll.u32 %v8956_v27, 16  ;;  %v4660_v2 = vor.u32 %v4659_v37, %v4656_v53 }
 0x13a   : > { %7155 = vmatmul.mubr.bf16.vlgmr.msra.gmra.mrb[0].mxu0 %v8729_v48  ;;  %v4646_v30 = vor.u32 %v4645_v11, %v8954_v22  ;;  %v7628_v48 = vld [vmem:[%s9501_s1 + $0x210] sm:$0xff]   ;;  %v4599_v24 = vrot.slane %v4598_v9, 4  ;;  %v4613_v28 = vrot.slane %v4612_v38, 4  ;;  %v4627_v15 = vrot.slane %v4625_v0, 5 }
 0x13b   : > { %6927 = vmatmul.mubr.bf16.gmra.mrb[12].mxu1 %v9557_v46  ;;  %v4669_v46 = vrot.slane %v4667_v21, 4  ;;  %7187 = vmatpush3.bf16.msra.mxu0 %v8705_v17  ;;  %v4636_v21 = vor.u32 %v4635_v49, %v4632_v51  ;;  %v4580_v17 = vsel %vm7862_vm6, %v8903_v41, %v8886_v58  ;;  %v4589_v49 = vrot.slane %v4588_v57, 4  ;;  %v9001_v41 = vld [vmem:[#allocation2 + $0xac] sm:$0xf] }
 0x13c   : > { %6930 = vmatprep.mubr.bf16.mxu1 %v9558_v4  ;;  %6959 = vmatpush3.bf16.msra.mxu1 %v7627_v5  ;;  %v4680_v4 = vrot.slane %v4678_v39, 4  ;;  %v4683_v5 = vrot.slane %v4681_v23, 5  ;;  %v4623_v51 = vrot.slane %v4622_v3, 4  ;;  %v4694_v58 = vor.u32 %v4693_v13, %v8976_v56  ;;  %v9012_v3 = vld [vmem:[#allocation2 + $0xb0] sm:$0x1] }
 0x13d   : > { %6960 = vmatprep.subr.bf16.mxu1 %v7629_v10  ;;  %7158 = vmatprep.mubr.bf16.mxu0 %v8773_v18  ;;  %v4603_v18 = vrot.slane %v4601_v60, 5  ;;  %v4670_v14 = vor.u32 %v4669_v46, %v8967_v40  ;;  %v4697_v37 = vshll.u32 %v8983_v12, 16  ;;  %v9559_v60 = vcombine.low %v8681_v32, %v8691_v52 }
 0x13e   : > { %7188 = vmatprep.subr.bf16.mxu0 %v7626_v36  ;;  %v4684_v39 = vor.u32 %v4683_v5, %v4680_v4  ;;  %v4637_v23 = vrot.slane %v4636_v21, 4  ;;  %v4647_v11 = vrot.slane %v4646_v30, 4  ;;  %v4651_v53 = vrot.slane %v4649_v29, 5  ;;  %v9034_v29 = vld [vmem:[#allocation2 + $0xb4] sm:$0xf] }
 0x13f   : > { %7189 = vmatpush3.bf16.msra.mxu0 %v7626_v36  ;;  %v4675_v57 = vrot.slane %v4673_v54, 5  ;;  %v9560_v46 = vcombine.low %v8716_v47, %v8720_v1  ;;  %v4661_v9 = vrot.slane %v4660_v2, 4  ;;  %v4671_v38 = vrot.slane %v4670_v14, 4 }
 0x140   : > { %6961 = vmatpush3.bf16.msra.mxu1 %v7629_v10  ;;  %v7630_v10 = vld [vmem:[%s9501_s1 + $0x218] sm:$0xff]   ;;  %7190 = vmatprep.subr.bf16.mxu0 %v7628_v48  ;;  %v4702_v32 = vshrl.u32 %v4401_v50, 16  ;;  %v4705_v52 = vshll.u32 %v4401_v50, 16  ;;  %v4594_v36 = vsel %vm7862_vm6, %v4589_v49, %v8909_v6  ;;  %v4604_v0 = vsel %vm7862_vm6, %v4599_v24, %v4603_v18 }
 0x141   : > { %7234 = vmatprep.subr.bf16.mxu1 %v8996_v42  ;;  %v4618_v4 = vsel %vm7862_vm6, %v4613_v28, %v8942_v55  ;;  %v4711_v47 = vshll.u32 %v9001_v41, 16  ;;  %v4685_v1 = vrot.slane %v4684_v39, 4  ;;  %v4695_v5 = vrot.slane %v4694_v58, 4 }
 0x142   : > { %7159 = vmatmul.mubr.bf16.gmra.mrb[4].mxu0 %v8865_v33  ;;  %v4699_v13 = vrot.slane %v4697_v37, 5  ;;  %v4715_v21 = vshrl.u32 %v9001_v41, 16  ;;  %v4628_v6 = vsel %vm7862_vm6, %v4623_v51, %v4627_v15  ;;  %v4642_v30 = vsel %vm7862_vm6, %v4637_v23, %v8954_v22  ;;  %v5123_v15 = vld [vmem:[#allocation2 + $0x48] sm:$0xe] }
 0x143   : > { %6931 = vmatmul.mubr.bf16.gmra.mrb[16].mxu1 %v9559_v60  ;;  %7162 = vmatprep.mubr.bf16.mxu0 %v8876_v62  ;;  %v4652_v55 = vsel %vm7862_vm6, %v4647_v11, %v4651_v53  ;;  %v4721_v33 = vshll.u32 %v9012_v3, 16  ;;  %v7633_v62 = vld [vmem:[%s9501_s1 + $0x220] sm:$0xff]   ;;  %v4666_v54 = vsel %vm7862_vm6, %v4661_v9, %v8967_v40  ;;  %v9044_v22 = vrot.slane %v4702_v32, 4  ;;  %v9059_v40 = vld [vmem:[#allocation2 + $0xb8] sm:$0xf]  ;;  %v7636_v11 = vld [vmem:[%s9501_s1 + $0x228] sm:$0xff]  }
 0x144   : > { %6934 = vmatprep.mubr.bf16.mxu1 %v9560_v46  ;;  %7191 = vmatpush3.bf16.msra.mxu0 %v7628_v48  ;;  %v4676_v48 = vsel %vm7862_vm6, %v4671_v38, %v4675_v57  ;;  %v9046_v18 = vrot.slane %v4705_v52, 5  ;;  %v9561_v2 = vsel %vm7862_vm6, %v8897_v31, %v8835_v19  ;;  %v6142_v49 = vcombine.low %v8936_v25, %v8963_v63  ;;  %v5124_v31 = vld [vmem:[#allocation2 + $0x54] sm:$0xe]  ;;  %v5125_v57 = vld [vmem:[#allocation2 + $0x60] sm:$0xe] }
 0x145   : > { %7192 = vmatprep.subr.bf16.mxu0 %v7630_v10  ;;  %v6349_v14 = vcombine.low %v9561_v2, %v4580_v17  ;;  %v9055_v24 = vcombine.low %v4594_v36, %v4604_v0  ;;  %v9057_v28 = vrot.slane %v4711_v47, 5  ;;  %v4690_v50 = vsel %vm7862_vm6, %v4685_v1, %v8976_v56  ;;  %v9565_v36 = vld [vmem:[#allocation6_spill] sm:$0xff]  ;;  %v5126_v1 = vld [vmem:[#allocation2 + $0x6c] sm:$0xe]  ;;  %v9569_v2 = vld [vmem:[#allocation16_spill] sm:$0xff] }
 0x146   : > { %v4700_v51 = vsel %vm7862_vm6, %v4695_v5, %v4699_v13  ;;  %v9066_v39 = vrot.slane %v4715_v21, 4  ;;  %v4726_v19 = vshrl.u32 %v9034_v29, 16  ;;  %v9562_v17 = vcombine.low %v8741_v59, %v8754_v35  ;;  %v7639_v21 = vld [vmem:[%s9501_s1 + $0x230] sm:$0xff]  }
 0x147   : > { %v9072_v58 = vcombine.low %v4618_v4, %v4628_v6  ;;  %v9074_v37 = vcombine.low %v4642_v30, %v4652_v55  ;;  %v9076_v60 = vcombine.low %v4666_v54, %v4676_v48  ;;  %v9078_v56 = vrot.slane %v4721_v33, 5  ;;  %v9566_v4 = vld [vmem:[#allocation8_spill] sm:$0xff]  ;;  %v9567_v33 = vld [vmem:[#allocation9_spill] sm:$0xff] }
 0x148   : > { %7193 = vmatpush3.bf16.msra.mxu0 %v7630_v10  ;;  %v9563_v23 = vcombine.low %v8793_v20, %v8829_v8  ;;  %v4708_v59 = vor.u32 %v9046_v18, %v9044_v22  ;;  %v4729_v35 = vshll.u32 %v9034_v29, 16  ;;  %v4735_v10 = vshll.u32 %v9059_v40, 16  ;;  %v9564_v20 = vld [vmem:[#allocation7_spill] sm:$0xff]  ;;  %v4407_v6 = vld [vmem:[#allocation2 + $0xc0] sm:$0xf]  ;;  %v9568_v22 = vld [vmem:[#allocation13_spill] sm:$0xff] }
 0x149   : > { %7194 = vmatprep.subr.bf16.mxu0 %v7633_v62  ;;  %v6371_v53 = vrot.slane %v5123_v15, 9  ;;  %v9090_v46 = vcombine.low %v4690_v50, %v4700_v51  ;;  %v5213_v9 = vrot.slane %v8712_v61, 5  ;;  %v5216_v8 = vrot.slane %v9564_v20, 5  ;;  %v9121_v15 = vld [vmem:[#allocation2 + $0xbc] sm:$0x1] }
 0x14a   : > { %v6372_v38 = vrot.slane %v5124_v31, 9  ;;  %7163 = vmatmul.mubr.bf16.gmra.mrb[8].mxu0 %v8880_v45  ;;  %v4718_v32 = vor.u32 %v9066_v39, %v9057_v28  ;;  %v9097_v52 = vrot.slane %v4726_v19, 4  ;;  %v5220_v0 = vrot.slane %v9565_v36, 5  ;;  %v9570_v19 = vld [vmem:[#allocation10_spill] sm:$0xff]  ;;  %v9571_v31 = vld [vmem:[#allocation11_spill] sm:$0xff] }
 0x14b   : > { %6935 = vmatmul.mubr.bf16.gmra.mrb[20].mxu1 %v9562_v17  ;;  %v5223_v47 = vrot.slane %v9566_v4, 5  ;;  %7166 = vmatprep.mubr.bf16.mxu0 %v6349_v14  ;;  %v4739_v5 = vshrl.u32 %v9059_v40, 16  ;;  %v9104_v61 = vsel %vm7992_vm13, %v6371_v53, %v5213_v9  ;;  %v5215_v13 = vrot.slane %v5213_v9, 4 }
 0x14c   : > { %6938 = vmatprep.mubr.bf16.mxu1 %v9563_v23  ;;  %7195 = vmatpush3.bf16.msra.mxu0 %v7633_v62  ;;  %v6373_v45 = vrot.slane %v5125_v57, 9  ;;  %v9111_v30 = vsel %vm7992_vm13, %v6372_v38, %v5220_v0  ;;  %v5222_v55 = vrot.slane %v5220_v0, 4  ;;  %v5227_v29 = vrot.slane %v9567_v33, 5  ;;  %v9136_v23 = vld [vmem:[#allocation2 + $0xc4] sm:$0xf]  ;;  %v9574_v38 = vld [vmem:[#allocation14_spill] sm:$0xff] }
 0x14d   : > { %7196 = vmatprep.subr.bf16.mxu0 %v7636_v11  ;;  %v5230_v62 = vrot.slane %v8822_v16, 5  ;;  %v9117_v54 = vsel %vm7992_vm13, %v5215_v13, %v5216_v8  ;;  %v6374_v48 = vrot.slane %v5126_v1, 9  ;;  %v5234_v18 = vrot.slane %v9568_v22, 5  ;;  %v9573_v8 = vld [vmem:[#allocation12_spill] sm:$0xff]  ;;  %v5127_v13 = vld [vmem:[#allocation2 + $0x78] sm:$0xe] }
 0x14e   : > { %v5237_v14 = vrot.slane %v9569_v2, 5  ;;  %v6403_v50 = vcombine.low %v9104_v61, %v9117_v54  ;;  %v9127_v51 = vsel %vm7992_vm13, %v5222_v55, %v5223_v47  ;;  %v9131_v16 = vsel %vm7992_vm13, %v6373_v45, %v5227_v29  ;;  %v7642_v47 = vld [vmem:[%s9501_s1 + $0x238] sm:$0xff]   ;;  %v7648_v61 = vld [vmem:[#allocation2 + $0xa8] sm:$0xff]  }
 0x14f   : > { %v5229_v39 = vrot.slane %v5227_v29, 4  ;;  %v9572_v17 = vcombine.low %v9570_v19, %v9571_v31  ;;  %v4750_v53 = vshrl.u32 %v4407_v6, 16  ;;  %v6404_v57 = vcombine.low %v9111_v30, %v9127_v51  ;;  %v9576_v2 = vld [vmem:[#allocation15_spill] sm:$0xff] }
 0x150   : > { %7197 = vmatpush3.bf16.msra.mxu0 %v7636_v11  ;;  %v9142_v9 = vsel %vm7992_vm13, %v6374_v48, %v5234_v18  ;;  %v5236_v20 = vrot.slane %v5234_v18, 4  ;;  %v9575_v36 = vcombine.low %v9573_v8, %v9574_v38  ;;  %v9147_v0 = vrot.slane %v4708_v59, 4  ;;  %v5128_v48 = vld [vmem:[#allocation2 + $0x84] sm:$0xe] }
 0x151   : > { %v9149_v4 = vrot.slane %v4729_v35, 5  ;;  %7198 = vmatprep.subr.bf16.mxu0 %v7639_v21  ;;  %v4753_v11 = vshll.u32 %v4407_v6, 16  ;;  %v9156_v1 = vsel %vm7992_vm13, %v5229_v39, %v5230_v62  ;;  %v9158_v45 = vrot.slane %v4735_v10, 5  ;;  %v2753_v6 = vld [vmem:[#allocation2 + $0x78] sm:$0xf] }
 0x152   : > { %v4745_v55 = vshll.u32 %v9121_v15, 16  ;;  %v6405_v59 = vcombine.low %v9131_v16, %v9156_v1  ;;  %v9165_v35 = vsel %vm7992_vm13, %v5236_v20, %v5237_v14  ;;  %7167 = vmatmul.mubr.bf16.gmra.mrb[12].mxu0 %v9055_v24  ;;  %v4719_v33 = vrot.slane %v4718_v32, 4  ;;  %v7631_v24 = vld [vmem:[#allocation2 + $0xc] sm:$0xff]  }
 0x153   : > { %6939 = vmatmul.mubr.bf16.gmra.mrb[24].mxu1 %v9572_v17  ;;  %v9168_v29 = vrot.slane %v4739_v5, 4  ;;  %v4759_v62 = vshll.u32 %v9136_v23, 16  ;;  %v6406_v10 = vcombine.low %v9142_v9, %v9165_v35  ;;  %7170 = vmatprep.mubr.bf16.mxu0 %v9072_v58  ;;  %v9174_v22 = vrot.slane %v4750_v53, 4  ;;  %v9578_v53 = vld [vmem:[#allocation5_spill] sm:$0xff] }
 0x154   : > { %6942 = vmatprep.mubr.bf16.mxu1 %v9575_v36  ;;  %7199 = vmatpush3.bf16.msra.mxu0 %v7639_v21  ;;  %v6375_v18 = vrot.slane %v5127_v13, 9  ;;  %v5241_v14 = vrot.slane %v9576_v2, 5  ;;  %v5244_v39 = vrot.slane %v8938_v26, 5  ;;  %v9178_v32 = vrot.slane %v4753_v11, 5  ;;  %v9577_v21 = vld [vmem:[#allocation4_spill] sm:$0xff] }
 0x155   : > { %v4763_v5 = vshrl.u32 %v9136_v23, 16  ;;  %7200 = vmatprep.subr.bf16.mxu0 %v7642_v47  ;;  %v2991_v19 = vshrl.u32 %v2753_v6, 16  ;;  %v2994_v31 = vshll.u32 %v2753_v6, 16  ;;  %v3013_v20 = vsel %vm7862_vm6, %v9578_v53, %v9577_v21  ;;  %v4410_v6 = vld [vmem:[#allocation2 + $0xcc] sm:$0xf]  ;;  %v7634_v21 = vld [vmem:[#allocation2 + $0x24] sm:$0xff]  }
 0x156   : > { %v9183_v17 = vsel %vm7992_vm13, %v6375_v18, %v5241_v14  ;;  %v5243_v58 = vrot.slane %v5241_v14, 4  ;;  %v6376_v8 = vrot.slane %v5128_v48, 9  ;;  %v4714_v26 = vsel %vm7862_vm6, %v9147_v0, %v9057_v28  ;;  %v9201_v48 = vld [vmem:[#allocation2 + $0xd0] sm:$0xf]  ;;  %v9579_v0 = vld [vmem:[#allocation17_spill] sm:$0xff] }
 0x157   : > { %v4732_v38 = vor.u32 %v9149_v4, %v9097_v52  ;;  %v2993_v36 = vrot.slane %v2991_v19, 4  ;;  %v2996_v11 = vrot.slane %v2994_v31, 5  ;;  %v4724_v13 = vsel %vm7862_vm6, %v4719_v33, %v9078_v56  ;;  %v5129_v56 = vld [vmem:[#allocation2 + $0x90] sm:$0xe]  ;;  %v9215_v33 = vld [vmem:[#allocation2 + $0xc8] sm:$0x1] }
 0x158   : > { %7201 = vmatpush3.bf16.msra.mxu0 %v7642_v47  ;;  %v9205_v28 = vsel %vm7992_vm13, %v5243_v58, %v5244_v39  ;;  %v5248_v52 = vrot.slane %v9579_v0, 5  ;;  %v5251_v4 = vrot.slane %v8947_v7, 5  ;;  %v9209_v18 = vrot.slane %v4759_v62, 5  ;;  %v7632_v19 = vld [vmem:[#allocation2 + $0x18] sm:$0xff]   ;;  %v9580_v31 = vld [vmem:[#allocation18_spill] sm:$0xff] }
 0x159   : > { %v4765_v25 = vrot.slane %v4763_v5, 4  ;;  %v6407_v63 = vcombine.low %v9183_v17, %v9205_v28  ;;  %v4742_v47 = vor.u32 %v9168_v29, %v9158_v45  ;;  %v4756_v2 = vor.u32 %v9178_v32, %v9174_v22  ;;  %v7720_v17 = vld [vmem:[#allocation2 + $0xac] sm:$0xf] }
 0x15a   : > { %v9221_v7 = vsel %vm7992_vm13, %v6376_v8, %v5248_v52  ;;  %v5250_v62 = vrot.slane %v5248_v52, 4  ;;  %7171 = vmatmul.mubr.bf16.gmra.mrb[16].mxu0 %v9074_v37  ;;  %v4774_v14 = vshrl.u32 %v4410_v6, 16  ;;  %v4777_v39 = vshll.u32 %v4410_v6, 16  ;;  %v9581_v8 = vld [vmem:[#allocation3_spill] sm:$0xff] }
 0x15b   : > { %6943 = vmatmul.mubr.bf16.gmra.mrb[28].mxu1 %v6142_v49  ;;  %v2997_v49 = vor.u32 %v2996_v11, %v2993_v36  ;;  %7174 = vmatprep.mubr.bf16.mxu0 %v9076_v60  ;;  %v4787_v29 = vshrl.u32 %v9201_v48, 16  ;;  %v6377_v32 = vrot.slane %v5129_v56, 9  ;;  %v5255_v58 = vrot.slane %v9580_v31, 5 }
 0x15c   : > { %6962 = vmatprep.mubr.bf16.mxu1 %v7631_v24  ;;  %v4783_v24 = vshll.u32 %v9201_v48, 16  ;;  %v9229_v22 = vsel %vm7992_vm13, %v5250_v62, %v5251_v4  ;;  %v4766_v37 = vor.u32 %v4765_v25, %v9209_v18  ;;  %v4769_v53 = vshll.u32 %v9215_v33, 16 }
 0x15d   : > { %v2998_v5 = vrot.slane %v2997_v49, 4  ;;  %v6408_v60 = vcombine.low %v9221_v7, %v9229_v22  ;;  %v6355_v11 = vcombine.low %v4714_v26, %v4724_v13  ;;  %v4733_v6 = vrot.slane %v4732_v38, 4  ;;  %v9243_v49 = vld [vmem:[#allocation2 + $0xd4] sm:$0x1]  ;;  %v5130_v13 = vld [vmem:[#allocation2 + $0x9c] sm:$0xe] }
 0x15e   : > { %v4747_v0 = vrot.slane %v4745_v55, 5  ;;  %v4743_v4 = vrot.slane %v4742_v47, 4  ;;  %v9247_v25 = vsel %vm7992_vm13, %v6377_v32, %v5255_v58  ;;  %v5257_v56 = vrot.slane %v5255_v58, 4 }
 0x15f   : > { %v3003_v36 = vsel %vm7862_vm6, %v2998_v5, %v9581_v8  ;;  %v5258_v62 = vrot.slane %v8956_v27, 5  ;;  %v4776_v5 = vrot.slane %v4774_v14, 4  ;;  %v4779_v31 = vrot.slane %v4777_v39, 5  ;;  %v7697_v27 = vld [vmem:[%s9501_s1 + $0x108] sm:$0xff]   ;;  %v7698_v8 = vld [vmem:[#allocation2 + $0x1c] sm:$0xf] }
 0x160   : > { %v9241_v52 = vcombine.low %v3003_v36, %v3013_v20  ;;  %v9250_v26 = vrot.slane %v4783_v24, 5  ;;  %v4789_v38 = vrot.slane %v4787_v29, 4  ;;  %v4757_v55 = vrot.slane %v4756_v2, 4 }
 0x161   : > { %v4767_v20 = vrot.slane %v4766_v37, 4  ;;  %v4771_v47 = vrot.slane %v4769_v53, 5  ;;  %v9255_v32 = vsel %vm7992_vm13, %v5257_v56, %v5258_v62  ;;  %v4748_v2 = vsel %vm7862_vm6, %v4743_v4, %v4747_v0  ;;  %v5131_v56 = vld [vmem:[#allocation2 + $0xa8] sm:$0xe] }
 0x162   : > { %v6409_v14 = vcombine.low %v9247_v25, %v9255_v32  ;;  %7175 = vmatmul.mubr.bf16.gmra.mrb[20].mxu0 %v9090_v46  ;;  %v4793_v39 = vshll.u32 %v9243_v49, 16  ;;  %v6378_v24 = vrot.slane %v5130_v13, 9  ;;  %v4780_v29 = vor.u32 %v4779_v31, %v4776_v5  ;;  %v7637_v46 = vld [vmem:[#allocation2 + $0x3c] sm:$0xff]  }
 0x163   : > { %6963 = vmatmul.mubr.bf16.vlgmr.msra.gmra.mrb[0].mxu1 %v7632_v19  ;;  %v7635_v19 = vld [vmem:[#allocation2 + $0x30] sm:$0xff]   ;;  %7178 = vmatprep.mubr.bf16.mxu0 %v6355_v11  ;;  %v4790_v58 = vor.u32 %v4789_v38, %v9250_v26  ;;  %v5265_v37 = vrot.slane %v8983_v12, 5  ;;  %v4772_v53 = vsel %vm7862_vm6, %v4767_v20, %v4771_v47  ;;  %v5185_v36 = vrot.slane %v7698_v8, 5 }
 0x164   : > { %7242 = vmatpush3.bf16.msra.mxu1 %v8996_v42  ;;  %6966 = vmatprep.mubr.bf16.mxu1 %v7634_v21  ;;  %v4738_v42 = vsel %vm7862_vm6, %v4733_v6, %v9158_v45  ;;  %v5262_v21 = vrot.slane %v8928_v44, 5  ;;  %v4762_v45 = vsel %vm7862_vm6, %v4757_v55, %v9209_v18  ;;  %v7699_v11 = vld [vmem:[%s9501_s1 + $0x110] sm:$0xff]   ;;  %v5119_v6 = vld [vmem:[#allocation2 + $0x18] sm:$0xe]  ;;  %v4795_v4 = vrot.slane %v4793_v39, 5 }
 0x165   : > { %7235 = vmatprep.subr.bf16.mxu1 %v7697_v27  ;;  %v6356_v0 = vcombine.low %v4738_v42, %v4748_v2  ;;  %v6357_v18 = vcombine.low %v4762_v45, %v4772_v53  ;;  %v4781_v62 = vrot.slane %v4780_v29, 4  ;;  %v4791_v5 = vrot.slane %v4790_v58, 4  ;;  %v7700_v55 = vld [vmem:[#allocation2 + $0x20] sm:$0x1]  ;;  %v7702_v39 = vld [vmem:[#allocation2 + $0x28] sm:$0xf] }
 0x166   : > { %v9282_v44 = vsel %vm7992_vm13, %v6378_v24, %v5262_v21  ;;  %v5264_v12 = vrot.slane %v5262_v21, 4  ;;  %v6367_v38 = vrot.slane %v5119_v6, 9  ;;  %v5187_v13 = vrot.slane %v5185_v36, 4  ;;  %v7638_v29 = vld [vmem:[#allocation2 + $0x48] sm:$0xff]   ;;  %v5132_v45 = vld [vmem:[#allocation2 + $0xb4] sm:$0xe] }
 0x167   : > { %v5188_v20 = vrot.slane %v7700_v55, 5  ;;  %v6379_v42 = vrot.slane %v5131_v56, 9  ;;  %v5269_v2 = vrot.slane %v9001_v41, 5  ;;  %v5192_v24 = vrot.slane %v7702_v39, 5  ;;  %v7640_v53 = vld [vmem:[#allocation2 + $0x54] sm:$0xff]   ;;  %v7704_v6 = vld [vmem:[%s9501_s1 + $0x120] sm:$0xff]  }
 0x168   : > { %7243 = vmatpush3.bf16.msra.mxu1 %v7697_v27  ;;  %v9286_v31 = vsel %vm7992_vm13, %v5264_v12, %v5265_v37  ;;  %v7701_v27 = vld [vmem:[%s9501_s1 + $0x118] sm:$0xff]   ;;  %v4786_v58 = vsel %vm7862_vm6, %v4781_v62, %v9250_v26  ;;  %v4796_v21 = vsel %vm7862_vm6, %v4791_v5, %v4795_v4  ;;  %v5120_v37 = vld [vmem:[#allocation2 + $0x24] sm:$0xe]  ;;  %v5121_v12 = vld [vmem:[#allocation2 + $0x30] sm:$0xe]  ;;  %v5276_v55 = vrot.slane %v9059_v40, 5 }
 0x169   : > { %7236 = vmatprep.subr.bf16.mxu1 %v7699_v11  ;;  %v6410_v47 = vcombine.low %v9282_v44, %v9286_v31  ;;  %v5271_v41 = vrot.slane %v5269_v2, 4  ;;  %v5189_v8 = vsel %vm7992_vm13, %v5187_v13, %v5188_v20  ;;  %v6358_v4 = vcombine.low %v4786_v58, %v4796_v21  ;;  %v5133_v40 = vld [vmem:[#allocation2 + $0xc0] sm:$0xe] }
 0x16a   : > { %7179 = vmatmul.mubr.bf16.gmra.mrb[24].mxu0 %v6356_v0  ;;  %v6368_v56 = vrot.slane %v5120_v37, 9  ;;  %v5194_v5 = vrot.slane %v5192_v24, 4  ;;  %v6369_v20 = vrot.slane %v5121_v12, 9  ;;  %v5279_v39 = vrot.slane %v9121_v15, 5  ;;  %v7641_v21 = vld [vmem:[#allocation2 + $0x60] sm:$0xff]   ;;  %v7709_v12 = vld [vmem:[%s9501_s1 + $0x130] sm:$0xff]  }
 0x16b   : > { %6967 = vmatmul.mubr.bf16.gmra.mrb[4].mxu1 %v7635_v19  ;;  %v5272_v19 = vrot.slane %v9012_v3, 5  ;;  %7182 = vmatprep.mubr.bf16.mxu0 %v6357_v18  ;;  %v5186_v3 = vsel %vm7992_vm13, %v6367_v38, %v5185_v36  ;;  %v6380_v18 = vrot.slane %v5132_v45, 9  ;;  %v7705_v38 = vld [vmem:[#allocation2 + $0x2c] sm:$0x1]  ;;  %v5278_v58 = vrot.slane %v5276_v55, 4 }
 0x16c   : > { %6970 = vmatprep.mubr.bf16.mxu1 %v7637_v46  ;;  %7244 = vmatpush3.bf16.msra.mxu1 %v7699_v11  ;;  %v9302_v46 = vsel %vm7992_vm13, %v6379_v42, %v5269_v2  ;;  %v7703_v11 = vld [vmem:[#allocation2 + $0x34] sm:$0xf]  ;;  %v6399_v62 = vcombine.low %v5186_v3, %v5189_v8  ;;  %v5195_v13 = vrot.slane %v7705_v38, 5  ;;  %v7706_v42 = vld [vmem:[#allocation2 + $0x38] sm:$0x1]  ;;  %v5193_v37 = vsel %vm7992_vm13, %v6368_v56, %v5192_v24  ;;  %v7643_v8 = vld [vmem:[#allocation2 + $0x6c] sm:$0xff]  }
 0x16d   : > { %7237 = vmatprep.subr.bf16.mxu1 %v7701_v27  ;;  %v5199_v26 = vrot.slane %v7703_v11, 5  ;;  %v9313_v0 = vsel %vm7992_vm13, %v5271_v41, %v5272_v19  ;;  %v5202_v2 = vrot.slane %v7706_v42, 5  ;;  %v7707_v19 = vld [vmem:[%s9501_s1 + $0x128] sm:$0xff]   ;;  %v5122_v41 = vld [vmem:[#allocation2 + $0x3c] sm:$0xe]  ;;  %v9332_v3 = vsel %vm7992_vm13, %v5278_v58, %v5279_v39 }
 0x16e   : > { %v6411_v36 = vcombine.low %v9302_v46, %v9313_v0  ;;  %v5196_v15 = vsel %vm7992_vm13, %v5194_v5, %v5195_v13  ;;  %v7708_v45 = vld [vmem:[#allocation2 + $0x40] sm:$0xf]  ;;  %v5283_v56 = vrot.slane %v9136_v23, 5  ;;  %v7710_v5 = vld [vmem:[#allocation2 + $0x44] sm:$0x1]  ;;  %v7711_v23 = vld [vmem:[%s9501_s1 + $0x138] sm:$0xff]  }
 0x16f   : > { %v5200_v11 = vsel %vm7992_vm13, %v6369_v20, %v5199_v26  ;;  %v5209_v38 = vrot.slane %v7710_v5, 5  ;;  %v5134_v42 = vld [vmem:[#allocation2 + $0xcc] sm:$0xe]  ;;  %v3096_v28 = vshll.u32 %v7720_v17, 16  ;;  %v7725_v0 = vld [vmem:[#allocation2 + $0xc8] sm:$0x1] }
 0x170   : > { %7245 = vmatpush3.bf16.msra.mxu1 %v7701_v27  ;;  %v5201_v27 = vrot.slane %v5199_v26, 4  ;;  %v5286_v26 = vrot.slane %v9215_v33, 5  ;;  %v6382_v39 = vrot.slane %v5134_v42, 9 }
 0x171   : > { %7238 = vmatprep.subr.bf16.mxu1 %v7704_v6 }
 0x172   : > { %7183 = vmatmul.mubr.bf16.gmra.mrb[28].mxu0 %v6358_v4  ;;  %v6381_v4 = vrot.slane %v5133_v40, 9 }
 0x173   : > { %6971 = vmatmul.mubr.bf16.gmra.mrb[8].mxu1 %v7638_v29  ;;  %v9324_v29 = vsel %vm7992_vm13, %v6380_v18, %v5276_v55  ;;  %7202 = vmatprep.mubr.bf16.mxu0 %v6399_v62  ;;  %v6400_v18 = vcombine.low %v5193_v37, %v5196_v15  ;;  %v6370_v62 = vrot.slane %v5122_v41, 9  ;;  %v5290_v37 = vrot.slane %v9201_v48, 5  ;;  %v7645_v15 = vld [vmem:[#allocation2 + $0x84] sm:$0xff]  }
 0x174   : > { %6974 = vmatprep.mubr.bf16.mxu1 %v7640_v53  ;;  %7246 = vmatpush3.bf16.msra.mxu1 %v7704_v6  ;;  %v5206_v53 = vrot.slane %v7708_v45, 5  ;;  %v5203_v6 = vsel %vm7992_vm13, %v5201_v27, %v5202_v2  ;;  %v6412_v24 = vcombine.low %v9324_v29, %v9332_v3  ;;  %v9347_v20 = vsel %vm7992_vm13, %v6381_v4, %v5283_v56 }
 0x175   : > { %7239 = vmatprep.subr.bf16.mxu1 %v7707_v19  ;;  %v6401_v13 = vcombine.low %v5200_v11, %v5203_v6  ;;  %v5285_v27 = vrot.slane %v5283_v56, 4  ;;  %v5293_v41 = vrot.slane %v9243_v49, 5  ;;  %v9366_v45 = vsel %vm7992_vm13, %v6382_v39, %v5290_v37  ;;  %v7646_v49 = vld [vmem:[#allocation2 + $0x90] sm:$0xff]  }
 0x176   : > { %v5208_v55 = vrot.slane %v5206_v53, 4  ;;  %v5207_v58 = vsel %vm7992_vm13, %v6370_v62, %v5206_v53  ;;  %v7712_v53 = vld [vmem:[#allocation2 + $0x70] sm:$0xf] }
 0x177   : > { %v9354_v2 = vsel %vm7992_vm13, %v5285_v27, %v5286_v26  ;;  %v2976_v4 = vshll.u32 %v7712_v53, 16  ;;  %v2980_v56 = vshrl.u32 %v7712_v53, 16  ;;  %v7713_v27 = vld [vmem:[#allocation2 + $0x74] sm:$0x1] }
 0x178   : > { %7247 = vmatpush3.bf16.msra.mxu1 %v7707_v19  ;;  %v6413_v33 = vcombine.low %v9347_v20, %v9354_v2  ;;  %v7644_v19 = vld [vmem:[#allocation2 + $0x78] sm:$0xff]   ;;  %v5210_v40 = vsel %vm7992_vm13, %v5208_v55, %v5209_v38  ;;  %v2756_v55 = vld [vmem:[#allocation2 + $0x84] sm:$0xf]  ;;  %v2986_v43 = vshll.u32 %v7713_v27, 16 }
 0x179   : > { %7240 = vmatprep.subr.bf16.mxu1 %v7709_v12  ;;  %v6402_v11 = vcombine.low %v5207_v58, %v5210_v40  ;;  %v2978_v38 = vrot.slane %v2976_v4, 5  ;;  %v2982_v26 = vrot.slane %v2980_v56, 4  ;;  %v3015_v39 = vshrl.u32 %v2756_v55, 16  ;;  %v7714_v58 = vld [vmem:[#allocation2 + $0x88] sm:$0xf] }
 0x17a   : > { %7203 = vmatmul.mubr.bf16.vlgmr.msra.gmra.mrb[0].mxu0 %v6400_v18  ;;  %v3024_v40 = vshll.u32 %v7714_v58, 16  ;;  %v2988_v54 = vrot.slane %v2986_v43, 5 }
 0x17b   : > { %6975 = vmatmul.mubr.bf16.gmra.mrb[12].mxu1 %v7641_v21  ;;  %7206 = vmatprep.mubr.bf16.mxu0 %v6401_v13  ;;  %v2750_v21 = vld [vmem:[#allocation2 + $0x6c] sm:$0xf]  ;;  %v7647_v13 = vld [vmem:[#allocation2 + $0x9c] sm:$0xff]  }
 0x17c   : > { %6978 = vmatprep.mubr.bf16.mxu1 %v7643_v8  ;;  %7248 = vmatpush3.bf16.msra.mxu1 %v7709_v12  ;;  %v5292_v8 = vrot.slane %v5290_v37, 4  ;;  %v2967_v6 = vshrl.u32 %v2750_v21, 16  ;;  %v2970_v12 = vshll.u32 %v2750_v21, 16  ;;  %v3028_v21 = vshrl.u32 %v7714_v58, 16  ;;  %v2759_v37 = vld [vmem:[#allocation2 + $0x90] sm:$0xf] }
 0x17d   : > { %7241 = vmatprep.subr.bf16.mxu1 %v7711_v23  ;;  %v3039_v4 = vshrl.u32 %v2759_v37, 16  ;;  %v3042_v56 = vshll.u32 %v2759_v37, 16  ;;  %v7650_v37 = vld [vmem:[#allocation2 + $0xc0] sm:$0xff]  }
 0x17e   : > { %v9370_v18 = vsel %vm7992_vm13, %v5292_v8, %v5293_v41  ;;  %v2969_v62 = vrot.slane %v2967_v6, 4  ;;  %v2972_v5 = vrot.slane %v2970_v12, 5  ;;  %v3017_v41 = vrot.slane %v3015_v39, 4  ;;  %v7649_v6 = vld [vmem:[#allocation2 + $0xb4] sm:$0xff]  }
 0x17f   : > { %v6414_v48 = vcombine.low %v9366_v45, %v9370_v18  ;;  %v9383_v12 = vrot.slane %v3024_v40, 5  ;;  %v3030_v53 = vrot.slane %v3028_v21, 4 }
 0x180   : > { %7249 = vmatpush3.bf16.msra.mxu1 %v7711_v23  ;;  %v2973_v42 = vor.u32 %v2972_v5, %v2969_v62  ;;  %v2983_v23 = vor.u32 %v2982_v26, %v2978_v38  ;;  %v7716_v5 = vld [vmem:[#allocation2 + $0xa0] sm:$0xf] }
 0x181   : > { %v3072_v26 = vshll.u32 %v7716_v5, 16  ;;  %v3076_v16 = vshrl.u32 %v7716_v5, 16  ;;  %v3031_v43 = vor.u32 %v3030_v53, %v9383_v12  ;;  %v7719_v53 = vld [vmem:[#allocation2 + $0xa4] sm:$0x1] }
 0x182   : > { %7207 = vmatmul.mubr.bf16.gmra.mrb[4].mxu0 %v6402_v11  ;;  %v2762_v11 = vld [vmem:[#allocation2 + $0x9c] sm:$0xf] }
 0x183   : > { %6979 = vmatmul.mubr.bf16.gmra.mrb[16].mxu1 %v7644_v19  ;;  %7210 = vmatprep.mubr.bf16.mxu0 %v6403_v50  ;;  %v3018_v19 = vshll.u32 %v2756_v55, 16  ;;  %v2974_v50 = vrot.slane %v2973_v42, 4  ;;  %v3063_v51 = vshrl.u32 %v2762_v11, 16  ;;  %v3041_v42 = vrot.slane %v3039_v4, 4 }
 0x184   : > { %6982 = vmatprep.mubr.bf16.mxu1 %v7645_v15  ;;  %v2984_v15 = vrot.slane %v2983_v23, 4  ;;  %v3044_v23 = vrot.slane %v3042_v56, 5  ;;  %v9395_v40 = vrot.slane %v3072_v26, 5  ;;  %v3078_v21 = vrot.slane %v3076_v16, 4  ;;  %v2768_v56 = vld [vmem:[#allocation2 + $0xb4] sm:$0xf] }
 0x185   : > { %v3020_v8 = vrot.slane %v3018_v19, 5  ;;  %v2979_v1 = vsel %vm7862_vm6, %v2974_v50, %v2978_v38  ;;  %v3065_v58 = vrot.slane %v3063_v51, 4  ;;  %v3082_v4 = vshll.u32 %v7719_v53, 16  ;;  %v7724_v53 = vld [vmem:[#allocation2 + $0xbc] sm:$0x1] }
 0x186   : > { %v3111_v26 = vshrl.u32 %v2768_v56, 16  ;;  %v3114_v16 = vshll.u32 %v2768_v56, 16 }
 0x187   : > { %v3021_v27 = vor.u32 %v3020_v8, %v3017_v41  ;;  %v3045_v41 = vor.u32 %v3044_v23, %v3041_v42  ;;  %v7718_v8 = vld [vmem:[#allocation2 + $0x98] sm:$0x1]  ;;  %v3084_v42 = vrot.slane %v3082_v4, 5  ;;  %v3130_v4 = vshll.u32 %v7724_v53, 16 }
 0x189   : > { %v3022_v50 = vrot.slane %v3021_v27, 4 }
 0x18a   : > { %7211 = vmatmul.mubr.bf16.gmra.mrb[8].mxu0 %v6404_v57  ;;  %v3066_v57 = vshll.u32 %v2762_v11, 16  ;;  %v3058_v11 = vshll.u32 %v7718_v8, 16 }
 0x18b   : > { %6983 = vmatmul.mubr.bf16.gmra.mrb[20].mxu1 %v7646_v49  ;;  %7214 = vmatprep.mubr.bf16.mxu0 %v6405_v59  ;;  %v7715_v49 = vld [vmem:[#allocation2 + $0x94] sm:$0xf]  ;;  %v2989_v59 = vsel %vm7862_vm6, %v2984_v15, %v2988_v54  ;;  %v3032_v15 = vrot.slane %v3031_v43, 4 }
 0x18c   : > { %6986 = vmatprep.mubr.bf16.mxu1 %v7647_v13  ;;  %v3048_v62 = vshll.u32 %v7715_v49, 16  ;;  %v3052_v30 = vshrl.u32 %v7715_v49, 16  ;;  %v7717_v13 = vld [vmem:[#allocation2 + $0x8c] sm:$0x1]  ;;  %v3068_v38 = vrot.slane %v3066_v57, 5  ;;  %v3046_v57 = vrot.slane %v3045_v41, 4 }
 0x18d   : > { %v3034_v55 = vshll.u32 %v7717_v13, 16  ;;  %v3060_v5 = vrot.slane %v3058_v11, 5 }
 0x18e   : > { %v9390_v39 = vrot.slane %v3048_v62, 5  ;;  %v3054_v19 = vrot.slane %v3052_v30, 4  ;;  %v3069_v35 = vor.u32 %v3068_v38, %v3065_v58  ;;  %v3027_v30 = vsel %vm7862_vm6, %v3022_v50, %v9383_v12  ;;  %v2771_v50 = vld [vmem:[#allocation2 + $0xc0] sm:$0xf] }
 0x18f   : > { %v3036_v54 = vrot.slane %v3034_v55, 5  ;;  %v3135_v8 = vshrl.u32 %v2771_v50, 16  ;;  %v3138_v11 = vshll.u32 %v2771_v50, 16 }
 0x190   : > { %v3055_v9 = vor.u32 %v3054_v19, %v9390_v39  ;;  %v3070_v27 = vrot.slane %v3069_v35, 4  ;;  %v3098_v19 = vrot.slane %v3096_v28, 5  ;;  %v3051_v7 = vsel %vm7862_vm6, %v3046_v57, %v9390_v39  ;;  %v7723_v39 = vld [vmem:[#allocation2 + $0xc4] sm:$0xf] }
 0x191   : > { %v3037_v51 = vsel %vm7862_vm6, %v3032_v15, %v3036_v54  ;;  %v7722_v15 = vld [vmem:[#allocation2 + $0xb0] sm:$0x1]  ;;  %v3140_v28 = vrot.slane %v3138_v11, 5 }
 0x192   : > { %7215 = vmatmul.mubr.bf16.gmra.mrb[12].mxu0 %v6406_v10  ;;  %v3079_v10 = vor.u32 %v3078_v21, %v9395_v40  ;;  %v3056_v55 = vrot.slane %v3055_v9, 4  ;;  %v6217_v38 = vcombine.low %v3027_v30, %v3037_v51  ;;  %v3113_v21 = vrot.slane %v3111_v26, 4 }
 0x193   : > { %6987 = vmatmul.mubr.bf16.gmra.mrb[24].mxu1 %v7648_v61  ;;  %v6215_v61 = vcombine.low %v2979_v1, %v2989_v59  ;;  %7218 = vmatprep.mubr.bf16.mxu0 %v6407_v63  ;;  %v3100_v63 = vshrl.u32 %v7720_v17, 16  ;;  %v7721_v1 = vld [vmem:[#allocation2 + $0xb8] sm:$0xf]  ;;  %v3106_v41 = vshll.u32 %v7722_v15, 16  ;;  %v3148_v9 = vshrl.u32 %v7723_v39, 16 }
 0x194   : > { %6990 = vmatprep.mubr.bf16.mxu1 %v7649_v6  ;;  %v2765_v6 = vld [vmem:[#allocation2 + $0xa8] sm:$0xf]  ;;  %v3120_v59 = vshll.u32 %v7721_v1, 16  ;;  %v3124_v13 = vshrl.u32 %v7721_v1, 16  ;;  %v3080_v43 = vrot.slane %v3079_v10, 4  ;;  %v3061_v22 = vsel %vm7862_vm6, %v3056_v55, %v3060_v5 }
 0x195   : > { %v3087_v49 = vshrl.u32 %v2765_v6, 16  ;;  %v3090_v62 = vshll.u32 %v2765_v6, 16  ;;  %v3102_v58 = vrot.slane %v3100_v63, 4  ;;  %v3144_v6 = vshll.u32 %v7723_v39, 16 }
 0x196   : > { %v3126_v54 = vrot.slane %v3124_v13, 4  ;;  %v3085_v25 = vsel %vm7862_vm6, %v3080_v43, %v3084_v42  ;;  %v3137_v17 = vrot.slane %v3135_v8, 4  ;;  %v3150_v30 = vrot.slane %v3148_v9, 4 }
 0x197   : > { %v3089_v12 = vrot.slane %v3087_v49, 4  ;;  %v3092_v23 = vrot.slane %v3090_v62, 5  ;;  %v3108_v62 = vrot.slane %v3106_v41, 5  ;;  %v3146_v63 = vrot.slane %v3144_v6, 5 }
 0x198   : > { %v3132_v5 = vrot.slane %v3130_v4, 5 }
 0x199   : > { %v3093_v32 = vor.u32 %v3092_v23, %v3089_v12  ;;  %v3151_v46 = vor.u32 %v3150_v30, %v3146_v63 }
 0x19a   : > { %7219 = vmatmul.mubr.bf16.gmra.mrb[16].mxu0 %v6408_v60  ;;  %v3075_v60 = vsel %vm7862_vm6, %v3070_v27, %v9395_v40  ;;  %v6218_v40 = vcombine.low %v3051_v7, %v3061_v22 }
 0x19b   : > { %6991 = vmatmul.mubr.bf16.gmra.mrb[28].mxu1 %v7650_v37  ;;  %7222 = vmatprep.mubr.bf16.mxu0 %v6409_v14  ;;  %v3116_v37 = vrot.slane %v3114_v16, 5  ;;  %v3103_v14 = vor.u32 %v3102_v58, %v3098_v19  ;;  %v3094_v56 = vrot.slane %v3093_v32, 4  ;;  %v3152_v55 = vrot.slane %v3151_v46, 4 }
 0x19c   : > { %7026 = vmatprep.mubr.bf16.mxu1 %v6215_v61  ;;  %v3122_v61 = vrot.slane %v3120_v59, 5 }
 0x19d   : > { %v3117_v35 = vor.u32 %v3116_v37, %v3113_v21  ;;  %v3104_v49 = vrot.slane %v3103_v14, 4  ;;  %v3099_v44 = vsel %vm7862_vm6, %v3094_v56, %v3098_v19 }
 0x19e   : > { %v3127_v10 = vor.u32 %v3126_v54, %v3122_v61 }
 0x19f   : > { %v3118_v51 = vrot.slane %v3117_v35, 4  ;;  %v3109_v31 = vsel %vm7862_vm6, %v3104_v49, %v3108_v62 }
 0x1a0   : > { %v3128_v57 = vrot.slane %v3127_v10, 4  ;;  %v6220_v1 = vcombine.low %v3099_v44, %v3109_v31 }
 0x1a1   : > { %v3123_v26 = vsel %vm7862_vm6, %v3118_v51, %v3122_v61 }
 0x1a2   : > { %7223 = vmatmul.mubr.bf16.gmra.mrb[20].mxu0 %v6410_v47  ;;  %v3141_v47 = vor.u32 %v3140_v28, %v3137_v17  ;;  %v3133_v16 = vsel %vm7862_vm6, %v3128_v57, %v3132_v5 }
 0x1a3   : > { %7027 = vmatmul.mubr.bf16.vlgmr.msra.gmra.mrb[16].mxu1 %v9241_v52  ;;  %v6219_v52 = vcombine.low %v3075_v60, %v3085_v25  ;;  %7226 = vmatprep.mubr.bf16.mxu0 %v6411_v36  ;;  %v3154_v36 = vshll.u32 %v7725_v0, 16  ;;  %v6221_v59 = vcombine.low %v3123_v26, %v3133_v16 }
 0x1a4   : > { %7030 = vmatprep.mubr.bf16.mxu1 %v6217_v38  ;;  %v3142_v13 = vrot.slane %v3141_v47, 4 }
 0x1a5   : > { %v3156_v27 = vrot.slane %v3154_v36, 5 }
 0x1a6   : > { %v3147_v43 = vsel %vm7862_vm6, %v3142_v13, %v3146_v63 }
 0x1a7   : > { %v3157_v42 = vsel %vm7862_vm6, %v3152_v55, %v3156_v27 }
 0x1a8   : > { %v6222_v29 = vcombine.low %v3147_v43, %v3157_v42 }
 0x1aa   : > { %7227 = vmatmul.mubr.bf16.gmra.mrb[24].mxu0 %v6412_v24 }
 0x1ab   : > { %7031 = vmatmul.mubr.bf16.gmra.mrb[20].mxu1 %v6218_v40  ;;  %7230 = vmatprep.mubr.bf16.mxu0 %v6413_v33 }
 0x1ac   : > { %7034 = vmatprep.mubr.bf16.mxu1 %v6219_v52 }
 0x1b2   : > { %7231 = vmatmul.mubr.bf16.gmra.mrb[28].mxu0 %v6414_v48 }
 0x1b3   : > { %7035 = vmatmul.mubr.bf16.gmra.mrb[24].mxu1 %v6220_v1 }
 0x1b4   : > { %7038 = vmatprep.mubr.bf16.mxu1 %v6221_v59 }
 0x1bb   : > { %7039 = vmatmul.mubr.bf16.gmra.mrb[28].mxu1 %v6222_v29 }
 0x236   : > { %v6964_v3 = vpop.f32.mrb[0].mxu1 }
 0x237   : > { %v2567_v24 = vpop.f32.mrb[1].mxu1 }
 0x238   : > { %v6965_v20 = vpop.f32.mrb[2].mxu1 }
 0x239   : > { %v2570_v2 = vpop.f32.mrb[3].mxu1 }
 0x23e   : > { %v6968_v33 = vpop.f32.mrb[4].mxu1 }
 0x23f   : > { %v2583_v12 = vpop.f32.mrb[5].mxu1 }
 0x240   : > { %v6969_v23 = vpop.f32.mrb[6].mxu1 }
 0x241   : > { %v2586_v19 = vpop.f32.mrb[7].mxu1 }
 0x246   : > { %v6972_v58 = vpop.f32.mrb[8].mxu1 }
 0x247   : > { %v2599_v38 = vpop.f32.mrb[9].mxu1 }
 0x248   : > { %v6973_v21 = vpop.f32.mrb[10].mxu1 }
 0x249   : > { %v2602_v34 = vpop.f32.mrb[11].mxu1 }
 0x24d   : > { %v7204_v48 = vpop.f32.mrb[0].mxu0 }
 0x24e   : > { %v9451_v37 = vpop.f32.mrb[12].mxu1  ;;  %v7250_v54 = vadd.f32 %v7204_v48, %v6964_v3  ;;  %v5458_v50 = vpop.f32.mrb[1].mxu0 }
 0x24f   : > { %v9453_v61 = vpop.f32.mrb[13].mxu1  ;;  %v7251_v7 = vadd.f32 %v5458_v50, %v2567_v24  ;;  %v7205_v22 = vpop.f32.mrb[2].mxu0 }
 0x250   : > { %v9455_v45 = vpop.f32.mrb[14].mxu1  ;;  %v7252_v60 = vadd.f32 %v7205_v22, %v6965_v20  ;;  %v5461_v25 = vpop.f32.mrb[3].mxu0  ;;  %v5816_v39 = vmul.f32 %v7250_v54, %v7250_v54 }
 0x251   : > { %v9457_v18 = vpop.f32.mrb[15].mxu1  ;;  %v7253_v32 = vadd.f32 %v5461_v25, %v2570_v2  ;;  %v5814_v15 = vmul.f32 %v7251_v7, %v7251_v7 }
 0x252   : > { %v6499_v14 = vpack.c.bf16 %v7252_v60, %v7250_v54  ;;  %v5817_v4 = vmul.f32 %v7252_v60, %v7252_v60 }
 0x253   : > { %v6494_v41 = vpack.c.bf16 %v7253_v32, %v7251_v7  ;;  %v5777_v8 = vadd.f32 %v7253_v32, %v7251_v7  ;;  %v5815_v11 = vmul.f32 %v7253_v32, %v7253_v32 }
 0x254   : > { %6571 = vst [vmem:[%s9464_s10 + $0x8] sm:$0xff] %v6499_v14  }
 0x255   : > { %6495 = vst [vmem:[%s9464_s10] sm:$0xff] %v6494_v41   ;;  %v5778_v6 = vadd.f32 %v7250_v54, %v5777_v8  ;;  %v5846_v9 = vadd.f32 %v5815_v11, %v5814_v15  ;;  %v7208_v35 = vpop.f32.mrb[4].mxu0 }
 0x256   : > { %v7254_v10 = vadd.f32 %v7208_v35, %v6968_v33  ;;  %v5474_v53 = vpop.f32.mrb[5].mxu0 }
 0x257   : > { %v5847_v40 = vadd.f32 %v5846_v9, %v5816_v39  ;;  %v7255_v52 = vadd.f32 %v5474_v53, %v2583_v12  ;;  %v5779_v56 = vadd.f32 %v7252_v60, %v5778_v6  ;;  %v7209_v49 = vpop.f32.mrb[6].mxu0 }
 0x258   : > { %v7256_v62 = vadd.f32 %v7209_v49, %v6969_v23  ;;  %v5477_v17 = vpop.f32.mrb[7].mxu0  ;;  %v5820_v46 = vmul.f32 %v7254_v10, %v7254_v10 }
 0x259   : > { %v5780_v28 = vadd.f32 %v7255_v52, %v5779_v56  ;;  %v5818_v63 = vmul.f32 %v7255_v52, %v7255_v52  ;;  %v5848_v30 = vadd.f32 %v5847_v40, %v5817_v4  ;;  %v7257_v51 = vadd.f32 %v5477_v17, %v2586_v19 }
 0x25a   : > { %v6509_v57 = vpack.c.bf16 %v7256_v62, %v7254_v10  ;;  %v5821_v59 = vmul.f32 %v7256_v62, %v7256_v62 }
 0x25b   : > { %v5849_v5 = vadd.f32 %v5848_v30, %v5818_v63  ;;  %v6504_v44 = vpack.c.bf16 %v7257_v51, %v7255_v52  ;;  %v5781_v31 = vadd.f32 %v7257_v51, %v5780_v28  ;;  %v5819_v47 = vmul.f32 %v7257_v51, %v7257_v51 }
 0x25c   : > { %6573 = vst [vmem:[%s9464_s10 + $0x18] sm:$0xff] %v6509_v57  }
 0x25d   : > { %6572 = vst [vmem:[%s9464_s10 + $0x10] sm:$0xff] %v6504_v44   ;;  %v5782_v0 = vadd.f32 %v7254_v10, %v5781_v31  ;;  %v5850_v36 = vadd.f32 %v5849_v5, %v5819_v47  ;;  %v7212_v26 = vpop.f32.mrb[8].mxu0 }
 0x25e   : > { %v7258_v16 = vadd.f32 %v7212_v26, %v6972_v58  ;;  %v5490_v1 = vpop.f32.mrb[9].mxu0 }
 0x25f   : > { %v5851_v13 = vadd.f32 %v5850_v36, %v5820_v46  ;;  %v7259_v55 = vadd.f32 %v5490_v1, %v2599_v38  ;;  %v5783_v27 = vadd.f32 %v7256_v62, %v5782_v0  ;;  %v7213_v43 = vpop.f32.mrb[10].mxu0 }
 0x260   : > { %v7260_v42 = vadd.f32 %v7213_v43, %v6973_v21  ;;  %v5493_v29 = vpop.f32.mrb[11].mxu0  ;;  %v5824_v58 = vmul.f32 %v7258_v16, %v7258_v16 }
 0x261   : > { %v5784_v3 = vadd.f32 %v7259_v55, %v5783_v27  ;;  %v5822_v24 = vmul.f32 %v7259_v55, %v7259_v55  ;;  %v5852_v20 = vadd.f32 %v5851_v13, %v5821_v59  ;;  %v7261_v2 = vadd.f32 %v5493_v29, %v2602_v34 }
 0x262   : > { %v6519_v33 = vpack.c.bf16 %v7260_v42, %v7258_v16  ;;  %v5825_v21 = vmul.f32 %v7260_v42, %v7260_v42 }
 0x263   : > { %v5853_v12 = vadd.f32 %v5852_v20, %v5822_v24  ;;  %v6514_v23 = vpack.c.bf16 %v7261_v2, %v7259_v55  ;;  %v5785_v19 = vadd.f32 %v7261_v2, %v5784_v3  ;;  %v5823_v48 = vmul.f32 %v7261_v2, %v7261_v2 }
 0x264   : > { %6575 = vst [vmem:[%s9464_s10 + $0x28] sm:$0xff] %v6519_v33  }
 0x265   : > { %6574 = vst [vmem:[%s9464_s10 + $0x20] sm:$0xff] %v6514_v23   ;;  %v5786_v54 = vadd.f32 %v7258_v16, %v5785_v19  ;;  %v5854_v50 = vadd.f32 %v5853_v12, %v5823_v48  ;;  %v7216_v38 = vpop.f32.mrb[12].mxu0 }
 0x266   : > { %v7262_v7 = vadd.f32 %v7216_v38, %v9451_v37  ;;  %v5506_v22 = vpop.f32.mrb[13].mxu0 }
 0x267   : > { %v5855_v60 = vadd.f32 %v5854_v50, %v5824_v58  ;;  %v7263_v25 = vadd.f32 %v5506_v22, %v9453_v61  ;;  %v5787_v34 = vadd.f32 %v7260_v42, %v5786_v54  ;;  %v7217_v32 = vpop.f32.mrb[14].mxu0 }
 0x268   : > { %v7264_v14 = vadd.f32 %v7217_v32, %v9455_v45  ;;  %v5509_v15 = vpop.f32.mrb[15].mxu0  ;;  %v5828_v53 = vmul.f32 %v7262_v7, %v7262_v7 }
 0x269   : > { %v5788_v41 = vadd.f32 %v7263_v25, %v5787_v34  ;;  %v5826_v8 = vmul.f32 %v7263_v25, %v7263_v25  ;;  %v5856_v11 = vadd.f32 %v5855_v60, %v5825_v21  ;;  %v7265_v39 = vadd.f32 %v5509_v15, %v9457_v18 }
 0x26a   : > { %v6529_v6 = vpack.c.bf16 %v7264_v14, %v7262_v7  ;;  %v5829_v56 = vmul.f32 %v7264_v14, %v7264_v14 }
 0x26b   : > { %v5857_v9 = vadd.f32 %v5856_v11, %v5826_v8  ;;  %v6524_v37 = vpack.c.bf16 %v7265_v39, %v7263_v25  ;;  %v5789_v35 = vadd.f32 %v7265_v39, %v5788_v41  ;;  %v5827_v10 = vmul.f32 %v7265_v39, %v7265_v39 }
 0x26c   : > { %6577 = vst [vmem:[%s9464_s10 + $0x38] sm:$0xff] %v6529_v6  }
 0x26d   : > { %6576 = vst [vmem:[%s9464_s10 + $0x30] sm:$0xff] %v6524_v37   ;;  %v5790_v61 = vadd.f32 %v7262_v7, %v5789_v35  ;;  %v5858_v4 = vadd.f32 %v5857_v9, %v5827_v10  ;;  %v7220_v40 = vpop.f32.mrb[16].mxu0 }
 0x26e   : > { %v5522_v52 = vpop.f32.mrb[17].mxu0 }
 0x26f   : > { %v5859_v45 = vadd.f32 %v5858_v4, %v5828_v53  ;;  %v5791_v49 = vadd.f32 %v7264_v14, %v5790_v61  ;;  %v7221_v62 = vpop.f32.mrb[18].mxu0 }
 0x270   : > { %v5525_v17 = vpop.f32.mrb[19].mxu0 }
 0x271   : > { %v5860_v28 = vadd.f32 %v5859_v45, %v5829_v56 }
 0x275   : > { %v7224_v31 = vpop.f32.mrb[20].mxu0 }
 0x276   : > { %v7028_v63 = vpop.f32.mrb[16].mxu1  ;;  %v5538_v36 = vpop.f32.mrb[21].mxu0 }
 0x277   : > { %v7266_v18 = vadd.f32 %v7220_v40, %v7028_v63  ;;  %v3385_v30 = vpop.f32.mrb[17].mxu1  ;;  %v7225_v16 = vpop.f32.mrb[22].mxu0 }
 0x278   : > { %v7267_v51 = vadd.f32 %v5522_v52, %v3385_v30  ;;  %v7029_v57 = vpop.f32.mrb[18].mxu1  ;;  %v5541_v27 = vpop.f32.mrb[23].mxu0 }
 0x279   : > { %v7268_v5 = vadd.f32 %v7221_v62, %v7029_v57  ;;  %v3388_v44 = vpop.f32.mrb[19].mxu1  ;;  %v5832_v43 = vmul.f32 %v7266_v18, %v7266_v18 }
 0x27a   : > { %v5792_v47 = vadd.f32 %v7267_v51, %v5791_v49  ;;  %v5830_v46 = vmul.f32 %v7267_v51, %v7267_v51  ;;  %v7269_v0 = vadd.f32 %v5525_v17, %v3388_v44 }
 0x27b   : > { %v6539_v26 = vpack.c.bf16 %v7268_v5, %v7266_v18  ;;  %v5833_v2 = vmul.f32 %v7268_v5, %v7268_v5 }
 0x27c   : > { %v5861_v1 = vadd.f32 %v5860_v28, %v5830_v46  ;;  %v6534_v59 = vpack.c.bf16 %v7269_v0, %v7267_v51  ;;  %v5793_v13 = vadd.f32 %v7269_v0, %v5792_v47  ;;  %v5831_v55 = vmul.f32 %v7269_v0, %v7269_v0 }
 0x27d   : > { %6579 = vst [vmem:[%s9464_s10 + $0x48] sm:$0xff] %v6539_v26   ;;  %v7228_v54 = vpop.f32.mrb[24].mxu0 }
 0x27e   : > { %6578 = vst [vmem:[%s9464_s10 + $0x40] sm:$0xff] %v6534_v59   ;;  %v5794_v42 = vadd.f32 %v7266_v18, %v5793_v13  ;;  %v5862_v29 = vadd.f32 %v5861_v1, %v5831_v55  ;;  %v7032_v3 = vpop.f32.mrb[20].mxu1  ;;  %v5554_v21 = vpop.f32.mrb[25].mxu0 }
 0x27f   : > { %v7270_v24 = vadd.f32 %v7224_v31, %v7032_v3  ;;  %v3401_v20 = vpop.f32.mrb[21].mxu1  ;;  %v7229_v25 = vpop.f32.mrb[26].mxu0 }
 0x280   : > { %v5863_v33 = vadd.f32 %v5862_v29, %v5832_v43  ;;  %v7271_v12 = vadd.f32 %v5538_v36, %v3401_v20  ;;  %v5795_v23 = vadd.f32 %v7268_v5, %v5794_v42  ;;  %v7033_v19 = vpop.f32.mrb[22].mxu1  ;;  %v5557_v41 = vpop.f32.mrb[27].mxu0 }
 0x281   : > { %v7272_v48 = vadd.f32 %v7225_v16, %v7033_v19  ;;  %v3404_v58 = vpop.f32.mrb[23].mxu1  ;;  %v5836_v8 = vmul.f32 %v7270_v24, %v7270_v24 }
 0x282   : > { %v5796_v50 = vadd.f32 %v7271_v12, %v5795_v23  ;;  %v5834_v38 = vmul.f32 %v7271_v12, %v7271_v12  ;;  %v5864_v7 = vadd.f32 %v5863_v33, %v5833_v2  ;;  %v7273_v22 = vadd.f32 %v5541_v27, %v3404_v58 }
 0x283   : > { %v6549_v60 = vpack.c.bf16 %v7272_v48, %v7270_v24  ;;  %v5837_v35 = vmul.f32 %v7272_v48, %v7272_v48 }
 0x284   : > { %v5865_v34 = vadd.f32 %v5864_v7, %v5834_v38  ;;  %v6544_v32 = vpack.c.bf16 %v7273_v22, %v7271_v12  ;;  %v5797_v14 = vadd.f32 %v7273_v22, %v5796_v50  ;;  %v5835_v15 = vmul.f32 %v7273_v22, %v7273_v22 }
 0x285   : > { %6581 = vst [vmem:[%s9464_s10 + $0x58] sm:$0xff] %v6549_v60   ;;  %v7232_v56 = vpop.f32.mrb[28].mxu0 }
 0x286   : > { %6580 = vst [vmem:[%s9464_s10 + $0x50] sm:$0xff] %v6544_v32   ;;  %v5798_v11 = vadd.f32 %v7270_v24, %v5797_v14  ;;  %v5866_v39 = vadd.f32 %v5865_v34, %v5835_v15  ;;  %v7036_v6 = vpop.f32.mrb[24].mxu1  ;;  %v5570_v28 = vpop.f32.mrb[29].mxu0 }
 0x287   : > { %v7274_v9 = vadd.f32 %v7228_v54, %v7036_v6  ;;  %v3417_v37 = vpop.f32.mrb[25].mxu1  ;;  %v7233_v18 = vpop.f32.mrb[30].mxu0 }
 0x288   : > { %v5867_v10 = vadd.f32 %v5866_v39, %v5836_v8  ;;  %v7275_v53 = vadd.f32 %v5554_v21, %v3417_v37  ;;  %v5799_v61 = vadd.f32 %v7272_v48, %v5798_v11  ;;  %v7037_v4 = vpop.f32.mrb[26].mxu1  ;;  %v5573_v44 = vpop.f32.mrb[31].mxu0 }
 0x289   : > { %v7276_v40 = vadd.f32 %v7229_v25, %v7037_v4  ;;  %v3420_v52 = vpop.f32.mrb[27].mxu1  ;;  %v5840_v31 = vmul.f32 %v7274_v9, %v7274_v9 }
 0x28a   : > { %v5800_v45 = vadd.f32 %v7275_v53, %v5799_v61  ;;  %v5838_v49 = vmul.f32 %v7275_v53, %v7275_v53  ;;  %v5868_v62 = vadd.f32 %v5867_v10, %v5837_v35  ;;  %v7277_v17 = vadd.f32 %v5557_v41, %v3420_v52 }
 0x28b   : > { %v6559_v63 = vpack.c.bf16 %v7276_v40, %v7274_v9  ;;  %v5841_v16 = vmul.f32 %v7276_v40, %v7276_v40 }
 0x28c   : > { %v5869_v30 = vadd.f32 %v5868_v62, %v5838_v49  ;;  %v6554_v51 = vpack.c.bf16 %v7277_v17, %v7275_v53  ;;  %v5801_v57 = vadd.f32 %v7277_v17, %v5800_v45  ;;  %v5839_v5 = vmul.f32 %v7277_v17, %v7277_v17 }
 0x28d   : > { %6583 = vst [vmem:[%s9464_s10 + $0x68] sm:$0xff] %v6559_v63  }
 0x28e   : > { %6582 = vst [vmem:[%s9464_s10 + $0x60] sm:$0xff] %v6554_v51   ;;  %v5802_v47 = vadd.f32 %v7274_v9, %v5801_v57  ;;  %v5870_v46 = vadd.f32 %v5869_v30, %v5839_v5  ;;  %v7040_v0 = vpop.f32.mrb[28].mxu1 }
 0x28f   : > { %v7278_v36 = vadd.f32 %v7232_v56, %v7040_v0  ;;  %v3433_v26 = vpop.f32.mrb[29].mxu1 }
 0x290   : > { %v5871_v1 = vadd.f32 %v5870_v46, %v5840_v31  ;;  %v7279_v59 = vadd.f32 %v5570_v28, %v3433_v26  ;;  %v5803_v13 = vadd.f32 %v7276_v40, %v5802_v47  ;;  %v7041_v55 = vpop.f32.mrb[30].mxu1 }
 0x291   : > { %v7280_v27 = vadd.f32 %v7233_v18, %v7041_v55  ;;  %v3436_v43 = vpop.f32.mrb[31].mxu1  ;;  %v5844_v19 = vmul.f32 %v7278_v36, %v7278_v36 }
 0x292   : > { %v5804_v42 = vadd.f32 %v7279_v59, %v5803_v13  ;;  %v5842_v29 = vmul.f32 %v7279_v59, %v7279_v59  ;;  %v5872_v3 = vadd.f32 %v5871_v1, %v5841_v16  ;;  %v7281_v24 = vadd.f32 %v5573_v44, %v3436_v43 }
 0x293   : > { %v6569_v20 = vpack.c.bf16 %v7280_v27, %v7278_v36  ;;  %v5845_v54 = vmul.f32 %v7280_v27, %v7280_v27 }
 0x294   : > { %v5873_v2 = vadd.f32 %v5872_v3, %v5842_v29  ;;  %v6564_v33 = vpack.c.bf16 %v7281_v24, %v7279_v59  ;;  %v5805_v12 = vadd.f32 %v7281_v24, %v5804_v42  ;;  %v5843_v23 = vmul.f32 %v7281_v24, %v7281_v24 }
 0x295   : > { %6585 = vst [vmem:[%s9464_s10 + $0x78] sm:$0xff] %v6569_v20  }
 0x296   : > { %6584 = vst [vmem:[%s9464_s10 + $0x70] sm:$0xff] %v6564_v33   ;;  %v5806_v48 = vadd.f32 %v7278_v36, %v5805_v12  ;;  %v5874_v58 = vadd.f32 %v5873_v2, %v5843_v23 }
 0x298   : > { %v5807_v50 = vadd.f32 %v7280_v27, %v5806_v48  ;;  %v5875_v38 = vadd.f32 %v5874_v58, %v5844_v19 }
 0x29a   : > { %v5808_v7 = vrot.slane %v5807_v50, 4  ;;  %v5876_v22 = vadd.f32 %v5875_v38, %v5845_v54 }
 0x29c   : > { %v5809_v21 = vadd.f32 %v5808_v7, %v5807_v50  ;;  %v5877_v60 = vrot.slane %v5876_v22, 4 }
 0x29e   : > { %v5810_v25 = vrot.slane %v5809_v21, 2  ;;  %v5878_v34 = vadd.f32 %v5877_v60, %v5876_v22 }
 0x2a0   : > { %v5811_v32 = vadd.f32 %v5810_v25, %v5809_v21  ;;  %v5879_v14 = vrot.slane %v5878_v34, 2 }
 0x2a2   : > { %v5812_v15 = vrot.slane %v5811_v32, 1  ;;  %v5880_v41 = vadd.f32 %v5879_v14, %v5878_v34 }
 0x2a4   : > { %v5881_v8 = vrot.slane %v5880_v41, 1  ;;  %v5813_v11 = vadd.f32 %v5812_v15, %v5811_v32 }
 0x2a6   : > { %v5882_v39 = vadd.f32 %v5881_v8, %v5880_v41 }
 0x2a8   : > { %v5884_v6 = vsel %vm699_vm2, %v5813_v11, %v5882_v39 }
 0x2a9   : > { %5885 = vst [vmem:[%s280_s14] sm:$0x3] %v5884_v6 }
 0x2aa PF: > { %s16_s20 = sadd.s32 1, %s7748_s20   ;;  %s9582_s18 = smov %s7744_s19 }
 0x2ab   : > { %p13_p5 = scmp.ge.s32.totalorder %s16_s20, 4   ;;  %s9583_s19 = smov %s9585_s2 }
 0x2ad   :  { %15 = sbr.rel (!%p13_p5) target bundleno = 2 (0x2), region = 91 }

// kernel: res_block_basic.5
= control target key start
LH: loop header
LB: loop body
LE: loop exit
PB: predicated region body
PF: predicated region fallthrough
CT: control target
= control target key end

     0   :  { %s8171_s18 = smov 0   ;;  %s8173_s19 = smov 0   ;;  %s10014_s0 = inlined_call_operand.vmem [shape: bf16[2,16,16,128], index: 0, kind: input, shape index: {}]   ;;  %s10015_s1 = inlined_call_operand.vmem [shape: bf16[9,128,128], index: 1, kind: input, shape index: {}]   ;;  %s10016_s2 = inlined_call_operand.vmem [shape: f32[1,128], index: 2, kind: input, shape index: {}]   ;;  %s10017_s3 = inlined_call_operand.vmem [shape: f32[1,128], index: 3, kind: input, shape index: {}]   ;;  %s10018_s4 = inlined_call_operand.vmem [shape: bf16[2,16,16,128], index: 4, kind: output, shape index: {0}]   ;;  %s10019_s5 = inlined_call_operand.vmem [shape: f32[2,2,128], index: 5, kind: output, shape index: {1}]  }
   0x1   :  { %s8175_s20 = smov 0  }
   0x2 LB: > { %s25_s21 = sadd.s32 1, %s8134_s19  ;;  %p6263_p0 = scmp.ge.s32.totalorder %s8138_s20, 1  ;;  %s8138_s20 = sphi %s8175_s20, %s16_s20   ;;  %s8134_s19 = sphi %s8173_s19, %s10093_s19   ;;  %s8130_s18 = sphi %s8171_s18, %s10092_s18  }
   0x3   : > { %p26_p1 = scmp.ge.s32.totalorder %s25_s21, 2  ;;  %p215_p2 = scmp.lt.s32.totalorder %s8138_s20, 3 }
   0x5   : > { %s10095_s21 = smov (%p26_p1, %s25_s21), 0  ;;  %p216_p3 = pnand %p6263_p0, %p215_p2 }
   0x7   : > { %219 = sbr.rel (%p216_p3) target bundleno = 715 (0x2cb), region = 36 }
   0xe   : > { %v7914_v0 = vld [vmem:[%s10015_s1 + $0x40] sm:$0xff]   ;;  %v8140_v2 = vmov 0   ;;  %v7916_v3 = vld [vmem:[%s10015_s1 + $0x48] sm:$0xff]   ;;  %v7918_v5 = vld [vmem:[%s10015_s1 + $0x50] sm:$0xff]   ;;  %p257_p4 = scmp.lt.s32.totalorder %s8130_s18, 1  ;;  %vm930_vm3 = vcmask 1043456  }
   0xf   : > { %v7915_v1 = vld [vmem:[%s10015_s1 + $0x100] sm:$0xff]   ;;  %472 = vst [vmem:[#allocation2] sm:$0xf] %v8140_v2  ;;  %473 = vst [vmem:[#allocation2 + $0x4] sm:$0xf] %v8140_v2  ;;  %7185 = vmatprep.subr.bf16.mxu1 %v7914_v0  ;;  %v7917_v4 = vld [vmem:[%s10015_s1 + $0x108] sm:$0xff]  }
  0x10   : > { %474 = vst [vmem:[#allocation2 + $0x8] sm:$0x1] %v8140_v2  ;;  %475 = vst [vmem:[#allocation2 + $0xc] sm:$0xf] %v8140_v2  ;;  %7377 = vmatprep.subr.bf16.mxu0 %v7915_v1  ;;  %7186 = vmatpush3.bf16.msra.mxu1 %v7914_v0  ;;  %v7919_v6 = vld [vmem:[%s10015_s1 + $0x110] sm:$0xff]   ;;  %v7920_v7 = vld [vmem:[%s10015_s1 + $0x58] sm:$0xff]  }
  0x11   : > { %476 = vst [vmem:[#allocation2 + $0x10] sm:$0xf] %v8140_v2  ;;  %477 = vst [vmem:[#allocation2 + $0x14] sm:$0x1] %v8140_v2  ;;  %7378 = vmatpush3.bf16.msra.mxu0 %v7915_v1  ;;  %7187 = vmatprep.subr.bf16.mxu1 %v7916_v3  ;;  %s10097_s18 = smov (!%p257_p4, %s8130_s18), 1  ;;  %v7921_v8 = vld [vmem:[%s10015_s1 + $0x118] sm:$0xff]  }
  0x12   : > { %478 = vst [vmem:[#allocation2 + $0x18] sm:$0xf] %v8140_v2  ;;  %479 = vst [vmem:[#allocation2 + $0x1c] sm:$0xf] %v8140_v2  ;;  %7379 = vmatprep.subr.bf16.mxu0 %v7917_v4  ;;  %v7922_v9 = vld [vmem:[%s10015_s1 + $0x60] sm:$0xff]   ;;  %s6729_s15 = sshll.u32 %s10097_s18, 7 }
  0x13   : > { %480 = vst [vmem:[#allocation2 + $0x20] sm:$0x1] %v8140_v2  ;;  %481 = vst [vmem:[#allocation2 + $0x24] sm:$0xf] %v8140_v2  ;;  %v7923_v10 = vld [vmem:[%s10015_s1 + $0x120] sm:$0xff]   ;;  %v7924_v11 = vld [vmem:[%s10015_s1 + $0x68] sm:$0xff]   ;;  %s8234_s26 = scalar_lea.vmem %s10014_s0, %s6729_s15 }
  0x14   : > { %482 = vst [vmem:[#allocation2 + $0x28] sm:$0xf] %v8140_v2  ;;  %483 = vst [vmem:[#allocation2 + $0x2c] sm:$0x1] %v8140_v2  ;;  %7188 = vmatpush3.bf16.msra.mxu1 %v7916_v3  ;;  %v7925_v15 = vld [vmem:[%s10015_s1 + $0x128] sm:$0xff]   ;;  %v6796_v21 = vld [vmem:[%s8234_s26] sm:$0xff]  }
  0x15   : > { %484 = vst [vmem:[#allocation2 + $0x30] sm:$0xf] %v8140_v2  ;;  %485 = vst [vmem:[#allocation2 + $0x34] sm:$0xf] %v8140_v2  ;;  %7380 = vmatpush3.bf16.msra.mxu0 %v7917_v4  ;;  %7189 = vmatprep.subr.bf16.mxu1 %v7918_v5  ;;  %vm1111_vm0 = vsmask.f32 3328  ;;  %v6797_v24 = vunpack.c.l.bf16 %v6796_v21  ;;  %v6798_v25 = vunpack.c.h.bf16 %v6796_v21 }
  0x16   : > { %486 = vst [vmem:[#allocation2 + $0x38] sm:$0x1] %v8140_v2  ;;  %487 = vst [vmem:[#allocation2 + $0x3c] sm:$0xf] %v8140_v2  ;;  %7381 = vmatprep.subr.bf16.mxu0 %v7919_v6  ;;  %v1047_v12 = vld [vmem:[#allocation2] sm:$0xf] }
  0x17   : > { %488 = vst [vmem:[#allocation2 + $0x40] sm:$0xf] %v8140_v2  ;;  %489 = vst [vmem:[#allocation2 + $0x44] sm:$0x1] %v8140_v2  ;;  %v1048_v13 = vld [vmem:[#allocation2 + $0x4] sm:$0xf] }
  0x18   : > { %490 = vst [vmem:[#allocation2 + $0x48] sm:$0xf] %v8140_v2  ;;  %491 = vst [vmem:[#allocation2 + $0x4c] sm:$0xf] %v8140_v2  ;;  %7190 = vmatpush3.bf16.msra.mxu1 %v7918_v5  ;;  %v1095_v14 = vld [vmem:[#allocation2 + $0x8] sm:$0x1] }
  0x19   : > { %492 = vst [vmem:[#allocation2 + $0x50] sm:$0x1] %v8140_v2  ;;  %493 = vst [vmem:[#allocation2 + $0x54] sm:$0xf] %v8140_v2  ;;  %7382 = vmatpush3.bf16.msra.mxu0 %v7919_v6  ;;  %7191 = vmatprep.subr.bf16.mxu1 %v7920_v7  ;;  %v1115_v16 = vshrl.u32 %v1047_v12, 16  ;;  %v1118_v17 = vshll.u32 %v1047_v12, 16 }
  0x1a   : > { %494 = vst [vmem:[#allocation2 + $0x58] sm:$0xf] %v8140_v2  ;;  %495 = vst [vmem:[#allocation2 + $0x5c] sm:$0x1] %v8140_v2  ;;  %7383 = vmatprep.subr.bf16.mxu0 %v7921_v8  ;;  %vm1112_vm1 = vsmask.f32 7440 }
  0x1b   : > { %496 = vst [vmem:[#allocation2 + $0x60] sm:$0xf] %v8140_v2  ;;  %497 = vst [vmem:[#allocation2 + $0x64] sm:$0xf] %v8140_v2  ;;  %v1124_v18 = vshll.u32 %v1048_v13, 16  ;;  %v1128_v19 = vshrl.u32 %v1048_v13, 16 }
  0x1c   : > { %498 = vst [vmem:[#allocation2 + $0x68] sm:$0x1] %v8140_v2  ;;  %499 = vst [vmem:[#allocation2 + $0x6c] sm:$0xf] %v8140_v2  ;;  %7192 = vmatpush3.bf16.msra.mxu1 %v7920_v7  ;;  %v1134_v20 = vshll.u32 %v1095_v14, 16  ;;  %v1117_v22 = vrot.slane %v1115_v16, 4 }
  0x1d   : > { %500 = vst [vmem:[#allocation2 + $0x70] sm:$0xf] %v8140_v2  ;;  %501 = vst [vmem:[#allocation2 + $0x74] sm:$0x1] %v8140_v2  ;;  %7384 = vmatpush3.bf16.msra.mxu0 %v7921_v8  ;;  %7193 = vmatprep.subr.bf16.mxu1 %v7922_v9  ;;  %v1120_v23 = vrot.slane %v1118_v17, 5  ;;  %v7926_v27 = vld [vmem:[%s10015_s1 + $0x70] sm:$0xff]  }
  0x1e   : > { %502 = vst [vmem:[#allocation2 + $0x78] sm:$0xf] %v8140_v2  ;;  %503 = vst [vmem:[#allocation2 + $0x7c] sm:$0xf] %v8140_v2  ;;  %7385 = vmatprep.subr.bf16.mxu0 %v7923_v10  ;;  %v8243_v26 = vld [vmem:[%s10016_s2] ss:$0 sm:$0xff] }
  0x1f   : > { %504 = vst [vmem:[#allocation2 + $0x80] sm:$0x1] %v8140_v2  ;;  %505 = vst [vmem:[#allocation2 + $0x84] sm:$0xf] %v8140_v2  ;;  %v1126_v28 = vrot.slane %v1124_v18, 5  ;;  %v1130_v29 = vrot.slane %v1128_v19, 4  ;;  %v1121_v32 = vor.u32 %v1120_v23, %v1117_v22  ;;  %v353_v33 = vmul.f32 %v6797_v24, %v8243_v26 }
  0x20   : > { %506 = vst [vmem:[#allocation2 + $0x88] sm:$0xf] %v8140_v2  ;;  %507 = vst [vmem:[#allocation2 + $0x8c] sm:$0x1] %v8140_v2  ;;  %7194 = vmatpush3.bf16.msra.mxu1 %v7922_v9  ;;  %v8251_v30 = vld [vmem:[%s10017_s3] ss:$0 sm:$0xff]  ;;  %v354_v34 = vmul.f32 %v6798_v25, %v8243_v26 }
  0x21   : > { %508 = vst [vmem:[#allocation2 + $0x90] sm:$0xf] %v8140_v2  ;;  %509 = vst [vmem:[#allocation2 + $0x94] sm:$0xf] %v8140_v2  ;;  %7386 = vmatpush3.bf16.msra.mxu0 %v7923_v10  ;;  %7195 = vmatprep.subr.bf16.mxu1 %v7924_v11  ;;  %v7927_v31 = vld [vmem:[%s10015_s1 + $0x130] sm:$0xff]   ;;  %v1131_v36 = vor.u32 %v1130_v29, %v1126_v28  ;;  %v1136_v37 = vrot.slane %v1134_v20, 5  ;;  %v392_v39 = vadd.f32 %v8251_v30, %v353_v33 }
  0x22   : > { %510 = vst [vmem:[#allocation2 + $0x98] sm:$0x1] %v8140_v2  ;;  %511 = vst [vmem:[#allocation2 + $0x9c] sm:$0xf] %v8140_v2  ;;  %7387 = vmatprep.subr.bf16.mxu0 %v7925_v15  ;;  %v1122_v38 = vrot.slane %v1121_v32, 4  ;;  %v393_v40 = vadd.f32 %v8251_v30, %v354_v34  ;;  %v7928_v41 = vld [vmem:[%s10015_s1 + $0x78] sm:$0xff]  }
  0x23   : > { %512 = vst [vmem:[#allocation2 + $0xa0] sm:$0xf] %v8140_v2  ;;  %513 = vst [vmem:[#allocation2 + $0xa4] sm:$0x1] %v8140_v2  ;;  %v7929_v42 = vld [vmem:[%s10015_s1 + $0x138] sm:$0xff]   ;;  %v1132_v43 = vrot.slane %v1131_v36, 4 }
  0x24   : > { %514 = vst [vmem:[#allocation2 + $0xa8] sm:$0xf] %v8140_v2  ;;  %515 = vst [vmem:[#allocation2 + $0xac] sm:$0xf] %v8140_v2  ;;  %7196 = vmatpush3.bf16.msra.mxu1 %v7924_v11  ;;  %vm937_vm4 = vcmask 1040384   ;;  %v6939_v44 = vld [vmem:[%s8234_s26 + $0x8] sm:$0xff]  }
  0x25   : > { %516 = vst [vmem:[#allocation2 + $0xb0] sm:$0x1] %v8140_v2  ;;  %517 = vst [vmem:[#allocation2 + $0xb4] sm:$0xf] %v8140_v2  ;;  %7388 = vmatpush3.bf16.msra.mxu0 %v7925_v15  ;;  %7197 = vmatprep.subr.bf16.mxu1 %v7926_v27  ;;  %v424_v46 = vmax.f32 %v392_v39, 0.0  ;;  %v425_v47 = vmax.f32 %v393_v40, 0.0  ;;  %v6801_v48 = vunpack.c.l.bf16 %v6939_v44  ;;  %v6802_v50 = vunpack.c.h.bf16 %v6939_v44 }
  0x26   : > { %518 = vst [vmem:[#allocation2 + $0xb8] sm:$0xf] %v8140_v2  ;;  %519 = vst [vmem:[#allocation2 + $0xbc] sm:$0x1] %v8140_v2  ;;  %7389 = vmatprep.subr.bf16.mxu0 %v7927_v31  ;;  %vm606_vm5 = vsmask.f32 256 }
  0x27   : > { %520 = vst [vmem:[#allocation2 + $0xc0] sm:$0xf] %v8140_v2  ;;  %521 = vst [vmem:[#allocation2 + $0xc4] sm:$0xf] %v8140_v2  ;;  %vm607_vm6 = vsmask.f32 4368  ;;  %v6731_v53 = vpack.c.bf16 %v424_v46, %v424_v46  ;;  %v6732_v54 = vpack.c.bf16 %v425_v47, %v425_v47  ;;  %v355_v56 = vmul.f32 %v6801_v48, %v8243_v26 }
  0x28   : > { %522 = vst [vmem:[#allocation2 + $0xc8] sm:$0x1] %v8140_v2  ;;  %523 = vst [vmem:[#allocation2 + $0xcc] sm:$0xf] %v8140_v2  ;;  %v6940_v51 = vld [vmem:[%s8234_s26 + $0x10] sm:$0xff]   ;;  %7198 = vmatpush3.bf16.msra.mxu1 %v7926_v27  ;;  %v8281_v55 = vld [vmem:[%s10015_s1] sm:$0xff]   ;;  %v356_v57 = vmul.f32 %v6802_v50, %v8243_v26 }
  0x29   : > { %524 = vst [vmem:[#allocation2 + $0xd0] sm:$0xf] %v8140_v2  ;;  %525 = vst [vmem:[#allocation2 + $0xd4] sm:$0x1] %v8140_v2  ;;  %7390 = vmatpush3.bf16.msra.mxu0 %v7927_v31  ;;  %7199 = vmatprep.subr.bf16.mxu1 %v7928_v41  ;;  %vm931_vm7 = vsmask.f32 7938  ;;  %v6805_v58 = vunpack.c.l.bf16 %v6940_v51  ;;  %v6806_v59 = vunpack.c.h.bf16 %v6940_v51  ;;  %v394_v3 = vadd.f32 %v8251_v30, %v355_v56 }
  0x2a   : > { %vm8260_vm2 = vmor %vm1111_vm0, %vm1112_vm1  ;;  %7391 = vmatprep.subr.bf16.mxu0 %v7929_v42  ;;  %v610_v60 = vshrl.u32 %v6731_v53, 16  ;;  %v613_v61 = vshll.u32 %v6731_v53, 16  ;;  %v618_v62 = vshrl.u32 %v6732_v54, 16  ;;  %v621_v63 = vshll.u32 %v6732_v54, 16  ;;  %v8288_v0 = vld [vmem:[%s10015_s1 + $0x140] sm:$0xff]   ;;  %v6941_v1 = vld [vmem:[%s8234_s26 + $0x18] sm:$0xff]  }
  0x2b   : > { %v1127_v45 = vsel %vm8260_vm2, %v1122_v38, %v1126_v28  ;;  %v1137_v49 = vsel %vm8260_vm2, %v1132_v43, %v1136_v37  ;;  %vm8293_vm8 = vmand %vm937_vm4, %vm606_vm5  ;;  %v395_v4 = vadd.f32 %v8251_v30, %v356_v57  ;;  %v357_v5 = vmul.f32 %v6805_v58, %v8243_v26  ;;  %v933_v13 = vld [vmem:[#allocation2 + $0xc] sm:$0xf]  ;;  %v939_v14 = vld [vmem:[#allocation2 + $0x14] sm:$0x1] }
  0x2c   : > { %v6319_v52 = vcombine.low %v1127_v45, %v1137_v49  ;;  %v358_v6 = vmul.f32 %v6806_v59, %v8243_v26  ;;  %7200 = vmatpush3.bf16.msra.mxu1 %v7928_v41  ;;  %vm8303_vm9 = vmor %vm606_vm5, %vm607_vm6  ;;  %v612_v8 = vrot.slane %v610_v60, 7  ;;  %v620_v9 = vrot.slane %v618_v62, 7  ;;  %v6942_v33 = vld [vmem:[%s8234_s26 + $0x20] sm:$0xff]   ;;  %v942_v44 = vld [vmem:[#allocation2 + $0x18] sm:$0xf] }
  0x2d   : > { %v6809_v10 = vunpack.c.l.bf16 %v6941_v1  ;;  %v6810_v11 = vunpack.c.h.bf16 %v6941_v1  ;;  %7392 = vmatpush3.bf16.msra.mxu0 %v7929_v42  ;;  %vm8309_vm10 = vmand %vm930_vm3, %vm931_vm7  ;;  %7233 = vmatprep.subr.bf16.mxu1 %v8281_v55  ;;  %v426_v15 = vmax.f32 %v394_v3, 0.0  ;;  %v427_v16 = vmax.f32 %v395_v4, 0.0  ;;  %v946_v47 = vld [vmem:[#allocation2 + $0x20] sm:$0x1]  ;;  %v949_v1 = vld [vmem:[#allocation2 + $0x24] sm:$0xf] }
  0x2e   : > { %7201 = vmatprep.mubr.bf16.mxu1 %v6319_v52  ;;  %v396_v17 = vadd.f32 %v8251_v30, %v357_v5  ;;  %v397_v18 = vadd.f32 %v8251_v30, %v358_v6  ;;  %v615_v19 = vor.u32 %v613_v61, %v612_v8  ;;  %v616_v20 = vrot.slane %v612_v8, 4  ;;  %7425 = vmatprep.subr.bf16.mxu0 %v8288_v0  ;;  %v7974_v2 = vld [vmem:[%s10015_s1 + $0xa8] sm:$0xff]  }
  0x2f   : > { %v623_v21 = vor.u32 %v621_v63, %v620_v9  ;;  %v625_v22 = vrot.slane %v620_v9, 4  ;;  %v6733_v23 = vpack.c.bf16 %v426_v15, %v426_v15  ;;  %v6734_v24 = vpack.c.bf16 %v427_v16, %v427_v16 }
  0x30   : > { %v428_v25 = vmax.f32 %v396_v17, 0.0  ;;  %v429_v27 = vmax.f32 %v397_v18, 0.0  ;;  %v934_v29 = vsel %vm8309_vm10, %v615_v19, %v933_v13  ;;  %v359_v32 = vmul.f32 %v6809_v10, %v8243_v26 }
  0x31   : > { %v624_v28 = vsel %vm8303_vm9, %v616_v20, %v623_v21  ;;  %v940_v31 = vsel %vm8293_vm8, %v625_v22, %v939_v14  ;;  %935 = vst [vmem:[#allocation2 + $0xc] sm:$0xf] %v934_v29  ;;  %v627_v34 = vshrl.u32 %v6733_v23, 16  ;;  %v630_v36 = vshll.u32 %v6733_v23, 16 }
  0x32   : > { %936 = vst [vmem:[#allocation2 + $0x10] sm:$0xf] %v624_v28  ;;  %941 = vst [vmem:[#allocation2 + $0x14] sm:$0x1] %v940_v31  ;;  %v635_v37 = vshrl.u32 %v6734_v24, 16  ;;  %v638_v38 = vshll.u32 %v6734_v24, 16  ;;  %v6735_v39 = vpack.c.bf16 %v428_v25, %v428_v25  ;;  %v6736_v40 = vpack.c.bf16 %v429_v27, %v429_v27 }
  0x33   : > { %v398_v41 = vadd.f32 %v8251_v30, %v359_v32  ;;  %v629_v42 = vrot.slane %v627_v34, 7  ;;  %v360_v45 = vmul.f32 %v6810_v11, %v8243_v26  ;;  %v6813_v46 = vunpack.c.l.bf16 %v6942_v33 }
  0x34   : > { %v637_v43 = vrot.slane %v635_v37, 7  ;;  %v644_v48 = vshrl.u32 %v6735_v39, 16  ;;  %v647_v49 = vshll.u32 %v6735_v39, 16  ;;  %v652_v50 = vshrl.u32 %v6736_v40, 16 }
  0x35   : > { %v655_v51 = vshll.u32 %v6736_v40, 16  ;;  %v632_v52 = vor.u32 %v630_v36, %v629_v42  ;;  %v633_v53 = vrot.slane %v629_v42, 4  ;;  %v430_v59 = vmax.f32 %v398_v41, 0.0 }
  0x36   : > { %v640_v54 = vor.u32 %v638_v38, %v637_v43  ;;  %v642_v56 = vrot.slane %v637_v43, 4  ;;  %v8327_v57 = vrot.slane %v644_v48, 7  ;;  %v8329_v58 = vrot.slane %v652_v50, 7 }
  0x37   : > { %v6814_v60 = vunpack.c.h.bf16 %v6942_v33  ;;  %v943_v62 = vsel %vm8309_vm10, %v632_v52, %v942_v44  ;;  %v361_v3 = vmul.f32 %v6813_v46, %v8243_v26  ;;  %v8343_v10 = vadd.f32 %v8251_v30, %v360_v45 }
  0x38   : > { %v641_v61 = vsel %vm8303_vm9, %v633_v53, %v640_v54  ;;  %v947_v63 = vsel %vm8293_vm8, %v642_v56, %v946_v47  ;;  %v1049_v4 = vld [vmem:[#allocation2 + $0xc] sm:$0xf]  ;;  %944 = vst [vmem:[#allocation2 + $0x18] sm:$0xf] %v943_v62  ;;  %v649_v8 = vor.u32 %v647_v49, %v8327_v57  ;;  %v8340_v9 = vor.u32 %v655_v51, %v8329_v58 }
  0x39   : > { %v1050_v5 = vld [vmem:[#allocation2 + $0x10] sm:$0xf]  ;;  %v1096_v6 = vld [vmem:[#allocation2 + $0x14] sm:$0x1]  ;;  %945 = vst [vmem:[#allocation2 + $0x1c] sm:$0xf] %v641_v61  ;;  %v8345_v11 = vpack.c.bf16 %v430_v59, %v430_v59  ;;  %v362_v22 = vmul.f32 %v6814_v60, %v8243_v26  ;;  %v8353_v23 = vadd.f32 %v8251_v30, %v361_v3 }
  0x3a   : > { %948 = vst [vmem:[#allocation2 + $0x20] sm:$0x1] %v947_v63  ;;  %v1139_v13 = vshrl.u32 %v1049_v4, 16  ;;  %v1142_v14 = vshll.u32 %v1049_v4, 16  ;;  %v1148_v15 = vshll.u32 %v1050_v5, 16  ;;  %v1152_v16 = vshrl.u32 %v1050_v5, 16 }
  0x3b   : > { %v2964_v17 = vld [vmem:[#allocation2 + $0xc] sm:$0xf]  ;;  %v1158_v18 = vshll.u32 %v1096_v6, 16  ;;  %v2965_v19 = vld [vmem:[#allocation2 + $0x10] sm:$0xf]  ;;  %v950_v21 = vsel %vm8309_vm10, %v649_v8, %v949_v1  ;;  %v8362_v53 = vadd.f32 %v8251_v30, %v362_v22  ;;  %vm2141_vm11 = vcmask 1042432  }
  0x3c   : > { %v8347_v20 = vld [vmem:[#allocation2 + $0x14] sm:$0x1]  ;;  %v1141_v24 = vrot.slane %v1139_v13, 4  ;;  %v1144_v25 = vrot.slane %v1142_v14, 5  ;;  %v1150_v27 = vrot.slane %v1148_v15, 5  ;;  %v1154_v28 = vrot.slane %v1152_v16, 4 }
  0x3d   : > { %951 = vst [vmem:[#allocation2 + $0x24] sm:$0xf] %v950_v21  ;;  %v1160_v29 = vrot.slane %v1158_v18, 5  ;;  %v3013_v31 = vshrl.u32 %v2964_v17, 16  ;;  %v3016_v32 = vshll.u32 %v2964_v17, 16  ;;  %v3022_v33 = vshll.u32 %v2965_v19, 16 }
  0x3e   : > { %v1145_v34 = vor.u32 %v1144_v25, %v1141_v24  ;;  %v1155_v36 = vor.u32 %v1154_v28, %v1150_v27  ;;  %v3026_v37 = vshrl.u32 %v2965_v19, 16  ;;  %v3032_v38 = vshll.u32 %v8347_v20, 16  ;;  %v7933_v4 = vld [vmem:[%s10015_s1 + $0x8] sm:$0xff]  }
  0x3f   : > { %v3015_v39 = vrot.slane %v3013_v31, 4  ;;  %v3018_v40 = vrot.slane %v3016_v32, 5  ;;  %v3024_v41 = vrot.slane %v3022_v33, 5  ;;  %v3787_v42 = vrot.slane %v8347_v20, 5  ;;  %v2967_v47 = vld [vmem:[#allocation2 + $0x18] sm:$0xf] }
  0x40   : > { %v1146_v43 = vrot.slane %v1145_v34, 4  ;;  %v1156_v44 = vrot.slane %v1155_v36, 4  ;;  %v3028_v45 = vrot.slane %v3026_v37, 4  ;;  %v3034_v46 = vrot.slane %v3032_v38, 5  ;;  %v8357_v49 = vld [vmem:[#allocation2 + $0x1c] sm:$0xf] }
  0x41   : > { %v3019_v48 = vor.u32 %v3018_v40, %v3015_v39  ;;  %v8359_v50 = vld [vmem:[#allocation2 + $0x20] sm:$0x1]  ;;  %v3037_v51 = vshrl.u32 %v2967_v47, 16  ;;  %v3040_v52 = vshll.u32 %v2967_v47, 16  ;;  %v3046_v60 = vshll.u32 %v8357_v49, 16  ;;  %v7936_v34 = vld [vmem:[%s10015_s1 + $0x10] sm:$0xff]  }
  0x42   : > { %v1151_v54 = vsel %vm8260_vm2, %v1146_v43, %v1150_v27  ;;  %v1161_v56 = vsel %vm8260_vm2, %v1156_v44, %v1160_v29  ;;  %v3029_v59 = vor.u32 %v3028_v45, %v3024_v41  ;;  %v1051_v3 = vld [vmem:[#allocation2 + $0x18] sm:$0xf]  ;;  %v3050_v8 = vshrl.u32 %v8357_v49, 16  ;;  %v1052_v18 = vld [vmem:[#allocation2 + $0x1c] sm:$0xf] }
  0x43   : > { %v6320_v61 = vcombine.low %v1151_v54, %v1161_v56  ;;  %v3020_v62 = vrot.slane %v3019_v48, 4  ;;  %v3039_v63 = vrot.slane %v3037_v51, 4  ;;  %v3042_v1 = vrot.slane %v3040_v52, 5  ;;  %v1097_v19 = vld [vmem:[#allocation2 + $0x20] sm:$0x1] }
  0x44   : > { %v3030_v5 = vrot.slane %v3029_v59, 4  ;;  %v3048_v6 = vrot.slane %v3046_v60, 5  ;;  %v3056_v13 = vshll.u32 %v8359_v50, 16  ;;  %v3791_v16 = vrot.slane %v8357_v49, 5  ;;  %v1053_v27 = vld [vmem:[#allocation2 + $0x24] sm:$0xf] }
  0x45   : > { %7202 = vmatmul.mubr.bf16.vlgmr.msra.gmra.mrb[0].mxu1 %v6320_v61  ;;  %v3025_v14 = vsel %vm8260_vm2, %v3020_v62, %v3024_v41  ;;  %v3043_v15 = vor.u32 %v3042_v1, %v3039_v63  ;;  %v3794_v17 = vrot.slane %v8359_v50, 5  ;;  %v3052_v22 = vrot.slane %v3050_v8, 4  ;;  %v953_v33 = vld [vmem:[#allocation2 + $0x2c] sm:$0x1]  ;;  %v2970_v39 = vld [vmem:[#allocation2 + $0x24] sm:$0xf] }
  0x46   : > { %v3035_v21 = vsel %vm8260_vm2, %v3030_v5, %v3034_v46  ;;  %7234 = vmatpush3.bf16.msra.mxu1 %v8281_v55  ;;  %v3058_v24 = vrot.slane %v3056_v13, 5  ;;  %v1163_v25 = vshrl.u32 %v1051_v3, 16  ;;  %v8383_v31 = vrot.slane %v3791_v16, 4  ;;  %v7939_v59 = vld [vmem:[%s10015_s1 + $0x18] sm:$0xff]   ;;  %v995_v49 = vld [vmem:[#allocation2 + $0x74] sm:$0x1] }
  0x47   : > { %v6479_v28 = vcombine.low %v3025_v14, %v3035_v21  ;;  %v3044_v29 = vrot.slane %v3043_v15, 4  ;;  %v1166_v32 = vshll.u32 %v1051_v3, 16  ;;  %7235 = vmatprep.subr.bf16.mxu1 %v7933_v4  ;;  %v3053_v36 = vor.u32 %v3052_v22, %v3048_v6 }
  0x48   : > { %v1165_v37 = vrot.slane %v1163_v25, 4  ;;  %v1172_v55 = vshll.u32 %v1052_v18, 16  ;;  %v1176_v38 = vshrl.u32 %v1052_v18, 16  ;;  %v1182_v43 = vshll.u32 %v1097_v19, 16  ;;  %v7942_v19 = vld [vmem:[%s10015_s1 + $0x20] sm:$0xff]  }
  0x49   : > { %7393 = vmatprep.mubr.bf16.mxu0 %v6479_v28  ;;  %v3049_v40 = vsel %vm8260_vm2, %v3044_v29, %v3048_v6  ;;  %v1168_v41 = vrot.slane %v1166_v32, 5  ;;  %v650_v44 = vrot.slane %v8327_v57, 4  ;;  %v3054_v45 = vrot.slane %v3053_v36, 4  ;;  %v8422_v32 = vld [vmem:[%s8234_s26 + $0x28] sm:$0xff]  }
  0x4a   : > { %v1174_v46 = vrot.slane %v1172_v55, 5  ;;  %v1178_v47 = vrot.slane %v1176_v38, 4  ;;  %v659_v48 = vrot.slane %v8329_v58, 4  ;;  %7236 = vmatpush3.bf16.msra.mxu1 %v7933_v4  ;;  %v1184_v52 = vrot.slane %v1182_v43, 5 }
  0x4b   : > { %v1169_v51 = vor.u32 %v1168_v41, %v1165_v37  ;;  %v658_v54 = vsel %vm8303_vm9, %v650_v44, %v8340_v9  ;;  %v1187_v56 = vshrl.u32 %v1053_v27, 16  ;;  %7237 = vmatprep.subr.bf16.mxu1 %v7936_v34  ;;  %v3059_v57 = vsel %vm8260_vm2, %v3054_v45, %v3058_v24  ;;  %v7932_v9 = vld [vmem:[%s10015_s1 + $0x148] sm:$0xff]   ;;  %v7934_v24 = vld [vmem:[%s10015_s1 + $0x150] sm:$0xff]  }
  0x4c   : > { %v1179_v60 = vor.u32 %v1178_v47, %v1174_v46  ;;  %952 = vst [vmem:[#allocation2 + $0x28] sm:$0xf] %v658_v54  ;;  %v954_v58 = vsel %vm8293_vm8, %v659_v48, %v953_v33  ;;  %v1190_v61 = vshll.u32 %v1053_v27, 16  ;;  %v6480_v62 = vcombine.low %v3049_v40, %v3059_v57  ;;  %v956_v37 = vld [vmem:[#allocation2 + $0x30] sm:$0xf] }
  0x4d   : > { %v1170_v63 = vrot.slane %v1169_v51, 4  ;;  %955 = vst [vmem:[#allocation2 + $0x2c] sm:$0x1] %v954_v58  ;;  %v1189_v1 = vrot.slane %v1187_v56, 4  ;;  %v3061_v3 = vshrl.u32 %v2970_v39, 16  ;;  %v3064_v6 = vshll.u32 %v2970_v39, 16 }
  0x4e   : > { %v1180_v4 = vrot.slane %v1179_v60, 4  ;;  %v1192_v5 = vrot.slane %v1190_v61, 5  ;;  %v431_v8 = vmax.f32 %v8343_v10, 0.0  ;;  %7238 = vmatpush3.bf16.msra.mxu1 %v7936_v34  ;;  %7394 = vmatmul.mubr.bf16.vlgmr.msra.gmra.mrb[0].mxu0 %v6480_v62  ;;  %v661_v15 = vshrl.u32 %v8345_v11, 16 }
  0x4f   : > { %v1175_v13 = vsel %vm8260_vm2, %v1170_v63, %v1174_v46  ;;  %v3063_v14 = vrot.slane %v3061_v3, 4  ;;  %v664_v18 = vshll.u32 %v8345_v11, 16  ;;  %7239 = vmatprep.subr.bf16.mxu1 %v7939_v59  ;;  %7426 = vmatpush3.bf16.msra.mxu0 %v8288_v0  ;;  %v3066_v22 = vrot.slane %v3064_v6, 5  ;;  %v960_v3 = vld [vmem:[#allocation2 + $0x38] sm:$0x1] }
  0x50   : > { %v1185_v10 = vsel %vm8260_vm2, %v1180_v4, %v1184_v52  ;;  %v1193_v21 = vor.u32 %v1192_v5, %v1189_v1  ;;  %v6738_v25 = vpack.c.bf16 %v431_v8, %v431_v8  ;;  %7427 = vmatprep.subr.bf16.mxu0 %v7932_v9  ;;  %v663_v11 = vrot.slane %v661_v15, 7 }
  0x51   : > { %v6321_v27 = vcombine.low %v1175_v13, %v1185_v10  ;;  %v432_v28 = vmax.f32 %v8353_v23, 0.0  ;;  %v433_v29 = vmax.f32 %v8362_v53, 0.0  ;;  %v3067_v33 = vor.u32 %v3066_v22, %v3063_v14  ;;  %v7944_v23 = vld [vmem:[%s10015_s1 + $0x28] sm:$0xff]   ;;  %v7937_v13 = vld [vmem:[%s10015_s1 + $0x160] sm:$0xff]  }
  0x52   : > { %v8424_v0 = vrot.slane %v1193_v21, 4  ;;  %v669_v34 = vshrl.u32 %v6738_v25, 16  ;;  %v672_v36 = vshll.u32 %v6738_v25, 16  ;;  %7240 = vmatpush3.bf16.msra.mxu1 %v7939_v59  ;;  %v666_v39 = vor.u32 %v664_v18, %v663_v11  ;;  %v7935_v59 = vld [vmem:[%s10015_s1 + $0x158] sm:$0xff]  }
  0x53   : > { %7205 = vmatprep.mubr.bf16.mxu1 %v6321_v27  ;;  %v1054_v55 = vld [vmem:[#allocation2 + $0x28] sm:$0xf]  ;;  %v667_v40 = vrot.slane %v663_v11, 4  ;;  %v6739_v41 = vpack.c.bf16 %v432_v28, %v432_v28  ;;  %v8426_v43 = vpack.c.bf16 %v433_v29, %v433_v29  ;;  %7241 = vmatprep.subr.bf16.mxu1 %v7942_v19  ;;  %v6817_v47 = vunpack.c.l.bf16 %v8422_v32 }
  0x54   : > { %v2971_v38 = vld [vmem:[#allocation2 + $0x28] sm:$0xf]  ;;  %7428 = vmatpush3.bf16.msra.mxu0 %v7932_v9  ;;  %v1098_v53 = vld [vmem:[#allocation2 + $0x2c] sm:$0x1]  ;;  %v1196_v44 = vshll.u32 %v1054_v55, 16  ;;  %v1200_v45 = vshrl.u32 %v1054_v55, 16  ;;  %v6818_v48 = vunpack.c.h.bf16 %v8422_v32  ;;  %v957_v1 = vsel %vm8309_vm10, %v666_v39, %v956_v37 }
  0x55   : > { %v2972_v46 = vld [vmem:[#allocation2 + $0x2c] sm:$0x1]  ;;  %v1206_v51 = vshll.u32 %v1098_v53, 16  ;;  %v3068_v52 = vrot.slane %v3067_v33, 4  ;;  %v3070_v54 = vshll.u32 %v2971_v38, 16  ;;  %v3074_v56 = vshrl.u32 %v2971_v38, 16  ;;  %7429 = vmatprep.subr.bf16.mxu0 %v7934_v24 }
  0x56   : > { %v1198_v57 = vrot.slane %v1196_v44, 5  ;;  %v1202_v60 = vrot.slane %v1200_v45, 4  ;;  %v3080_v58 = vshll.u32 %v2972_v46, 16  ;;  %v671_v61 = vrot.slane %v669_v34, 7  ;;  %7242 = vmatpush3.bf16.msra.mxu1 %v7942_v19  ;;  %958 = vst [vmem:[#allocation2 + $0x30] sm:$0xf] %v957_v1 }
  0x57   : > { %v1208_v62 = vrot.slane %v1206_v51, 5  ;;  %v3072_v9 = vrot.slane %v3070_v54, 5  ;;  %v3076_v63 = vrot.slane %v3074_v56, 4  ;;  %7243 = vmatprep.subr.bf16.mxu1 %v7944_v23  ;;  %v678_v19 = vshrl.u32 %v6739_v41, 16 }
  0x58   : > { %v1199_v4 = vsel %vm8260_vm2, %v8424_v0, %v1198_v57  ;;  %v1203_v5 = vor.u32 %v1202_v60, %v1198_v57  ;;  %v3082_v6 = vrot.slane %v3080_v58, 5  ;;  %v674_v8 = vor.u32 %v672_v36, %v671_v61  ;;  %7430 = vmatpush3.bf16.msra.mxu0 %v7934_v24  ;;  %v963_v24 = vld [vmem:[#allocation2 + $0x3c] sm:$0xf]  ;;  %v6944_v36 = vld [vmem:[%s8234_s26 + $0x30] sm:$0xff]  }
  0x59   : > { %v3073_v14 = vsel %vm8260_vm2, %v3068_v52, %v3072_v9  ;;  %v3077_v15 = vor.u32 %v3076_v63, %v3072_v9  ;;  %v676_v18 = vrot.slane %v671_v61, 4  ;;  %7431 = vmatprep.subr.bf16.mxu0 %v7935_v59  ;;  %v681_v22 = vshll.u32 %v6739_v41, 16  ;;  %v7938_v41 = vld [vmem:[%s10015_s1 + $0x168] sm:$0xff]   ;;  %v7940_v9 = vld [vmem:[%s10015_s1 + $0x170] sm:$0xff]  }
  0x5a   : > { %v1204_v10 = vrot.slane %v1203_v5, 4  ;;  %v675_v21 = vsel %vm8303_vm9, %v667_v40, %v674_v8  ;;  %v686_v25 = vshrl.u32 %v8426_v43, 16  ;;  %7244 = vmatpush3.bf16.msra.mxu1 %v7944_v23  ;;  %v680_v28 = vrot.slane %v678_v19, 7  ;;  %v967_v40 = vld [vmem:[#allocation2 + $0x44] sm:$0x1] }
  0x5b   : > { %v3078_v27 = vrot.slane %v3077_v15, 4  ;;  %959 = vst [vmem:[#allocation2 + $0x34] sm:$0xf] %v675_v21  ;;  %v961_v11 = vsel %vm8293_vm8, %v676_v18, %v960_v3  ;;  %v689_v29 = vshll.u32 %v8426_v43, 16  ;;  %v363_v33 = vmul.f32 %v6817_v47, %v8243_v26 }
  0x5c   : > { %v1209_v32 = vsel %vm8260_vm2, %v1204_v10, %v1208_v62  ;;  %962 = vst [vmem:[#allocation2 + $0x38] sm:$0x1] %v961_v11  ;;  %7432 = vmatpush3.bf16.msra.mxu0 %v7935_v59  ;;  %v688_v0 = vrot.slane %v686_v25, 7  ;;  %v364_v34 = vmul.f32 %v6818_v48, %v8243_v26  ;;  %v683_v38 = vor.u32 %v681_v22, %v680_v28 }
  0x5d   : > { %v6322_v37 = vcombine.low %v1199_v4, %v1209_v32  ;;  %v3083_v55 = vsel %vm8260_vm2, %v3078_v27, %v3082_v6  ;;  %v684_v39 = vrot.slane %v680_v28, 4  ;;  %7433 = vmatprep.subr.bf16.mxu0 %v7937_v13  ;;  %v402_v44 = vadd.f32 %v8251_v30, %v363_v33  ;;  %v2973_v45 = vld [vmem:[#allocation2 + $0x30] sm:$0xf] }
  0x5e   : > { %v6481_v43 = vcombine.low %v3073_v14, %v3083_v55  ;;  %v691_v23 = vor.u32 %v689_v29, %v688_v0  ;;  %v693_v53 = vrot.slane %v688_v0, 4  ;;  %v1055_v46 = vld [vmem:[#allocation2 + $0x30] sm:$0xf]  ;;  %v964_v47 = vsel %vm8309_vm10, %v683_v38, %v963_v24  ;;  %v7941_v29 = vld [vmem:[%s10015_s1 + $0x178] sm:$0xff]  }
  0x5f   : > { %7206 = vmatmul.mubr.bf16.gmra.mrb[4].mxu1 %v6322_v37  ;;  %v403_v48 = vadd.f32 %v8251_v30, %v364_v34  ;;  %v6821_v51 = vunpack.c.l.bf16 %v6944_v36  ;;  %v6822_v52 = vunpack.c.h.bf16 %v6944_v36  ;;  %v3085_v54 = vshrl.u32 %v2973_v45, 16  ;;  %965 = vst [vmem:[#allocation2 + $0x3c] sm:$0xf] %v964_v47 }
  0x60   : > { %7397 = vmatprep.mubr.bf16.mxu0 %v6481_v43  ;;  %v3088_v56 = vshll.u32 %v2973_v45, 16  ;;  %v1211_v59 = vshrl.u32 %v1055_v46, 16  ;;  %v1214_v57 = vshll.u32 %v1055_v46, 16  ;;  %7434 = vmatpush3.bf16.msra.mxu0 %v7937_v13  ;;  %v692_v60 = vsel %vm8303_vm9, %v684_v39, %v691_v23 }
  0x61   : > { %v968_v58 = vsel %vm8293_vm8, %v693_v53, %v967_v40  ;;  %v434_v61 = vmax.f32 %v402_v44, 0.0  ;;  %v435_v62 = vmax.f32 %v403_v48, 0.0  ;;  %7435 = vmatprep.subr.bf16.mxu0 %v7938_v41  ;;  %v3087_v1 = vrot.slane %v3085_v54, 4  ;;  %966 = vst [vmem:[#allocation2 + $0x40] sm:$0xf] %v692_v60  ;;  %v8500_v44 = vld [vmem:[%s10015_s1 + $0x180] sm:$0xff]  }
  0x62   : > { %v8473_v63 = vld [vmem:[#allocation2 + $0x34] sm:$0xf]  ;;  %v3090_v3 = vrot.slane %v3088_v56, 5  ;;  %969 = vst [vmem:[#allocation2 + $0x44] sm:$0x1] %v968_v58  ;;  %v365_v5 = vmul.f32 %v6821_v51, %v8243_v26  ;;  %v366_v6 = vmul.f32 %v6822_v52, %v8243_v26  ;;  %v1213_v22 = vrot.slane %v1211_v59, 4 }
  0x63   : > { %v1056_v4 = vld [vmem:[#allocation2 + $0x34] sm:$0xf]  ;;  %v8477_v8 = vld [vmem:[#allocation2 + $0x38] sm:$0x1]  ;;  %v3094_v13 = vshll.u32 %v8473_v63, 16  ;;  %v3098_v14 = vshrl.u32 %v8473_v63, 16  ;;  %v8481_v18 = vpack.c.bf16 %v434_v61, %v434_v61  ;;  %v8483_v19 = vpack.c.bf16 %v435_v62, %v435_v62 }
  0x64   : > { %v1099_v15 = vld [vmem:[#allocation2 + $0x38] sm:$0x1]  ;;  %v3091_v10 = vor.u32 %v3090_v3, %v3087_v1  ;;  %v3104_v21 = vshll.u32 %v8477_v8, 16  ;;  %v1216_v25 = vrot.slane %v1214_v57, 5  ;;  %7436 = vmatpush3.bf16.msra.mxu0 %v7938_v41  ;;  %v7946_v26 = vld [vmem:[%s10015_s1 + $0x30] sm:$0xff]   ;;  %v1220_v11 = vshll.u32 %v1056_v4, 16 }
  0x65   : > { %v3096_v24 = vrot.slane %v3094_v13, 5  ;;  %v3100_v27 = vrot.slane %v3098_v14, 4  ;;  %v1224_v28 = vshrl.u32 %v1056_v4, 16  ;;  %7437 = vmatprep.subr.bf16.mxu0 %v7940_v9  ;;  %v1230_v34 = vshll.u32 %v1099_v15, 16  ;;  %7245 = vmatprep.subr.bf16.mxu1 %v7946_v26 }
  0x66   : > { %v3092_v32 = vrot.slane %v3091_v10, 4  ;;  %v3106_v0 = vrot.slane %v3104_v21, 5  ;;  %v1217_v33 = vor.u32 %v1216_v25, %v1213_v22  ;;  %v1222_v37 = vrot.slane %v1220_v11, 5  ;;  %v1057_v38 = vld [vmem:[#allocation2 + $0x3c] sm:$0xf]  ;;  %7246 = vmatpush3.bf16.msra.mxu1 %v7946_v26 }
  0x67   : > { %v3101_v36 = vor.u32 %v3100_v27, %v3096_v24  ;;  %v1226_v55 = vrot.slane %v1224_v28, 4  ;;  %v8493_v39 = vadd.f32 %v8251_v30, %v365_v5  ;;  %v1232_v43 = vrot.slane %v1230_v34, 5  ;;  %v2976_v53 = vld [vmem:[#allocation2 + $0x3c] sm:$0xf] }
  0x68   : > { %v3097_v40 = vsel %vm8260_vm2, %v3092_v32, %v3096_v24  ;;  %v1218_v41 = vrot.slane %v1217_v33, 4  ;;  %v1235_v23 = vshrl.u32 %v1057_v38, 16  ;;  %7438 = vmatpush3.bf16.msra.mxu0 %v7940_v9  ;;  %v1058_v47 = vld [vmem:[#allocation2 + $0x40] sm:$0xf]  ;;  %v1238_v51 = vshll.u32 %v1057_v38, 16 }
  0x69   : > { %v3102_v45 = vrot.slane %v3101_v36, 4  ;;  %v1227_v46 = vor.u32 %v1226_v55, %v1222_v37  ;;  %v1100_v48 = vld [vmem:[#allocation2 + $0x44] sm:$0x1]  ;;  %v8503_v52 = vadd.f32 %v8251_v30, %v366_v6  ;;  %7439 = vmatprep.subr.bf16.mxu0 %v7941_v29  ;;  %v1244_v59 = vshll.u32 %v1058_v47, 16  ;;  %v8509_v9 = vld [vmem:[#allocation2 + $0x40] sm:$0xf] }
  0x6a   : > { %v1223_v54 = vsel %vm8260_vm2, %v1218_v41, %v1222_v37  ;;  %v1237_v56 = vrot.slane %v1235_v23, 4  ;;  %v1248_v57 = vshrl.u32 %v1058_v47, 16  ;;  %v1240_v61 = vrot.slane %v1238_v51, 5  ;;  %v8511_v30 = vld [vmem:[#allocation2 + $0x44] sm:$0x1]  ;;  %v6945_v23 = vld [vmem:[%s8234_s26 + $0x38] sm:$0xff]  }
  0x6b   : > { %v3107_v60 = vsel %vm8260_vm2, %v3102_v45, %v3106_v0  ;;  %v1228_v58 = vrot.slane %v1227_v46, 4  ;;  %v1254_v62 = vshll.u32 %v1100_v48, 16  ;;  %v1246_v3 = vrot.slane %v1244_v59, 5  ;;  %v970_v55 = vld [vmem:[#allocation2 + $0x48] sm:$0xf] }
  0x6c   : > { %v6482_v1 = vcombine.low %v3097_v40, %v3107_v60  ;;  %v1250_v4 = vrot.slane %v1248_v57, 4  ;;  %v3109_v5 = vshrl.u32 %v2976_v53, 16  ;;  %7440 = vmatpush3.bf16.msra.mxu0 %v7941_v29  ;;  %v1241_v13 = vor.u32 %v1240_v61, %v1237_v56 }
  0x6d   : > { %v1233_v6 = vsel %vm8260_vm2, %v1228_v58, %v1232_v43  ;;  %v1256_v14 = vrot.slane %v1254_v62, 5  ;;  %v3112_v15 = vshll.u32 %v2976_v53, 16  ;;  %7473 = vmatprep.subr.bf16.mxu0 %v8500_v44  ;;  %v3118_v25 = vshll.u32 %v8509_v9, 16 }
  0x6e   : > { %7398 = vmatmul.mubr.bf16.gmra.mrb[4].mxu0 %v6482_v1  ;;  %v6323_v10 = vcombine.low %v1223_v54, %v1233_v6  ;;  %v1251_v21 = vor.u32 %v1250_v4, %v1246_v3  ;;  %v3111_v22 = vrot.slane %v3109_v5, 4  ;;  %v1242_v26 = vrot.slane %v1241_v13, 4 }
  0x6f   : > { %v3114_v24 = vrot.slane %v3112_v15, 5  ;;  %v3122_v27 = vshrl.u32 %v8509_v9, 16  ;;  %v3128_v11 = vshll.u32 %v8511_v30, 16  ;;  %v3120_v29 = vrot.slane %v3118_v25, 5  ;;  %v8544_v25 = vld [vmem:[%s10016_s2] ss:$0 sm:$0xff] }
  0x70   : > { %7209 = vmatprep.mubr.bf16.mxu1 %v6323_v10  ;;  %v1252_v28 = vrot.slane %v1251_v21, 4  ;;  %v695_v32 = vshrl.u32 %v8481_v18, 16  ;;  %v698_v0 = vshll.u32 %v8481_v18, 16  ;;  %v1247_v33 = vsel %vm8260_vm2, %v1242_v26, %v1246_v3  ;;  %v974_v18 = vld [vmem:[#allocation2 + $0x50] sm:$0x1]  ;;  %v6946_v3 = vld [vmem:[%s8234_s26 + $0x40] sm:$0xff]  }
  0x71   : > { %v3115_v34 = vor.u32 %v3114_v24, %v3111_v22  ;;  %v3124_v36 = vrot.slane %v3122_v27, 4  ;;  %v3130_v37 = vrot.slane %v3128_v11, 5  ;;  %v703_v41 = vshrl.u32 %v8483_v19, 16  ;;  %v977_v10 = vld [vmem:[#allocation2 + $0x54] sm:$0xf] }
  0x72   : > { %v1257_v38 = vsel %vm8260_vm2, %v1252_v28, %v1256_v14  ;;  %v697_v40 = vrot.slane %v695_v32, 7  ;;  %v706_v43 = vshll.u32 %v8483_v19, 16  ;;  %v436_v47 = vmax.f32 %v8493_v39, 0.0  ;;  %v981_v11 = vld [vmem:[#allocation2 + $0x5c] sm:$0x1] }
  0x73   : > { %v6324_v53 = vcombine.low %v1247_v33, %v1257_v38  ;;  %v3116_v45 = vrot.slane %v3115_v34, 4  ;;  %v3125_v46 = vor.u32 %v3124_v36, %v3120_v29  ;;  %v705_v54 = vrot.slane %v703_v41, 7  ;;  %v7948_v32 = vld [vmem:[%s10015_s1 + $0x38] sm:$0xff]   ;;  %v8554_v34 = vld [vmem:[%s10017_s3] ss:$0 sm:$0xff] }
  0x74   : > { %v700_v48 = vor.u32 %v698_v0, %v697_v40  ;;  %v701_v51 = vrot.slane %v697_v40, 4  ;;  %v437_v56 = vmax.f32 %v8503_v52, 0.0  ;;  %v6743_v60 = vpack.c.bf16 %v436_v47, %v436_v47  ;;  %7247 = vmatprep.subr.bf16.mxu1 %v7948_v32 }
  0x75   : > { %7210 = vmatmul.mubr.bf16.gmra.mrb[8].mxu1 %v6324_v53  ;;  %v3121_v59 = vsel %vm8260_vm2, %v3116_v45, %v3120_v29  ;;  %v3126_v57 = vrot.slane %v3125_v46, 4  ;;  %v6825_v19 = vunpack.c.l.bf16 %v6945_v23  ;;  %v708_v58 = vor.u32 %v706_v43, %v705_v54  ;;  %v8563_v45 = vld [vmem:[%s8234_s26 + $0x48] sm:$0xff]  }
  0x76   : > { %v710_v61 = vrot.slane %v705_v54, 4  ;;  %v971_v62 = vsel %vm8309_vm10, %v700_v48, %v970_v55  ;;  %v6744_v1 = vpack.c.bf16 %v437_v56, %v437_v56  ;;  %v712_v4 = vshrl.u32 %v6743_v60, 16  ;;  %7248 = vmatpush3.bf16.msra.mxu1 %v7948_v32 }
  0x77   : > { %v3131_v39 = vsel %vm8260_vm2, %v3126_v57, %v3130_v37  ;;  %972 = vst [vmem:[#allocation2 + $0x48] sm:$0xf] %v971_v62  ;;  %v715_v52 = vshll.u32 %v6743_v60, 16  ;;  %v6826_v5 = vunpack.c.h.bf16 %v6945_v23  ;;  %v709_v13 = vsel %vm8303_vm9, %v701_v51, %v708_v58 }
  0x78   : > { %v6483_v6 = vcombine.low %v3121_v59, %v3131_v39  ;;  %v975_v14 = vsel %vm8293_vm8, %v710_v61, %v974_v18  ;;  %v720_v15 = vshrl.u32 %v6744_v1, 16  ;;  %973 = vst [vmem:[#allocation2 + $0x4c] sm:$0xf] %v709_v13  ;;  %v714_v21 = vrot.slane %v712_v4, 7 }
  0x79   : > { %976 = vst [vmem:[#allocation2 + $0x50] sm:$0x1] %v975_v14  ;;  %v723_v22 = vshll.u32 %v6744_v1, 16  ;;  %v367_v26 = vmul.f32 %v8544_v25, %v6825_v19  ;;  %v368_v24 = vmul.f32 %v8544_v25, %v6826_v5  ;;  %v6829_v28 = vunpack.c.l.bf16 %v6946_v3 }
  0x7a   : > { %7401 = vmatprep.mubr.bf16.mxu0 %v6483_v6  ;;  %v722_v27 = vrot.slane %v720_v15, 7  ;;  %v6830_v29 = vunpack.c.h.bf16 %v6946_v3  ;;  %v717_v0 = vor.u32 %v715_v52, %v714_v21  ;;  %v718_v33 = vrot.slane %v714_v21, 4 }
  0x7b   : > { %v406_v36 = vadd.f32 %v8554_v34, %v367_v26  ;;  %v407_v37 = vadd.f32 %v8554_v34, %v368_v24  ;;  %v369_v40 = vmul.f32 %v8544_v25, %v6829_v28  ;;  %vm2142_vm12 = vcmask 1046532  }
  0x7c   : > { %v725_v55 = vor.u32 %v723_v22, %v722_v27  ;;  %v727_v38 = vrot.slane %v722_v27, 4  ;;  %v370_v41 = vmul.f32 %v8544_v25, %v6830_v29  ;;  %v978_v43 = vsel %vm8309_vm10, %v717_v0, %v977_v10  ;;  %vm8576_vm13 = vmor %vm2141_vm11, %vm2142_vm12  ;;  %v8603_v27 = vld [vmem:[%s8234_s26 + $0x50] sm:$0xff]  }
  0x7d   : > { %v438_v23 = vmax.f32 %v406_v36, 0.0  ;;  %v439_v53 = vmax.f32 %v407_v37, 0.0  ;;  %979 = vst [vmem:[#allocation2 + $0x54] sm:$0xf] %v978_v43  ;;  %v8570_v51 = vadd.f32 %v8554_v34, %v369_v40  ;;  %v8593_v39 = vsel %vm8576_vm13, %v8383_v31, %v3794_v17  ;;  %v7952_v17 = vld [vmem:[%s10015_s1 + $0x80] sm:$0xff]  }
  0x7e   : > { %v2979_v46 = vld [vmem:[#allocation2 + $0x48] sm:$0xf]  ;;  %v726_v47 = vsel %vm8303_vm9, %v718_v33, %v725_v55  ;;  %v982_v48 = vsel %vm8293_vm8, %v727_v38, %v981_v11  ;;  %v8573_v54 = vadd.f32 %v8554_v34, %v370_v41  ;;  %v6833_v4 = vunpack.c.l.bf16 %v8563_v45  ;;  %7281 = vmatprep.subr.bf16.mxu1 %v7952_v17 }
  0x7f   : > { %v1059_v18 = vld [vmem:[#allocation2 + $0x48] sm:$0xf]  ;;  %v3133_v59 = vshrl.u32 %v2979_v46, 16  ;;  %v3136_v57 = vshll.u32 %v2979_v46, 16  ;;  %980 = vst [vmem:[#allocation2 + $0x58] sm:$0xf] %v726_v47  ;;  %v8584_v1 = vpack.c.bf16 %v438_v23, %v438_v23  ;;  %v8586_v3 = vpack.c.bf16 %v439_v53, %v439_v53 }
  0x80   : > { %v1259_v60 = vshrl.u32 %v1059_v18, 16  ;;  %v1262_v19 = vshll.u32 %v1059_v18, 16  ;;  %983 = vst [vmem:[#allocation2 + $0x5c] sm:$0x1] %v982_v48  ;;  %v8580_v58 = vld [vmem:[#allocation2 + $0x4c] sm:$0xf]  ;;  %v6834_v55 = vunpack.c.h.bf16 %v8563_v45  ;;  %v8607_v23 = vmul.f32 %v8544_v25, %v6833_v4 }
  0x81   : > { %v8582_v61 = vld [vmem:[#allocation2 + $0x50] sm:$0x1]  ;;  %v1060_v62 = vld [vmem:[#allocation2 + $0x4c] sm:$0xf]  ;;  %v3135_v52 = vrot.slane %v3133_v59, 4  ;;  %v3138_v5 = vrot.slane %v3136_v57, 5  ;;  %v6837_v53 = vunpack.c.l.bf16 %v8603_v27 }
  0x82   : > { %v3142_v6 = vshll.u32 %v8580_v58, 16  ;;  %v3146_v13 = vshrl.u32 %v8580_v58, 16  ;;  %v1101_v14 = vld [vmem:[#allocation2 + $0x50] sm:$0x1]  ;;  %v3152_v15 = vshll.u32 %v8582_v61, 16  ;;  %v1261_v10 = vrot.slane %v1259_v60, 4 }
  0x83   : > { %v1264_v21 = vrot.slane %v1262_v19, 5  ;;  %v1268_v50 = vshll.u32 %v1060_v62, 16  ;;  %v3139_v31 = vor.u32 %v3138_v5, %v3135_v52  ;;  %v1272_v24 = vshrl.u32 %v1060_v62, 16  ;;  %v8056_v7 = vld [vmem:[#allocation2 + $0x48] sm:$0xf] }
  0x84   : > { %v3144_v22 = vrot.slane %v3142_v6, 5  ;;  %v3148_v26 = vrot.slane %v3146_v13, 4  ;;  %v3154_v11 = vrot.slane %v3152_v15, 5  ;;  %v1278_v32 = vshll.u32 %v1101_v14, 16  ;;  %v1061_v37 = vld [vmem:[#allocation2 + $0x54] sm:$0xf] }
  0x85   : > { %v1265_v28 = vor.u32 %v1264_v21, %v1261_v10  ;;  %v1270_v29 = vrot.slane %v1268_v50, 5  ;;  %v3140_v0 = vrot.slane %v3139_v31, 4  ;;  %v1274_v36 = vrot.slane %v1272_v24, 4  ;;  %v2982_v59 = vld [vmem:[#allocation2 + $0x54] sm:$0xf] }
  0x86   : > { %v3149_v33 = vor.u32 %v3148_v26, %v3144_v22  ;;  %v1280_v40 = vrot.slane %v1278_v32, 5  ;;  %v1062_v41 = vld [vmem:[#allocation2 + $0x58] sm:$0xf]  ;;  %v1283_v48 = vshrl.u32 %v1061_v37, 16  ;;  %v1286_v60 = vshll.u32 %v1061_v37, 16 }
  0x87   : > { %v1266_v38 = vrot.slane %v1265_v28, 4  ;;  %v1102_v43 = vld [vmem:[#allocation2 + $0x5c] sm:$0x1]  ;;  %v3145_v46 = vsel %vm8260_vm2, %v3140_v0, %v3144_v22  ;;  %v1275_v47 = vor.u32 %v1274_v36, %v1270_v29  ;;  %v1292_v19 = vshll.u32 %v1062_v41, 16  ;;  %v2983_v52 = vld [vmem:[#allocation2 + $0x58] sm:$0xf] }
  0x88   : > { %v3150_v18 = vrot.slane %v3149_v33, 4  ;;  %v1296_v62 = vshrl.u32 %v1062_v41, 16  ;;  %v1285_v6 = vrot.slane %v1283_v48, 4  ;;  %v1302_v13 = vshll.u32 %v1102_v43, 16  ;;  %v2984_v50 = vld [vmem:[#allocation2 + $0x5c] sm:$0x1] }
  0x89   : > { %v1271_v57 = vsel %vm8260_vm2, %v1266_v38, %v1270_v29  ;;  %v1276_v5 = vrot.slane %v1275_v47, 4  ;;  %v1288_v15 = vrot.slane %v1286_v60, 5  ;;  %v1294_v10 = vrot.slane %v1292_v19, 5 }
  0x8a   : > { %v3155_v4 = vsel %vm8260_vm2, %v3150_v18, %v3154_v11  ;;  %v1298_v21 = vrot.slane %v1296_v62, 4  ;;  %v1304_v31 = vrot.slane %v1302_v13, 5  ;;  %v3157_v22 = vshrl.u32 %v2982_v59, 16  ;;  %v988_v13 = vld [vmem:[#allocation2 + $0x68] sm:$0x1] }
  0x8b   : > { %v6484_v14 = vcombine.low %v3145_v46, %v3155_v4  ;;  %v1281_v17 = vsel %vm8260_vm2, %v1276_v5, %v1280_v40  ;;  %v3160_v26 = vshll.u32 %v2982_v59, 16  ;;  %v1289_v28 = vor.u32 %v1288_v15, %v1285_v6  ;;  %v3718_v46 = vld [vmem:[#allocation2 + $0xc] sm:$0xe]  ;;  %v984_v59 = vld [vmem:[#allocation2 + $0x60] sm:$0xf] }
  0x8c   : > { %v6325_v24 = vcombine.low %v1271_v57, %v1281_v17  ;;  %v1299_v29 = vor.u32 %v1298_v21, %v1294_v10  ;;  %v3166_v32 = vshll.u32 %v2983_v52, 16  ;;  %v3159_v11 = vrot.slane %v3157_v22, 4 }
  0x8d   : > { %7402 = vmatmul.mubr.bf16.gmra.mrb[8].mxu0 %v6484_v14  ;;  %v3162_v0 = vrot.slane %v3160_v26, 5  ;;  %v3170_v33 = vshrl.u32 %v2983_v52, 16  ;;  %v3176_v36 = vshll.u32 %v2984_v50, 16  ;;  %v1290_v37 = vrot.slane %v1289_v28, 4  ;;  %v3719_v50 = vld [vmem:[#allocation2 + $0x18] sm:$0xe] }
  0x8e   : > { %7213 = vmatprep.mubr.bf16.mxu1 %v6325_v24  ;;  %v1300_v38 = vrot.slane %v1299_v29, 4  ;;  %v3168_v41 = vrot.slane %v3166_v32, 5  ;;  %v729_v43 = vshrl.u32 %v8584_v1, 16  ;;  %v732_v48 = vshll.u32 %v8584_v1, 16  ;;  %v8036_v32 = vld [vmem:[#allocation2 + $0x10] sm:$0xf] }
  0x8f   : > { %v3163_v40 = vor.u32 %v3162_v0, %v3159_v11  ;;  %v3172_v18 = vrot.slane %v3170_v33, 4  ;;  %v3178_v47 = vrot.slane %v3176_v36, 5  ;;  %v1295_v57 = vsel %vm8260_vm2, %v1290_v37, %v1294_v10 }
  0x90   : > { %v1305_v60 = vsel %vm8260_vm2, %v1300_v38, %v1304_v31  ;;  %v731_v19 = vrot.slane %v729_v43, 7  ;;  %v737_v62 = vshrl.u32 %v8586_v3, 16  ;;  %v740_v6 = vshll.u32 %v8586_v3, 16 }
  0x91   : > { %v6326_v52 = vcombine.low %v1295_v57, %v1305_v60  ;;  %v3164_v4 = vrot.slane %v3163_v40, 4  ;;  %v3173_v5 = vor.u32 %v3172_v18, %v3168_v41  ;;  %v440_v1 = vmax.f32 %v8570_v51, 0.0 }
  0x92   : > { %v734_v14 = vor.u32 %v732_v48, %v731_v19  ;;  %v735_v15 = vrot.slane %v731_v19, 4  ;;  %v739_v21 = vrot.slane %v737_v62, 7  ;;  %v441_v31 = vmax.f32 %v8573_v54, 0.0 }
  0x93   : > { %7214 = vmatmul.mubr.bf16.gmra.mrb[12].mxu1 %v6326_v52  ;;  %v3169_v10 = vsel %vm8260_vm2, %v3164_v4, %v3168_v41  ;;  %v3174_v17 = vrot.slane %v3173_v5, 4  ;;  %v6503_v22 = vrot.slane %v3718_v46, 9  ;;  %v6747_v28 = vpack.c.bf16 %v440_v1, %v440_v1  ;;  %v991_v46 = vld [vmem:[#allocation2 + $0x6c] sm:$0xf] }
  0x94   : > { %v742_v26 = vor.u32 %v740_v6, %v739_v21  ;;  %v744_v24 = vrot.slane %v739_v21, 4  ;;  %v985_v3 = vsel %vm8309_vm10, %v734_v14, %v984_v59  ;;  %v6748_v51 = vpack.c.bf16 %v441_v31, %v441_v31 }
  0x95   : > { %v3179_v29 = vsel %vm8260_vm2, %v3174_v17, %v3178_v47  ;;  %986 = vst [vmem:[#allocation2 + $0x60] sm:$0xf] %v985_v3  ;;  %v3784_v11 = vrot.slane %v8036_v32, 5  ;;  %v6504_v0 = vrot.slane %v3719_v50, 9  ;;  %v746_v37 = vshrl.u32 %v6747_v28, 16 }
  0x96   : > { %v6485_v33 = vcombine.low %v3169_v10, %v3179_v29  ;;  %v743_v36 = vsel %vm8303_vm9, %v735_v15, %v742_v26  ;;  %v989_v54 = vsel %vm8293_vm8, %v744_v24, %v988_v13  ;;  %v749_v38 = vshll.u32 %v6747_v28, 16 }
  0x97   : > { %987 = vst [vmem:[#allocation2 + $0x64] sm:$0xf] %v743_v36  ;;  %990 = vst [vmem:[#allocation2 + $0x68] sm:$0x1] %v989_v54  ;;  %v754_v41 = vshrl.u32 %v6748_v51, 16  ;;  %v757_v43 = vshll.u32 %v6748_v51, 16  ;;  %v8640_v40 = vsel %vm8576_vm13, %v6503_v22, %v3784_v11  ;;  %v8646_v48 = vsel %vm8576_vm13, %v6504_v0, %v3791_v16 }
  0x98   : > { %7405 = vmatprep.mubr.bf16.mxu0 %v6485_v33  ;;  %v748_v18 = vrot.slane %v746_v37, 7  ;;  %v3786_v47 = vrot.slane %v3784_v11, 4  ;;  %v372_v59 = vmul.f32 %v8544_v25, %v6834_v55  ;;  %v6536_v60 = vcombine.low %v8646_v48, %v8593_v39 }
  0x99   : > { %v756_v57 = vrot.slane %v754_v41, 7  ;;  %v410_v19 = vadd.f32 %v8554_v34, %v8607_v23  ;;  %v6838_v62 = vunpack.c.h.bf16 %v8603_v27  ;;  %v373_v20 = vmul.f32 %v8544_v25, %v6837_v53 }
  0x9a   : > { %v751_v52 = vor.u32 %v749_v38, %v748_v18  ;;  %v752_v4 = vrot.slane %v748_v18, 4  ;;  %v8660_v16 = vsel %vm8576_vm13, %v3786_v47, %v3787_v42  ;;  %v411_v45 = vadd.f32 %v8554_v34, %v372_v59 }
  0x9b   : > { %v759_v55 = vor.u32 %v757_v43, %v756_v57  ;;  %v761_v5 = vrot.slane %v756_v57, 4  ;;  %v6535_v6 = vcombine.low %v8640_v40, %v8660_v16  ;;  %v442_v13 = vmax.f32 %v410_v19, 0.0 }
  0x9c   : > { %v2985_v23 = vld [vmem:[#allocation2 + $0x60] sm:$0xf]  ;;  %v992_v15 = vsel %vm8309_vm10, %v751_v52, %v991_v46  ;;  %v443_v21 = vmax.f32 %v411_v45, 0.0  ;;  %v8671_v42 = vmul.f32 %v8544_v25, %v6838_v62 }
  0x9d   : > { %v1063_v14 = vld [vmem:[#allocation2 + $0x60] sm:$0xf]  ;;  %v3181_v1 = vshrl.u32 %v2985_v23, 16  ;;  %v3184_v50 = vshll.u32 %v2985_v23, 16  ;;  %993 = vst [vmem:[#allocation2 + $0x6c] sm:$0xf] %v992_v15  ;;  %v760_v24 = vsel %vm8303_vm9, %v752_v4, %v759_v55  ;;  %v996_v27 = vsel %vm8293_vm8, %v761_v5, %v995_v49 }
  0x9e   : > { %v1307_v10 = vshrl.u32 %v1063_v14, 16  ;;  %v1310_v17 = vshll.u32 %v1063_v14, 16  ;;  %v8673_v31 = vld [vmem:[#allocation2 + $0x64] sm:$0xf]  ;;  %v8675_v22 = vld [vmem:[#allocation2 + $0x68] sm:$0x1]  ;;  %v6749_v53 = vpack.c.bf16 %v442_v13, %v442_v13  ;;  %v8681_v3 = vpack.c.bf16 %v443_v21, %v443_v21 }
  0x9f   : > { %v1064_v26 = vld [vmem:[#allocation2 + $0x64] sm:$0xf]  ;;  %v3183_v28 = vrot.slane %v3181_v1, 4  ;;  %v3186_v29 = vrot.slane %v3184_v50, 5  ;;  %v3190_v51 = vshll.u32 %v8673_v31, 16  ;;  %v3194_v32 = vshrl.u32 %v8673_v31, 16 }
  0xa0   : > { %v1103_v11 = vld [vmem:[#allocation2 + $0x68] sm:$0x1]  ;;  %994 = vst [vmem:[#allocation2 + $0x70] sm:$0xf] %v760_v24  ;;  %997 = vst [vmem:[#allocation2 + $0x74] sm:$0x1] %v996_v27 }
  0xa1   : > { %v3200_v0 = vshll.u32 %v8675_v22, 16  ;;  %v1309_v33 = vrot.slane %v1307_v10, 4  ;;  %v1312_v36 = vrot.slane %v1310_v17, 5  ;;  %v1316_v54 = vshll.u32 %v1064_v26, 16 }
  0xa2   : > { %v3187_v37 = vor.u32 %v3186_v29, %v3183_v28  ;;  %v3192_v38 = vrot.slane %v3190_v51, 5  ;;  %v3196_v41 = vrot.slane %v3194_v32, 4  ;;  %v1320_v43 = vshrl.u32 %v1064_v26, 16 }
  0xa3   : > { %v3202_v46 = vrot.slane %v3200_v0, 5  ;;  %v1313_v18 = vor.u32 %v1312_v36, %v1309_v33  ;;  %v1318_v47 = vrot.slane %v1316_v54, 5  ;;  %v1326_v59 = vshll.u32 %v1103_v11, 16  ;;  %v998_v0 = vld [vmem:[#allocation2 + $0x78] sm:$0xf] }
  0xa4   : > { %v3188_v57 = vrot.slane %v3187_v37, 4  ;;  %v3197_v19 = vor.u32 %v3196_v41, %v3192_v38  ;;  %v1322_v62 = vrot.slane %v1320_v43, 4  ;;  %v763_v52 = vshrl.u32 %v6749_v53, 16  ;;  %v1065_v45 = vld [vmem:[#allocation2 + $0x6c] sm:$0xf] }
  0xa5   : > { %v1314_v4 = vrot.slane %v1313_v18, 4  ;;  %v1328_v49 = vrot.slane %v1326_v59, 5  ;;  %v766_v55 = vshll.u32 %v6749_v53, 16  ;;  %v771_v5 = vshrl.u32 %v8681_v3, 16  ;;  %v1002_v18 = vld [vmem:[#allocation2 + $0x80] sm:$0x1] }
  0xa6   : > { %v3193_v13 = vsel %vm8260_vm2, %v3188_v57, %v3192_v38  ;;  %v3198_v23 = vrot.slane %v3197_v19, 4  ;;  %v1323_v14 = vor.u32 %v1322_v62, %v1318_v47  ;;  %v1331_v15 = vshrl.u32 %v1065_v45, 16  ;;  %v3720_v38 = vld [vmem:[#allocation2 + $0x24] sm:$0xe] }
  0xa7   : > { %v1319_v21 = vsel %vm8260_vm2, %v1314_v4, %v1318_v47  ;;  %v1066_v1 = vld [vmem:[#allocation2 + $0x70] sm:$0xf]  ;;  %v1104_v50 = vld [vmem:[#allocation2 + $0x74] sm:$0x1]  ;;  %v1334_v10 = vshll.u32 %v1065_v45, 16  ;;  %v765_v17 = vrot.slane %v763_v52, 7  ;;  %v412_v26 = vadd.f32 %v8554_v34, %v373_v20 }
  0xa8   : > { %v3203_v24 = vsel %vm8260_vm2, %v3198_v23, %v3202_v46  ;;  %v1324_v27 = vrot.slane %v1323_v14, 4  ;;  %v1333_v53 = vrot.slane %v1331_v15, 4  ;;  %v1340_v28 = vshll.u32 %v1066_v1, 16  ;;  %v3721_v45 = vld [vmem:[#allocation2 + $0x30] sm:$0xe]  ;;  %v6949_v15 = vld [vmem:[%s8234_s26 + $0x58] sm:$0xff]  }
  0xa9   : > { %v6486_v29 = vcombine.low %v3193_v13, %v3203_v24  ;;  %v1336_v51 = vrot.slane %v1334_v10, 5  ;;  %v1344_v32 = vshrl.u32 %v1066_v1, 16  ;;  %v1350_v11 = vshll.u32 %v1104_v50, 16  ;;  %v8038_v14 = vld [vmem:[#allocation2 + $0x2c] sm:$0x1] }
  0xaa   : > { %v1329_v33 = vsel %vm8260_vm2, %v1324_v27, %v1328_v49  ;;  %v1342_v36 = vrot.slane %v1340_v28, 5  ;;  %v768_v54 = vor.u32 %v766_v55, %v765_v17  ;;  %v769_v37 = vrot.slane %v765_v17, 4 }
  0xab   : > { %7406 = vmatmul.mubr.bf16.gmra.mrb[12].mxu0 %v6486_v29  ;;  %v6327_v20 = vcombine.low %v1319_v21, %v1329_v33  ;;  %v1337_v41 = vor.u32 %v1336_v51, %v1333_v53  ;;  %v1346_v43 = vrot.slane %v1344_v32, 4  ;;  %v1352_v46 = vrot.slane %v1350_v11, 5  ;;  %v7945_v53 = vld [vmem:[%s10015_s1 + $0x188] sm:$0xff]  }
  0xac   : > { %7441 = vmatprep.mubr.bf16.mxu0 %v6535_v6  ;;  %v773_v47 = vrot.slane %v771_v5, 7  ;;  %v774_v59 = vshll.u32 %v8681_v3, 16  ;;  %v999_v57 = vsel %vm8309_vm10, %v768_v54, %v998_v0  ;;  %v413_v19 = vadd.f32 %v8554_v34, %v8671_v42  ;;  %v8037_v6 = vld [vmem:[#allocation2 + $0x28] sm:$0xf]  ;;  %v1005_v0 = vld [vmem:[#allocation2 + $0x84] sm:$0xf] }
  0xad   : > { %7217 = vmatprep.mubr.bf16.mxu1 %v6327_v20  ;;  %v1338_v62 = vrot.slane %v1337_v41, 4  ;;  %v1347_v52 = vor.u32 %v1346_v43, %v1342_v36  ;;  %1000 = vst [vmem:[#allocation2 + $0x78] sm:$0xf] %v999_v57  ;;  %v444_v4 = vmax.f32 %v412_v26, 0.0  ;;  %v6505_v49 = vrot.slane %v3720_v38, 9 }
  0xae   : > { %v776_v55 = vor.u32 %v774_v59, %v773_v47  ;;  %v778_v40 = vrot.slane %v773_v47, 4  ;;  %v445_v16 = vmax.f32 %v413_v19, 0.0  ;;  %v3798_v5 = vrot.slane %v8037_v6, 5  ;;  %v1009_v20 = vld [vmem:[#allocation2 + $0x8c] sm:$0x1]  ;;  %v6950_v47 = vld [vmem:[%s8234_s26 + $0x60] sm:$0xff]  }
  0xaf   : > { %v1343_v3 = vsel %vm8260_vm2, %v1338_v62, %v1342_v36  ;;  %v1348_v13 = vrot.slane %v1347_v52, 4  ;;  %v6751_v23 = vpack.c.bf16 %v444_v4, %v444_v4  ;;  %v3801_v42 = vrot.slane %v8038_v14, 5  ;;  %v3722_v14 = vld [vmem:[#allocation2 + $0x3c] sm:$0xe] }
  0xb0   : > { %v777_v21 = vsel %vm8303_vm9, %v769_v37, %v776_v55  ;;  %v1003_v1 = vsel %vm8293_vm8, %v778_v40, %v1002_v18  ;;  %v6752_v50 = vpack.c.bf16 %v445_v16, %v445_v16  ;;  %v3799_v10 = vsel %vm8576_vm13, %v6505_v49, %v3798_v5 }
  0xb1   : > { %v1353_v17 = vsel %vm8260_vm2, %v1348_v13, %v1352_v46  ;;  %1001 = vst [vmem:[#allocation2 + $0x7c] sm:$0xf] %v777_v21  ;;  %1004 = vst [vmem:[#allocation2 + $0x80] sm:$0x1] %v1003_v1  ;;  %v780_v26 = vshrl.u32 %v6751_v23, 16  ;;  %v783_v24 = vshll.u32 %v6751_v23, 16  ;;  %v6841_v43 = vunpack.c.l.bf16 %v6949_v15 }
  0xb2   : > { %v3800_v27 = vrot.slane %v3798_v5, 4  ;;  %v6328_v28 = vcombine.low %v1343_v3, %v1353_v17  ;;  %v788_v29 = vshrl.u32 %v6752_v50, 16  ;;  %v791_v51 = vshll.u32 %v6752_v50, 16  ;;  %v7949_v50 = vld [vmem:[%s10015_s1 + $0x198] sm:$0xff]  }
  0xb3   : > { %v6506_v32 = vrot.slane %v3721_v45, 9  ;;  %7442 = vmatmul.mubr.bf16.vlgmr.msra.gmra.mrb[0].mxu0 %v6536_v60  ;;  %v782_v11 = vrot.slane %v780_v26, 7  ;;  %v3805_v36 = vrot.slane %v8473_v63, 5  ;;  %v3808_v54 = vrot.slane %v8477_v8, 5  ;;  %v7947_v63 = vld [vmem:[%s10015_s1 + $0x190] sm:$0xff]  }
  0xb4   : > { %v3802_v33 = vsel %vm8576_vm13, %v3800_v27, %v3801_v42  ;;  %7218 = vmatmul.mubr.bf16.gmra.mrb[16].mxu1 %v6328_v28  ;;  %7474 = vmatpush3.bf16.msra.mxu0 %v8500_v44  ;;  %v1067_v37 = vld [vmem:[#allocation2 + $0x78] sm:$0xf]  ;;  %v790_v38 = vrot.slane %v788_v29, 7  ;;  %v6842_v39 = vunpack.c.h.bf16 %v6949_v15  ;;  %v375_v4 = vmul.f32 %v8544_v25, %v6841_v43 }
  0xb5   : > { %v6537_v41 = vcombine.low %v3799_v10, %v3802_v33  ;;  %v1355_v48 = vshrl.u32 %v1067_v37, 16  ;;  %v1358_v60 = vshll.u32 %v1067_v37, 16  ;;  %v785_v46 = vor.u32 %v783_v24, %v782_v11  ;;  %7475 = vmatprep.subr.bf16.mxu0 %v7945_v53  ;;  %v8752_v33 = vld [vmem:[%s8234_s26 + $0x68] sm:$0xff]  }
  0xb6   : > { %v786_v18 = vrot.slane %v782_v11, 4  ;;  %v793_v8 = vor.u32 %v791_v51, %v790_v38  ;;  %v795_v59 = vrot.slane %v790_v38, 4  ;;  %v3806_v44 = vsel %vm8576_vm13, %v6506_v32, %v3805_v36 }
  0xb7   : > { %7445 = vmatprep.mubr.bf16.mxu0 %v6537_v41  ;;  %v3807_v57 = vrot.slane %v3805_v36, 4  ;;  %v1357_v19 = vrot.slane %v1355_v48, 4  ;;  %v1360_v62 = vrot.slane %v1358_v60, 5  ;;  %v1006_v52 = vsel %vm8309_vm10, %v785_v46, %v1005_v0  ;;  %v7953_v36 = vld [vmem:[%s10015_s1 + $0x1a0] sm:$0xff]  }
  0xb8   : > { %v1068_v49 = vld [vmem:[#allocation2 + $0x7c] sm:$0xf]  ;;  %v1105_v45 = vld [vmem:[#allocation2 + $0x80] sm:$0x1]  ;;  %v794_v55 = vsel %vm8303_vm9, %v786_v18, %v793_v8  ;;  %1007 = vst [vmem:[#allocation2 + $0x84] sm:$0xf] %v1006_v52  ;;  %v1010_v40 = vsel %vm8293_vm8, %v795_v59, %v1009_v20  ;;  %7476 = vmatpush3.bf16.msra.mxu0 %v7945_v53  ;;  %v376_v6 = vmul.f32 %v8544_v25, %v6842_v39  ;;  %v6845_v1 = vunpack.c.l.bf16 %v6950_v47 }
  0xb9   : > { %v3809_v16 = vsel %vm8576_vm13, %v3807_v57, %v3808_v54  ;;  %v1361_v5 = vor.u32 %v1360_v62, %v1357_v19  ;;  %v1364_v3 = vshll.u32 %v1068_v49, 16  ;;  %v1368_v13 = vshrl.u32 %v1068_v49, 16  ;;  %1008 = vst [vmem:[#allocation2 + $0x88] sm:$0xf] %v794_v55  ;;  %1011 = vst [vmem:[#allocation2 + $0x8c] sm:$0x1] %v1010_v40  ;;  %7477 = vmatprep.subr.bf16.mxu0 %v7947_v63 }
  0xba   : > { %v1374_v23 = vshll.u32 %v1105_v45, 16  ;;  %v6538_v42 = vcombine.low %v3806_v44, %v3809_v16  ;;  %v414_v15 = vadd.f32 %v8554_v34, %v375_v4  ;;  %v415_v21 = vadd.f32 %v8554_v34, %v376_v6  ;;  %v7957_v49 = vld [vmem:[%s10015_s1 + $0x1a8] sm:$0xff]  }
  0xbb   : > { %v1362_v10 = vrot.slane %v1361_v5, 4  ;;  %v1366_v17 = vrot.slane %v1364_v3, 5  ;;  %v1370_v26 = vrot.slane %v1368_v13, 4  ;;  %v6846_v28 = vunpack.c.h.bf16 %v6950_v47 }
  0xbc   : > { %v1376_v24 = vrot.slane %v1374_v23, 5  ;;  %7446 = vmatmul.mubr.bf16.gmra.mrb[4].mxu0 %v6538_v42  ;;  %v446_v27 = vmax.f32 %v414_v15, 0.0  ;;  %v447_v53 = vmax.f32 %v415_v21, 0.0  ;;  %v377_v29 = vmul.f32 %v8544_v25, %v6845_v1  ;;  %v1012_v23 = vld [vmem:[#allocation2 + $0x90] sm:$0xf] }
  0xbd   : > { %v1367_v51 = vsel %vm8260_vm2, %v1362_v10, %v1366_v17  ;;  %v1371_v32 = vor.u32 %v1370_v26, %v1366_v17  ;;  %v6507_v11 = vrot.slane %v3722_v14, 9  ;;  %v3812_v0 = vrot.slane %v8509_v9, 5  ;;  %7478 = vmatpush3.bf16.msra.mxu0 %v7947_v63  ;;  %v1016_v26 = vld [vmem:[#allocation2 + $0x98] sm:$0x1] }
  0xbe   : > { %v6753_v54 = vpack.c.bf16 %v446_v27, %v446_v27  ;;  %v6754_v37 = vpack.c.bf16 %v447_v53, %v447_v53  ;;  %v378_v38 = vmul.f32 %v8544_v25, %v6846_v28  ;;  %v416_v20 = vadd.f32 %v8554_v34, %v377_v29  ;;  %7479 = vmatprep.subr.bf16.mxu0 %v7949_v50 }
  0xbf   : > { %v1372_v41 = vrot.slane %v1371_v32, 4  ;;  %v8759_v43 = vld [vmem:[#allocation2 + $0x84] sm:$0xf]  ;;  %v3813_v9 = vsel %vm8576_vm13, %v6507_v11, %v3812_v0  ;;  %v3814_v39 = vrot.slane %v3812_v0, 4  ;;  %v3815_v48 = vrot.slane %v8511_v30, 5 }
  0xc0   : > { %v8764_v60 = vld [vmem:[#allocation2 + $0x88] sm:$0xf]  ;;  %v1106_v46 = vld [vmem:[#allocation2 + $0x8c] sm:$0x1]  ;;  %v1379_v18 = vshrl.u32 %v8759_v43, 16  ;;  %v1382_v47 = vshll.u32 %v8759_v43, 16  ;;  %v417_v63 = vadd.f32 %v8554_v34, %v378_v38  ;;  %v6849_v8 = vunpack.c.l.bf16 %v8752_v33 }
  0xc1   : > { %v1377_v59 = vsel %vm8260_vm2, %v1372_v41, %v1376_v24  ;;  %v1388_v44 = vshll.u32 %v8764_v60, 16  ;;  %v1392_v57 = vshrl.u32 %v8764_v60, 16  ;;  %v1398_v19 = vshll.u32 %v1106_v46, 16  ;;  %7480 = vmatpush3.bf16.msra.mxu0 %v7949_v50  ;;  %v7961_v24 = vld [vmem:[%s10015_s1 + $0x1b0] sm:$0xff]  }
  0xc2   : > { %v6329_v30 = vcombine.low %v1367_v51, %v1377_v59  ;;  %v1381_v62 = vrot.slane %v1379_v18, 4  ;;  %v1384_v52 = vrot.slane %v1382_v47, 5  ;;  %v797_v4 = vshrl.u32 %v6753_v54, 16  ;;  %7481 = vmatprep.subr.bf16.mxu0 %v7953_v36  ;;  %v3723_v51 = vld [vmem:[#allocation2 + $0x48] sm:$0xe]  ;;  %v6952_v41 = vld [vmem:[%s8234_s26 + $0x70] sm:$0xff]  }
  0xc3   : > { %v1390_v45 = vrot.slane %v1388_v44, 5  ;;  %v1394_v55 = vrot.slane %v1392_v57, 4  ;;  %v1400_v40 = vrot.slane %v1398_v19, 5  ;;  %v800_v16 = vshll.u32 %v6753_v54, 16  ;;  %v1019_v18 = vld [vmem:[#allocation2 + $0x9c] sm:$0xf] }
  0xc4   : > { %7221 = vmatprep.mubr.bf16.mxu1 %v6329_v30  ;;  %v1385_v6 = vor.u32 %v1384_v52, %v1381_v62  ;;  %v799_v5 = vrot.slane %v797_v4, 7  ;;  %v805_v3 = vshrl.u32 %v6754_v37, 16  ;;  %v808_v13 = vshll.u32 %v6754_v37, 16  ;;  %v7965_v47 = vld [vmem:[%s10015_s1 + $0x1b8] sm:$0xff]   ;;  %v1023_v44 = vld [vmem:[#allocation2 + $0xa4] sm:$0x1] }
  0xc5   : > { %v1395_v14 = vor.u32 %v1394_v55, %v1390_v45  ;;  %v448_v42 = vmax.f32 %v416_v20, 0.0  ;;  %v449_v15 = vmax.f32 %v417_v63, 0.0  ;;  %v3816_v21 = vsel %vm8576_vm13, %v3814_v39, %v3815_v48  ;;  %7482 = vmatpush3.bf16.msra.mxu0 %v7953_v36 }
  0xc6   : > { %v1386_v1 = vrot.slane %v1385_v6, 4  ;;  %v802_v50 = vor.u32 %v800_v16, %v799_v5  ;;  %v803_v10 = vrot.slane %v799_v5, 4  ;;  %v807_v17 = vrot.slane %v805_v3, 7  ;;  %7483 = vmatprep.subr.bf16.mxu0 %v7957_v49 }
  0xc7   : > { %v1396_v27 = vrot.slane %v1395_v14, 4  ;;  %v6755_v53 = vpack.c.bf16 %v448_v42, %v448_v42  ;;  %v6756_v28 = vpack.c.bf16 %v449_v15, %v449_v15  ;;  %v6539_v29 = vcombine.low %v3813_v9, %v3816_v21  ;;  %v8829_v14 = vld [vmem:[%s10017_s3] ss:$0 sm:$0xff] }
  0xc8   : > { %v1391_v32 = vsel %vm8260_vm2, %v1386_v1, %v1390_v45  ;;  %v810_v11 = vor.u32 %v808_v13, %v807_v17  ;;  %v812_v0 = vrot.slane %v807_v17, 4  ;;  %v1013_v36 = vsel %vm8309_vm10, %v802_v50, %v1012_v23 }
  0xc9   : > { %v1401_v54 = vsel %vm8260_vm2, %v1396_v27, %v1400_v40  ;;  %1014 = vst [vmem:[#allocation2 + $0x90] sm:$0xf] %v1013_v36  ;;  %v814_v37 = vshrl.u32 %v6755_v53, 16  ;;  %v817_v38 = vshll.u32 %v6755_v53, 16  ;;  %v822_v20 = vshrl.u32 %v6756_v28, 16  ;;  %7449 = vmatprep.mubr.bf16.mxu0 %v6539_v29  ;;  %7484 = vmatpush3.bf16.msra.mxu0 %v7957_v49 }
  0xca   : > { %v6330_v9 = vcombine.low %v1391_v32, %v1401_v54  ;;  %v811_v39 = vsel %vm8303_vm9, %v803_v10, %v810_v11  ;;  %v1017_v48 = vsel %vm8293_vm8, %v812_v0, %v1016_v26  ;;  %v825_v46 = vshll.u32 %v6756_v28, 16  ;;  %7485 = vmatprep.subr.bf16.mxu0 %v7961_v24 }
  0xcb   : > { %1015 = vst [vmem:[#allocation2 + $0x94] sm:$0xf] %v811_v39  ;;  %1018 = vst [vmem:[#allocation2 + $0x98] sm:$0x1] %v1017_v48  ;;  %v816_v63 = vrot.slane %v814_v37, 7  ;;  %v824_v59 = vrot.slane %v822_v20, 7  ;;  %v6850_v62 = vunpack.c.h.bf16 %v8752_v33  ;;  %v379_v52 = vmul.f32 %v8544_v25, %v6849_v8 }
  0xcc   : > { %v6508_v57 = vrot.slane %v3723_v51, 9  ;;  %v3819_v19 = vrot.slane %v8580_v58, 5  ;;  %7222 = vmatmul.mubr.bf16.gmra.mrb[20].mxu1 %v6330_v9  ;;  %v3822_v30 = vrot.slane %v8582_v61, 5  ;;  %v6853_v4 = vunpack.c.l.bf16 %v6952_v41  ;;  %v8807_v58 = vld [vmem:[%s10016_s2] ss:$0 sm:$0xff] }
  0xcd   : > { %v819_v49 = vor.u32 %v817_v38, %v816_v63  ;;  %v820_v45 = vrot.slane %v816_v63, 4  ;;  %v827_v55 = vor.u32 %v825_v46, %v824_v59  ;;  %v829_v40 = vrot.slane %v824_v59, 4  ;;  %7486 = vmatpush3.bf16.msra.mxu0 %v7961_v24  ;;  %v8814_v25 = vld [vmem:[%s10015_s1 + $0x1c0] sm:$0xff]  }
  0xce   : > { %v3820_v16 = vsel %vm8576_vm13, %v6508_v57, %v3819_v19  ;;  %v3821_v6 = vrot.slane %v3819_v19, 4  ;;  %v380_v61 = vmul.f32 %v8807_v58, %v6850_v62  ;;  %v418_v33 = vadd.f32 %v8554_v34, %v379_v52  ;;  %7487 = vmatprep.subr.bf16.mxu0 %v7965_v47 }
  0xcf   : > { %v828_v8 = vsel %vm8303_vm9, %v820_v45, %v827_v55  ;;  %v1020_v5 = vsel %vm8309_vm10, %v819_v49, %v1019_v18  ;;  %v1024_v3 = vsel %vm8293_vm8, %v829_v40, %v1023_v44  ;;  %v6854_v13 = vunpack.c.h.bf16 %v6952_v41 }
  0xd0   : > { %v8822_v23 = vld [vmem:[#allocation2 + $0x90] sm:$0xf]  ;;  %1021 = vst [vmem:[#allocation2 + $0x9c] sm:$0xf] %v1020_v5  ;;  %1022 = vst [vmem:[#allocation2 + $0xa0] sm:$0xf] %v828_v8  ;;  %v3823_v34 = vsel %vm8576_vm13, %v3821_v6, %v3822_v30  ;;  %v419_v42 = vadd.f32 %v8829_v14, %v380_v61  ;;  %v381_v21 = vmul.f32 %v8807_v58, %v6853_v4 }
  0xd1   : > { %1025 = vst [vmem:[#allocation2 + $0xa4] sm:$0x1] %v1024_v3  ;;  %v450_v15 = vmax.f32 %v418_v33, 0.0  ;;  %v1403_v1 = vshrl.u32 %v8822_v23, 16  ;;  %v1406_v50 = vshll.u32 %v8822_v23, 16  ;;  %v6540_v10 = vcombine.low %v3820_v16, %v3823_v34  ;;  %7488 = vmatpush3.bf16.msra.mxu0 %v7965_v47 }
  0xd2   : > { %v8835_v17 = vld [vmem:[#allocation2 + $0x94] sm:$0xf]  ;;  %v1107_v26 = vld [vmem:[#allocation2 + $0x98] sm:$0x1]  ;;  %v451_v24 = vmax.f32 %v419_v42, 0.0  ;;  %v382_v53 = vmul.f32 %v8807_v58, %v6854_v13  ;;  %v420_v28 = vadd.f32 %v8829_v14, %v381_v21  ;;  %7521 = vmatprep.subr.bf16.mxu0 %v8814_v25 }
  0xd3   : > { %v6757_v27 = vpack.c.bf16 %v450_v15, %v450_v15  ;;  %v1405_v29 = vrot.slane %v1403_v1, 4  ;;  %v1408_v51 = vrot.slane %v1406_v50, 5  ;;  %v1412_v32 = vshll.u32 %v8835_v17, 16  ;;  %7450 = vmatmul.mubr.bf16.gmra.mrb[8].mxu0 %v6540_v10  ;;  %v1026_v16 = vld [vmem:[#allocation2 + $0xa8] sm:$0xf] }
  0xd4   : > { %v1416_v11 = vshrl.u32 %v8835_v17, 16  ;;  %v1422_v0 = vshll.u32 %v1107_v26, 16  ;;  %v6758_v36 = vpack.c.bf16 %v451_v24, %v451_v24  ;;  %v421_v44 = vadd.f32 %v8829_v14, %v382_v53  ;;  %v3724_v5 = vld [vmem:[#allocation2 + $0x54] sm:$0xe]  ;;  %v1030_v10 = vld [vmem:[#allocation2 + $0xb0] sm:$0x1] }
  0xd5   : > { %v831_v54 = vshrl.u32 %v6757_v27, 16  ;;  %v1409_v37 = vor.u32 %v1408_v51, %v1405_v29  ;;  %v1414_v38 = vrot.slane %v1412_v32, 5  ;;  %v834_v41 = vshll.u32 %v6757_v27, 16  ;;  %v8041_v32 = vld [vmem:[#allocation2 + $0x58] sm:$0xf] }
  0xd6   : > { %v1418_v20 = vrot.slane %v1416_v11, 4  ;;  %v1424_v9 = vrot.slane %v1422_v0, 5  ;;  %v839_v48 = vshrl.u32 %v6758_v36, 16  ;;  %v842_v46 = vshll.u32 %v6758_v36, 16 }
  0xd7   : > { %v833_v39 = vrot.slane %v831_v54, 7  ;;  %v1410_v18 = vrot.slane %v1409_v37, 4  ;;  %v8842_v63 = vld [vmem:[#allocation2 + $0x9c] sm:$0xf]  ;;  %v8844_v59 = vld [vmem:[#allocation2 + $0xa0] sm:$0xf] }
  0xd8   : > { %v1419_v47 = vor.u32 %v1418_v20, %v1414_v38  ;;  %v452_v57 = vmax.f32 %v420_v28, 0.0  ;;  %v1108_v19 = vld [vmem:[#allocation2 + $0xa4] sm:$0x1]  ;;  %v1427_v30 = vshrl.u32 %v8842_v63, 16  ;;  %v1430_v62 = vshll.u32 %v8842_v63, 16 }
  0xd9   : > { %v1436_v52 = vshll.u32 %v8844_v59, 16  ;;  %v1440_v4 = vshrl.u32 %v8844_v59, 16  ;;  %v1415_v49 = vsel %vm8260_vm2, %v1410_v18, %v1414_v38  ;;  %v1446_v55 = vshll.u32 %v1108_v19, 16  ;;  %v3725_v38 = vld [vmem:[#allocation2 + $0x60] sm:$0xe] }
  0xda   : > { %v1420_v45 = vrot.slane %v1419_v47, 4  ;;  %v836_v40 = vor.u32 %v834_v41, %v833_v39  ;;  %v1429_v6 = vrot.slane %v1427_v30, 4  ;;  %v1432_v61 = vrot.slane %v1430_v62, 5 }
  0xdb   : > { %v1438_v33 = vrot.slane %v1436_v52, 5  ;;  %v1442_v8 = vrot.slane %v1440_v4, 4  ;;  %v1448_v13 = vrot.slane %v1446_v55, 5  ;;  %v837_v34 = vrot.slane %v833_v39, 4  ;;  %v8042_v39 = vld [vmem:[#allocation2 + $0x5c] sm:$0x1] }
  0xdc   : > { %v1425_v3 = vsel %vm8260_vm2, %v1420_v45, %v1424_v9  ;;  %v841_v42 = vrot.slane %v839_v48, 7  ;;  %v1433_v21 = vor.u32 %v1432_v61, %v1429_v6  ;;  %v1027_v50 = vsel %vm8309_vm10, %v836_v40, %v1026_v16  ;;  %v1033_v55 = vld [vmem:[#allocation2 + $0xb4] sm:$0xf]  ;;  %v2989_v16 = vld [vmem:[#allocation2 + $0x70] sm:$0xf] }
  0xdd   : > { %v6331_v15 = vcombine.low %v1415_v49, %v1425_v3  ;;  %v1443_v1 = vor.u32 %v1442_v8, %v1438_v33  ;;  %1028 = vst [vmem:[#allocation2 + $0xa8] sm:$0xf] %v1027_v50  ;;  %v453_v27 = vmax.f32 %v421_v44, 0.0  ;;  %v6759_v53 = vpack.c.bf16 %v452_v57, %v452_v57  ;;  %v3726_v57 = vld [vmem:[#allocation2 + $0x6c] sm:$0xe] }
  0xde   : > { %v844_v26 = vor.u32 %v842_v46, %v841_v42  ;;  %v846_v24 = vrot.slane %v841_v42, 4  ;;  %v1434_v28 = vrot.slane %v1433_v21, 4  ;;  %v6509_v51 = vrot.slane %v3724_v5, 9  ;;  %v1037_v61 = vld [vmem:[#allocation2 + $0xbc] sm:$0x1] }
  0xdf   : > { %7225 = vmatprep.mubr.bf16.mxu1 %v6331_v15  ;;  %v1444_v29 = vrot.slane %v1443_v1, 4  ;;  %v3826_v11 = vrot.slane %v8041_v32, 5  ;;  %v6760_v54 = vpack.c.bf16 %v453_v27, %v453_v27  ;;  %v848_v37 = vshrl.u32 %v6759_v53, 16  ;;  %v2990_v1 = vld [vmem:[#allocation2 + $0x74] sm:$0x1] }
  0xe0   : > { %v845_v0 = vsel %vm8303_vm9, %v837_v34, %v844_v26  ;;  %v1031_v36 = vsel %vm8293_vm8, %v846_v24, %v1030_v10  ;;  %v1439_v20 = vsel %vm8260_vm2, %v1434_v28, %v1438_v33  ;;  %v851_v9 = vshll.u32 %v6759_v53, 16 }
  0xe1   : > { %v1449_v41 = vsel %vm8260_vm2, %v1444_v29, %v1448_v13  ;;  %1029 = vst [vmem:[#allocation2 + $0xac] sm:$0xf] %v845_v0  ;;  %1032 = vst [vmem:[#allocation2 + $0xb0] sm:$0x1] %v1031_v36  ;;  %v3829_v48 = vrot.slane %v8042_v39, 5  ;;  %v850_v18 = vrot.slane %v848_v37, 7  ;;  %v3827_v40 = vsel %vm8576_vm13, %v6509_v51, %v3826_v11 }
  0xe2   : > { %v6332_v46 = vcombine.low %v1439_v20, %v1449_v41  ;;  %v856_v47 = vshrl.u32 %v6760_v54, 16  ;;  %v859_v44 = vshll.u32 %v6760_v54, 16  ;;  %v3828_v19 = vrot.slane %v3826_v11, 4  ;;  %v3727_v41 = vld [vmem:[#allocation2 + $0x78] sm:$0xe] }
  0xe3   : > { %v6510_v30 = vrot.slane %v3725_v38, 9  ;;  %v3833_v62 = vrot.slane %v8673_v31, 5  ;;  %v3836_v52 = vrot.slane %v8675_v22, 5  ;;  %v853_v4 = vor.u32 %v851_v9, %v850_v18 }
  0xe4   : > { %7226 = vmatmul.mubr.bf16.gmra.mrb[24].mxu1 %v6332_v46  ;;  %v854_v49 = vrot.slane %v850_v18, 4  ;;  %v858_v45 = vrot.slane %v856_v47, 7  ;;  %v8869_v6 = vld [vmem:[#allocation2 + $0xa8] sm:$0xf]  ;;  %v3830_v33 = vsel %vm8576_vm13, %v3828_v19, %v3829_v48  ;;  %v6511_v22 = vrot.slane %v3726_v57, 9 }
  0xe5   : > { %v3834_v31 = vsel %vm8576_vm13, %v6510_v30, %v3833_v62  ;;  %v3835_v8 = vrot.slane %v3833_v62, 4  ;;  %v1451_v5 = vshrl.u32 %v8869_v6, 16  ;;  %v1454_v3 = vshll.u32 %v8869_v6, 16  ;;  %v8893_v48 = vld [vmem:[#allocation2 + $0x7c] sm:$0xf] }
  0xe6   : > { %v861_v13 = vor.u32 %v859_v44, %v858_v45  ;;  %v863_v34 = vrot.slane %v858_v45, 4  ;;  %v1034_v42 = vsel %vm8309_vm10, %v853_v4, %v1033_v55  ;;  %v6541_v15 = vcombine.low %v3827_v40, %v3830_v33  ;;  %v8895_v46 = vld [vmem:[#allocation2 + $0x80] sm:$0x1]  ;;  %v2996_v45 = vld [vmem:[#allocation2 + $0x8c] sm:$0x1] }
  0xe7   : > { %v3837_v21 = vsel %vm8576_vm13, %v3835_v8, %v3836_v52  ;;  %v3840_v50 = vrot.slane %v2989_v16, 5  ;;  %v1453_v24 = vrot.slane %v1451_v5, 4  ;;  %v1456_v27 = vrot.slane %v1454_v3, 5  ;;  %1035 = vst [vmem:[#allocation2 + $0xb4] sm:$0xf] %v1034_v42 }
  0xe8   : > { %v8881_v10 = vld [vmem:[#allocation2 + $0xac] sm:$0xf]  ;;  %v1109_v26 = vld [vmem:[#allocation2 + $0xb0] sm:$0x1]  ;;  %v862_v53 = vsel %vm8303_vm9, %v854_v49, %v861_v13  ;;  %v1038_v28 = vsel %vm8293_vm8, %v863_v34, %v1037_v61  ;;  %7453 = vmatprep.mubr.bf16.mxu0 %v6541_v15  ;;  %v6542_v11 = vcombine.low %v3834_v31, %v3837_v21  ;;  %v3843_v37 = vrot.slane %v2990_v1, 5 }
  0xe9   : > { %v1460_v29 = vshll.u32 %v8881_v10, 16  ;;  %v1464_v51 = vshrl.u32 %v8881_v10, 16  ;;  %v1470_v32 = vshll.u32 %v1109_v26, 16  ;;  %1036 = vst [vmem:[#allocation2 + $0xb8] sm:$0xf] %v862_v53  ;;  %v1457_v0 = vor.u32 %v1456_v27, %v1453_v24 }
  0xea   : > { %1039 = vst [vmem:[#allocation2 + $0xbc] sm:$0x1] %v1038_v28  ;;  %v3841_v36 = vsel %vm8576_vm13, %v6511_v22, %v3840_v50  ;;  %v3842_v54 = vrot.slane %v3840_v50, 4  ;;  %7454 = vmatmul.mubr.bf16.gmra.mrb[12].mxu0 %v6542_v11  ;;  %v6512_v57 = vrot.slane %v3727_v41, 9  ;;  %v3847_v52 = vrot.slane %v8893_v48, 5 }
  0xeb   : > { %v1462_v38 = vrot.slane %v1460_v29, 5  ;;  %v1466_v20 = vrot.slane %v1464_v51, 4  ;;  %v1458_v9 = vrot.slane %v1457_v0, 4  ;;  %v1472_v47 = vrot.slane %v1470_v32, 5  ;;  %v2995_v49 = vld [vmem:[#allocation2 + $0x88] sm:$0xf] }
  0xec   : > { %v3844_v39 = vsel %vm8576_vm13, %v3842_v54, %v3843_v37  ;;  %v3850_v4 = vrot.slane %v8895_v46, 5  ;;  %v3728_v55 = vld [vmem:[#allocation2 + $0x84] sm:$0xe]  ;;  %v3729_v3 = vld [vmem:[#allocation2 + $0x90] sm:$0xe]  ;;  %v3848_v15 = vsel %vm8576_vm13, %v6512_v57, %v3847_v52  ;;  %v3849_v27 = vrot.slane %v3847_v52, 4 }
  0xed   : > { %v1467_v18 = vor.u32 %v1466_v20, %v1462_v38  ;;  %v6543_v44 = vcombine.low %v3841_v36, %v3844_v39  ;;  %v1463_v19 = vsel %vm8260_vm2, %v1458_v9, %v1462_v38  ;;  %v2998_v21 = vld [vmem:[#allocation2 + $0x94] sm:$0xf]  ;;  %v2999_v1 = vld [vmem:[#allocation2 + $0x98] sm:$0x1]  ;;  %v6513_v28 = vrot.slane %v3728_v55, 9 }
  0xee   : > { %v8899_v62 = vld [vmem:[#allocation2 + $0xb4] sm:$0xf]  ;;  %v3854_v29 = vrot.slane %v2995_v49, 5  ;;  %v3857_v51 = vrot.slane %v2996_v45, 5  ;;  %v3851_v11 = vsel %vm8576_vm13, %v3849_v27, %v3850_v4  ;;  %v6514_v0 = vrot.slane %v3729_v3, 9 }
  0xef   : > { %v1468_v30 = vrot.slane %v1467_v18, 4  ;;  %7457 = vmatprep.mubr.bf16.mxu0 %v6543_v44  ;;  %v1475_v61 = vshrl.u32 %v8899_v62, 16  ;;  %v1478_v33 = vshll.u32 %v8899_v62, 16  ;;  %v3861_v36 = vrot.slane %v2998_v21, 5  ;;  %v3001_v41 = vld [vmem:[#allocation2 + $0xa0] sm:$0xf] }
  0xf0   : > { %v8903_v40 = vld [vmem:[#allocation2 + $0xb8] sm:$0xf]  ;;  %v6544_v37 = vcombine.low %v3848_v15, %v3851_v11  ;;  %v3855_v38 = vsel %vm8576_vm13, %v6513_v28, %v3854_v29  ;;  %v3856_v20 = vrot.slane %v3854_v29, 4  ;;  %v3730_v9 = vld [vmem:[#allocation2 + $0x9c] sm:$0xe] }
  0xf1   : > { %v1110_v16 = vld [vmem:[#allocation2 + $0xbc] sm:$0x1]  ;;  %v1473_v31 = vsel %vm8260_vm2, %v1468_v30, %v1472_v47  ;;  %v1484_v8 = vshll.u32 %v8903_v40, 16  ;;  %v1488_v22 = vshrl.u32 %v8903_v40, 16  ;;  %v1477_v34 = vrot.slane %v1475_v61, 4 }
  0xf2   : > { %v1494_v5 = vshll.u32 %v1110_v16, 16  ;;  %v6333_v13 = vcombine.low %v1463_v19, %v1473_v31  ;;  %v1480_v42 = vrot.slane %v1478_v33, 5  ;;  %v3863_v18 = vrot.slane %v3861_v36, 4  ;;  %v3002_v44 = vld [vmem:[#allocation2 + $0xa4] sm:$0x1]  ;;  %7458 = vmatmul.mubr.bf16.gmra.mrb[16].mxu0 %v6544_v37  ;;  %v6953_v21 = vld [vmem:[%s8234_s26 + $0x78] sm:$0xff]   ;;  %s9978_s26 = scalar_lea.vmem %s10018_s4, %s6729_s15 }
  0xf3   : > { %v1486_v50 = vrot.slane %v1484_v8, 5  ;;  %v1490_v26 = vrot.slane %v1488_v22, 4  ;;  %v3864_v47 = vrot.slane %v2999_v1, 5  ;;  %v8043_v19 = vld [vmem:[#allocation2] sm:$0xf]  ;;  %v3858_v4 = vsel %vm8576_vm13, %v3856_v20, %v3857_v51  ;;  %s6268_s15 = sshll.u32 %s10097_s18, 1 }
  0xf4   : > { %v1496_v24 = vrot.slane %v1494_v5, 5  ;;  %7229 = vmatprep.mubr.bf16.mxu1 %v6333_v13  ;;  %v1481_v53 = vor.u32 %v1480_v42, %v1477_v34  ;;  %v8919_v30 = vld [vmem:[#allocation2 + $0x4] sm:$0xf]  ;;  %v3862_v49 = vsel %vm8576_vm13, %v6514_v0, %v3861_v36  ;;  %v3004_v45 = vld [vmem:[#allocation2 + $0xac] sm:$0xf]  ;;  %v6545_v16 = vcombine.low %v3855_v38, %v3858_v4  ;;  %s280_s27 = scalar_lea.vmem %s10019_s5, %s6268_s15 }
  0xf5   : > { %v1491_v32 = vor.u32 %v1490_v26, %v1486_v50  ;;  %v6343_v52 = vcombine.low %v8043_v19, %v8919_v30  ;;  %v3865_v61 = vsel %vm8576_vm13, %v3863_v18, %v3864_v47  ;;  %v6515_v33 = vrot.slane %v3730_v9, 9  ;;  %v3005_v31 = vld [vmem:[#allocation2 + $0xb0] sm:$0x1]  ;;  %v3731_v8 = vld [vmem:[#allocation2 + $0xa8] sm:$0xe] }
  0xf6   : > { %v1482_v54 = vrot.slane %v1481_v53, 4  ;;  %v3868_v5 = vrot.slane %v3001_v41, 5  ;;  %v3871_v3 = vrot.slane %v3002_v44, 5  ;;  %v3007_v13 = vld [vmem:[#allocation2 + $0xb8] sm:$0xf]  ;;  %7461 = vmatprep.mubr.bf16.mxu0 %v6545_v16  ;;  %v3875_v42 = vrot.slane %v3004_v45, 5 }
  0xf7   : > { %v1492_v39 = vrot.slane %v1491_v32, 4  ;;  %v3732_v34 = vld [vmem:[#allocation2 + $0xb4] sm:$0xe]  ;;  %v3008_v15 = vld [vmem:[#allocation2 + $0xbc] sm:$0x1]  ;;  %v6546_v1 = vcombine.low %v3862_v49, %v3865_v61  ;;  %v3878_v53 = vrot.slane %v3005_v31, 5  ;;  %v6857_v11 = vunpack.c.l.bf16 %v6953_v21 }
  0xf8   : > { %v1487_v57 = vsel %vm8260_vm2, %v1482_v54, %v1486_v50  ;;  %v3869_v50 = vsel %vm8576_vm13, %v6515_v33, %v3868_v5  ;;  %v3870_v26 = vrot.slane %v3868_v5, 4  ;;  %v3877_v27 = vrot.slane %v3875_v42, 4  ;;  %v8045_v37 = vld [vmem:[#allocation2 + $0xc] sm:$0xf]  ;;  %v8935_v38 = vld [vmem:[#allocation2 + $0x10] sm:$0xf] }
  0xf9   : > { %v1497_v55 = vsel %vm8260_vm2, %v1492_v39, %v1496_v24  ;;  %v6516_v24 = vrot.slane %v3731_v8, 9  ;;  %v6517_v28 = vrot.slane %v3732_v34, 9  ;;  %v3882_v29 = vrot.slane %v3007_v13, 5  ;;  %v8047_v39 = vld [vmem:[#allocation2 + $0x18] sm:$0xf]  ;;  %v7956_v19 = vld [vmem:[%s10015_s1 + $0x88] sm:$0xff]  }
  0xfa   : > { %v6334_v22 = vcombine.low %v1487_v57, %v1497_v55  ;;  %v3872_v51 = vsel %vm8576_vm13, %v3870_v26, %v3871_v3  ;;  %v3885_v32 = vrot.slane %v3008_v15, 5  ;;  %v6858_v0 = vunpack.c.h.bf16 %v6953_v21  ;;  %7462 = vmatmul.mubr.bf16.gmra.mrb[20].mxu0 %v6546_v1  ;;  %v8940_v18 = vld [vmem:[#allocation2 + $0x1c] sm:$0xf]  ;;  %v8049_v61 = vld [vmem:[%s10015_s1 + $0x80] sm:$0xff]   ;;  %v7960_v31 = vld [vmem:[%s10015_s1 + $0x90] sm:$0xff]  }
  0xfb   : > { %v6547_v36 = vcombine.low %v3869_v50, %v3872_v51  ;;  %v3884_v54 = vrot.slane %v3882_v29, 4  ;;  %v6344_v20 = vcombine.low %v8045_v37, %v8935_v38  ;;  %v383_v41 = vmul.f32 %v8807_v58, %v6857_v11  ;;  %v8050_v5 = vld [vmem:[#allocation2 + $0x24] sm:$0xf]  ;;  %v8052_v21 = vld [vmem:[#allocation2 + $0x30] sm:$0xf]  ;;  %v7964_v26 = vld [vmem:[%s10015_s1 + $0x98] sm:$0xff]  }
  0xfc   : > { %7230 = vmatmul.mubr.bf16.gmra.mrb[28].mxu1 %v6334_v22  ;;  %v384_v9 = vmul.f32 %v8807_v58, %v6858_v0  ;;  %v6345_v47 = vcombine.low %v8047_v39, %v8940_v18  ;;  %v3876_v44 = vsel %vm8576_vm13, %v6516_v24, %v3875_v42  ;;  %v3879_v57 = vsel %vm8576_vm13, %v3877_v27, %v3878_v53  ;;  %v8965_v1 = vld [vmem:[#allocation2 + $0x34] sm:$0xf]  ;;  %v1040_v53 = vld [vmem:[#allocation2 + $0xc0] sm:$0xf]  ;;  %v8983_v39 = vld [vmem:[#allocation2 + $0x4c] sm:$0xf] }
  0xfd   : > { %7249 = vmatprep.mubr.bf16.mxu1 %v6343_v52  ;;  %7465 = vmatprep.mubr.bf16.mxu0 %v6547_v36  ;;  %v3883_v52 = vsel %vm8576_vm13, %v6517_v28, %v3882_v29  ;;  %v3886_v58 = vsel %vm8576_vm13, %v3884_v54, %v3885_v32  ;;  %v422_v4 = vadd.f32 %v8829_v14, %v383_v41  ;;  %v1044_v28 = vld [vmem:[#allocation2 + $0xc8] sm:$0x1]  ;;  %v7968_v37 = vld [vmem:[%s10015_s1 + $0xa0] sm:$0xff]  }
  0xfe   : > { %v423_v49 = vadd.f32 %v8829_v14, %v384_v9  ;;  %v6548_v45 = vcombine.low %v3876_v44, %v3879_v57  ;;  %v6549_v33 = vcombine.low %v3883_v52, %v3886_v58  ;;  %v8962_v14 = vld [vmem:[#allocation2 + $0x28] sm:$0xf]  ;;  %v6347_v50 = vcombine.low %v8052_v21, %v8965_v1  ;;  %v8980_v41 = vld [vmem:[#allocation2 + $0x40] sm:$0xf] }
  0xff   : > { %v454_v55 = vmax.f32 %v422_v4, 0.0  ;;  %v6346_v3 = vcombine.low %v8050_v5, %v8962_v14  ;;  %v6349_v12 = vcombine.low %v8056_v7, %v8983_v39  ;;  %v2146_v5 = vrot.slane %v8919_v30, 5  ;;  %v8062_v21 = vld [vmem:[#allocation2 + $0x8] sm:$0x1] }
 0x100   : > { %v455_v16 = vmax.f32 %v423_v49, 0.0  ;;  %v8058_v49 = vld [vmem:[#allocation2 + $0x54] sm:$0xf]  ;;  %v2153_v30 = vrot.slane %v8935_v38, 5  ;;  %v2174_v7 = vrot.slane %v8965_v1, 5 }
 0x101   : > { %v6761_v8 = vpack.c.bf16 %v454_v55, %v454_v55 }
 0x102   : > { %v6762_v22 = vpack.c.bf16 %v455_v16, %v455_v16  ;;  %7466 = vmatmul.mubr.bf16.gmra.mrb[24].mxu0 %v6548_v45  ;;  %v8992_v45 = vld [vmem:[#allocation2 + $0x58] sm:$0xf] }
 0x103   : > { %v865_v13 = vshrl.u32 %v6761_v8, 16  ;;  %v868_v34 = vshll.u32 %v6761_v8, 16  ;;  %7469 = vmatprep.mubr.bf16.mxu0 %v6549_v33  ;;  %v6350_v55 = vcombine.low %v8058_v49, %v8992_v45  ;;  %v8060_v33 = vld [vmem:[#allocation2 + $0x60] sm:$0xf] }
 0x104   : > { %7250 = vmatmul.mubr.bf16.vlgmr.msra.gmra.mrb[0].mxu1 %v6344_v20  ;;  %v873_v42 = vshrl.u32 %v6762_v22, 16  ;;  %v876_v15 = vshll.u32 %v6762_v22, 16  ;;  %v8054_v20 = vld [vmem:[#allocation2 + $0x3c] sm:$0xf] }
 0x105   : > { %7282 = vmatpush3.bf16.msra.mxu1 %v8049_v61  ;;  %7253 = vmatprep.mubr.bf16.mxu1 %v6345_v47  ;;  %v867_v24 = vrot.slane %v865_v13, 7  ;;  %v6348_v9 = vcombine.low %v8054_v20, %v8980_v41  ;;  %v7980_v47 = vld [vmem:[%s10015_s1 + $0xb0] sm:$0xff]   ;;  %v7986_v22 = vld [vmem:[%s10015_s1 + $0xb8] sm:$0xff]   ;;  %v3242_v13 = vshrl.u32 %v8893_v48, 16 }
 0x106   : > { %7283 = vmatprep.subr.bf16.mxu1 %v7956_v19  ;;  %v875_v27 = vrot.slane %v873_v42, 7  ;;  %v7969_v42 = vld [vmem:[#allocation2 + $0x18] sm:$0xff]   ;;  %v9024_v20 = vld [vmem:[#allocation2 + $0x70] sm:$0xf] }
 0x107   : > { %v870_v29 = vor.u32 %v868_v34, %v867_v24  ;;  %v871_v51 = vrot.slane %v867_v24, 4 }
 0x108   : > { %v878_v32 = vor.u32 %v876_v15, %v875_v27  ;;  %v880_v11 = vrot.slane %v875_v27, 4  ;;  %v2093_v15 = vld [vmem:[#allocation2] sm:$0xe] }
 0x109   : > { %7284 = vmatpush3.bf16.msra.mxu1 %v7956_v19  ;;  %v1041_v36 = vsel %vm8309_vm10, %v870_v29, %v1040_v53  ;;  %v2094_v53 = vld [vmem:[#allocation2 + $0xc] sm:$0xe]  ;;  %v2160_v29 = vrot.slane %v8940_v18, 5  ;;  %v2097_v18 = vld [vmem:[#allocation2 + $0x30] sm:$0xe] }
 0x10a   : > { %7285 = vmatprep.subr.bf16.mxu1 %v7960_v31  ;;  %v879_v0 = vsel %vm8303_vm9, %v871_v51, %v878_v32  ;;  %v1045_v54 = vsel %vm8293_vm8, %v880_v11, %v1044_v28  ;;  %1042 = vst [vmem:[#allocation2 + $0xc0] sm:$0xf] %v1041_v36  ;;  %v2095_v28 = vld [vmem:[#allocation2 + $0x18] sm:$0xe]  ;;  %v6367_v32 = vrot.slane %v2093_v15, 9  ;;  %v2148_v11 = vrot.slane %v2146_v5, 4 }
 0x10b   : > { %1043 = vst [vmem:[#allocation2 + $0xc4] sm:$0xf] %v879_v0  ;;  %1046 = vst [vmem:[#allocation2 + $0xc8] sm:$0x1] %v1045_v54  ;;  %v2096_v0 = vld [vmem:[#allocation2 + $0x24] sm:$0xe] }
 0x10c   : > { %7254 = vmatmul.mubr.bf16.gmra.mrb[4].mxu1 %v6346_v3  ;;  %v3238_v3 = vshll.u32 %v8893_v48, 16  ;;  %v9015_v48 = vld [vmem:[%s10015_s1 + $0xc0] sm:$0xff]   ;;  %v2167_v36 = vrot.slane %v8962_v14, 5  ;;  %v9022_v54 = vrot.slane %v3242_v13, 4  ;;  %v6368_v14 = vrot.slane %v2094_v53, 9 }
 0x10d   : > { %7257 = vmatprep.mubr.bf16.mxu1 %v6347_v50  ;;  %7286 = vmatpush3.bf16.msra.mxu1 %v7960_v31  ;;  %v8997_v31 = vld [vmem:[#allocation2 + $0x64] sm:$0xf]  ;;  %v2149_v50 = vrot.slane %v8062_v21, 5  ;;  %v9033_v1 = vsel %vm8576_vm13, %v6367_v32, %v2146_v5  ;;  %v6371_v13 = vrot.slane %v2097_v18, 9  ;;  %v8070_v15 = vld [vmem:[#allocation2 + $0x38] sm:$0x1] }
 0x10e   : > { %7287 = vmatprep.subr.bf16.mxu1 %v7964_v26  ;;  %v6351_v8 = vcombine.low %v8060_v33, %v8997_v31  ;;  %v9020_v38 = vrot.slane %v3238_v3, 5  ;;  %v2098_v33 = vld [vmem:[#allocation2 + $0x3c] sm:$0xe]  ;;  %v2169_v3 = vrot.slane %v2167_v36, 4  ;;  %v2177_v21 = vrot.slane %v8070_v15, 5  ;;  %v7976_v5 = vld [vmem:[%s10015_s1 + $0x1c8] sm:$0xff]  }
 0x10f   : > { %v4603_v32 = vld [vmem:[#allocation2 + $0x18] sm:$0xf]  ;;  %v2181_v18 = vrot.slane %v8980_v41, 5  ;;  %v2188_v41 = vrot.slane %v8983_v39, 5  ;;  %v8072_v15 = vld [vmem:[#allocation2 + $0x50] sm:$0x1] }
 0x110   : > { %v7988_v39 = vld [vmem:[%s10015_s1 + $0x1d8] sm:$0xff]   ;;  %v4605_v51 = vld [vmem:[#allocation2 + $0x20] sm:$0x1]  ;;  %v2102_v53 = vld [vmem:[#allocation2 + $0x6c] sm:$0xe] }
 0x111   : > { %7288 = vmatpush3.bf16.msra.mxu1 %v7964_v26  ;;  %v3733_v19 = vld [vmem:[#allocation2 + $0xc0] sm:$0xe]  ;;  %v9008_v26 = vld [vmem:[#allocation2 + $0x14] sm:$0x1] }
 0x112   : > { %7289 = vmatprep.subr.bf16.mxu1 %v7968_v37  ;;  %v3010_v44 = vld [vmem:[#allocation2 + $0xc4] sm:$0xf]  ;;  %v3011_v57 = vld [vmem:[#allocation2 + $0xc8] sm:$0x1]  ;;  %v6518_v52 = vrot.slane %v3733_v19, 9  ;;  %v2156_v24 = vrot.slane %v9008_v26, 5  ;;  %v6356_v26 = vcombine.low %v8842_v63, %v8844_v59 }
 0x113   : > { %v3889_v58 = vrot.slane %v3010_v44, 5  ;;  %v3892_v4 = vrot.slane %v3011_v57, 5  ;;  %v2155_v57 = vrot.slane %v2153_v30, 4  ;;  %v6369_v19 = vrot.slane %v2095_v28, 9  ;;  %v4613_v63 = vld [vmem:[#allocation2 + $0x40] sm:$0xf] }
 0x114   : > { %7258 = vmatmul.mubr.bf16.gmra.mrb[8].mxu1 %v6348_v9  ;;  %v9059_v28 = vsel %vm8576_vm13, %v6368_v14, %v2153_v30  ;;  %v9079_v30 = vsel %vm8576_vm13, %v6371_v13, %v2174_v7  ;;  %v7977_v14 = vld [vmem:[#allocation2 + $0x3c] sm:$0xff]   ;;  %v2183_v13 = vrot.slane %v2181_v18, 4 }
 0x115   : > { %7261 = vmatprep.mubr.bf16.mxu1 %v6349_v12  ;;  %7290 = vmatpush3.bf16.msra.mxu1 %v7968_v37  ;;  %v3890_v16 = vsel %vm8576_vm13, %v6518_v52, %v3889_v58  ;;  %v3891_v61 = vrot.slane %v3889_v58, 4  ;;  %v8064_v37 = vld [vmem:[#allocation2 + $0x6c] sm:$0xf]  ;;  %v7971_v12 = vld [vmem:[#allocation2 + $0x24] sm:$0xff]   ;;  %v7975_v52 = vld [vmem:[#allocation2 + $0x30] sm:$0xff]   ;;  %v2162_v58 = vrot.slane %v2160_v29, 4 }
 0x116   : > { %7291 = vmatprep.subr.bf16.mxu1 %v7974_v2  ;;  %v6352_v9 = vcombine.low %v8064_v37, %v9024_v20 }
 0x117   : > { %v3893_v34 = vsel %vm8576_vm13, %v3891_v61, %v3892_v4  ;;  %v8068_v4 = vld [vmem:[#allocation2 + $0x20] sm:$0x1] }
 0x118   : > { %v6550_v27 = vcombine.low %v3890_v16, %v3893_v34  ;;  %v2163_v49 = vrot.slane %v8068_v4, 5  ;;  %v8069_v16 = vld [vmem:[#allocation2 + $0x2c] sm:$0x1]  ;;  %v6354_v34 = vcombine.low %v8759_v43, %v8764_v60  ;;  %v6358_v43 = vcombine.low %v8899_v62, %v8903_v40  ;;  %v2099_v60 = vld [vmem:[#allocation2 + $0x48] sm:$0xe] }
 0x119   : > { %7292 = vmatpush3.bf16.msra.mxu1 %v7974_v2  ;;  %v8066_v2 = vld [vmem:[#allocation2 + $0x78] sm:$0xf]  ;;  %v2170_v61 = vrot.slane %v8069_v16, 5  ;;  %v7981_v4 = vld [vmem:[#allocation2 + $0x48] sm:$0xff]  }
 0x11a   : > { %7293 = vmatprep.subr.bf16.mxu1 %v7980_v47  ;;  %7470 = vmatmul.mubr.bf16.gmra.mrb[28].mxu0 %v6550_v27  ;;  %v6357_v27 = vcombine.low %v8869_v6, %v8881_v10 }
 0x11b   : > { %7489 = vmatprep.mubr.bf16.mxu0 %v7969_v42  ;;  %v2176_v42 = vrot.slane %v2174_v7, 4  ;;  %v7982_v7 = vld [vmem:[%s10015_s1 + $0x1d0] sm:$0xff]  }
 0x11c   : > { %7262 = vmatmul.mubr.bf16.gmra.mrb[12].mxu1 %v6350_v55  ;;  %v6370_v55 = vrot.slane %v2096_v0, 9  ;;  %v9071_v0 = vsel %vm8576_vm13, %v2162_v58, %v2163_v49 }
 0x11d   : > { %7265 = vmatprep.mubr.bf16.mxu1 %v6351_v8  ;;  %7294 = vmatpush3.bf16.msra.mxu1 %v7980_v47  ;;  %v9028_v47 = vld [vmem:[#allocation2 + $0x7c] sm:$0xf]  ;;  %v9037_v8 = vsel %vm8576_vm13, %v2148_v11, %v2149_v50  ;;  %v6355_v50 = vcombine.low %v8822_v23, %v8835_v17  ;;  %v9063_v23 = vsel %vm8576_vm13, %v2155_v57, %v2156_v24  ;;  %v6372_v24 = vrot.slane %v2098_v33, 9 }
 0x11e   : > { %7295 = vmatprep.subr.bf16.mxu1 %v7986_v22  ;;  %v6353_v44 = vcombine.low %v8066_v2, %v9028_v47  ;;  %v9067_v17 = vsel %vm8576_vm13, %v6369_v19, %v2160_v29  ;;  %v4604_v11 = vld [vmem:[#allocation2 + $0x1c] sm:$0xf]  ;;  %v9075_v37 = vsel %vm8576_vm13, %v6370_v55, %v2167_v36  ;;  %v9084_v29 = vsel %vm8576_vm13, %v2169_v3, %v2170_v61  ;;  %v2100_v61 = vld [vmem:[#allocation2 + $0x54] sm:$0xe]  ;;  %v4606_v3 = vld [vmem:[#allocation2 + $0x24] sm:$0xf] }
 0x11f   : > { %v6373_v36 = vrot.slane %v2099_v60, 9  ;;  %v4655_v2 = vshll.u32 %v4603_v32, 16  ;;  %v9105_v16 = vsel %vm8576_vm13, %v6372_v24, %v2181_v18  ;;  %v2195_v33 = vrot.slane %v8992_v45, 5 }
 0x120   : > { %v2202_v60 = vrot.slane %v8997_v31, 5  ;;  %v6374_v18 = vrot.slane %v2100_v61, 9  ;;  %v4676_v55 = vshrl.u32 %v4606_v3, 16  ;;  %v10042_v62 = vcombine.low %v9033_v1, %v9037_v8  ;;  %v9217_v1 = vld [vmem:[%s10015_s1 + $0x200] sm:$0xff]  }
 0x121   : > { %7296 = vmatpush3.bf16.msra.mxu1 %v7986_v22  ;;  %v4657_v24 = vrot.slane %v4655_v2, 5  ;;  %v2190_v22 = vrot.slane %v2188_v41, 4  ;;  %v2197_v49 = vrot.slane %v2195_v33, 4  ;;  %v8074_v2 = vld [vmem:[#allocation2 + $0x68] sm:$0x1]  ;;  %10044 = vst [vmem:[#allocation4_spill] sm:$0xff] %v9217_v1 }
 0x122   : > { %7329 = vmatprep.subr.bf16.mxu1 %v9015_v48  ;;  %7490 = vmatmul.mubr.bf16.vlgmr.msra.gmra.mrb[0].mxu0 %v7971_v12  ;;  %v4652_v12 = vshrl.u32 %v4603_v32, 16  ;;  %v4607_v32 = vld [vmem:[#allocation2 + $0x28] sm:$0xf] }
 0x123   : > { %7522 = vmatpush3.bf16.msra.mxu0 %v8814_v25  ;;  %7493 = vmatprep.mubr.bf16.mxu0 %v7975_v52  ;;  %v4661_v25 = vshll.u32 %v4604_v11, 16  ;;  %v8071_v52 = vld [vmem:[#allocation2 + $0x44] sm:$0x1]  ;;  %v4685_v31 = vshll.u32 %v4607_v32, 16  ;;  %v4689_v57 = vshrl.u32 %v4607_v32, 16 }
 0x124   : > { %7266 = vmatmul.mubr.bf16.gmra.mrb[16].mxu1 %v6352_v9  ;;  %v9088_v9 = vsel %vm8576_vm13, %v2176_v42, %v2177_v21  ;;  %7523 = vmatprep.subr.bf16.mxu0 %v7976_v5  ;;  %v2184_v58 = vrot.slane %v8071_v52, 5  ;;  %v9113_v42 = vsel %vm8576_vm13, %v6373_v36, %v2188_v41  ;;  %v2191_v21 = vrot.slane %v8072_v15, 5  ;;  %v8073_v15 = vld [vmem:[#allocation2 + $0x5c] sm:$0x1] }
 0x125   : > { %7269 = vmatprep.mubr.bf16.mxu1 %v6353_v44  ;;  %v4665_v44 = vshrl.u32 %v4604_v11, 16  ;;  %v2101_v11 = vld [vmem:[#allocation2 + $0x60] sm:$0xe]  ;;  %v4654_v45 = vrot.slane %v4652_v12, 4  ;;  %v4679_v36 = vshll.u32 %v4606_v3, 16  ;;  %v2198_v19 = vrot.slane %v8073_v15, 5 }
 0x126   : > { %v2204_v12 = vrot.slane %v2202_v60, 4  ;;  %v9129_v61 = vsel %vm8576_vm13, %v2190_v22, %v2191_v21  ;;  %v4678_v3 = vrot.slane %v4676_v55, 4  ;;  %v7987_v15 = vld [vmem:[#allocation2 + $0x60] sm:$0xff]   ;;  %v4691_v22 = vrot.slane %v4689_v57, 4 }
 0x127   : > { %7524 = vmatpush3.bf16.msra.mxu0 %v7976_v5  ;;  %v9116_v5 = vrot.slane %v4661_v25, 5  ;;  %v4667_v52 = vrot.slane %v4665_v44, 4  ;;  %v2205_v25 = vrot.slane %v8074_v2, 5  ;;  %v7992_v44 = vld [vmem:[%s10015_s1 + $0x1e0] sm:$0xff]   ;;  %v4658_v41 = vor.u32 %v4657_v24, %v4654_v45  ;;  %v8075_v24 = vld [vmem:[#allocation2 + $0x74] sm:$0x1] }
 0x128   : > { %7525 = vmatprep.subr.bf16.mxu0 %v7982_v7  ;;  %v4681_v32 = vrot.slane %v4679_v36, 5  ;;  %v9142_v45 = vrot.slane %v4685_v31, 5  ;;  %v4609_v36 = vld [vmem:[#allocation2 + $0x30] sm:$0xf]  ;;  %v2104_v2 = vld [vmem:[#allocation2 + $0x84] sm:$0xe] }
 0x129   : > { %v9150_v55 = vsel %vm8576_vm13, %v2204_v12, %v2205_v25  ;;  %v4700_v25 = vshrl.u32 %v4609_v36, 16 }
 0x12a   : > { %7494 = vmatmul.mubr.bf16.gmra.mrb[4].mxu0 %v7977_v14  ;;  %v9124_v14 = vsel %vm8576_vm13, %v2183_v13, %v2184_v58  ;;  %v7996_v58 = vld [vmem:[%s10015_s1 + $0x1e8] sm:$0xff]   ;;  %v9140_v13 = vsel %vm8576_vm13, %v2197_v49, %v2198_v19  ;;  %v2103_v49 = vld [vmem:[#allocation2 + $0x78] sm:$0xe]  ;;  %v4682_v59 = vor.u32 %v4681_v32, %v4678_v3  ;;  %v4692_v6 = vor.u32 %v4691_v22, %v9142_v45  ;;  %v8076_v3 = vld [vmem:[#allocation2 + $0x80] sm:$0x1] }
 0x12b   : > { %7497 = vmatprep.mubr.bf16.mxu0 %v7981_v4  ;;  %7526 = vmatpush3.bf16.msra.mxu0 %v7982_v7  ;;  %v4668_v4 = vor.u32 %v4667_v52, %v9116_v5  ;;  %v4671_v7 = vshll.u32 %v4605_v51, 16  ;;  %v6376_v51 = vrot.slane %v2102_v53, 9  ;;  %v2212_v52 = vrot.slane %v8075_v24, 5  ;;  %v8077_v22 = vld [vmem:[#allocation2 + $0x88] sm:$0xf] }
 0x12c   : > { %7270 = vmatmul.mubr.bf16.gmra.mrb[20].mxu1 %v6354_v34  ;;  %v6375_v34 = vrot.slane %v2101_v11, 9  ;;  %7527 = vmatprep.subr.bf16.mxu0 %v7988_v39  ;;  %v7983_v11 = vld [vmem:[#allocation2 + $0x54] sm:$0xff]   ;;  %v4659_v53 = vrot.slane %v4658_v41, 4  ;;  %v6377_v12 = vrot.slane %v2103_v49, 9  ;;  %v4703_v41 = vshll.u32 %v4609_v36, 16 }
 0x12d   : > { %7273 = vmatprep.mubr.bf16.mxu1 %v6355_v50  ;;  %v2209_v50 = vrot.slane %v9024_v20, 5  ;;  %v9133_v20 = vsel %vm8576_vm13, %v6374_v18, %v2195_v33  ;;  %v4608_v18 = vld [vmem:[#allocation2 + $0x2c] sm:$0x1]  ;;  %v4669_v57 = vrot.slane %v4668_v4, 4  ;;  %v4673_v19 = vrot.slane %v4671_v7, 5 }
 0x12e   : > { %v9146_v33 = vsel %vm8576_vm13, %v6375_v34, %v2202_v60  ;;  %v4695_v10 = vshll.u32 %v4608_v18, 16  ;;  %v4664_v4 = vsel %vm8260_vm2, %v4659_v53, %v9116_v5  ;;  %v2219_v32 = vrot.slane %v8076_v3, 5  ;;  %v7991_v18 = vld [vmem:[#allocation2 + $0x78] sm:$0xff]   ;;  %v2105_v36 = vld [vmem:[#allocation2 + $0x90] sm:$0xe] }
 0x12f   : > { %7528 = vmatpush3.bf16.msra.mxu0 %v7988_v39  ;;  %v2211_v21 = vrot.slane %v2209_v50, 4  ;;  %v2216_v39 = vrot.slane %v9028_v47, 5  ;;  %v9169_v47 = vsel %vm8576_vm13, %v6376_v51, %v2209_v50  ;;  %v8000_v50 = vld [vmem:[%s10015_s1 + $0x1f0] sm:$0xff]   ;;  %v4683_v51 = vrot.slane %v4682_v59, 4  ;;  %v4611_v53 = vld [vmem:[#allocation2 + $0x38] sm:$0x1] }
 0x130   : > { %7529 = vmatprep.subr.bf16.mxu0 %v7992_v44  ;;  %v4693_v49 = vrot.slane %v4692_v6, 4  ;;  %v6378_v5 = vrot.slane %v2104_v2, 9  ;;  %v8004_v59 = vld [vmem:[%s10015_s1 + $0x1f8] sm:$0xff]  }
 0x131   : > { %v9174_v34 = vsel %vm8576_vm13, %v2211_v21, %v2212_v52  ;;  %v2218_v7 = vrot.slane %v2216_v39, 4  ;;  %v2223_v21 = vrot.slane %v8077_v22, 5  ;;  %v9196_v6 = vsel %vm8576_vm13, %v6377_v12, %v2216_v39  ;;  %v9210_v12 = vld [vmem:[#allocation2 + $0x4c] sm:$0xf] }
 0x132   : > { %7498 = vmatmul.mubr.bf16.gmra.mrb[8].mxu0 %v7983_v11  ;;  %v4612_v11 = vld [vmem:[#allocation2 + $0x3c] sm:$0xf]  ;;  %10043 = vst [vmem:[#allocation3_spill] sm:$0xff] %v9210_v12 }
 0x133   : > { %7501 = vmatprep.mubr.bf16.mxu0 %v7987_v15  ;;  %7530 = vmatpush3.bf16.msra.mxu0 %v7992_v44  ;;  %v4674_v44 = vsel %vm8260_vm2, %v4669_v57, %v4673_v19  ;;  %v7989_v15 = vld [vmem:[#allocation2 + $0x6c] sm:$0xff]   ;;  %v4702_v57 = vrot.slane %v4700_v25, 4  ;;  %v4705_v19 = vrot.slane %v4703_v41, 5  ;;  %v4724_v3 = vshrl.u32 %v4612_v11, 16  ;;  %v4615_v25 = vld [vmem:[#allocation2 + $0x48] sm:$0xf] }
 0x134   : > { %7274 = vmatmul.mubr.bf16.gmra.mrb[24].mxu1 %v6356_v26  ;;  %7531 = vmatprep.subr.bf16.mxu0 %v7996_v58  ;;  %v4697_v26 = vrot.slane %v4695_v10, 5  ;;  %v4727_v31 = vshll.u32 %v4612_v11, 16  ;;  %v8078_v10 = vld [vmem:[#allocation2 + $0x8c] sm:$0x1]  ;;  %v2225_v41 = vrot.slane %v2223_v21, 4  ;;  %v4737_v11 = vshrl.u32 %v4613_v63, 16 }
 0x135   : > { %7277 = vmatprep.mubr.bf16.mxu1 %v6357_v27  ;;  %v4610_v27 = vld [vmem:[#allocation2 + $0x34] sm:$0xf]  ;;  %v2226_v2 = vrot.slane %v8078_v10, 5  ;;  %v9221_v8 = vsel %vm8576_vm13, %v6378_v5, %v2223_v21 }
 0x136   : > { %v4709_v24 = vshll.u32 %v4610_v27, 16  ;;  %v4713_v52 = vshrl.u32 %v4610_v27, 16  ;;  %v9192_v27 = vcombine.low %v4664_v4, %v4674_v44  ;;  %v4698_v44 = vsel %vm8260_vm2, %v4693_v49, %v4697_v26  ;;  %v7994_v49 = vld [vmem:[%s10015_s1 + $0xc8] sm:$0xff]  }
 0x137   : > { %7532 = vmatpush3.bf16.msra.mxu0 %v7996_v58  ;;  %v9200_v58 = vsel %vm8576_vm13, %v2218_v7, %v2219_v32  ;;  %v4719_v7 = vshll.u32 %v4611_v53, 16  ;;  %v4733_v32 = vshll.u32 %v4613_v63, 16  ;;  %v4729_v22 = vrot.slane %v4727_v31, 5 }
 0x138   : > { %7533 = vmatprep.subr.bf16.mxu0 %v8000_v50  ;;  %v9208_v4 = vrot.slane %v4709_v24, 5  ;;  %v4715_v39 = vrot.slane %v4713_v52, 4  ;;  %v4748_v26 = vshrl.u32 %v4615_v25, 16  ;;  %v4751_v24 = vshll.u32 %v4615_v25, 16  ;;  %v4618_v52 = vld [vmem:[#allocation2 + $0x54] sm:$0xf] }
 0x139   : > { %v4757_v63 = vshll.u32 %v9210_v12, 16  ;;  %v9234_v31 = vsel %vm8576_vm13, %v2225_v41, %v2226_v2  ;;  %v9241_v25 = vld [vmem:[#allocation2 + $0x58] sm:$0xf]  ;;  %v4772_v21 = vshrl.u32 %v4618_v52, 16  ;;  %v4775_v60 = vshll.u32 %v4618_v52, 16 }
 0x13a   : > { %7502 = vmatmul.mubr.bf16.gmra.mrb[12].mxu0 %v7989_v15  ;;  %v4726_v15 = vrot.slane %v4724_v3, 4  ;;  %v4716_v5 = vor.u32 %v4715_v39, %v9208_v4  ;;  %v4739_v3 = vrot.slane %v4737_v11, 4  ;;  %10045 = vst [vmem:[#allocation5_spill] sm:$0xff] %v9241_v25  ;;  %v10046_v2 = vcombine.low %v9059_v28, %v9063_v23 }
 0x13b   : > { %7505 = vmatprep.mubr.bf16.mxu0 %v7991_v18  ;;  %7534 = vmatpush3.bf16.msra.mxu0 %v8000_v50  ;;  %v4761_v50 = vshrl.u32 %v9210_v12, 16  ;;  %v7993_v18 = vld [vmem:[#allocation2 + $0x84] sm:$0xff]   ;;  %v4750_v41 = vrot.slane %v4748_v26, 4  ;;  %v4753_v39 = vrot.slane %v4751_v24, 5  ;;  %v4781_v28 = vshll.u32 %v9241_v25, 16 }
 0x13c   : > { %7278 = vmatmul.mubr.bf16.gmra.mrb[28].mxu1 %v6358_v43  ;;  %v4688_v43 = vsel %vm8260_vm2, %v4683_v51, %v9142_v45  ;;  %v4706_v45 = vor.u32 %v4705_v19, %v4702_v57  ;;  %v4614_v51 = vld [vmem:[#allocation2 + $0x44] sm:$0x1]  ;;  %7535 = vmatprep.subr.bf16.mxu0 %v8004_v59  ;;  %v9237_v57 = vrot.slane %v4719_v7, 5  ;;  %v9239_v19 = vrot.slane %v4733_v32, 5 }
 0x13d   : > { %7297 = vmatprep.mubr.bf16.mxu1 %v10042_v62  ;;  %v9228_v53 = vcombine.low %v4688_v43, %v4698_v44  ;;  %v4743_v10 = vshll.u32 %v4614_v51, 16  ;;  %v7995_v62 = vld [vmem:[#allocation2 + $0x90] sm:$0xff]   ;;  %v4730_v44 = vor.u32 %v4729_v22, %v4726_v15  ;;  %v9247_v7 = vrot.slane %v4757_v63, 5 }
 0x13e   : > { %v4707_v43 = vrot.slane %v4706_v45, 4  ;;  %v4763_v32 = vrot.slane %v4761_v50, 4  ;;  %v4717_v11 = vrot.slane %v4716_v5, 4  ;;  %v8079_v45 = vld [vmem:[#allocation2 + $0x94] sm:$0xf]  ;;  %v4785_v23 = vshrl.u32 %v9241_v25, 16 }
 0x13f   : > { %7536 = vmatpush3.bf16.msra.mxu0 %v8004_v59  ;;  %v10047_v59 = vcombine.low %v9067_v17, %v9071_v0  ;;  %v2230_v51 = vrot.slane %v8079_v45, 5  ;;  %v9253_v15 = vld [vmem:[#allocation2 + $0x50] sm:$0x1]  ;;  %v9261_v26 = vrot.slane %v4743_v10, 5  ;;  %v6379_v17 = vrot.slane %v2105_v36, 9  ;;  %v7997_v36 = vld [vmem:[#allocation2 + $0x9c] sm:$0xff]  }
 0x140   : > { %7569 = vmatprep.subr.bf16.mxu0 %v9217_v1  ;;  %10048 = vst [vmem:[#allocation6_spill] sm:$0xff] %v9253_v15  ;;  %v7998_v22 = vld [vmem:[%s10015_s1 + $0xd0] sm:$0xff]   ;;  %v8080_v0 = vld [vmem:[#allocation2 + $0xa0] sm:$0xf]  ;;  %v4712_v63 = vsel %vm8260_vm2, %v4707_v43, %v9208_v4  ;;  %v8081_v50 = vld [vmem:[#allocation2 + $0x98] sm:$0x1]  ;;  %v4754_v45 = vor.u32 %v4753_v39, %v4750_v41  ;;  %v4722_v4 = vsel %vm8260_vm2, %v4717_v11, %v9237_v57 }
 0x141   : > { %v2237_v24 = vrot.slane %v8080_v0, 5  ;;  %v2233_v52 = vrot.slane %v8081_v50, 5  ;;  %v4774_v5 = vrot.slane %v4772_v21, 4  ;;  %v4767_v10 = vshll.u32 %v9253_v15, 16  ;;  %v7999_v50 = vld [vmem:[#allocation2 + $0xa8] sm:$0xff]  }
 0x142   : > { %7506 = vmatmul.mubr.bf16.gmra.mrb[16].mxu0 %v7993_v18  ;;  %v2106_v18 = vld [vmem:[#allocation2 + $0x9c] sm:$0xe]  ;;  %v2232_v43 = vrot.slane %v2230_v51, 4  ;;  %v9276_v21 = vrot.slane %v4781_v28, 5  ;;  %v9284_v15 = vsel %vm8576_vm13, %v6379_v17, %v2230_v51  ;;  %v8083_v11 = vld [vmem:[#allocation2 + $0xac] sm:$0xf]  ;;  %v10050_v25 = vcombine.low %v9079_v30, %v9088_v9 }
 0x143   : > { %7509 = vmatprep.mubr.bf16.mxu0 %v7995_v62  ;;  %v8002_v62 = vld [vmem:[%s10015_s1 + $0xd8] sm:$0xff]   ;;  %v6380_v41 = vrot.slane %v2106_v18, 9  ;;  %v2239_v39 = vrot.slane %v2237_v24, 4  ;;  %v2244_v28 = vrot.slane %v8083_v11, 5  ;;  %v4755_v18 = vrot.slane %v4754_v45, 4  ;;  %v8006_v30 = vld [vmem:[%s10015_s1 + $0xe0] sm:$0xff]  }
 0x144   : > { %7298 = vmatmul.mubr.bf16.vlgmr.msra.gmra.mrb[0].mxu1 %v10046_v2  ;;  %v4777_v2 = vrot.slane %v4775_v60, 5  ;;  %v4787_v60 = vrot.slane %v4785_v23, 4  ;;  %v10049_v23 = vcombine.low %v9075_v37, %v9084_v29  ;;  %v4769_v12 = vrot.slane %v4767_v10, 5  ;;  %v2107_v1 = vld [vmem:[#allocation2 + $0xa8] sm:$0xe] }
 0x145   : > { %7330 = vmatpush3.bf16.msra.mxu1 %v9015_v48  ;;  %7301 = vmatprep.mubr.bf16.mxu1 %v10047_v59  ;;  %v4740_v48 = vor.u32 %v4739_v3, %v9239_v19  ;;  %v9266_v59 = vrot.slane %v4730_v44, 4  ;;  %v4764_v3 = vor.u32 %v4763_v32, %v9247_v7  ;;  %v8082_v32 = vld [vmem:[#allocation2 + $0xa4] sm:$0x1]  ;;  %v9300_v37 = vsel %vm8576_vm13, %v2232_v43, %v2233_v52  ;;  %v8084_v45 = vld [vmem:[#allocation2 + $0xb0] sm:$0x1] }
 0x146   : > { %7331 = vmatprep.subr.bf16.mxu1 %v7994_v49  ;;  %v2240_v0 = vrot.slane %v8082_v32, 5  ;;  %v4778_v57 = vor.u32 %v4777_v2, %v4774_v5  ;;  %v4788_v29 = vor.u32 %v4787_v60, %v9276_v21  ;;  %v10051_v5 = vshll.u32 %v8895_v46, 16  ;;  %v4621_v46 = vld [vmem:[#allocation2 + $0x60] sm:$0xf]  ;;  %v9324_v10 = vld [vmem:[#allocation2 + $0x64] sm:$0xf] }
 0x147   : > { %v4741_v44 = vrot.slane %v4740_v48, 4  ;;  %v9289_v48 = vcombine.low %v4712_v63, %v4722_v4  ;;  %v4765_v32 = vrot.slane %v4764_v3, 4  ;;  %v4736_v51 = vsel %vm8260_vm2, %v9266_v59, %v9239_v19  ;;  %v2108_v63 = vld [vmem:[#allocation2 + $0xb4] sm:$0xe] }
 0x148   : > { %v9306_v2 = vrot.slane %v10051_v5, 5  ;;  %v9316_v19 = vsel %vm8576_vm13, %v6380_v41, %v2237_v24  ;;  %v6381_v52 = vrot.slane %v2107_v1, 9  ;;  %v2246_v59 = vrot.slane %v2244_v28, 4  ;;  %v8001_v41 = vld [vmem:[#allocation2 + $0xb4] sm:$0xff]  }
 0x149   : > { %7332 = vmatpush3.bf16.msra.mxu1 %v7994_v49  ;;  %v9278_v49 = vld [vmem:[#allocation2 + $0x5c] sm:$0x1]  ;;  %v4746_v9 = vsel %vm8260_vm2, %v4741_v44, %v9261_v26  ;;  %10053 = vst [vmem:[#allocation8_spill] sm:$0xff] %v9316_v19  ;;  %v2247_v3 = vrot.slane %v8084_v45, 5  ;;  %v4760_v26 = vsel %vm8260_vm2, %v4755_v18, %v9247_v7  ;;  %v4770_v24 = vsel %vm8260_vm2, %v4765_v32, %v4769_v12  ;;  %v4624_v32 = vld [vmem:[#allocation2 + $0x6c] sm:$0xf] }
 0x14a   : > { %7333 = vmatprep.subr.bf16.mxu1 %v7998_v22  ;;  %v4791_v17 = vshll.u32 %v9278_v49, 16  ;;  %10052 = vst [vmem:[#allocation7_spill] sm:$0xff] %v9306_v2  ;;  %7510 = vmatmul.mubr.bf16.gmra.mrb[20].mxu0 %v7997_v36  ;;  %v6382_v36 = vrot.slane %v2108_v63, 9  ;;  %v2251_v4 = vrot.slane %v8903_v40, 5  ;;  %v9332_v43 = vrot.slane %v4788_v29, 4 }
 0x14b   : > { %7513 = vmatprep.mubr.bf16.mxu0 %v7999_v50  ;;  %v4796_v1 = vshrl.u32 %v4621_v46, 16  ;;  %v4799_v44 = vshll.u32 %v4621_v46, 16  ;;  %v9339_v7 = vcombine.low %v4736_v51, %v4746_v9  ;;  %v4805_v40 = vshll.u32 %v9324_v10, 16  ;;  %v8003_v50 = vld [vmem:[#allocation2 + $0xc0] sm:$0xff]   ;;  %v9359_v51 = vld [vmem:[#allocation2 + $0x70] sm:$0xf] }
 0x14c   : > { %7302 = vmatmul.mubr.bf16.gmra.mrb[4].mxu1 %v10049_v23  ;;  %v9334_v60 = vrot.slane %v4791_v17, 5  ;;  %v9349_v11 = vcombine.low %v4760_v26, %v4770_v24  ;;  %v9357_v18 = vsel %vm8576_vm13, %v6381_v52, %v2244_v28  ;;  %10056 = vst [vmem:[#allocation11_spill] sm:$0xff] %v9359_v51  ;;  %v10057_v29 = vcombine.low %v9105_v16, %v9124_v14  ;;  %v8085_v9 = vld [vmem:[#allocation2 + $0xbc] sm:$0x1]  ;;  %v4627_v28 = vld [vmem:[#allocation2 + $0x78] sm:$0xf] }
 0x14d   : > { %7305 = vmatprep.mubr.bf16.mxu1 %v10050_v25  ;;  %7334 = vmatpush3.bf16.msra.mxu1 %v7998_v22  ;;  %v9320_v25 = vsel %vm8576_vm13, %v2239_v39, %v2240_v0  ;;  %v9322_v22 = vrot.slane %v4778_v57, 4  ;;  %v8008_v39 = vld [vmem:[%s10015_s1 + $0xe8] sm:$0xff]   ;;  %v9366_v17 = vsel %vm8576_vm13, %v2246_v59, %v2247_v3  ;;  %v9370_v63 = vsel %vm8576_vm13, %v6382_v36, %v2251_v4  ;;  %v9372_v52 = vld [vmem:[#allocation2 + $0x7c] sm:$0xf]  ;;  %v8010_v16 = vld [vmem:[%s10015_s1 + $0xf0] sm:$0xff]  }
 0x14e   : > { %7335 = vmatprep.subr.bf16.mxu1 %v8002_v62  ;;  %10054 = vst [vmem:[#allocation9_spill] sm:$0xff] %v9320_v25  ;;  %v9343_v0 = vld [vmem:[#allocation2 + $0x68] sm:$0x1]  ;;  %v2253_v5 = vrot.slane %v2251_v4, 4  ;;  %v2254_v46 = vrot.slane %v8085_v9, 5  ;;  %10058 = vst [vmem:[#allocation12_spill] sm:$0xff] %v9372_v52  ;;  %v10059_v45 = vcombine.low %v9113_v42, %v9129_v61 }
 0x14f   : > { %10055 = vst [vmem:[#allocation10_spill] sm:$0xff] %v9343_v0  ;;  %v4798_v59 = vrot.slane %v4796_v1, 4  ;;  %v4801_v3 = vrot.slane %v4799_v44, 5  ;;  %v4815_v26 = vshll.u32 %v9343_v0, 16  ;;  %v4630_v24 = vld [vmem:[#allocation2 + $0x84] sm:$0xf] }
 0x150   : > { %v9385_v36 = vrot.slane %v4805_v40, 5  ;;  %v4820_v61 = vshrl.u32 %v4624_v32, 16  ;;  %v9387_v4 = vld [vmem:[#allocation2 + $0x88] sm:$0xf]  ;;  %v4829_v9 = vshll.u32 %v9359_v51, 16  ;;  %v4833_v1 = vshrl.u32 %v9359_v51, 16 }
 0x151   : > { %7336 = vmatpush3.bf16.msra.mxu1 %v8002_v62  ;;  %v4809_v62 = vshrl.u32 %v9324_v10, 16  ;;  %10060 = vst [vmem:[#allocation13_spill] sm:$0xff] %v9387_v4  ;;  %v4844_v44 = vshrl.u32 %v4627_v28, 16  ;;  %v4853_v57 = vshll.u32 %v9372_v52, 16  ;;  %v4868_v40 = vshrl.u32 %v4630_v24, 16 }
 0x152   : > { %7337 = vmatprep.subr.bf16.mxu1 %v8006_v30  ;;  %7514 = vmatmul.mubr.bf16.gmra.mrb[24].mxu0 %v8001_v41  ;;  %v4857_v41 = vshrl.u32 %v9372_v52, 16  ;;  %v4871_v12 = vshll.u32 %v4630_v24, 16  ;;  %v4877_v23 = vshll.u32 %v9387_v4, 16  ;;  %v4881_v14 = vshrl.u32 %v9387_v4, 16  ;;  %v4633_v51 = vld [vmem:[#allocation2 + $0x90] sm:$0xf] }
 0x153   : > { %v4811_v42 = vrot.slane %v4809_v62, 4  ;;  %7517 = vmatprep.mubr.bf16.mxu0 %v8003_v50  ;;  %v8005_v62 = vld [vmem:[#allocation2 + $0xcc] sm:$0xff]   ;;  %v4802_v50 = vor.u32 %v4801_v3, %v4798_v59  ;;  %v4822_v2 = vrot.slane %v4820_v61, 4  ;;  %v9406_v0 = vrot.slane %v4829_v9, 5  ;;  %v9408_v3 = vld [vmem:[#allocation2 + $0x94] sm:$0xf] }
 0x154   : > { %7306 = vmatmul.mubr.bf16.gmra.mrb[8].mxu1 %v10057_v29  ;;  %v9389_v29 = vld [vmem:[#allocation2 + $0x74] sm:$0x1]  ;;  %10062 = vst [vmem:[#allocation15_spill] sm:$0xff] %v9408_v3  ;;  %v10063_v4 = vcombine.low %v9133_v20, %v9140_v13  ;;  %v9413_v25 = vld [vmem:[#allocation2 + $0x80] sm:$0x1]  ;;  %v9415_v19 = vrot.slane %v4853_v57, 5  ;;  %v10064_v9 = vcombine.low %v9146_v33, %v9150_v55 }
 0x155   : > { %7309 = vmatprep.mubr.bf16.mxu1 %v10059_v45  ;;  %7338 = vmatpush3.bf16.msra.mxu1 %v8006_v30  ;;  %v4823_v30 = vshll.u32 %v4624_v32, 16  ;;  %10061 = vst [vmem:[#allocation14_spill] sm:$0xff] %v9389_v29  ;;  %v4847_v45 = vshll.u32 %v4627_v28, 16  ;;  %v9397_v32 = vsel %vm8576_vm13, %v2253_v5, %v2254_v46  ;;  %v8012_v28 = vld [vmem:[%s10015_s1 + $0xf8] sm:$0xff]   ;;  %v4812_v52 = vor.u32 %v4811_v42, %v9385_v36 }
 0x156   : > { %7339 = vmatprep.subr.bf16.mxu1 %v8008_v39  ;;  %v4835_v5 = vrot.slane %v4833_v1, 4  ;;  %v4846_v46 = vrot.slane %v4844_v44, 4  ;;  %v4859_v42 = vrot.slane %v4857_v41, 4  ;;  %v4870_v61 = vrot.slane %v4868_v40, 4  ;;  %v9420_v1 = vld [vmem:[#allocation2 + $0x8c] sm:$0x1] }
 0x157   : > { %v4825_v24 = vrot.slane %v4823_v30, 5  ;;  %v4849_v59 = vrot.slane %v4847_v45, 5  ;;  %v4873_v30 = vrot.slane %v4871_v12, 5  ;;  %v9422_v44 = vrot.slane %v4877_v23, 5 }
 0x158   : > { %v4883_v45 = vrot.slane %v4881_v14, 4  ;;  %v4895_v20 = vshll.u32 %v4633_v51, 16  ;;  %v9424_v13 = vrot.slane %v4802_v50, 4  ;;  %v9426_v57 = vrot.slane %v4815_v26, 5  ;;  %v4636_v14 = vld [vmem:[#allocation2 + $0x9c] sm:$0xf] }
 0x159   : > { %7340 = vmatpush3.bf16.msra.mxu1 %v8008_v39  ;;  %v4839_v39 = vshll.u32 %v9389_v29, 16  ;;  %v4892_v29 = vshrl.u32 %v4633_v51, 16  ;;  %v4901_v12 = vshll.u32 %v9408_v3, 16  ;;  %v4826_v33 = vor.u32 %v4825_v24, %v4822_v2  ;;  %v9440_v24 = vld [vmem:[#allocation2 + $0xa0] sm:$0xf] }
 0x15a   : > { %7341 = vmatprep.subr.bf16.mxu1 %v8010_v16  ;;  %7518 = vmatmul.mubr.bf16.gmra.mrb[28].mxu0 %v8005_v62  ;;  %v4836_v55 = vor.u32 %v4835_v5, %v9406_v0  ;;  %v4850_v23 = vor.u32 %v4849_v59, %v4846_v46  ;;  %v9433_v51 = vrot.slane %v4812_v52, 4  ;;  %v4860_v26 = vor.u32 %v4859_v42, %v9415_v19  ;;  %v9445_v5 = vld [vmem:[%s10015_s1 + $0x100] sm:$0xff]   ;;  %v9448_v52 = vld [vmem:[#allocation2 + $0x98] sm:$0x1] }
 0x15b   : > { %7537 = vmatprep.mubr.bf16.mxu0 %v9192_v27  ;;  %v9435_v41 = vrot.slane %v4839_v39, 5  ;;  %v4887_v40 = vshll.u32 %v9420_v1, 16  ;;  %v4874_v62 = vor.u32 %v4873_v30, %v4870_v61  ;;  %v4884_v50 = vor.u32 %v4883_v45, %v9422_v44  ;;  %v8009_v45 = vld [vmem:[%s10015_s1 + $0x208] sm:$0xff]  }
 0x15c   : > { %7310 = vmatmul.mubr.bf16.gmra.mrb[12].mxu1 %v10063_v4  ;;  %v4905_v4 = vshrl.u32 %v9408_v3, 16  ;;  %v4894_v27 = vrot.slane %v4892_v29, 4  ;;  %v4897_v2 = vrot.slane %v4895_v20, 5  ;;  %v9450_v39 = vrot.slane %v4901_v12, 5 }
 0x15d   : > { %7313 = vmatprep.mubr.bf16.mxu1 %v10064_v9  ;;  %7342 = vmatpush3.bf16.msra.mxu1 %v8010_v16  ;;  %v4863_v16 = vshll.u32 %v9413_v25, 16  ;;  %v4919_v59 = vshll.u32 %v4636_v14, 16  ;;  %v4827_v42 = vrot.slane %v4826_v33, 4  ;;  %v4837_v61 = vrot.slane %v4836_v55, 4 }
 0x15e   : > { %7343 = vmatprep.subr.bf16.mxu1 %v8012_v28  ;;  %v4907_v46 = vrot.slane %v4905_v4, 4  ;;  %v4851_v29 = vrot.slane %v4850_v23, 4  ;;  %v10065_v9 = vcombine.low %v9169_v47, %v9174_v34  ;;  %v4861_v20 = vrot.slane %v4860_v26, 4 }
 0x15f   : > { %v4865_v30 = vrot.slane %v4863_v16, 5  ;;  %v4889_v3 = vrot.slane %v4887_v40, 5  ;;  %v4925_v12 = vshll.u32 %v9440_v24, 16  ;;  %v4929_v4 = vshrl.u32 %v9440_v24, 16 }
 0x160   : > { %v10066_v33 = vcombine.low %v9196_v6, %v9200_v58  ;;  %v4875_v55 = vrot.slane %v4874_v62, 4  ;;  %v4885_v23 = vrot.slane %v4884_v50, 4  ;;  %v4898_v16 = vor.u32 %v4897_v2, %v4894_v27  ;;  %v10068_v62 = vld [vmem:[#allocation4_spill] sm:$0xff]  ;;  %v4639_v50 = vld [vmem:[#allocation2 + $0xa8] sm:$0xf] }
 0x161   : > { %7344 = vmatpush3.bf16.msra.mxu1 %v8012_v28  ;;  %v4916_v28 = vshrl.u32 %v4636_v14, 16  ;;  %v4911_v47 = vshll.u32 %v9448_v52, 16  ;;  %v4808_v34 = vsel %vm8260_vm2, %v9424_v13, %v9385_v36  ;;  %v4908_v14 = vor.u32 %v4907_v46, %v9450_v39  ;;  %v9499_v2 = vld [vmem:[#allocation2 + $0xac] sm:$0xf] }
 0x162   : > { %7617 = vmatprep.subr.bf16.mxu1 %v9445_v5  ;;  %7538 = vmatmul.mubr.bf16.vlgmr.msra.gmra.mrb[0].mxu0 %v9228_v53  ;;  %v4921_v40 = vrot.slane %v4919_v59, 5  ;;  %v10067_v6 = vor.u32 %v9022_v54, %v9020_v38  ;;  %v4818_v53 = vsel %vm8260_vm2, %v9433_v51, %v9426_v57  ;;  %v4832_v36 = vsel %vm8260_vm2, %v4827_v42, %v9406_v0  ;;  %v9487_v54 = vld [vmem:[#allocation2 + $0xa4] sm:$0x1] }
 0x163   : > { %v4918_v26 = vrot.slane %v4916_v28, 4  ;;  %7570 = vmatpush3.bf16.msra.mxu0 %v10068_v62  ;;  %7541 = vmatprep.mubr.bf16.mxu0 %v9289_v48  ;;  %v4842_v13 = vsel %vm8260_vm2, %v4837_v61, %v9435_v41  ;;  %v8011_v48 = vld [vmem:[%s10015_s1 + $0x210] sm:$0xff]   ;;  %v4856_v57 = vsel %vm8260_vm2, %v4851_v29, %v9415_v19  ;;  %v4866_v51 = vsel %vm8260_vm2, %v4861_v20, %v4865_v30 }
 0x164   : > { %7314 = vmatmul.mubr.bf16.gmra.mrb[16].mxu1 %v10065_v9  ;;  %v9473_v58 = vrot.slane %v10067_v6, 4  ;;  %7571 = vmatprep.subr.bf16.mxu0 %v8009_v45  ;;  %v9497_v0 = vrot.slane %v4925_v12, 5  ;;  %v4931_v27 = vrot.slane %v4929_v4, 4  ;;  %v4880_v41 = vsel %vm8260_vm2, %v4875_v55, %v9422_v44  ;;  %v10073_v6 = vld [vmem:[#allocation3_spill] sm:$0xff] }
 0x165   : > { %7317 = vmatprep.mubr.bf16.mxu1 %v10066_v33  ;;  %v4890_v46 = vsel %vm8260_vm2, %v4885_v23, %v4889_v3  ;;  %v9506_v28 = vrot.slane %v4898_v16, 4  ;;  %v9508_v59 = vrot.slane %v4911_v47, 5  ;;  %v9510_v19 = vrot.slane %v4908_v14, 4  ;;  %v9553_v23 = vld [vmem:[#allocation2 + $0xb0] sm:$0x1] }
 0x166   : > { %v4922_v42 = vor.u32 %v4921_v40, %v4918_v26  ;;  %v4935_v61 = vshll.u32 %v9487_v54, 16  ;;  %v4940_v29 = vshrl.u32 %v4639_v50, 16  ;;  %v10069_v30 = vsel %vm8260_vm2, %v9332_v43, %v9334_v60  ;;  %v9555_v16 = vld [vmem:[#allocation2 + $0xb4] sm:$0xf] }
 0x167   : > { %7572 = vmatpush3.bf16.msra.mxu0 %v8009_v45  ;;  %v10070_v3 = vsel %vm8260_vm2, %v9322_v22, %v9276_v21  ;;  %v6413_v9 = vcombine.low %v9357_v18, %v9366_v17  ;;  %v4943_v20 = vshll.u32 %v4639_v50, 16  ;;  %v4949_v12 = vshll.u32 %v9499_v2, 16  ;;  %v8013_v21 = vld [vmem:[%s10015_s1 + $0x218] sm:$0xff]   ;;  %v5361_v17 = vld [vmem:[#allocation2 + $0x48] sm:$0xe] }
 0x168   : > { %v9523_v44 = vcombine.low %v10070_v3, %v10069_v30  ;;  %v10071_v45 = vcombine.low %v9221_v8, %v9234_v31  ;;  %7573 = vmatprep.subr.bf16.mxu0 %v8011_v48  ;;  %v6414_v43 = vcombine.low %v9370_v63, %v9397_v32  ;;  %v9533_v60 = vcombine.low %v4808_v34, %v4818_v53  ;;  %v5362_v14 = vld [vmem:[#allocation2 + $0x54] sm:$0xe]  ;;  %v5363_v53 = vld [vmem:[#allocation2 + $0x60] sm:$0xe] }
 0x169   : > { %v4932_v22 = vor.u32 %v4931_v27, %v9497_v0  ;;  %v4953_v18 = vshrl.u32 %v9499_v2, 16  ;;  %v10072_v4 = vcombine.low %v9284_v15, %v9300_v37  ;;  %v9543_v8 = vcombine.low %v4832_v36, %v4842_v13  ;;  %v8016_v36 = vld [vmem:[%s10015_s1 + $0x220] sm:$0xff]  }
 0x16a   : > { %v9545_v31 = vcombine.low %v4856_v57, %v4866_v51  ;;  %v9547_v33 = vcombine.low %v4880_v41, %v4890_v46  ;;  %v4904_v55 = vsel %vm8260_vm2, %v9506_v28, %v9450_v39  ;;  %7542 = vmatmul.mubr.bf16.gmra.mrb[4].mxu0 %v9339_v7  ;;  %v4914_v15 = vsel %vm8260_vm2, %v9510_v19, %v9508_v59  ;;  %v10075_v46 = vld [vmem:[#allocation5_spill] sm:$0xff]  ;;  %v5367_v59 = vld [vmem:[#allocation2 + $0x90] sm:$0xe] }
 0x16b   : > { %v9562_v37 = vrot.slane %v4922_v42, 4  ;;  %v9564_v47 = vrot.slane %v4935_v61, 5  ;;  %v9566_v34 = vrot.slane %v4940_v29, 4  ;;  %7545 = vmatprep.mubr.bf16.mxu0 %v9349_v11  ;;  %7574 = vmatpush3.bf16.msra.mxu0 %v8011_v48  ;;  %v9569_v26 = vrot.slane %v4943_v20, 5  ;;  %v10074_v11 = vld [vmem:[#allocation6_spill] sm:$0xff] }
 0x16c   : > { %7318 = vmatmul.mubr.bf16.gmra.mrb[20].mxu1 %v10071_v45  ;;  %v9571_v40 = vrot.slane %v4949_v12, 5  ;;  %v6643_v7 = vrot.slane %v5361_v17, 9  ;;  %v5451_v62 = vrot.slane %v10073_v6, 5  ;;  %7575 = vmatprep.subr.bf16.mxu0 %v8013_v21  ;;  %v9577_v13 = vrot.slane %v4932_v22, 4  ;;  %v5364_v20 = vld [vmem:[#allocation2 + $0x6c] sm:$0xe] }
 0x16d   : > { %7321 = vmatprep.mubr.bf16.mxu1 %v10072_v4  ;;  %v4955_v50 = vrot.slane %v4953_v18, 4  ;;  %v4959_v57 = vshll.u32 %v9553_v23, 16  ;;  %v5454_v48 = vrot.slane %v10074_v11, 5  ;;  %v6644_v41 = vrot.slane %v5362_v14, 9  ;;  %v10076_v17 = vld [vmem:[#allocation8_spill] sm:$0xff]  ;;  %v10077_v4 = vld [vmem:[#allocation9_spill] sm:$0xff] }
 0x16e   : > { %v9583_v51 = vsel %vm8576_vm13, %v6643_v7, %v5451_v62  ;;  %v5453_v27 = vrot.slane %v5451_v62, 4  ;;  %v5458_v42 = vrot.slane %v10075_v46, 5  ;;  %v4964_v61 = vshrl.u32 %v9555_v16, 16  ;;  %v10079_v7 = vld [vmem:[#allocation10_spill] sm:$0xff]  ;;  %v9611_v62 = vld [vmem:[#allocation2 + $0xb8] sm:$0xf] }
 0x16f   : > { %v5461_v29 = vrot.slane %v9278_v49, 5  ;;  %v6645_v30 = vrot.slane %v5363_v53, 9  ;;  %v5465_v3 = vrot.slane %v9324_v10, 5  ;;  %7576 = vmatpush3.bf16.msra.mxu0 %v8013_v21  ;;  %v4967_v12 = vshll.u32 %v9555_v16, 16  ;;  %v8019_v49 = vld [vmem:[%s10015_s1 + $0x228] sm:$0xff]  }
 0x170   : > { %v9592_v45 = vsel %vm8576_vm13, %v5453_v27, %v5454_v48  ;;  %v9596_v22 = vsel %vm8576_vm13, %v6644_v41, %v5458_v42  ;;  %v5460_v18 = vrot.slane %v5458_v42, 4  ;;  %v10078_v14 = vcombine.low %v10076_v17, %v10077_v4  ;;  %7577 = vmatprep.subr.bf16.mxu0 %v8016_v36  ;;  %v10080_v48 = vld [vmem:[#allocation11_spill] sm:$0xff]  ;;  %v10081_v41 = vld [vmem:[#allocation14_spill] sm:$0xff] }
 0x171   : > { %v9608_v21 = vsel %vm8576_vm13, %v6645_v30, %v5465_v3  ;;  %v5467_v16 = vrot.slane %v5465_v3, 4  ;;  %v5468_v6 = vrot.slane %v10079_v7, 5  ;;  %v6646_v11 = vrot.slane %v5364_v20, 9  ;;  %v8022_v20 = vld [vmem:[%s10015_s1 + $0x230] sm:$0xff]   ;;  %v5365_v4 = vld [vmem:[#allocation2 + $0x78] sm:$0xe] }
 0x172   : > { %v9615_v53 = vsel %vm8576_vm13, %v5460_v18, %v5461_v29  ;;  %v5472_v27 = vrot.slane %v10080_v48, 5  ;;  %v5475_v46 = vrot.slane %v10081_v41, 5  ;;  %7546 = vmatmul.mubr.bf16.gmra.mrb[8].mxu0 %v9523_v44  ;;  %v4946_v42 = vor.u32 %v9569_v26, %v9566_v34  ;;  %v2991_v29 = vld [vmem:[#allocation2 + $0x78] sm:$0xf]  ;;  %v4645_v7 = vld [vmem:[#allocation2 + $0xc0] sm:$0xf] }
 0x173   : > { %v4956_v30 = vor.u32 %v4955_v50, %v9571_v40  ;;  %v9627_v3 = vsel %vm8576_vm13, %v5467_v16, %v5468_v6  ;;  %7549 = vmatprep.mubr.bf16.mxu0 %v9533_v60  ;;  %7578 = vmatpush3.bf16.msra.mxu0 %v8016_v36  ;;  %v9644_v36 = vrot.slane %v4959_v57, 5  ;;  %v9649_v18 = vrot.slane %v4964_v61, 4  ;;  %v5366_v34 = vld [vmem:[#allocation2 + $0x84] sm:$0xe]  ;;  %v10082_v44 = vld [vmem:[#allocation7_spill] sm:$0xff] }
 0x174   : > { %7322 = vmatmul.mubr.bf16.gmra.mrb[24].mxu1 %v10078_v14  ;;  %v9638_v26 = vsel %vm8576_vm13, %v6646_v11, %v5472_v27  ;;  %v5474_v50 = vrot.slane %v5472_v27, 4  ;;  %7579 = vmatprep.subr.bf16.mxu0 %v8019_v49  ;;  %v4973_v17 = vshll.u32 %v9611_v62, 16  ;;  %v8014_v14 = vld [vmem:[#allocation2 + $0xc] sm:$0xff]   ;;  %v9652_v16 = vrot.slane %v4967_v12, 5  ;;  %v9665_v12 = vld [vmem:[#allocation2 + $0xc4] sm:$0xf] }
 0x175   : > { %7325 = vmatprep.mubr.bf16.mxu1 %v6413_v9  ;;  %v3229_v11 = vshrl.u32 %v2991_v29, 16  ;;  %v3232_v57 = vshll.u32 %v2991_v29, 16  ;;  %v9658_v48 = vrot.slane %v4946_v42, 4  ;;  %v9660_v27 = vrot.slane %v4956_v30, 4 }
 0x176   : > { %v9656_v6 = vsel %vm8576_vm13, %v5474_v50, %v5475_v46  ;;  %v4977_v61 = vshrl.u32 %v9611_v62, 16  ;;  %v3251_v46 = vsel %vm8260_vm2, %v9473_v58, %v10082_v44  ;;  %v6647_v42 = vrot.slane %v5365_v4, 9  ;;  %v10083_v50 = vld [vmem:[#allocation12_spill] sm:$0xff]  ;;  %v10084_v44 = vld [vmem:[#allocation13_spill] sm:$0xff] }
 0x177   : > { %7580 = vmatpush3.bf16.msra.mxu0 %v8019_v49  ;;  %v3231_v9 = vrot.slane %v3229_v11, 4  ;;  %v3234_v10 = vrot.slane %v3232_v57, 5  ;;  %v9674_v30 = vrot.slane %v4973_v17, 5  ;;  %v4988_v29 = vshrl.u32 %v4645_v7, 16  ;;  %v8025_v49 = vld [vmem:[%s10015_s1 + $0x238] sm:$0xff]  }
 0x178   : > { %7581 = vmatprep.subr.bf16.mxu0 %v8022_v20  ;;  %v5479_v11 = vrot.slane %v10083_v50, 5  ;;  %v5482_v57 = vrot.slane %v9413_v25, 5  ;;  %v6648_v58 = vrot.slane %v5366_v34, 9  ;;  %v5486_v4 = vrot.slane %v10084_v44, 5  ;;  %v9711_v50 = vld [vmem:[#allocation2 + $0xc8] sm:$0x1] }
 0x179   : > { %v3235_v41 = vor.u32 %v3234_v10, %v3231_v9  ;;  %v5489_v63 = vrot.slane %v9420_v1, 5  ;;  %v4991_v32 = vshll.u32 %v4645_v7, 16  ;;  %v5001_v25 = vshrl.u32 %v9665_v12, 16 }
 0x17a   : > { %7550 = vmatmul.mubr.bf16.gmra.mrb[12].mxu0 %v9543_v8  ;;  %v9687_v17 = vsel %vm8576_vm13, %v6647_v42, %v5479_v11  ;;  %v5481_v60 = vrot.slane %v5479_v11, 4  ;;  %v9693_v9 = vsel %vm8576_vm13, %v6648_v58, %v5486_v4  ;;  %v5488_v1 = vrot.slane %v5486_v4, 4  ;;  %v8015_v8 = vld [vmem:[#allocation2 + $0x18] sm:$0xff]  }
 0x17b   : > { %7553 = vmatprep.mubr.bf16.mxu0 %v9545_v31  ;;  %7582 = vmatpush3.bf16.msra.mxu0 %v8022_v20  ;;  %v3236_v10 = vrot.slane %v3235_v41, 4  ;;  %v4952_v34 = vsel %vm8260_vm2, %v9658_v48, %v9571_v40  ;;  %v4979_v7 = vrot.slane %v4977_v61, 4  ;;  %v8017_v20 = vld [vmem:[#allocation2 + $0x24] sm:$0xff]   ;;  %v4962_v41 = vsel %vm8260_vm2, %v9660_v27, %v9644_v36  ;;  %v9709_v42 = vld [vmem:[#allocation2 + $0xbc] sm:$0x1] }
 0x17c   : > { %7326 = vmatmul.mubr.bf16.gmra.mrb[28].mxu1 %v6414_v43  ;;  %v4997_v43 = vshll.u32 %v9665_v12, 16  ;;  %7583 = vmatprep.subr.bf16.mxu0 %v8025_v49  ;;  %v9703_v31 = vsel %vm8576_vm13, %v5481_v60, %v5482_v57  ;;  %v9720_v60 = vsel %vm8576_vm13, %v5488_v1, %v5489_v63  ;;  %v4993_v48 = vrot.slane %v4991_v32, 5  ;;  %v4648_v61 = vld [vmem:[#allocation2 + $0xcc] sm:$0xf]  ;;  %v9738_v57 = vld [vmem:[#allocation2 + $0xd0] sm:$0xf] }
 0x17d   : > { %7345 = vmatprep.mubr.bf16.mxu1 %v8014_v14  ;;  %v4970_v14 = vor.u32 %v9652_v16, %v9649_v18  ;;  %v3241_v40 = vsel %vm8260_vm2, %v3236_v10, %v9020_v38  ;;  %v6679_v18 = vcombine.low %v9687_v17, %v9703_v31  ;;  %v4990_v16 = vrot.slane %v4988_v29, 4  ;;  %v8112_v31 = vld [vmem:[#allocation2 + $0xb0] sm:$0x1] }
 0x17e   : > { %v9722_v11 = vcombine.low %v3241_v40, %v3251_v46  ;;  %v6680_v36 = vcombine.low %v9693_v9, %v9720_v60  ;;  %v6625_v38 = vcombine.low %v4904_v55, %v4914_v15  ;;  %v9736_v27 = vrot.slane %v4997_v43, 5  ;;  %v10087_v43 = vld [vmem:[#allocation15_spill] sm:$0xff] }
 0x17f   : > { %v5003_v29 = vrot.slane %v5001_v25, 4  ;;  %7584 = vmatpush3.bf16.msra.mxu0 %v8025_v49  ;;  %v4980_v46 = vor.u32 %v4979_v7, %v9674_v30  ;;  %v4983_v58 = vshll.u32 %v9709_v42, 16  ;;  %v5007_v44 = vshll.u32 %v9711_v50, 16 }
 0x180   : > { %v10085_v39 = vsel %vm8260_vm2, %v9577_v13, %v9564_v47  ;;  %v10086_v28 = vsel %vm8260_vm2, %v9562_v37, %v9497_v0  ;;  %v6627_v55 = vcombine.low %v4952_v34, %v4962_v41  ;;  %v5012_v15 = vshrl.u32 %v4648_v61, 16  ;;  %v5368_v13 = vld [vmem:[#allocation2 + $0x9c] sm:$0xe] }
 0x181   : > { %v6626_v19 = vcombine.low %v10086_v28, %v10085_v39  ;;  %v4971_v49 = vrot.slane %v4970_v14, 4  ;;  %v4994_v4 = vor.u32 %v4993_v48, %v4990_v16  ;;  %v5015_v63 = vshll.u32 %v4648_v61, 16  ;;  %v8020_v14 = vld [vmem:[#allocation2 + $0x3c] sm:$0xff]   ;;  %v8088_v16 = vld [vmem:[%s10015_s1 + $0x110] sm:$0xff]  }
 0x182   : > { %7554 = vmatmul.mubr.bf16.gmra.mrb[16].mxu0 %v9547_v33  ;;  %v5021_v47 = vshll.u32 %v9738_v57, 16  ;;  %v5004_v32 = vor.u32 %v5003_v29, %v9736_v27  ;;  %v5025_v0 = vshrl.u32 %v9738_v57, 16  ;;  %v6649_v37 = vrot.slane %v5367_v59, 9  ;;  %v8018_v33 = vld [vmem:[#allocation2 + $0x30] sm:$0xff]  }
 0x183   : > { %7557 = vmatprep.mubr.bf16.mxu0 %v6625_v38  ;;  %v5493_v25 = vrot.slane %v10087_v43, 5  ;;  %v4981_v10 = vrot.slane %v4980_v46, 4  ;;  %v4985_v1 = vrot.slane %v4983_v58, 5  ;;  %v5496_v34 = vrot.slane %v9448_v52, 5  ;;  %v9773_v46 = vld [vmem:[#allocation2 + $0xd4] sm:$0x1] }
 0x184   : > { %7346 = vmatmul.mubr.bf16.vlgmr.msra.gmra.mrb[0].mxu1 %v8015_v8  ;;  %v5009_v8 = vrot.slane %v5007_v44, 5  ;;  %v5014_v7 = vrot.slane %v5012_v15, 4  ;;  %v6650_v40 = vrot.slane %v5368_v13, 9  ;;  %v4995_v48 = vrot.slane %v4994_v4, 4  ;;  %v5369_v43 = vld [vmem:[#allocation2 + $0xa8] sm:$0xe] }
 0x185   : > { %7625 = vmatpush3.bf16.msra.mxu1 %v9445_v5  ;;  %7349 = vmatprep.mubr.bf16.mxu1 %v8017_v20  ;;  %v8087_v5 = vld [vmem:[%s10015_s1 + $0x108] sm:$0xff]   ;;  %v9765_v20 = vsel %vm8576_vm13, %v6649_v37, %v5493_v25  ;;  %v5495_v41 = vrot.slane %v5493_v25, 4  ;;  %v5017_v61 = vrot.slane %v5015_v63, 5  ;;  %v9770_v38 = vrot.slane %v5021_v47, 5 }
 0x186   : > { %7618 = vmatprep.subr.bf16.mxu1 %v8087_v5  ;;  %v5500_v52 = vrot.slane %v9440_v24, 5  ;;  %v5005_v29 = vrot.slane %v5004_v32, 4  ;;  %v5027_v58 = vrot.slane %v5025_v0, 4  ;;  %v5503_v59 = vrot.slane %v9487_v54, 5  ;;  %v8089_v54 = vld [vmem:[%s10015_s1 + $0x118] sm:$0xff]   ;;  %v8021_v32 = vld [vmem:[#allocation2 + $0x48] sm:$0xff]  }
 0x187   : > { %v9777_v44 = vsel %vm8576_vm13, %v5495_v41, %v5496_v34  ;;  %v4976_v15 = vsel %vm8260_vm2, %v4971_v49, %v9674_v30  ;;  %v5018_v4 = vor.u32 %v5017_v61, %v5014_v7  ;;  %v5031_v63 = vshll.u32 %v9773_v46, 16  ;;  %v5357_v49 = vld [vmem:[#allocation2 + $0x18] sm:$0xe]  ;;  %v8090_v0 = vld [vmem:[#allocation2 + $0x1c] sm:$0xf] }
 0x188   : > { %v6681_v39 = vcombine.low %v9765_v20, %v9777_v44  ;;  %v9784_v28 = vsel %vm8576_vm13, %v6650_v40, %v5500_v52  ;;  %v5502_v24 = vrot.slane %v5500_v52, 4  ;;  %v5010_v47 = vsel %vm8260_vm2, %v5005_v29, %v5009_v8  ;;  %v8091_v8 = vld [vmem:[%s10015_s1 + $0x120] sm:$0xff]  }
 0x189   : > { %7626 = vmatpush3.bf16.msra.mxu1 %v8087_v5  ;;  %v4986_v5 = vsel %vm8260_vm2, %v4981_v10, %v4985_v1  ;;  %v5028_v30 = vor.u32 %v5027_v58, %v9770_v38  ;;  %v5423_v37 = vrot.slane %v8090_v0, 5  ;;  %v5019_v10 = vrot.slane %v5018_v4, 4  ;;  %v8092_v61 = vld [vmem:[#allocation2 + $0x20] sm:$0x1]  ;;  %v5358_v29 = vld [vmem:[#allocation2 + $0x24] sm:$0xe] }
 0x18a   : > { %7619 = vmatprep.subr.bf16.mxu1 %v8088_v16  ;;  %7558 = vmatmul.mubr.bf16.gmra.mrb[20].mxu0 %v6626_v19  ;;  %v5000_v19 = vsel %vm8260_vm2, %v4995_v48, %v9736_v27  ;;  %v9803_v13 = vsel %vm8576_vm13, %v5502_v24, %v5503_v59  ;;  %v6628_v25 = vcombine.low %v4976_v15, %v4986_v5  ;;  %v5033_v1 = vrot.slane %v5031_v63, 5  ;;  %v8093_v58 = vld [vmem:[#allocation2 + $0x28] sm:$0xf]  ;;  %v8024_v0 = vld [vmem:[#allocation2 + $0x60] sm:$0xff]  }
 0x18b   : > { %7561 = vmatprep.mubr.bf16.mxu0 %v6627_v55  ;;  %v6682_v55 = vcombine.low %v9784_v28, %v9803_v13  ;;  %v6629_v27 = vcombine.low %v5000_v19, %v5010_v47  ;;  %v6639_v34 = vrot.slane %v5357_v49, 9  ;;  %v5029_v7 = vrot.slane %v5028_v30, 4 }
 0x18c   : > { %7350 = vmatmul.mubr.bf16.gmra.mrb[4].mxu1 %v8018_v33  ;;  %v8023_v33 = vld [vmem:[#allocation2 + $0x54] sm:$0xff]   ;;  %v6651_v41 = vrot.slane %v5369_v43, 9  ;;  %v5507_v40 = vrot.slane %v9499_v2, 5  ;;  %v5425_v48 = vrot.slane %v5423_v37, 4  ;;  %v5426_v52 = vrot.slane %v8092_v61, 5  ;;  %v8094_v2 = vld [vmem:[%s10015_s1 + $0x128] sm:$0xff]  }
 0x18d   : > { %7353 = vmatprep.mubr.bf16.mxu1 %v8020_v14  ;;  %7627 = vmatpush3.bf16.msra.mxu1 %v8088_v16  ;;  %v5370_v14 = vld [vmem:[#allocation2 + $0xb4] sm:$0xe]  ;;  %v5510_v16 = vrot.slane %v9553_v23, 5  ;;  %v5430_v59 = vrot.slane %v8093_v58, 5  ;;  %v5359_v23 = vld [vmem:[#allocation2 + $0x30] sm:$0xe]  ;;  %v5024_v47 = vsel %vm8260_vm2, %v5019_v10, %v9770_v38  ;;  %v5034_v30 = vsel %vm8260_vm2, %v5029_v7, %v5033_v1 }
 0x18e   : > { %7620 = vmatprep.subr.bf16.mxu1 %v8089_v54  ;;  %v9814_v24 = vsel %vm8576_vm13, %v6651_v41, %v5507_v40  ;;  %v5509_v15 = vrot.slane %v5507_v40, 4  ;;  %v6652_v5 = vrot.slane %v5370_v14, 9  ;;  %v5514_v63 = vrot.slane %v9611_v62, 5  ;;  %v8097_v14 = vld [vmem:[#allocation2 + $0x38] sm:$0x1]  ;;  %v8098_v41 = vld [vmem:[%s10015_s1 + $0x130] sm:$0xff]  }
 0x18f   : > { %v5517_v19 = vrot.slane %v9709_v42, 5  ;;  %v5424_v49 = vsel %vm8576_vm13, %v6639_v34, %v5423_v37  ;;  %v5427_v62 = vsel %vm8576_vm13, %v5425_v48, %v5426_v52  ;;  %v8096_v37 = vld [vmem:[#allocation2 + $0x2c] sm:$0x1]  ;;  %v6641_v1 = vrot.slane %v5359_v23, 9  ;;  %v5371_v61 = vld [vmem:[#allocation2 + $0xc0] sm:$0xe] }
 0x190   : > { %v9838_v38 = vsel %vm8576_vm13, %v6652_v5, %v5514_v63  ;;  %v5516_v43 = vrot.slane %v5514_v63, 4  ;;  %v5433_v10 = vrot.slane %v8096_v37, 5  ;;  %v5440_v7 = vrot.slane %v8097_v14, 5  ;;  %v5360_v58 = vld [vmem:[#allocation2 + $0x3c] sm:$0xe] }
 0x191   : > { %7628 = vmatpush3.bf16.msra.mxu1 %v8089_v54  ;;  %v8095_v54 = vld [vmem:[#allocation2 + $0x34] sm:$0xf]  ;;  %v6653_v23 = vrot.slane %v5371_v61, 9  ;;  %v8100_v63 = vld [vmem:[#allocation2 + $0x40] sm:$0xf] }
 0x192   : > { %7621 = vmatprep.subr.bf16.mxu1 %v8091_v8  ;;  %7562 = vmatmul.mubr.bf16.gmra.mrb[24].mxu0 %v6628_v25  ;;  %v5437_v4 = vrot.slane %v8095_v54, 5  ;;  %v8026_v25 = vld [vmem:[#allocation2 + $0x6c] sm:$0xff]   ;;  %v9845_v40 = vsel %vm8576_vm13, %v5516_v43, %v5517_v19  ;;  %v5444_v19 = vrot.slane %v8100_v63, 5  ;;  %v8030_v63 = vld [vmem:[#allocation2 + $0x9c] sm:$0xff]  }
 0x193   : > { %7565 = vmatprep.mubr.bf16.mxu0 %v6629_v27  ;;  %v5432_v27 = vrot.slane %v5430_v59, 4  ;;  %v6684_v48 = vcombine.low %v9838_v38, %v9845_v40  ;;  %v5372_v54 = vld [vmem:[#allocation2 + $0xcc] sm:$0xe] }
 0x194   : > { %7354 = vmatmul.mubr.bf16.gmra.mrb[8].mxu1 %v8021_v32  ;;  %v9830_v32 = vsel %vm8576_vm13, %v5509_v15, %v5510_v16  ;;  %v5439_v34 = vrot.slane %v5437_v4, 4  ;;  %v6671_v16 = vcombine.low %v5424_v49, %v5427_v62  ;;  %v5438_v15 = vsel %vm8576_vm13, %v6641_v1, %v5437_v4  ;;  %v8101_v4 = vld [vmem:[#allocation2 + $0x44] sm:$0x1] }
 0x195   : > { %7357 = vmatprep.mubr.bf16.mxu1 %v8023_v33  ;;  %7629 = vmatpush3.bf16.msra.mxu1 %v8091_v8  ;;  %v6683_v42 = vcombine.low %v9814_v24, %v9830_v32  ;;  %v6640_v33 = vrot.slane %v5358_v29, 9  ;;  %v6630_v8 = vcombine.low %v5024_v47, %v5034_v30  ;;  %v5434_v29 = vsel %vm8576_vm13, %v5432_v27, %v5433_v10  ;;  %v2988_v47 = vld [vmem:[#allocation2 + $0x6c] sm:$0xf]  ;;  %v8027_v30 = vld [vmem:[#allocation2 + $0x78] sm:$0xff]  }
 0x196   : > { %7622 = vmatprep.subr.bf16.mxu1 %v8094_v2  ;;  %v5441_v5 = vsel %vm8576_vm13, %v5439_v34, %v5440_v7  ;;  %v5447_v62 = vrot.slane %v8101_v4, 5  ;;  %v6654_v37 = vrot.slane %v5372_v54, 9  ;;  %v3205_v10 = vshrl.u32 %v2988_v47, 16  ;;  %v8102_v7 = vld [vmem:[#allocation2 + $0x70] sm:$0xf] }
 0x197   : > { %v5431_v52 = vsel %vm8576_vm13, %v6640_v33, %v5430_v59  ;;  %v5521_v59 = vrot.slane %v9665_v12, 5  ;;  %v6673_v33 = vcombine.low %v5438_v15, %v5441_v5  ;;  %v5524_v12 = vrot.slane %v9711_v50, 5  ;;  %v8029_v54 = vld [vmem:[#allocation2 + $0x90] sm:$0xff]  }
 0x198   : > { %v6672_v49 = vcombine.low %v5431_v52, %v5434_v29  ;;  %v3208_v1 = vshll.u32 %v2988_v47, 16  ;;  %v5531_v34 = vrot.slane %v9773_v46, 5  ;;  %v5446_v14 = vrot.slane %v5444_v19, 4  ;;  %v2994_v47 = vld [vmem:[#allocation2 + $0x84] sm:$0xf] }
 0x199   : > { %7630 = vmatpush3.bf16.msra.mxu1 %v8094_v2  ;;  %v8099_v2 = vld [vmem:[%s10015_s1 + $0x138] sm:$0xff]   ;;  %v5523_v43 = vrot.slane %v5521_v59, 4  ;;  %v9863_v27 = vsel %vm8576_vm13, %v6653_v23, %v5521_v59  ;;  %v3207_v46 = vrot.slane %v3205_v10, 4  ;;  %v10088_v10 = vcombine.low %v9583_v51, %v9592_v45  ;;  %v8105_v51 = vld [vmem:[#allocation2 + $0x8c] sm:$0x1] }
 0x19a   : > { %7623 = vmatprep.subr.bf16.mxu1 %v8098_v41  ;;  %7566 = vmatmul.mubr.bf16.gmra.mrb[28].mxu0 %v6630_v8  ;;  %v5528_v8 = vrot.slane %v9738_v57, 5  ;;  %v5448_v5 = vsel %vm8576_vm13, %v5446_v14, %v5447_v62  ;;  %v8032_v14 = vld [vmem:[#allocation2 + $0xb4] sm:$0xff]   ;;  %v3272_v45 = vshll.u32 %v8105_v51, 16 }
 0x19b   : > { %7585 = vmatprep.mubr.bf16.mxu0 %v6671_v16  ;;  %v3218_v16 = vshrl.u32 %v8102_v7, 16  ;;  %v9870_v61 = vsel %vm8576_vm13, %v5523_v43, %v5524_v12  ;;  %v3253_v43 = vshrl.u32 %v2994_v47, 16 }
 0x19c   : > { %7358 = vmatmul.mubr.bf16.gmra.mrb[12].mxu1 %v8024_v0  ;;  %v6642_v0 = vrot.slane %v5360_v58, 9  ;;  %v6685_v52 = vcombine.low %v9863_v27, %v9870_v61  ;;  %v9876_v50 = vsel %vm8576_vm13, %v6654_v37, %v5528_v8  ;;  %v5530_v29 = vrot.slane %v5528_v8, 4  ;;  %v2997_v37 = vld [vmem:[#allocation2 + $0x90] sm:$0xf] }
 0x19d   : > { %7361 = vmatprep.mubr.bf16.mxu1 %v8026_v25  ;;  %7631 = vmatpush3.bf16.msra.mxu1 %v8098_v41  ;;  %v8028_v25 = vld [vmem:[#allocation2 + $0x84] sm:$0xff]   ;;  %v3214_v41 = vshll.u32 %v8102_v7, 16  ;;  %v3210_v58 = vrot.slane %v3208_v1, 5  ;;  %v3220_v23 = vrot.slane %v3218_v16, 4  ;;  %v3255_v7 = vrot.slane %v3253_v43, 4 }
 0x19e   : > { %7624 = vmatprep.subr.bf16.mxu1 %v8099_v2  ;;  %v5445_v57 = vsel %vm8576_vm13, %v6642_v0, %v5444_v19  ;;  %v9882_v15 = vsel %vm8576_vm13, %v5530_v29, %v5531_v34  ;;  %v8103_v0 = vld [vmem:[#allocation2 + $0x74] sm:$0x1]  ;;  %v8031_v34 = vld [vmem:[#allocation2 + $0xa8] sm:$0xff]  }
 0x19f   : > { %v6686_v59 = vcombine.low %v9876_v50, %v9882_v15  ;;  %v3211_v19 = vor.u32 %v3210_v58, %v3207_v46  ;;  %v3224_v4 = vshll.u32 %v8103_v0, 16  ;;  %v3280_v46 = vshll.u32 %v2997_v37, 16  ;;  %v3000_v58 = vld [vmem:[#allocation2 + $0x9c] sm:$0xf] }
 0x1a1   : > { %7632 = vmatpush3.bf16.msra.mxu1 %v8099_v2  ;;  %v3216_v2 = vrot.slane %v3214_v41, 5  ;;  %v3212_v12 = vrot.slane %v3211_v19, 4  ;;  %v3226_v8 = vrot.slane %v3224_v4, 5  ;;  %v3304_v19 = vshll.u32 %v3000_v58, 16 }
 0x1a2   : > { %7586 = vmatmul.mubr.bf16.vlgmr.msra.gmra.mrb[0].mxu0 %v6672_v49 }
 0x1a3   : > { %7589 = vmatprep.mubr.bf16.mxu0 %v6673_v33  ;;  %v3221_v49 = vor.u32 %v3220_v23, %v3216_v2  ;;  %v8104_v33 = vld [vmem:[#allocation2 + $0x88] sm:$0xf] }
 0x1a4   : > { %7362 = vmatmul.mubr.bf16.gmra.mrb[16].mxu1 %v8027_v30  ;;  %v6674_v30 = vcombine.low %v5445_v57, %v5448_v5  ;;  %v3262_v56 = vshll.u32 %v8104_v33, 16  ;;  %v3266_v62 = vshrl.u32 %v8104_v33, 16  ;;  %v3277_v57 = vshrl.u32 %v2997_v37, 16 }
 0x1a5   : > { %7365 = vmatprep.mubr.bf16.mxu1 %v8028_v25  ;;  %v3256_v25 = vshll.u32 %v2994_v47, 16  ;;  %v3222_v1 = vrot.slane %v3221_v49, 4  ;;  %v3217_v5 = vsel %vm8260_vm2, %v3212_v12, %v3216_v2  ;;  %v8107_v49 = vld [vmem:[#allocation2 + $0xa0] sm:$0xf]  ;;  %v3282_v2 = vrot.slane %v3280_v46, 5 }
 0x1a6   : > { %v9891_v16 = vrot.slane %v3262_v56, 5  ;;  %v3268_v29 = vrot.slane %v3266_v62, 4  ;;  %v3310_v0 = vshll.u32 %v8107_v49, 16  ;;  %v3314_v4 = vshrl.u32 %v8107_v49, 16  ;;  %v8033_v62 = vld [vmem:[#allocation2 + $0xc0] sm:$0xff]  }
 0x1a7   : > { %v3258_v41 = vrot.slane %v3256_v25, 5  ;;  %v3227_v23 = vsel %vm8260_vm2, %v3222_v1, %v3226_v8  ;;  %v3279_v33 = vrot.slane %v3277_v57, 4  ;;  %v10089_v56 = vcombine.low %v9596_v22, %v9615_v53  ;;  %v8108_v53 = vld [vmem:[#allocation2 + $0x98] sm:$0x1] }
 0x1a8   : > { %v3269_v25 = vor.u32 %v3268_v29, %v9891_v16  ;;  %v10090_v12 = vcombine.low %v9608_v21, %v9627_v3  ;;  %v6487_v37 = vcombine.low %v3217_v5, %v3227_v23  ;;  %v3003_v29 = vld [vmem:[#allocation2 + $0xa8] sm:$0xf]  ;;  %v8109_v21 = vld [vmem:[#allocation2 + $0xa4] sm:$0x1] }
 0x1a9   : > { %v3259_v43 = vor.u32 %v3258_v41, %v3255_v7  ;;  %v9906_v7 = vrot.slane %v3310_v0, 5  ;;  %v3316_v41 = vrot.slane %v3314_v4, 4  ;;  %v3283_v22 = vor.u32 %v3282_v2, %v3279_v33 }
 0x1aa   : > { %7590 = vmatmul.mubr.bf16.gmra.mrb[4].mxu0 %v6674_v30  ;;  %v3301_v30 = vshrl.u32 %v3000_v58, 16  ;;  %v3270_v46 = vrot.slane %v3269_v25, 4  ;;  %v3296_v58 = vshll.u32 %v8108_v53, 16  ;;  %v3320_v3 = vshll.u32 %v8109_v21, 16  ;;  %v3009_v53 = vld [vmem:[#allocation2 + $0xc0] sm:$0xf] }
 0x1ab   : > { %7593 = vmatprep.mubr.bf16.mxu0 %v10088_v10  ;;  %v3274_v10 = vrot.slane %v3272_v45, 5  ;;  %v3260_v57 = vrot.slane %v3259_v43, 4  ;;  %v3325_v5 = vshrl.u32 %v3003_v29, 16  ;;  %v3328_v23 = vshll.u32 %v3003_v29, 16  ;;  %v3006_v45 = vld [vmem:[#allocation2 + $0xb4] sm:$0xf] }
 0x1ac   : > { %7366 = vmatmul.mubr.bf16.gmra.mrb[20].mxu1 %v8029_v54  ;;  %v8106_v54 = vld [vmem:[#allocation2 + $0x94] sm:$0xf]  ;;  %v3284_v4 = vrot.slane %v3283_v22, 4  ;;  %v3298_v43 = vrot.slane %v3296_v58, 5  ;;  %v10091_v25 = vcombine.low %v9638_v26, %v9656_v6  ;;  %v3349_v33 = vshrl.u32 %v3006_v45, 16 }
 0x1ad   : > { %7369 = vmatprep.mubr.bf16.mxu1 %v8030_v63  ;;  %v3286_v63 = vshll.u32 %v8106_v54, 16  ;;  %v3290_v47 = vshrl.u32 %v8106_v54, 16  ;;  %v3265_v49 = vsel %vm8260_vm2, %v3260_v57, %v9891_v16  ;;  %v3275_v0 = vsel %vm8260_vm2, %v3270_v46, %v3274_v10 }
 0x1ae   : > { %v3352_v2 = vshll.u32 %v3006_v45, 16  ;;  %v3322_v16 = vrot.slane %v3320_v3, 5  ;;  %v6489_v57 = vcombine.low %v3265_v49, %v3275_v0  ;;  %v3351_v26 = vrot.slane %v3349_v33, 4 }
 0x1af   : > { %v9904_v1 = vrot.slane %v3286_v63, 5  ;;  %v3292_v8 = vrot.slane %v3290_v47, 4  ;;  %v3317_v63 = vor.u32 %v3316_v41, %v9906_v7  ;;  %v8110_v47 = vld [vmem:[#allocation2 + $0xac] sm:$0xf]  ;;  %v3376_v45 = vshll.u32 %v3009_v53, 16 }
 0x1b0   : > { %v3354_v6 = vrot.slane %v3352_v2, 5 }
 0x1b1   : > { %v3293_v51 = vor.u32 %v3292_v8, %v9904_v1  ;;  %v3327_v8 = vrot.slane %v3325_v5, 4  ;;  %v3289_v58 = vsel %vm8260_vm2, %v3284_v4, %v9904_v1  ;;  %v8113_v1 = vld [vmem:[#allocation2 + $0xc4] sm:$0xf]  ;;  %v3378_v33 = vrot.slane %v3376_v45, 5 }
 0x1b2   : > { %7594 = vmatmul.mubr.bf16.gmra.mrb[8].mxu0 %v10089_v56  ;;  %v8111_v56 = vld [vmem:[#allocation2 + $0xb8] sm:$0xf] }
 0x1b3   : > { %7597 = vmatprep.mubr.bf16.mxu0 %v10090_v12  ;;  %v3362_v12 = vshrl.u32 %v8111_v56, 16 }
 0x1b4   : > { %7370 = vmatmul.mubr.bf16.gmra.mrb[24].mxu1 %v8031_v34  ;;  %v3303_v34 = vrot.slane %v3301_v30, 4  ;;  %v3334_v30 = vshll.u32 %v8110_v47, 16 }
 0x1b5   : > { %7373 = vmatprep.mubr.bf16.mxu1 %v8032_v14  ;;  %v3306_v14 = vrot.slane %v3304_v19, 5  ;;  %v3338_v19 = vshrl.u32 %v8110_v47, 16  ;;  %v3364_v22 = vrot.slane %v3362_v12, 4  ;;  %v8115_v12 = vld [vmem:[#allocation2 + $0xc8] sm:$0x1] }
 0x1b6   : > { %v3336_v41 = vrot.slane %v3334_v30, 5  ;;  %v8114_v30 = vld [vmem:[#allocation2 + $0xbc] sm:$0x1] }
 0x1b7   : > { %v3307_v54 = vor.u32 %v3306_v14, %v3303_v34  ;;  %v3330_v34 = vrot.slane %v3328_v23, 5  ;;  %v3318_v14 = vrot.slane %v3317_v63, 4  ;;  %v3340_v29 = vrot.slane %v3338_v19, 4 }
 0x1b8   : > { %v3373_v23 = vshrl.u32 %v3009_v53, 16  ;;  %v3386_v63 = vshrl.u32 %v8113_v1, 16  ;;  %v3368_v19 = vshll.u32 %v8114_v30, 16 }
 0x1b9   : > { %v3308_v10 = vrot.slane %v3307_v54, 4  ;;  %v3323_v21 = vsel %vm8260_vm2, %v3318_v14, %v3322_v16  ;;  %v3331_v3 = vor.u32 %v3330_v34, %v3327_v8  ;;  %v3341_v5 = vor.u32 %v3340_v29, %v3336_v41 }
 0x1ba   : > { %7598 = vmatmul.mubr.bf16.gmra.mrb[12].mxu0 %v10091_v25  ;;  %v3382_v54 = vshll.u32 %v8113_v1, 16  ;;  %v3375_v25 = vrot.slane %v3373_v23, 4  ;;  %v3370_v60 = vrot.slane %v3368_v19, 5 }
 0x1bb   : > { %7601 = vmatprep.mubr.bf16.mxu0 %v6679_v18  ;;  %v3344_v18 = vshll.u32 %v8112_v31, 16  ;;  %v3332_v0 = vrot.slane %v3331_v3, 4  ;;  %v3342_v4 = vrot.slane %v3341_v5, 4 }
 0x1bc   : > { %7374 = vmatmul.mubr.bf16.gmra.mrb[28].mxu1 %v8033_v62  ;;  %v3358_v62 = vshll.u32 %v8111_v56, 16  ;;  %v3384_v2 = vrot.slane %v3382_v54, 5  ;;  %v3388_v56 = vrot.slane %v3386_v63, 4  ;;  %v3379_v44 = vor.u32 %v3378_v33, %v3375_v25 }
 0x1bd   : > { %7409 = vmatprep.mubr.bf16.mxu1 %v6487_v37  ;;  %v3294_v37 = vrot.slane %v3293_v51, 4  ;;  %v3313_v51 = vsel %vm8260_vm2, %v3308_v10, %v9906_v7 }
 0x1be   : > { %v3360_v46 = vrot.slane %v3358_v62, 5  ;;  %v6491_v49 = vcombine.low %v3313_v51, %v3323_v21  ;;  %v3380_v14 = vrot.slane %v3379_v44, 4 }
 0x1bf   : > { %v3299_v17 = vsel %vm8260_vm2, %v3294_v37, %v3298_v43  ;;  %v3346_v43 = vrot.slane %v3344_v18, 5  ;;  %v3392_v37 = vshll.u32 %v8115_v12, 16 }
 0x1c0   : > { %v3365_v47 = vor.u32 %v3364_v22, %v3360_v46  ;;  %v6490_v7 = vcombine.low %v3289_v58, %v3299_v17  ;;  %v3385_v28 = vsel %vm8260_vm2, %v3380_v14, %v3384_v2 }
 0x1c1   : > { %v3347_v20 = vsel %vm8260_vm2, %v3342_v4, %v3346_v43  ;;  %v3394_v29 = vrot.slane %v3392_v37, 5 }
 0x1c2   : > { %7602 = vmatmul.mubr.bf16.gmra.mrb[16].mxu0 %v6680_v36  ;;  %v3366_v9 = vrot.slane %v3365_v47, 4  ;;  %v3337_v36 = vsel %vm8260_vm2, %v3332_v0, %v3336_v41 }
 0x1c3   : > { %7605 = vmatprep.mubr.bf16.mxu0 %v6681_v39  ;;  %v3389_v39 = vor.u32 %v3388_v56, %v3384_v2  ;;  %v6492_v34 = vcombine.low %v3337_v36, %v3347_v20 }
 0x1c4   : > { %7410 = vmatmul.mubr.bf16.vlgmr.msra.gmra.mrb[16].mxu1 %v9722_v11  ;;  %v3355_v11 = vor.u32 %v3354_v6, %v3351_v26  ;;  %v3371_v8 = vsel %vm8260_vm2, %v3366_v9, %v3370_v60 }
 0x1c5   : > { %7413 = vmatprep.mubr.bf16.mxu1 %v6489_v57  ;;  %v3390_v41 = vrot.slane %v3389_v39, 4 }
 0x1c6   : > { %v3356_v62 = vrot.slane %v3355_v11, 4 }
 0x1c7   : > { %v3395_v13 = vsel %vm8260_vm2, %v3390_v41, %v3394_v29 }
 0x1c8   : > { %v3361_v16 = vsel %vm8260_vm2, %v3356_v62, %v3360_v46 }
 0x1c9   : > { %v6493_v10 = vcombine.low %v3361_v16, %v3371_v8 }
 0x1ca   : > { %7606 = vmatmul.mubr.bf16.gmra.mrb[20].mxu0 %v6682_v55  ;;  %v6494_v55 = vcombine.low %v3385_v28, %v3395_v13 }
 0x1cb   : > { %7609 = vmatprep.mubr.bf16.mxu0 %v6683_v42 }
 0x1cc   : > { %7414 = vmatmul.mubr.bf16.gmra.mrb[20].mxu1 %v6490_v7 }
 0x1cd   : > { %7417 = vmatprep.mubr.bf16.mxu1 %v6491_v49 }
 0x1d2   : > { %7610 = vmatmul.mubr.bf16.gmra.mrb[24].mxu0 %v6684_v48 }
 0x1d3   : > { %7613 = vmatprep.mubr.bf16.mxu0 %v6685_v52 }
 0x1d4   : > { %7418 = vmatmul.mubr.bf16.gmra.mrb[24].mxu1 %v6492_v34 }
 0x1d5   : > { %7421 = vmatprep.mubr.bf16.mxu1 %v6493_v10 }
 0x1da   : > { %7614 = vmatmul.mubr.bf16.gmra.mrb[28].mxu0 %v6686_v59 }
 0x1dc   : > { %7422 = vmatmul.mubr.bf16.gmra.mrb[28].mxu1 %v6494_v55 }
 0x257   : > { %v7347_v24 = vpop.f32.mrb[0].mxu1 }
 0x258   : > { %v2805_v32 = vpop.f32.mrb[1].mxu1 }
 0x259   : > { %v7348_v42 = vpop.f32.mrb[2].mxu1 }
 0x25a   : > { %v2808_v57 = vpop.f32.mrb[3].mxu1 }
 0x25f   : > { %v7351_v35 = vpop.f32.mrb[4].mxu1 }
 0x260   : > { %v2821_v26 = vpop.f32.mrb[5].mxu1 }
 0x261   : > { %v7352_v6 = vpop.f32.mrb[6].mxu1 }
 0x262   : > { %v2824_v46 = vpop.f32.mrb[7].mxu1 }
 0x267   : > { %v7355_v38 = vpop.f32.mrb[8].mxu1 }
 0x268   : > { %v2837_v40 = vpop.f32.mrb[9].mxu1 }
 0x269   : > { %v7356_v48 = vpop.f32.mrb[10].mxu1 }
 0x26a   : > { %v2840_v27 = vpop.f32.mrb[11].mxu1 }
 0x26f   : > { %v9965_v61 = vpop.f32.mrb[12].mxu1 }
 0x270   : > { %v9967_v52 = vpop.f32.mrb[13].mxu1 }
 0x271   : > { %v9969_v22 = vpop.f32.mrb[14].mxu1 }
 0x272   : > { %v9971_v50 = vpop.f32.mrb[15].mxu1 }
 0x275   : > { %v7587_v15 = vpop.f32.mrb[0].mxu0 }
 0x276   : > { %v7633_v59 = vadd.f32 %v7587_v15, %v7347_v24  ;;  %v5696_v53 = vpop.f32.mrb[1].mxu0 }
 0x277   : > { %v7634_v58 = vadd.f32 %v5696_v53, %v2805_v32  ;;  %v7588_v17 = vpop.f32.mrb[2].mxu0 }
 0x278   : > { %v7635_v31 = vadd.f32 %v7588_v17, %v7348_v42  ;;  %v5699_v18 = vpop.f32.mrb[3].mxu0  ;;  %v6054_v1 = vmul.f32 %v7633_v59, %v7633_v59 }
 0x279   : > { %v7636_v51 = vadd.f32 %v5699_v18, %v2808_v57  ;;  %v6052_v3 = vmul.f32 %v7634_v58, %v7634_v58 }
 0x27a   : > { %v6867_v21 = vpack.c.bf16 %v7635_v31, %v7633_v59  ;;  %v6055_v19 = vmul.f32 %v7635_v31, %v7635_v31 }
 0x27b   : > { %v6862_v5 = vpack.c.bf16 %v7636_v51, %v7634_v58  ;;  %v6015_v23 = vadd.f32 %v7636_v51, %v7634_v58  ;;  %v6053_v45 = vmul.f32 %v7636_v51, %v7636_v51 }
 0x27c   : > { %6954 = vst [vmem:[%s9978_s26 + $0x8] sm:$0xff] %v6867_v21  }
 0x27d   : > { %6863 = vst [vmem:[%s9978_s26] sm:$0xff] %v6862_v5   ;;  %v6016_v54 = vadd.f32 %v7633_v59, %v6015_v23  ;;  %v6084_v63 = vadd.f32 %v6053_v45, %v6052_v3  ;;  %v7591_v11 = vpop.f32.mrb[4].mxu0 }
 0x27e   : > { %v7637_v47 = vadd.f32 %v7591_v11, %v7351_v35  ;;  %v5712_v30 = vpop.f32.mrb[5].mxu0 }
 0x27f   : > { %v6085_v7 = vadd.f32 %v6084_v63, %v6054_v1  ;;  %v7638_v49 = vadd.f32 %v5712_v30, %v2821_v26  ;;  %v6017_v0 = vadd.f32 %v7635_v31, %v6016_v54  ;;  %v7592_v4 = vpop.f32.mrb[6].mxu0 }
 0x280   : > { %v7639_v43 = vadd.f32 %v7592_v4, %v7352_v6  ;;  %v5715_v25 = vpop.f32.mrb[7].mxu0  ;;  %v6058_v39 = vmul.f32 %v7637_v47, %v7637_v47 }
 0x281   : > { %v6018_v33 = vadd.f32 %v7638_v49, %v6017_v0  ;;  %v6056_v2 = vmul.f32 %v7638_v49, %v7638_v49  ;;  %v6086_v56 = vadd.f32 %v6085_v7, %v6055_v19  ;;  %v7640_v62 = vadd.f32 %v5715_v25, %v2824_v46 }
 0x282   : > { %v6877_v9 = vpack.c.bf16 %v7639_v43, %v7637_v47  ;;  %v6059_v10 = vmul.f32 %v7639_v43, %v7639_v43 }
 0x283   : > { %v6087_v60 = vadd.f32 %v6086_v56, %v6056_v2  ;;  %v6872_v36 = vpack.c.bf16 %v7640_v62, %v7638_v49  ;;  %v6019_v20 = vadd.f32 %v7640_v62, %v6018_v33  ;;  %v6057_v44 = vmul.f32 %v7640_v62, %v7640_v62 }
 0x284   : > { %6956 = vst [vmem:[%s9978_s26 + $0x18] sm:$0xff] %v6877_v9  }
 0x285   : > { %6955 = vst [vmem:[%s9978_s26 + $0x10] sm:$0xff] %v6872_v36   ;;  %v6020_v12 = vadd.f32 %v7637_v47, %v6019_v20  ;;  %v6088_v37 = vadd.f32 %v6087_v60, %v6057_v44  ;;  %v7595_v16 = vpop.f32.mrb[8].mxu0 }
 0x286   : > { %v7641_v8 = vadd.f32 %v7595_v16, %v7355_v38  ;;  %v5728_v34 = vpop.f32.mrb[9].mxu0 }
 0x287   : > { %v6089_v14 = vadd.f32 %v6088_v37, %v6058_v39  ;;  %v7642_v41 = vadd.f32 %v5728_v34, %v2837_v40  ;;  %v6021_v29 = vadd.f32 %v7639_v43, %v6020_v12  ;;  %v7596_v28 = vpop.f32.mrb[10].mxu0 }
 0x288   : > { %v7643_v13 = vadd.f32 %v7596_v28, %v7356_v48  ;;  %v5731_v55 = vpop.f32.mrb[11].mxu0  ;;  %v6062_v38 = vmul.f32 %v7641_v8, %v7641_v8 }
 0x289   : > { %v6022_v24 = vadd.f32 %v7642_v41, %v6021_v29  ;;  %v6060_v32 = vmul.f32 %v7642_v41, %v7642_v41  ;;  %v6090_v42 = vadd.f32 %v6089_v14, %v6059_v10  ;;  %v7644_v57 = vadd.f32 %v5731_v55, %v2840_v27 }
 0x28a   : > { %v6887_v35 = vpack.c.bf16 %v7643_v13, %v7641_v8  ;;  %v6063_v48 = vmul.f32 %v7643_v13, %v7643_v13 }
 0x28b   : > { %v6091_v26 = vadd.f32 %v6090_v42, %v6060_v32  ;;  %v6882_v6 = vpack.c.bf16 %v7644_v57, %v7642_v41  ;;  %v6023_v46 = vadd.f32 %v7644_v57, %v6022_v24  ;;  %v6061_v15 = vmul.f32 %v7644_v57, %v7644_v57 }
 0x28c   : > { %6958 = vst [vmem:[%s9978_s26 + $0x28] sm:$0xff] %v6887_v35  }
 0x28d   : > { %6957 = vst [vmem:[%s9978_s26 + $0x20] sm:$0xff] %v6882_v6   ;;  %v6024_v59 = vadd.f32 %v7641_v8, %v6023_v46  ;;  %v6092_v53 = vadd.f32 %v6091_v26, %v6061_v15  ;;  %v7599_v40 = vpop.f32.mrb[12].mxu0 }
 0x28e   : > { %v7645_v58 = vadd.f32 %v7599_v40, %v9965_v61  ;;  %v5744_v17 = vpop.f32.mrb[13].mxu0 }
 0x28f   : > { %v6093_v31 = vadd.f32 %v6092_v53, %v6062_v38  ;;  %v7646_v18 = vadd.f32 %v5744_v17, %v9967_v52  ;;  %v6025_v27 = vadd.f32 %v7643_v13, %v6024_v59  ;;  %v7600_v51 = vpop.f32.mrb[14].mxu0 }
 0x290   : > { %v7647_v21 = vadd.f32 %v7600_v51, %v9969_v22  ;;  %v5747_v3 = vpop.f32.mrb[15].mxu0  ;;  %v6066_v52 = vmul.f32 %v7645_v58, %v7645_v58 }
 0x291   : > { %v6026_v5 = vadd.f32 %v7646_v18, %v6025_v27  ;;  %v6064_v23 = vmul.f32 %v7646_v18, %v7646_v18  ;;  %v6094_v45 = vadd.f32 %v6093_v31, %v6063_v48  ;;  %v7648_v1 = vadd.f32 %v5747_v3, %v9971_v50 }
 0x292   : > { %v6897_v54 = vpack.c.bf16 %v7647_v21, %v7645_v58  ;;  %v6067_v33 = vmul.f32 %v7647_v21, %v7647_v21 }
 0x293   : > { %v6095_v63 = vadd.f32 %v6094_v45, %v6064_v23  ;;  %v6892_v61 = vpack.c.bf16 %v7648_v1, %v7646_v18  ;;  %v6027_v11 = vadd.f32 %v7648_v1, %v6026_v5  ;;  %v6065_v47 = vmul.f32 %v7648_v1, %v7648_v1 }
 0x294   : > { %6960 = vst [vmem:[%s9978_s26 + $0x38] sm:$0xff] %v6897_v54  }
 0x295   : > { %6959 = vst [vmem:[%s9978_s26 + $0x30] sm:$0xff] %v6892_v61   ;;  %v6028_v7 = vadd.f32 %v7645_v58, %v6027_v11  ;;  %v6096_v49 = vadd.f32 %v6095_v63, %v6065_v47  ;;  %v7603_v0 = vpop.f32.mrb[16].mxu0 }
 0x296   : > { %v5760_v43 = vpop.f32.mrb[17].mxu0 }
 0x297   : > { %v7411_v30 = vpop.f32.mrb[16].mxu1  ;;  %v6097_v2 = vadd.f32 %v6096_v49, %v6066_v52  ;;  %v6029_v56 = vadd.f32 %v7647_v21, %v6028_v7  ;;  %v7604_v62 = vpop.f32.mrb[18].mxu0 }
 0x298   : > { %v3623_v19 = vpop.f32.mrb[17].mxu1  ;;  %v7649_v4 = vadd.f32 %v7603_v0, %v7411_v30  ;;  %v5763_v60 = vpop.f32.mrb[19].mxu0 }
 0x299   : > { %v7412_v22 = vpop.f32.mrb[18].mxu1  ;;  %v7650_v50 = vadd.f32 %v5760_v43, %v3623_v19  ;;  %v6098_v44 = vadd.f32 %v6097_v2, %v6067_v33 }
 0x29a   : > { %v3626_v25 = vpop.f32.mrb[19].mxu1  ;;  %v7651_v9 = vadd.f32 %v7604_v62, %v7412_v22  ;;  %v6070_v41 = vmul.f32 %v7649_v4, %v7649_v4 }
 0x29b   : > { %v6030_v36 = vadd.f32 %v7650_v50, %v6029_v56  ;;  %v6068_v20 = vmul.f32 %v7650_v50, %v7650_v50  ;;  %v7652_v39 = vadd.f32 %v5763_v60, %v3626_v25 }
 0x29c   : > { %v6907_v12 = vpack.c.bf16 %v7651_v9, %v7649_v4  ;;  %v6071_v57 = vmul.f32 %v7651_v9, %v7651_v9 }
 0x29d   : > { %v6099_v37 = vadd.f32 %v6098_v44, %v6068_v20  ;;  %v6902_v16 = vpack.c.bf16 %v7652_v39, %v7650_v50  ;;  %v6031_v8 = vadd.f32 %v7652_v39, %v6030_v36  ;;  %v6069_v34 = vmul.f32 %v7652_v39, %v7652_v39  ;;  %v7607_v13 = vpop.f32.mrb[20].mxu0 }
 0x29e   : > { %6962 = vst [vmem:[%s9978_s26 + $0x48] sm:$0xff] %v6907_v12   ;;  %v5776_v32 = vpop.f32.mrb[21].mxu0 }
 0x29f   : > { %v7415_v10 = vpop.f32.mrb[20].mxu1  ;;  %6961 = vst [vmem:[%s9978_s26 + $0x40] sm:$0xff] %v6902_v16   ;;  %v6032_v29 = vadd.f32 %v7649_v4, %v6031_v8  ;;  %v6100_v28 = vadd.f32 %v6099_v37, %v6069_v34  ;;  %v7608_v46 = vpop.f32.mrb[22].mxu0 }
 0x2a0   : > { %v3639_v14 = vpop.f32.mrb[21].mxu1  ;;  %v7653_v24 = vadd.f32 %v7607_v13, %v7415_v10  ;;  %v5779_v38 = vpop.f32.mrb[23].mxu0 }
 0x2a1   : > { %v7416_v55 = vpop.f32.mrb[22].mxu1  ;;  %v6101_v35 = vadd.f32 %v6100_v28, %v6070_v41  ;;  %v7654_v26 = vadd.f32 %v5776_v32, %v3639_v14  ;;  %v6033_v6 = vadd.f32 %v7651_v9, %v6032_v29 }
 0x2a2   : > { %v3642_v42 = vpop.f32.mrb[23].mxu1  ;;  %v7655_v15 = vadd.f32 %v7608_v46, %v7416_v55  ;;  %v6074_v3 = vmul.f32 %v7653_v24, %v7653_v24 }
 0x2a3   : > { %v6034_v59 = vadd.f32 %v7654_v26, %v6033_v6  ;;  %v6072_v53 = vmul.f32 %v7654_v26, %v7654_v26  ;;  %v6102_v40 = vadd.f32 %v6101_v35, %v6071_v57  ;;  %v7656_v58 = vadd.f32 %v5779_v38, %v3642_v42 }
 0x2a4   : > { %v6917_v17 = vpack.c.bf16 %v7655_v15, %v7653_v24  ;;  %v6075_v11 = vmul.f32 %v7655_v15, %v7655_v15 }
 0x2a5   : > { %v6103_v48 = vadd.f32 %v6102_v40, %v6072_v53  ;;  %v6912_v31 = vpack.c.bf16 %v7656_v58, %v7654_v26  ;;  %v6035_v18 = vadd.f32 %v7656_v58, %v6034_v59  ;;  %v6073_v27 = vmul.f32 %v7656_v58, %v7656_v58  ;;  %v7611_v45 = vpop.f32.mrb[24].mxu0 }
 0x2a6   : > { %6964 = vst [vmem:[%s9978_s26 + $0x58] sm:$0xff] %v6917_v17   ;;  %v5792_v63 = vpop.f32.mrb[25].mxu0 }
 0x2a7   : > { %v7419_v51 = vpop.f32.mrb[24].mxu1  ;;  %6963 = vst [vmem:[%s9978_s26 + $0x50] sm:$0xff] %v6912_v31   ;;  %v6036_v5 = vadd.f32 %v7653_v24, %v6035_v18  ;;  %v6104_v23 = vadd.f32 %v6103_v48, %v6073_v27  ;;  %v7612_v52 = vpop.f32.mrb[26].mxu0 }
 0x2a8   : > { %v3655_v21 = vpop.f32.mrb[25].mxu1  ;;  %v7657_v54 = vadd.f32 %v7611_v45, %v7419_v51  ;;  %v5795_v49 = vpop.f32.mrb[27].mxu0 }
 0x2a9   : > { %v7420_v1 = vpop.f32.mrb[26].mxu1  ;;  %v6105_v47 = vadd.f32 %v6104_v23, %v6074_v3  ;;  %v7658_v30 = vadd.f32 %v5792_v63, %v3655_v21  ;;  %v6037_v19 = vadd.f32 %v7655_v15, %v6036_v5 }
 0x2aa   : > { %v3658_v61 = vpop.f32.mrb[27].mxu1  ;;  %v7659_v7 = vadd.f32 %v7612_v52, %v7420_v1  ;;  %v6078_v60 = vmul.f32 %v7657_v54, %v7657_v54 }
 0x2ab   : > { %v6038_v0 = vadd.f32 %v7658_v30, %v6037_v19  ;;  %v6076_v22 = vmul.f32 %v7658_v30, %v7658_v30  ;;  %v6106_v4 = vadd.f32 %v6105_v47, %v6075_v11  ;;  %v7660_v43 = vadd.f32 %v5795_v49, %v3658_v61 }
 0x2ac   : > { %v6927_v25 = vpack.c.bf16 %v7659_v7, %v7657_v54  ;;  %v6079_v8 = vmul.f32 %v7659_v7, %v7659_v7 }
 0x2ad   : > { %v6107_v33 = vadd.f32 %v6106_v4, %v6076_v22  ;;  %v6922_v2 = vpack.c.bf16 %v7660_v43, %v7658_v30  ;;  %v6039_v50 = vadd.f32 %v7660_v43, %v6038_v0  ;;  %v6077_v56 = vmul.f32 %v7660_v43, %v7660_v43  ;;  %v7615_v44 = vpop.f32.mrb[28].mxu0 }
 0x2ae   : > { %6966 = vst [vmem:[%s9978_s26 + $0x68] sm:$0xff] %v6927_v25   ;;  %v5808_v37 = vpop.f32.mrb[29].mxu0 }
 0x2af   : > { %v7423_v62 = vpop.f32.mrb[28].mxu1  ;;  %6965 = vst [vmem:[%s9978_s26 + $0x60] sm:$0xff] %v6922_v2   ;;  %v6040_v36 = vadd.f32 %v7657_v54, %v6039_v50  ;;  %v6108_v20 = vadd.f32 %v6107_v33, %v6077_v56  ;;  %v7616_v41 = vpop.f32.mrb[30].mxu0 }
 0x2b0   : > { %v3671_v9 = vpop.f32.mrb[29].mxu1  ;;  %v7661_v12 = vadd.f32 %v7615_v44, %v7423_v62  ;;  %v5811_v28 = vpop.f32.mrb[31].mxu0 }
 0x2b1   : > { %v7424_v39 = vpop.f32.mrb[30].mxu1  ;;  %v6109_v34 = vadd.f32 %v6108_v20, %v6078_v60  ;;  %v7662_v10 = vadd.f32 %v5808_v37, %v3671_v9  ;;  %v6041_v14 = vadd.f32 %v7659_v7, %v6040_v36 }
 0x2b2   : > { %v3674_v16 = vpop.f32.mrb[31].mxu1  ;;  %v7663_v29 = vadd.f32 %v7616_v41, %v7424_v39  ;;  %v6082_v46 = vmul.f32 %v7661_v12, %v7661_v12 }
 0x2b3   : > { %v6042_v13 = vadd.f32 %v7662_v10, %v6041_v14  ;;  %v6080_v55 = vmul.f32 %v7662_v10, %v7662_v10  ;;  %v6110_v24 = vadd.f32 %v6109_v34, %v6079_v8  ;;  %v7664_v32 = vadd.f32 %v5811_v28, %v3674_v16 }
 0x2b4   : > { %v6937_v42 = vpack.c.bf16 %v7663_v29, %v7661_v12  ;;  %v6083_v59 = vmul.f32 %v7663_v29, %v7663_v29 }
 0x2b5   : > { %v6111_v57 = vadd.f32 %v6110_v24, %v6080_v55  ;;  %v6932_v35 = vpack.c.bf16 %v7664_v32, %v7662_v10  ;;  %v6043_v26 = vadd.f32 %v7664_v32, %v6042_v13  ;;  %v6081_v6 = vmul.f32 %v7664_v32, %v7664_v32 }
 0x2b6   : > { %6968 = vst [vmem:[%s9978_s26 + $0x78] sm:$0xff] %v6937_v42  }
 0x2b7   : > { %6967 = vst [vmem:[%s9978_s26 + $0x70] sm:$0xff] %v6932_v35   ;;  %v6044_v15 = vadd.f32 %v7661_v12, %v6043_v26  ;;  %v6112_v38 = vadd.f32 %v6111_v57, %v6081_v6 }
 0x2b9   : > { %v6045_v53 = vadd.f32 %v7663_v29, %v6044_v15  ;;  %v6113_v40 = vadd.f32 %v6112_v38, %v6082_v46 }
 0x2bb   : > { %v6046_v58 = vrot.slane %v6045_v53, 4  ;;  %v6114_v17 = vadd.f32 %v6113_v40, %v6083_v59 }
 0x2bd   : > { %v6047_v48 = vadd.f32 %v6046_v58, %v6045_v53  ;;  %v6115_v31 = vrot.slane %v6114_v17, 4 }
 0x2bf   : > { %v6048_v18 = vrot.slane %v6047_v48, 2  ;;  %v6116_v27 = vadd.f32 %v6115_v31, %v6114_v17 }
 0x2c1   : > { %v6049_v51 = vadd.f32 %v6048_v18, %v6047_v48  ;;  %v6117_v21 = vrot.slane %v6116_v27, 2 }
 0x2c3   : > { %v6050_v3 = vrot.slane %v6049_v51, 1  ;;  %v6118_v5 = vadd.f32 %v6117_v21, %v6116_v27 }
 0x2c5   : > { %v6119_v23 = vrot.slane %v6118_v5, 1  ;;  %v6051_v45 = vadd.f32 %v6050_v3, %v6049_v51 }
 0x2c7   : > { %v6120_v1 = vadd.f32 %v6119_v23, %v6118_v5 }
 0x2c9   : > { %v6122_v54 = vsel %vm937_vm4, %v6051_v45, %v6120_v1 }
 0x2ca   : > { %6123 = vst [vmem:[%s280_s27] sm:$0x3] %v6122_v54 }
 0x2cb PF: > { %s16_s20 = sadd.s32 1, %s8138_s20   ;;  %s10092_s18 = smov %s8134_s19 }
 0x2cc   : > { %p13_p5 = scmp.ge.s32.totalorder %s16_s20, 4   ;;  %s10093_s19 = smov %s10095_s21 }
 0x2ce   :  { %15 = sbr.rel (!%p13_p5) target bundleno = 2 (0x2), region = 91 }

</bundles_post_ra>
